<compile_context>
chip_gen: v5e
topology: v5e:2x2
jax: 0.10.0
libtpu: 0.0.40
codegen_flags: <defaults>
</compile_context>

<pallas_src>
import functools

import jax
import jax.numpy as jnp
from jax.experimental import pallas as pl
from jax.experimental.pallas import tpu as pltpu


def _round_up(x, m):
    return ((x + m - 1) // m) * m


def _tile_map(i):
    return (i, 0)


def _const_map(i):
    return (0, 0)


def _mlp_kernel(x_ref,
                w1_ref, b1_ref,
                w2_ref, b2_ref,
                w3_ref, b3_ref,
                w4_ref, b4_ref,
                o_ref,
                xpad_ref,
                *, k_in):
    # Zero-fill + cast the raw f32 (tb, k_in) x tile into the lane-padded bf16 scratch.
    # Zeroing every step keeps the padding columns correct on every core (v7x has 2 TCs,
    # each with its own scratch), and is negligible next to the matmuls.
    xpad_ref[...] = jnp.zeros_like(xpad_ref)
    xpad_ref[:, :k_in] = x_ref[...].astype(jnp.bfloat16)

    # ---- fc1 (+ folded bn1) + relu ----
    h = jnp.dot(xpad_ref[...], w1_ref[...], preferred_element_type=jnp.float32)
    h = jnp.maximum(h + b1_ref[...], 0.0)

    # ---- fc2 (+ folded bn2) + relu ----
    h = jnp.dot(h.astype(jnp.bfloat16), w2_ref[...], preferred_element_type=jnp.float32)
    h = jnp.maximum(h + b2_ref[...], 0.0)

    # ---- fc3 (+ folded bn3) + relu ----
    h = jnp.dot(h.astype(jnp.bfloat16), w3_ref[...], preferred_element_type=jnp.float32)
    h = jnp.maximum(h + b3_ref[...], 0.0)

    # ---- fc4 (logits, lane-padded to 128 columns) ----
    logits = jnp.dot(h.astype(jnp.bfloat16), w4_ref[...],
                     preferred_element_type=jnp.float32) + b4_ref[...]
    o_ref[...] = logits.astype(o_ref.dtype)


def asl_classifier_forward(x, params, *, num_classes=10, block_batch=512):
    """x: (B, input_size) f32. params: folded/padded weights. Returns (B, num_classes) f32."""
    (w1, b1, w2, b2, w3, b3, w4, b4) = params

    B, k_in = x.shape
    k_pad = w1.shape[0]          # padded input feature dim (multiple of 128)
    n_pad = w4.shape[1]          # lane-padded logits dim (multiple of 128)

    # Batch tile: multiple of 16 (bf16 sublane packing); aim for >= 2 grid steps on
    # medium/large batches so the "parallel" axis can use both TensorCores on v7x.
    tb = max(16, min(block_batch, _round_up(pl.cdiv(B, 2), 16)))
    b_pad = _round_up(B, tb)
    if b_pad != B:
        x = jnp.pad(x, ((0, b_pad - B), (0, 0)))

    grid = (b_pad // tb,)
    kernel = functools.partial(_mlp_kernel, k_in=k_in)

    def _call(single_buffer_weights):
        def wspec(shape):
            if single_buffer_weights:
                # Constant index_map blocks are fetched once; a single buffer halves
                # their VMEM footprint (~2.6 MiB reclaimed).
                return pl.BlockSpec(shape, _const_map, pipeline_mode=pl.Buffered(1))
            return pl.BlockSpec(shape, _const_map)

        in_specs = [pl.BlockSpec((tb, k_in), _tile_map)]   # raw f32 x, full-dim lane block
        for w, b in ((w1, b1), (w2, b2), (w3, b3), (w4, b4)):
            in_specs.append(wspec(w.shape))                # weights stay VMEM-resident
            in_specs.append(wspec(b.shape))

        return pl.pallas_call(
            kernel,
            out_shape=jax.ShapeDtypeStruct((b_pad, n_pad), jnp.float32),
            grid=grid,
            in_specs=in_specs,
            out_specs=pl.BlockSpec((tb, n_pad), _tile_map),
            scratch_shapes=[pltpu.VMEM((tb, k_pad), jnp.bfloat16)],
            compiler_params=pltpu.CompilerParams(
                dimension_semantics=("parallel",),
                vmem_limit_bytes=32 << 20,
            ),
        )(x, w1, b1, w2, b2, w3, b3, w4, b4)

    try:
        out = jax.block_until_ready(_call(True))
    except Exception:
        # pl.Buffered(1) not supported by this jax version -> default double buffering.
        out = _call(False)

    return out[:B, :num_classes]


def make_params(key, input_size=555, num_classes=10):
    """Deterministic synthetic parameters matching ASLClassifier shapes, with BatchNorm
    folded into the Linears, fc1 input rows zero-padded to a multiple of 128, fc4
    output columns zero-padded to a multiple of 128 (lane-dense store), weights in
    bfloat16 (biases in float32)."""
    dims = [(input_size, 1024), (1024, 512), (512, 256), (256, num_classes)]
    eps = 1e-5
    keys = jax.random.split(key, 16)
    ki = iter(keys)

    def linear(din, dout):
        # stored as (in, out) == PyTorch weight.T
        w = jax.random.normal(next(ki), (din, dout), jnp.float32) * (1.0 / jnp.sqrt(din))
        b = jax.random.normal(next(ki), (1, dout), jnp.float32) * 0.01
        return w, b

    def bn_fold(w, b, dout):
        gamma = jnp.ones((1, dout), jnp.float32)
        beta = jnp.zeros((1, dout), jnp.float32)
        running_mean = jax.random.normal(next(ki), (1, dout), jnp.float32) * 0.1
        running_var = jnp.abs(jax.random.normal(next(ki), (1, dout), jnp.float32)) * 0.1 + 1.0
        scale = gamma / jnp.sqrt(running_var + eps)
        shift = beta - running_mean * scale
        return w * scale, b * scale + shift

    w1, b1 = linear(*dims[0]); w1, b1 = bn_fold(w1, b1, dims[0][1])
    w2, b2 = linear(*dims[1]); w2, b2 = bn_fold(w2, b2, dims[1][1])
    w3, b3 = linear(*dims[2]); w3, b3 = bn_fold(w3, b3, dims[2][1])
    w4, b4 = linear(*dims[3])

    # Zero-pad fc1 input rows 555 -> 640 (multiple of 128).
    k_pad = _round_up(input_size, 128)
    w1 = jnp.pad(w1, ((0, k_pad - input_size), (0, 0)))

    # Zero-pad fc4 output columns 10 -> 128 (lane-dense logits store).
    n_pad = _round_up(num_classes, 128)
    w4 = jnp.pad(w4, ((0, 0), (0, n_pad - num_classes)))
    b4 = jnp.pad(b4, ((0, 0), (0, n_pad - num_classes)))

    # Weights in bf16 (MXU-native, half the HBM bytes); biases stay f32.
    to_bf16 = lambda a: a.astype(jnp.bfloat16)
    return (to_bf16(w1), b1, to_bf16(w2), b2, to_bf16(w3), b3, to_bf16(w4), b4)


def reference_forward(x, params, num_classes=10):
    """Plain-JAX reference with identical eval semantics and identical bf16/f32 mixed precision."""
    (w1, b1, w2, b2, w3, b3, w4, b4) = params
    k_pad = w1.shape[0]
    xb = jnp.pad(x, ((0, 0), (0, k_pad - x.shape[1]))).astype(jnp.bfloat16)
    h = jnp.maximum(jnp.dot(xb, w1, preferred_element_type=jnp.float32) + b1, 0.0)
    h = jnp.maximum(jnp.dot(h.astype(jnp.bfloat16), w2,
                            preferred_element_type=jnp.float32) + b2, 0.0)
    h = jnp.maximum(jnp.dot(h.astype(jnp.bfloat16), w3,
                            preferred_element_type=jnp.float32) + b3, 0.0)
    logits = jnp.dot(h.astype(jnp.bfloat16), w4, preferred_element_type=jnp.float32) + b4
    return logits[:, :num_classes]


if __name__ == "__main__":
    key = jax.random.PRNGKey(0)
    k_x, k_p = jax.random.split(key)

    batch, input_size, num_classes = 8, 555, 10
    x = jax.random.normal(k_x, (batch, input_size), jnp.float32)
    params = make_params(k_p, input_size=input_size, num_classes=num_classes)

    out = asl_classifier_forward(x, params, num_classes=num_classes)
    out = jax.block_until_ready(out)

    ref = reference_forward(x, params, num_classes=num_classes)
    assert out.shape == (batch, num_classes)
    assert jnp.allclose(out, ref, atol=1e-2, rtol=1e-2), "mismatch vs reference"

    print("KERNEL_OK")
</pallas_src>

<mosaic_0001>
module attributes {stable_mosaic.version = 11 : i64} {
  func.func @_mlp_kernel(%arg0: i32, %arg1: memref<16x555xf32, #tpu.memory_space<vmem>>, %arg2: memref<640x1024xbf16, #tpu.memory_space<vmem>>, %arg3: memref<1x1024xf32, #tpu.memory_space<vmem>>, %arg4: memref<1024x512xbf16, #tpu.memory_space<vmem>>, %arg5: memref<1x512xf32, #tpu.memory_space<vmem>>, %arg6: memref<512x256xbf16, #tpu.memory_space<vmem>>, %arg7: memref<1x256xf32, #tpu.memory_space<vmem>>, %arg8: memref<256x128xbf16, #tpu.memory_space<vmem>>, %arg9: memref<1x128xf32, #tpu.memory_space<vmem>>, %arg10: memref<16x128xf32, #tpu.memory_space<vmem>>, %arg11: memref<16x640xbf16, #tpu.memory_space<vmem>>) attributes {dimension_semantics = [#tpu.dimension_semantics<parallel>], iteration_bounds = array<i64: 1>, scalar_prefetch = 0 : i64, scratch_operands = 1 : i64, tpu.core_type = #tpu.core_type<tc>, window_params = [{transform_indices = @transform_0, window_bounds = array<i64: 16, 555>}, {pipeline_mode = #tpu.pipeline_mode<synchronous>, transform_indices = @transform_1, window_bounds = array<i64: 640, 1024>}, {pipeline_mode = #tpu.pipeline_mode<synchronous>, transform_indices = @transform_2, window_bounds = array<i64: 1, 1024>}, {pipeline_mode = #tpu.pipeline_mode<synchronous>, transform_indices = @transform_3, window_bounds = array<i64: 1024, 512>}, {pipeline_mode = #tpu.pipeline_mode<synchronous>, transform_indices = @transform_4, window_bounds = array<i64: 1, 512>}, {pipeline_mode = #tpu.pipeline_mode<synchronous>, transform_indices = @transform_5, window_bounds = array<i64: 512, 256>}, {pipeline_mode = #tpu.pipeline_mode<synchronous>, transform_indices = @transform_6, window_bounds = array<i64: 1, 256>}, {pipeline_mode = #tpu.pipeline_mode<synchronous>, transform_indices = @transform_7, window_bounds = array<i64: 256, 128>}, {pipeline_mode = #tpu.pipeline_mode<synchronous>, transform_indices = @transform_8, window_bounds = array<i64: 1, 128>}, {transform_indices = @transform_9, window_bounds = array<i64: 16, 128>}]} {
    %cst = arith.constant 0.000000e+00 : bf16
    %0 = vector.broadcast %cst : bf16 to vector<16x640xbf16>
    %c0 = arith.constant 0 : index
    %c0_0 = arith.constant 0 : index
    %1 = vector.load %arg11[%c0, %c0_0] : memref<16x640xbf16, #tpu.memory_space<vmem>>, vector<16x640xbf16>
    tpu.vector_store %arg11[%c0, %c0_0], %0 {strides = array<i32>} : memref<16x640xbf16, #tpu.memory_space<vmem>>, vector<16x640xbf16>,
    %c0_1 = arith.constant 0 : index
    %c0_2 = arith.constant 0 : index
    %2 = vector.load %arg1[%c0_1, %c0_2] : memref<16x555xf32, #tpu.memory_space<vmem>>, vector<16x555xf32>
    %3 = arith.truncf %2 : vector<16x555xf32> to vector<16x555xbf16>
    %c0_3 = arith.constant 0 : index
    %c0_4 = arith.constant 0 : index
    %4 = vector.load %arg11[%c0_3, %c0_4] : memref<16x640xbf16, #tpu.memory_space<vmem>>, vector<16x555xbf16>
    tpu.vector_store %arg11[%c0_3, %c0_4], %3 {strides = array<i32>} : memref<16x640xbf16, #tpu.memory_space<vmem>>, vector<16x555xbf16>,
    %c0_5 = arith.constant 0 : index
    %c0_6 = arith.constant 0 : index
    %5 = vector.load %arg11[%c0_5, %c0_6] : memref<16x640xbf16, #tpu.memory_space<vmem>>, vector<16x640xbf16>
    %c0_7 = arith.constant 0 : index
    %c0_8 = arith.constant 0 : index
    %6 = vector.load %arg2[%c0_7, %c0_8] : memref<640x1024xbf16, #tpu.memory_space<vmem>>, vector<640x1024xbf16>
    %cst_9 = arith.constant dense<0.000000e+00> : vector<16x1024xf32>
    %7 = tpu.matmul %5, %6, %cst_9 {dimension_numbers = #tpu.dot_dimension_numbers<[1], [0], [0], [1], [0, 0, 1, 1], [], []>} : vector<16x640xbf16>, vector<640x1024xbf16>, vector<16x1024xf32> -> vector<16x1024xf32>
    %c0_10 = arith.constant 0 : index
    %c0_11 = arith.constant 0 : index
    %8 = vector.load %arg3[%c0_10, %c0_11] : memref<1x1024xf32, #tpu.memory_space<vmem>>, vector<1x1024xf32>
    %9 = vector.broadcast %8 : vector<1x1024xf32> to vector<16x1024xf32>
    %10 = arith.addf %7, %9 : vector<16x1024xf32>
    %cst_12 = arith.constant 0.000000e+00 : f32
    %11 = vector.broadcast %cst_12 : f32 to vector<16x1024xf32>
    %12 = arith.maximumf %10, %11 : vector<16x1024xf32>
    %13 = arith.truncf %12 : vector<16x1024xf32> to vector<16x1024xbf16>
    %c0_13 = arith.constant 0 : index
    %c0_14 = arith.constant 0 : index
    %14 = vector.load %arg4[%c0_13, %c0_14] : memref<1024x512xbf16, #tpu.memory_space<vmem>>, vector<1024x512xbf16>
    %cst_15 = arith.constant dense<0.000000e+00> : vector<16x512xf32>
    %15 = tpu.matmul %13, %14, %cst_15 {dimension_numbers = #tpu.dot_dimension_numbers<[1], [0], [0], [1], [0, 0, 1, 1], [], []>} : vector<16x1024xbf16>, vector<1024x512xbf16>, vector<16x512xf32> -> vector<16x512xf32>
    %c0_16 = arith.constant 0 : index
    %c0_17 = arith.constant 0 : index
    %16 = vector.load %arg5[%c0_16, %c0_17] : memref<1x512xf32, #tpu.memory_space<vmem>>, vector<1x512xf32>
    %17 = vector.broadcast %16 : vector<1x512xf32> to vector<16x512xf32>
    %18 = arith.addf %15, %17 : vector<16x512xf32>
    %cst_18 = arith.constant 0.000000e+00 : f32
    %19 = vector.broadcast %cst_18 : f32 to vector<16x512xf32>
    %20 = arith.maximumf %18, %19 : vector<16x512xf32>
    %21 = arith.truncf %20 : vector<16x512xf32> to vector<16x512xbf16>
    %c0_19 = arith.constant 0 : index
    %c0_20 = arith.constant 0 : index
    %22 = vector.load %arg6[%c0_19, %c0_20] : memref<512x256xbf16, #tpu.memory_space<vmem>>, vector<512x256xbf16>
    %cst_21 = arith.constant dense<0.000000e+00> : vector<16x256xf32>
    %23 = tpu.matmul %21, %22, %cst_21 {dimension_numbers = #tpu.dot_dimension_numbers<[1], [0], [0], [1], [0, 0, 1, 1], [], []>} : vector<16x512xbf16>, vector<512x256xbf16>, vector<16x256xf32> -> vector<16x256xf32>
    %c0_22 = arith.constant 0 : index
    %c0_23 = arith.constant 0 : index
    %24 = vector.load %arg7[%c0_22, %c0_23] : memref<1x256xf32, #tpu.memory_space<vmem>>, vector<1x256xf32>
    %25 = vector.broadcast %24 : vector<1x256xf32> to vector<16x256xf32>
    %26 = arith.addf %23, %25 : vector<16x256xf32>
    %cst_24 = arith.constant 0.000000e+00 : f32
    %27 = vector.broadcast %cst_24 : f32 to vector<16x256xf32>
    %28 = arith.maximumf %26, %27 : vector<16x256xf32>
    %29 = arith.truncf %28 : vector<16x256xf32> to vector<16x256xbf16>
    %c0_25 = arith.constant 0 : index
    %c0_26 = arith.constant 0 : index
    %30 = vector.load %arg8[%c0_25, %c0_26] : memref<256x128xbf16, #tpu.memory_space<vmem>>, vector<256x128xbf16>
    %cst_27 = arith.constant dense<0.000000e+00> : vector<16x128xf32>
    %31 = tpu.matmul %29, %30, %cst_27 {dimension_numbers = #tpu.dot_dimension_numbers<[1], [0], [0], [1], [0, 0, 1, 1], [], []>} : vector<16x256xbf16>, vector<256x128xbf16>, vector<16x128xf32> -> vector<16x128xf32>
    %c0_28 = arith.constant 0 : index
    %c0_29 = arith.constant 0 : index
    %32 = vector.load %arg9[%c0_28, %c0_29] : memref<1x128xf32, #tpu.memory_space<vmem>>, vector<1x128xf32>
    %33 = vector.broadcast %32 : vector<1x128xf32> to vector<16x128xf32>
    %34 = arith.addf %31, %33 : vector<16x128xf32>
    %c0_30 = arith.constant 0 : index
    %c0_31 = arith.constant 0 : index
    %35 = vector.load %arg10[%c0_30, %c0_31] : memref<16x128xf32, #tpu.memory_space<vmem>>, vector<16x128xf32>
    tpu.vector_store %arg10[%c0_30, %c0_31], %34 {strides = array<i32>} : memref<16x128xf32, #tpu.memory_space<vmem>>, vector<16x128xf32>,
    return
  }
  func.func @transform_0(%arg0: i32) -> (i32, i32) {
    %c0_i32 = arith.constant 0 : i32
    %c0_i32_0 = arith.constant 0 : i32
    return %arg0, %c0_i32 : i32, i32
  }
  func.func @transform_1(%arg0: i32) -> (i32, i32) {
    %c0_i32 = arith.constant 0 : i32
    %c0_i32_0 = arith.constant 0 : i32
    %c0_i32_1 = arith.constant 0 : i32
    return %c0_i32, %c0_i32_0 : i32, i32
  }
  func.func @transform_2(%arg0: i32) -> (i32, i32) {
    %c0_i32 = arith.constant 0 : i32
    %c0_i32_0 = arith.constant 0 : i32
    %c0_i32_1 = arith.constant 0 : i32
    return %c0_i32, %c0_i32_0 : i32, i32
  }
  func.func @transform_3(%arg0: i32) -> (i32, i32) {
    %c0_i32 = arith.constant 0 : i32
    %c0_i32_0 = arith.constant 0 : i32
    %c0_i32_1 = arith.constant 0 : i32
    return %c0_i32, %c0_i32_0 : i32, i32
  }
  func.func @transform_4(%arg0: i32) -> (i32, i32) {
    %c0_i32 = arith.constant 0 : i32
    %c0_i32_0 = arith.constant 0 : i32
    %c0_i32_1 = arith.constant 0 : i32
    return %c0_i32, %c0_i32_0 : i32, i32
  }
  func.func @transform_5(%arg0: i32) -> (i32, i32) {
    %c0_i32 = arith.constant 0 : i32
    %c0_i32_0 = arith.constant 0 : i32
    %c0_i32_1 = arith.constant 0 : i32
    return %c0_i32, %c0_i32_0 : i32, i32
  }
  func.func @transform_6(%arg0: i32) -> (i32, i32) {
    %c0_i32 = arith.constant 0 : i32
    %c0_i32_0 = arith.constant 0 : i32
    %c0_i32_1 = arith.constant 0 : i32
    return %c0_i32, %c0_i32_0 : i32, i32
  }
  func.func @transform_7(%arg0: i32) -> (i32, i32) {
    %c0_i32 = arith.constant 0 : i32
    %c0_i32_0 = arith.constant 0 : i32
    %c0_i32_1 = arith.constant 0 : i32
    return %c0_i32, %c0_i32_0 : i32, i32
  }
  func.func @transform_8(%arg0: i32) -> (i32, i32) {
    %c0_i32 = arith.constant 0 : i32
    %c0_i32_0 = arith.constant 0 : i32
    %c0_i32_1 = arith.constant 0 : i32
    return %c0_i32, %c0_i32_0 : i32, i32
  }
  func.func @transform_9(%arg0: i32) -> (i32, i32) {
    %c0_i32 = arith.constant 0 : i32
    %c0_i32_0 = arith.constant 0 : i32
    return %arg0, %c0_i32 : i32, i32
  }
}

module attributes {stable_mosaic.version = 11 : i64} {
  func.func @_mlp_kernel(%arg0: i32, %arg1: memref<16x555xf32, #tpu.memory_space<vmem>>, %arg2: memref<640x1024xbf16, #tpu.memory_space<vmem>>, %arg3: memref<1x1024xf32, #tpu.memory_space<vmem>>, %arg4: memref<1024x512xbf16, #tpu.memory_space<vmem>>, %arg5: memref<1x512xf32, #tpu.memory_space<vmem>>, %arg6: memref<512x256xbf16, #tpu.memory_space<vmem>>, %arg7: memref<1x256xf32, #tpu.memory_space<vmem>>, %arg8: memref<256x128xbf16, #tpu.memory_space<vmem>>, %arg9: memref<1x128xf32, #tpu.memory_space<vmem>>, %arg10: memref<16x128xf32, #tpu.memory_space<vmem>>, %arg11: memref<16x640xbf16, #tpu.memory_space<vmem>>) attributes {dimension_semantics = [#tpu.dimension_semantics<parallel>], iteration_bounds = array<i64: 1>, scalar_prefetch = 0 : i64, scratch_operands = 1 : i64, tpu.core_type = #tpu.core_type<tc>, window_params = [{transform_indices = @transform_0, window_bounds = array<i64: 16, 555>}, {pipeline_mode = #tpu.pipeline_mode<synchronous>, transform_indices = @transform_1, window_bounds = array<i64: 640, 1024>}, {pipeline_mode = #tpu.pipeline_mode<synchronous>, transform_indices = @transform_2, window_bounds = array<i64: 1, 1024>}, {pipeline_mode = #tpu.pipeline_mode<synchronous>, transform_indices = @transform_3, window_bounds = array<i64: 1024, 512>}, {pipeline_mode = #tpu.pipeline_mode<synchronous>, transform_indices = @transform_4, window_bounds = array<i64: 1, 512>}, {pipeline_mode = #tpu.pipeline_mode<synchronous>, transform_indices = @transform_5, window_bounds = array<i64: 512, 256>}, {pipeline_mode = #tpu.pipeline_mode<synchronous>, transform_indices = @transform_6, window_bounds = array<i64: 1, 256>}, {pipeline_mode = #tpu.pipeline_mode<synchronous>, transform_indices = @transform_7, window_bounds = array<i64: 256, 128>}, {pipeline_mode = #tpu.pipeline_mode<synchronous>, transform_indices = @transform_8, window_bounds = array<i64: 1, 128>}, {transform_indices = @transform_9, window_bounds = array<i64: 16, 128>}]} {
    %cst = arith.constant 0.000000e+00 : bf16
    %0 = vector.broadcast %cst : bf16 to vector<16x640xbf16>
    %c0 = arith.constant 0 : index
    %c0_0 = arith.constant 0 : index
    %1 = vector.load %arg11[%c0, %c0_0] : memref<16x640xbf16, #tpu.memory_space<vmem>>, vector<16x640xbf16>
    tpu.vector_store %arg11[%c0, %c0_0], %0 {strides = array<i32>} : memref<16x640xbf16, #tpu.memory_space<vmem>>, vector<16x640xbf16>,
    %c0_1 = arith.constant 0 : index
    %c0_2 = arith.constant 0 : index
    %2 = vector.load %arg1[%c0_1, %c0_2] : memref<16x555xf32, #tpu.memory_space<vmem>>, vector<16x555xf32>
    %3 = arith.truncf %2 : vector<16x555xf32> to vector<16x555xbf16>
    %c0_3 = arith.constant 0 : index
    %c0_4 = arith.constant 0 : index
    %4 = vector.load %arg11[%c0_3, %c0_4] : memref<16x640xbf16, #tpu.memory_space<vmem>>, vector<16x555xbf16>
    tpu.vector_store %arg11[%c0_3, %c0_4], %3 {strides = array<i32>} : memref<16x640xbf16, #tpu.memory_space<vmem>>, vector<16x555xbf16>,
    %c0_5 = arith.constant 0 : index
    %c0_6 = arith.constant 0 : index
    %5 = vector.load %arg11[%c0_5, %c0_6] : memref<16x640xbf16, #tpu.memory_space<vmem>>, vector<16x640xbf16>
    %c0_7 = arith.constant 0 : index
    %c0_8 = arith.constant 0 : index
    %6 = vector.load %arg2[%c0_7, %c0_8] : memref<640x1024xbf16, #tpu.memory_space<vmem>>, vector<640x1024xbf16>
    %cst_9 = arith.constant dense<0.000000e+00> : vector<16x1024xf32>
    %7 = tpu.matmul %5, %6, %cst_9 {dimension_numbers = #tpu.dot_dimension_numbers<[1], [0], [0], [1], [0, 0, 1, 1], [], []>} : vector<16x640xbf16>, vector<640x1024xbf16>, vector<16x1024xf32> -> vector<16x1024xf32>
    %c0_10 = arith.constant 0 : index
    %c0_11 = arith.constant 0 : index
    %8 = vector.load %arg3[%c0_10, %c0_11] : memref<1x1024xf32, #tpu.memory_space<vmem>>, vector<1x1024xf32>
    %9 = vector.broadcast %8 : vector<1x1024xf32> to vector<16x1024xf32>
    %10 = arith.addf %7, %9 : vector<16x1024xf32>
    %cst_12 = arith.constant 0.000000e+00 : f32
    %11 = vector.broadcast %cst_12 : f32 to vector<16x1024xf32>
    %12 = arith.maximumf %10, %11 : vector<16x1024xf32>
    %13 = arith.truncf %12 : vector<16x1024xf32> to vector<16x1024xbf16>
    %c0_13 = arith.constant 0 : index
    %c0_14 = arith.constant 0 : index
    %14 = vector.load %arg4[%c0_13, %c0_14] : memref<1024x512xbf16, #tpu.memory_space<vmem>>, vector<1024x512xbf16>
    %cst_15 = arith.constant dense<0.000000e+00> : vector<16x512xf32>
    %15 = tpu.matmul %13, %14, %cst_15 {dimension_numbers = #tpu.dot_dimension_numbers<[1], [0], [0], [1], [0, 0, 1, 1], [], []>} : vector<16x1024xbf16>, vector<1024x512xbf16>, vector<16x512xf32> -> vector<16x512xf32>
    %c0_16 = arith.constant 0 : index
    %c0_17 = arith.constant 0 : index
    %16 = vector.load %arg5[%c0_16, %c0_17] : memref<1x512xf32, #tpu.memory_space<vmem>>, vector<1x512xf32>
    %17 = vector.broadcast %16 : vector<1x512xf32> to vector<16x512xf32>
    %18 = arith.addf %15, %17 : vector<16x512xf32>
    %cst_18 = arith.constant 0.000000e+00 : f32
    %19 = vector.broadcast %cst_18 : f32 to vector<16x512xf32>
    %20 = arith.maximumf %18, %19 : vector<16x512xf32>
    %21 = arith.truncf %20 : vector<16x512xf32> to vector<16x512xbf16>
    %c0_19 = arith.constant 0 : index
    %c0_20 = arith.constant 0 : index
    %22 = vector.load %arg6[%c0_19, %c0_20] : memref<512x256xbf16, #tpu.memory_space<vmem>>, vector<512x256xbf16>
    %cst_21 = arith.constant dense<0.000000e+00> : vector<16x256xf32>
    %23 = tpu.matmul %21, %22, %cst_21 {dimension_numbers = #tpu.dot_dimension_numbers<[1], [0], [0], [1], [0, 0, 1, 1], [], []>} : vector<16x512xbf16>, vector<512x256xbf16>, vector<16x256xf32> -> vector<16x256xf32>
    %c0_22 = arith.constant 0 : index
    %c0_23 = arith.constant 0 : index
    %24 = vector.load %arg7[%c0_22, %c0_23] : memref<1x256xf32, #tpu.memory_space<vmem>>, vector<1x256xf32>
    %25 = vector.broadcast %24 : vector<1x256xf32> to vector<16x256xf32>
    %26 = arith.addf %23, %25 : vector<16x256xf32>
    %cst_24 = arith.constant 0.000000e+00 : f32
    %27 = vector.broadcast %cst_24 : f32 to vector<16x256xf32>
    %28 = arith.maximumf %26, %27 : vector<16x256xf32>
    %29 = arith.truncf %28 : vector<16x256xf32> to vector<16x256xbf16>
    %c0_25 = arith.constant 0 : index
    %c0_26 = arith.constant 0 : index
    %30 = vector.load %arg8[%c0_25, %c0_26] : memref<256x128xbf16, #tpu.memory_space<vmem>>, vector<256x128xbf16>
    %cst_27 = arith.constant dense<0.000000e+00> : vector<16x128xf32>
    %31 = tpu.matmul %29, %30, %cst_27 {dimension_numbers = #tpu.dot_dimension_numbers<[1], [0], [0], [1], [0, 0, 1, 1], [], []>} : vector<16x256xbf16>, vector<256x128xbf16>, vector<16x128xf32> -> vector<16x128xf32>
    %c0_28 = arith.constant 0 : index
    %c0_29 = arith.constant 0 : index
    %32 = vector.load %arg9[%c0_28, %c0_29] : memref<1x128xf32, #tpu.memory_space<vmem>>, vector<1x128xf32>
    %33 = vector.broadcast %32 : vector<1x128xf32> to vector<16x128xf32>
    %34 = arith.addf %31, %33 : vector<16x128xf32>
    %c0_30 = arith.constant 0 : index
    %c0_31 = arith.constant 0 : index
    %35 = vector.load %arg10[%c0_30, %c0_31] : memref<16x128xf32, #tpu.memory_space<vmem>>, vector<16x128xf32>
    tpu.vector_store %arg10[%c0_30, %c0_31], %34 {strides = array<i32>} : memref<16x128xf32, #tpu.memory_space<vmem>>, vector<16x128xf32>,
    return
  }
  func.func @transform_0(%arg0: i32) -> (i32, i32) {
    %c0_i32 = arith.constant 0 : i32
    %c0_i32_0 = arith.constant 0 : i32
    return %arg0, %c0_i32 : i32, i32
  }
  func.func @transform_1(%arg0: i32) -> (i32, i32) {
    %c0_i32 = arith.constant 0 : i32
    %c0_i32_0 = arith.constant 0 : i32
    %c0_i32_1 = arith.constant 0 : i32
    return %c0_i32, %c0_i32_0 : i32, i32
  }
  func.func @transform_2(%arg0: i32) -> (i32, i32) {
    %c0_i32 = arith.constant 0 : i32
    %c0_i32_0 = arith.constant 0 : i32
    %c0_i32_1 = arith.constant 0 : i32
    return %c0_i32, %c0_i32_0 : i32, i32
  }
  func.func @transform_3(%arg0: i32) -> (i32, i32) {
    %c0_i32 = arith.constant 0 : i32
    %c0_i32_0 = arith.constant 0 : i32
    %c0_i32_1 = arith.constant 0 : i32
    return %c0_i32, %c0_i32_0 : i32, i32
  }
  func.func @transform_4(%arg0: i32) -> (i32, i32) {
    %c0_i32 = arith.constant 0 : i32
    %c0_i32_0 = arith.constant 0 : i32
    %c0_i32_1 = arith.constant 0 : i32
    return %c0_i32, %c0_i32_0 : i32, i32
  }
  func.func @transform_5(%arg0: i32) -> (i32, i32) {
    %c0_i32 = arith.constant 0 : i32
    %c0_i32_0 = arith.constant 0 : i32
    %c0_i32_1 = arith.constant 0 : i32
    return %c0_i32, %c0_i32_0 : i32, i32
  }
  func.func @transform_6(%arg0: i32) -> (i32, i32) {
    %c0_i32 = arith.constant 0 : i32
    %c0_i32_0 = arith.constant 0 : i32
    %c0_i32_1 = arith.constant 0 : i32
    return %c0_i32, %c0_i32_0 : i32, i32
  }
  func.func @transform_7(%arg0: i32) -> (i32, i32) {
    %c0_i32 = arith.constant 0 : i32
    %c0_i32_0 = arith.constant 0 : i32
    %c0_i32_1 = arith.constant 0 : i32
    return %c0_i32, %c0_i32_0 : i32, i32
  }
  func.func @transform_8(%arg0: i32) -> (i32, i32) {
    %c0_i32 = arith.constant 0 : i32
    %c0_i32_0 = arith.constant 0 : i32
    %c0_i32_1 = arith.constant 0 : i32
    return %c0_i32, %c0_i32_0 : i32, i32
  }
  func.func @transform_9(%arg0: i32) -> (i32, i32) {
    %c0_i32 = arith.constant 0 : i32
    %c0_i32_0 = arith.constant 0 : i32
    return %arg0, %c0_i32 : i32, i32
  }
}

</mosaic_0001>

<bundles_post_ra>
// kernel: tpu_custom_call.1
= control target key start
LH: loop header
LB: loop body
LE: loop exit
PB: predicated region body
PF: predicated region fallthrough
CT: control target
= control target key end

     0   :  { %14 = vsyncpa [#allocation4], 0  ;;  %s9392_s0 = inlined_call_operand.hbm [shape: f32[16,555], index: 0, kind: input, shape index: {}]   ;;  %s9393_s1 = inlined_call_operand.hbm [shape: bf16[640,1024], index: 1, kind: input, shape index: {}]   ;;  %s9394_s2 = inlined_call_operand.hbm [shape: f32[1,1024], index: 2, kind: input, shape index: {}]   ;;  %s9395_s3 = inlined_call_operand.hbm [shape: bf16[1024,512], index: 3, kind: input, shape index: {}]   ;;  %s9396_s4 = inlined_call_operand.hbm [shape: f32[1,512], index: 4, kind: input, shape index: {}]   ;;  %s9397_s5 = inlined_call_operand.hbm [shape: bf16[512,256], index: 5, kind: input, shape index: {}]   ;;  %s9398_s6 = inlined_call_operand.hbm [shape: f32[1,256], index: 6, kind: input, shape index: {}]   ;;  %s9399_s7 = inlined_call_operand.hbm [shape: bf16[256,128], index: 7, kind: input, shape index: {}]   ;;  %s9400_s8 = inlined_call_operand.hbm [shape: f32[1,128], index: 8, kind: input, shape index: {}]   ;;  %s9401_s9 = inlined_call_operand.hbm [shape: f32[16,128], index: 9, kind: output, shape index: {}]  }
   0x1   :  { %15 = vsyncpa [#allocation7], 0 }
   0x2   :  { %16 = vsyncpa [#allocation10], 0 }
   0x3   :  { %17 = vsyncpa [#allocation13], 0 }
   0x4   :  { %18 = vsyncpa [#allocation16], 0  ;;  %s37_s11 = sshll.u32 %s9393_s1, 4  ;;  %s38_s11 = int_to_ptr.hbm [resolvable:$true] %s37_s11 }
   0x5   :  { %19 = vsyncpa [#allocation5], 0  ;;  %s9029_s12 = smov [#allocation6]   ;;  %s61_s16 = sshll.u32 %s9395_s3, 4  ;;  %s62_s16 = int_to_ptr.hbm [resolvable:$true] %s61_s16 }
   0x6   :  { %s39_s13 = sshll.u32 %s9029_s12, 4  ;;  %s9030_s17 = smov 512   ;;  %s40_s13 = int_to_ptr.vmem [resolvable:$true] %s39_s13 }
   0x7   :  { %s9031_s18 = smov 32   ;;  %s9032_s19 = smov [#allocation9]  }
   0x8   :  { %45 = dma.hbm_to_vmem [thread:$0]  %s38_s11, 40960, %s40_s13, [#allocation7], %s9030_s17, %s9030_s17, %s9031_s18  }
   0x9   :  { %s63_s20 = sshll.u32 %s9032_s19, 4  ;;  %s9033_s21 = smov 256   ;;  %s64_s20 = int_to_ptr.vmem [resolvable:$true] %s63_s20 }
   0xa   :  { %s9034_s22 = smov 16   ;;  %s85_s24 = sshll.u32 %s9397_s5, 4  ;;  %s86_s24 = int_to_ptr.hbm [resolvable:$true] %s85_s24 }
   0xb   :  { %69 = dma.hbm_to_vmem [thread:$0]  %s62_s16, 32768, %s64_s20, [#allocation10], %s9033_s21, %s9033_s21, %s9034_s22  }
   0xc   :  { %s9035_s25 = smov [#allocation12]   ;;  %s109_s28 = sshll.u32 %s9399_s7, 4  ;;  %s110_s28 = int_to_ptr.hbm [resolvable:$true] %s109_s28 }
   0xd   :  { %s87_s26 = sshll.u32 %s9035_s25, 4  ;;  %s9036_s29 = smov 128   ;;  %s88_s26 = int_to_ptr.vmem [resolvable:$true] %s87_s26 }
   0xe   :  { %s9037_s30 = smov 8   ;;  %s9038_s10 = smov [#allocation15]  }
   0xf   :  { %93 = dma.hbm_to_vmem [thread:$0]  %s86_s24, 8192, %s88_s26, [#allocation13], %s9036_s29, %s9036_s29, %s9037_s30  }
  0x10   :  { %s111_s11 = sshll.u32 %s9038_s10, 4  ;;  %s9039_s12 = smov 64   ;;  %s112_s11 = int_to_ptr.vmem [resolvable:$true] %s111_s11 }
  0x11   :  { %s9040_s5 = smov 4   ;;  %s24_s15 = sshll.u32 %s9392_s0, 4  ;;  %s25_s15 = int_to_ptr.hbm [resolvable:$true] %s24_s15 }
  0x12   :  { %117 = dma.hbm_to_vmem [thread:$0]  %s110_s28, 2048, %s112_s11, [#allocation16], %s9039_s12, %s9039_s12, %s9040_s5  }
  0x13   :  { %s9041_s16 = smov [#allocation3]   ;;  %s51_s19 = sshll.u32 %s9394_s2, 4  ;;  %s52_s19 = int_to_ptr.hbm [resolvable:$true] %s51_s19 }
  0x14   :  { %s26_s7 = sshll.u32 %s9041_s16, 4  ;;  %s9042_s20 = smov 640   ;;  %s27_s7 = int_to_ptr.vmem [resolvable:$true] %s26_s7 }
  0x15   :  { %s9043_s21 = smov 40   ;;  %s9044_s22 = smov [#allocation8]  }
  0x16   :  { %32 = dma.hbm_to_vmem [thread:$0]  %s25_s15, 1280, %s27_s7, [#allocation4], %s9042_s20, %s9042_s20, %s9043_s21  }
  0x17   :  { %s53_s1 = sshll.u32 %s9044_s22, 4  ;;  %s75_s25 = sshll.u32 %s9396_s4, 4  ;;  %s54_s1 = int_to_ptr.vmem [resolvable:$true] %s53_s1  ;;  %s76_s25 = int_to_ptr.hbm [resolvable:$true] %s75_s25 }
  0x18   :  { %56 = dma.hbm_to_vmem [thread:$0]  %s52_s19, 128, %s54_s1, [#allocation7]  }
  0x19   :  { %s99_s27 = sshll.u32 %s9398_s6, 4  ;;  %s9045_s3 = smov [#allocation11]   ;;  %s100_s27 = int_to_ptr.hbm [resolvable:$true] %s99_s27 }
  0x1a   :  { %s77_s28 = sshll.u32 %s9045_s3, 4  ;;  %s9046_s2 = smov [#allocation14]   ;;  %s78_s28 = int_to_ptr.vmem [resolvable:$true] %s77_s28 }
  0x1b   :  { %80 = dma.hbm_to_vmem [thread:$0]  %s76_s25, 64, %s78_s28, [#allocation10]  }
  0x1c   :  { %s101_s10 = sshll.u32 %s9046_s2, 4  ;;  %s123_s5 = sshll.u32 %s9400_s8, 4  ;;  %s102_s10 = int_to_ptr.vmem [resolvable:$true] %s101_s10  ;;  %s124_s5 = int_to_ptr.hbm [resolvable:$true] %s123_s5 }
  0x1d   :  { %104 = dma.hbm_to_vmem [thread:$0]  %s100_s27, 32, %s102_s10, [#allocation13]  }
  0x1e   :  { %s9047_s4 = smov [#allocation17]  }
  0x1f   :  { %s125_s13 = sshll.u32 %s9047_s4, 4  ;;  %s126_s13 = int_to_ptr.vmem [resolvable:$true] %s125_s13 }
  0x20   :  { %128 = dma.hbm_to_vmem [thread:$0]  %s124_s5, 16, %s126_s13, [#allocation16]  }
  0x21   :  { %9017 = dma.done.wait [#allocation4], 1280  }
  0x22   :  { %9018 = vsyncadd [#allocation4], 4294966016 }
  0x23   :  { %9019 = dma.done.wait [#allocation7], 41088  }
  0x24   :  { %9020 = vsyncadd [#allocation7], 4294926208 }
  0x25   :  { %9021 = dma.done.wait [#allocation10], 32832  }
  0x26   :  { %9022 = vsyncadd [#allocation10], 4294934464 }
  0x27   :  { %9023 = dma.done.wait [#allocation13], 8224  }
  0x28   :  { %9024 = vsyncadd [#allocation13], 4294959072 }
  0x29   :  { %9025 = dma.done.wait [#allocation16], 2064  }
  0x2a   :  { %9026 = vsyncadd [#allocation16], 4294965232  ;;  %v5694_v0 = vld [vmem:[#allocation6 + $0x1c0] sm:$0xf]  ;;  %vm190_vm0 = vcmask 347136   ;;  %s9049_s6 = smov [#allocation18]  }
  0x2b   :  { %v8157_v1 = vld [vmem:[#allocation6 + $0x1dc] sm:$0xf0]  ;;  %s5429_s8 = sshll.u32 %s9049_s6, 4  ;;  %s5431_s16 = sshll.u32 %s9401_s9, 4  ;;  %s5430_s8 = int_to_ptr.vmem [resolvable:$true] %s5429_s8  ;;  %s5432_s16 = int_to_ptr.hbm [resolvable:$true] %s5431_s16 }
  0x2c   :  { %v5950_v2 = vld [vmem:[#allocation6 + $0x3c0] sm:$0xf]  ;;  %v5695_v3 = vor.u32 %v8157_v1, %v5694_v0 }
  0x2d   :  { %v8221_v4 = vld [vmem:[#allocation6 + $0x3dc] sm:$0xf0] }
  0x2e   :  { %v6206_v5 = vld [vmem:[#allocation6 + $0x5c0] sm:$0xf]  ;;  %v5951_v7 = vor.u32 %v8221_v4, %v5950_v2  ;;  %2165 = vmatpush.bf16.msra.mxu0 %v5695_v3 }
  0x2f   :  { %v8285_v6 = vld [vmem:[#allocation6 + $0x5dc] sm:$0xf0] }
  0x30   :  { %v6207_v8 = vor.u32 %v8285_v6, %v6206_v5  ;;  %v6462_v9 = vld [vmem:[#allocation6 + $0x7c0] sm:$0xf]  ;;  %2179 = vmatpush.bf16.msra.mxu1 %v5951_v7 }
  0x31   :  { %v8349_v10 = vld [vmem:[#allocation6 + $0x7dc] sm:$0xf0] }
  0x32   :  { %v5662_v11 = vld [vmem:[#allocation6 + $0x180] sm:$0xf]  ;;  %v6463_v12 = vor.u32 %v8349_v10, %v6462_v9  ;;  %2193 = vmatpush.bf16.msra.mxu2 %v6207_v8 }
  0x33   :  { %v8149_v13 = vld [vmem:[#allocation6 + $0x19c] sm:$0xf0] }
  0x34   :  { %v5918_v14 = vld [vmem:[#allocation6 + $0x380] sm:$0xf]  ;;  %v5663_v16 = vor.u32 %v8149_v13, %v5662_v11  ;;  %2207 = vmatpush.bf16.msra.mxu3 %v6463_v12 }
  0x35   :  { %v8213_v15 = vld [vmem:[#allocation6 + $0x39c] sm:$0xf0] }
  0x36   :  { %v5919_v17 = vor.u32 %v8213_v15, %v5918_v14  ;;  %v6174_v18 = vld [vmem:[#allocation6 + $0x580] sm:$0xf]  ;;  %2166 = vmatpush.bf16.msra.mxu0 %v5663_v16 }
  0x37   :  { %v8277_v19 = vld [vmem:[#allocation6 + $0x59c] sm:$0xf0] }
  0x38   :  { %v6430_v20 = vld [vmem:[#allocation6 + $0x780] sm:$0xf]  ;;  %v6175_v21 = vor.u32 %v8277_v19, %v6174_v18  ;;  %2180 = vmatpush.bf16.msra.mxu1 %v5919_v17 }
  0x39   :  { %v8341_v22 = vld [vmem:[#allocation6 + $0x79c] sm:$0xf0] }
  0x3a   :  { %v5630_v23 = vld [vmem:[#allocation6 + $0x140] sm:$0xf]  ;;  %v6431_v25 = vor.u32 %v8341_v22, %v6430_v20  ;;  %2194 = vmatpush.bf16.msra.mxu2 %v6175_v21 }
  0x3b   :  { %v8141_v24 = vld [vmem:[#allocation6 + $0x15c] sm:$0xf0] }
  0x3c   :  { %v5886_v26 = vld [vmem:[#allocation6 + $0x340] sm:$0xf]  ;;  %v5631_v29 = vor.u32 %v8141_v24, %v5630_v23  ;;  %2208 = vmatpush.bf16.msra.mxu3 %v6431_v25 }
  0x3d   :  { %v8205_v27 = vld [vmem:[#allocation6 + $0x35c] sm:$0xf0] }
  0x3e   :  { %v6142_v28 = vld [vmem:[#allocation6 + $0x540] sm:$0xf]  ;;  %v5887_v33 = vor.u32 %v8205_v27, %v5886_v26  ;;  %2167 = vmatpush.bf16.msra.mxu0 %v5631_v29 }
  0x3f   :  { %v8269_v30 = vld [vmem:[#allocation6 + $0x55c] sm:$0xf0] }
  0x40   :  { %v6398_v31 = vld [vmem:[#allocation6 + $0x740] sm:$0xf]  ;;  %v6143_v34 = vor.u32 %v8269_v30, %v6142_v28  ;;  %2181 = vmatpush.bf16.msra.mxu1 %v5887_v33  ;;  %v8153_v30 = vld [vmem:[#allocation6 + $0x1c4] sm:$0xf] }
  0x41   :  { %v8333_v32 = vld [vmem:[#allocation6 + $0x75c] sm:$0xf0]  ;;  %v8217_v33 = vld [vmem:[#allocation6 + $0x3c4] sm:$0xf] }
  0x42   :  { %v5598_v35 = vld [vmem:[#allocation6 + $0x100] sm:$0xf]  ;;  %v6399_v38 = vor.u32 %v8333_v32, %v6398_v31  ;;  %2195 = vmatpush.bf16.msra.mxu2 %v6143_v34  ;;  %v5696_v32 = vld [vmem:[#allocation6 + $0x1e0] sm:$0xf0] }
  0x43   :  { %v8133_v36 = vld [vmem:[#allocation6 + $0x11c] sm:$0xf0]  ;;  %v5952_v34 = vld [vmem:[#allocation6 + $0x3e0] sm:$0xf0] }
  0x44   :  { %v5854_v37 = vld [vmem:[#allocation6 + $0x300] sm:$0xf]  ;;  %v5599_v44 = vor.u32 %v8133_v36, %v5598_v35  ;;  %2209 = vmatpush.bf16.msra.mxu3 %v6399_v38  ;;  %v6208_v38 = vld [vmem:[#allocation6 + $0x5e0] sm:$0xf0] }
  0x45   :  { %v8197_v39 = vld [vmem:[#allocation6 + $0x31c] sm:$0xf0] }
  0x46   :  { %v6110_v40 = vld [vmem:[#allocation6 + $0x500] sm:$0xf]  ;;  %v5855_v45 = vor.u32 %v8197_v39, %v5854_v37  ;;  %2168 = vmatpush.bf16.msra.mxu0 %v5599_v44  ;;  %v8281_v37 = vld [vmem:[#allocation6 + $0x5c4] sm:$0xf]  ;;  %v5955_v44 = vor.u32 %v8217_v33, %v5952_v34 }
  0x47   :  { %v8261_v41 = vld [vmem:[#allocation6 + $0x51c] sm:$0xf0]  ;;  %v5824_v34 = vld [vmem:[#allocation6 + $0x2e0] sm:$0xf0] }
  0x48   :  { %v6366_v42 = vld [vmem:[#allocation6 + $0x700] sm:$0xf]  ;;  %v6111_v46 = vor.u32 %v8261_v41, %v6110_v40  ;;  %2182 = vmatpush.bf16.msra.mxu1 %v5855_v45  ;;  %v8145_v45 = vld [vmem:[#allocation6 + $0x184] sm:$0xf] }
  0x49   :  { %v8325_v43 = vld [vmem:[#allocation6 + $0x71c] sm:$0xf0] }
  0x4a   :  { %v5566_v47 = vld [vmem:[#allocation6 + $0xc0] sm:$0xf]  ;;  %v6367_v50 = vor.u32 %v8325_v43, %v6366_v42  ;;  %2196 = vmatpush.bf16.msra.mxu2 %v6111_v46  ;;  %v5699_v43 = vor.u32 %v8153_v30, %v5696_v32  ;;  %v5664_v46 = vld [vmem:[#allocation6 + $0x1a0] sm:$0xf0] }
  0x4b   :  { %v8125_v48 = vld [vmem:[#allocation6 + $0xdc] sm:$0xf0] }
  0x4c   :  { %v5822_v49 = vld [vmem:[#allocation6 + $0x2c0] sm:$0xf]  ;;  %v5567_v56 = vor.u32 %v8125_v48, %v5566_v47  ;;  %2210 = vmatpush.bf16.msra.mxu3 %v6367_v50  ;;  %v8209_v47 = vld [vmem:[#allocation6 + $0x384] sm:$0xf]  ;;  %v6211_v48 = vor.u32 %v8281_v37, %v6208_v38 }
  0x4d   :  { %v8189_v51 = vld [vmem:[#allocation6 + $0x2dc] sm:$0xf0]  ;;  %v8273_v50 = vld [vmem:[#allocation6 + $0x584] sm:$0xf] }
  0x4e   :  { %v6078_v52 = vld [vmem:[#allocation6 + $0x4c0] sm:$0xf]  ;;  %v5823_v57 = vor.u32 %v8189_v51, %v5822_v49  ;;  %2169 = vmatpush.bf16.msra.mxu0 %v5567_v56  ;;  %v5920_v49 = vld [vmem:[#allocation6 + $0x3a0] sm:$0xf0] }
  0x4f   :  { %v8253_v53 = vld [vmem:[#allocation6 + $0x4dc] sm:$0xf0]  ;;  %v6176_v51 = vld [vmem:[#allocation6 + $0x5a0] sm:$0xf0] }
  0x50   :  { %v6334_v54 = vld [vmem:[#allocation6 + $0x6c0] sm:$0xf]  ;;  %v6079_v58 = vor.u32 %v8253_v53, %v6078_v52  ;;  %2183 = vmatpush.bf16.msra.mxu1 %v5823_v57  ;;  %v172_v53 = vld [vmem:[#allocation3] sm:$0xff]  ;;  %v6080_v38 = vld [vmem:[#allocation6 + $0x4e0] sm:$0xf0] }
  0x51   :  { %v8317_v55 = vld [vmem:[#allocation6 + $0x6dc] sm:$0xf0] }
  0x52   :  { %v5534_v59 = vld [vmem:[#allocation6 + $0x80] sm:$0xf]  ;;  %v6335_v62 = vor.u32 %v8317_v55, %v6334_v54  ;;  %2197 = vmatpush.bf16.msra.mxu2 %v6079_v58  ;;  %v173_v54 = vld [vmem:[#allocation3 + $0x8] sm:$0xff] }
  0x53   :  { %v8117_v60 = vld [vmem:[#allocation6 + $0x9c] sm:$0xf0]  ;;  %v177_v55 = vld [vmem:[#allocation3 + $0x28] sm:$0xff] }
  0x54   :  { %v5790_v61 = vld [vmem:[#allocation6 + $0x280] sm:$0xf]  ;;  %v5535_v4 = vor.u32 %v8117_v60, %v5534_v59  ;;  %2211 = vmatpush.bf16.msra.mxu3 %v6335_v62  ;;  %v182_v59 = vpack.c.bf16 %v173_v54, %v172_v53  ;;  %v9048_v60 = vmov 0   ;;  %v5667_v62 = vor.u32 %v8145_v45, %v5664_v46  ;;  %v5792_v53 = vld [vmem:[#allocation6 + $0x2a0] sm:$0xf0] }
  0x55   :  { %v8181_v63 = vld [vmem:[#allocation6 + $0x29c] sm:$0xf0]  ;;  %168 = vst [vmem:[#allocation2 + $0x10] sm:$0xf] %v9048_v60  ;;  %v8241_v54 = vld [vmem:[#allocation6 + $0x484] sm:$0xf] }
  0x56   :  { %v6046_v0 = vld [vmem:[#allocation6 + $0x480] sm:$0xf]  ;;  %v5791_v5 = vor.u32 %v8181_v63, %v5790_v61  ;;  %2170 = vmatpush.bf16.msra.mxu0 %v5535_v4  ;;  %v5923_v63 = vor.u32 %v8209_v47, %v5920_v49  ;;  %171 = vst [vmem:[#allocation2 + $0x24] sm:$0xf] %v9048_v60  ;;  %v8201_v4 = vld [vmem:[#allocation6 + $0x344] sm:$0xf] }
  0x57   :  { %v8245_v1 = vld [vmem:[#allocation6 + $0x49c] sm:$0xf0]  ;;  %188 = vst [vmem:[#allocation2] sm:$0xff] %v182_v59  ;;  %v8113_v49 = vld [vmem:[#allocation6 + $0x84] sm:$0xf] }
  0x58   :  { %v6302_v2 = vld [vmem:[#allocation6 + $0x680] sm:$0xf]  ;;  %v6047_v6 = vor.u32 %v8245_v1, %v6046_v0  ;;  %2184 = vmatpush.bf16.msra.mxu1 %v5791_v5  ;;  %v8137_v0 = vld [vmem:[#allocation6 + $0x144] sm:$0xf] }
  0x59   :  { %v8309_v3 = vld [vmem:[#allocation6 + $0x69c] sm:$0xf0]  ;;  %v5632_v1 = vld [vmem:[#allocation6 + $0x160] sm:$0xf0] }
  0x5a   :  { %v5502_v7 = vld [vmem:[#allocation6 + $0x40] sm:$0xf]  ;;  %v6303_v10 = vor.u32 %v8309_v3, %v6302_v2  ;;  %2198 = vmatpush.bf16.msra.mxu2 %v6047_v6  ;;  %v6179_v3 = vor.u32 %v8273_v50, %v6176_v51  ;;  %v5888_v5 = vld [vmem:[#allocation6 + $0x360] sm:$0xf0]  ;;  %v175_v6 = vld [vmem:[#allocation3 + $0x18] sm:$0xff] }
  0x5b   :  { %v8109_v8 = vld [vmem:[#allocation6 + $0x5c] sm:$0xf0]  ;;  %v5536_v50 = vld [vmem:[#allocation6 + $0xa0] sm:$0xf0] }
  0x5c   :  { %v5758_v9 = vld [vmem:[#allocation6 + $0x240] sm:$0xf]  ;;  %v5503_v16 = vor.u32 %v8109_v8, %v5502_v7  ;;  %2212 = vmatpush.bf16.msra.mxu3 %v6303_v10  ;;  %v8265_v7 = vld [vmem:[#allocation6 + $0x544] sm:$0xf] }
  0x5d   :  { %v8173_v11 = vld [vmem:[#allocation6 + $0x25c] sm:$0xf0]  ;;  %v6144_v8 = vld [vmem:[#allocation6 + $0x560] sm:$0xf0] }
  0x5e   :  { %v6014_v12 = vld [vmem:[#allocation6 + $0x440] sm:$0xf]  ;;  %v5759_v19 = vor.u32 %v8173_v11, %v5758_v9  ;;  %2171 = vmatpush.bf16.msra.mxu0 %v5503_v16  ;;  %v5600_v16 = vld [vmem:[#allocation6 + $0x120] sm:$0xf0]  ;;  %v5450_v33 = vld [vmem:[#allocation2] sm:$0xf] }
  0x5f   :  { %v8237_v13 = vld [vmem:[#allocation6 + $0x45c] sm:$0xf0]  ;;  %v8177_v51 = vld [vmem:[#allocation6 + $0x284] sm:$0xf] }
  0x60   :  { %v6270_v14 = vld [vmem:[#allocation6 + $0x640] sm:$0xf]  ;;  %v6015_v20 = vor.u32 %v8237_v13, %v6014_v12  ;;  %2185 = vmatpush.bf16.msra.mxu1 %v5759_v19  ;;  %v8129_v13 = vld [vmem:[#allocation6 + $0x104] sm:$0xf]  ;;  %v6147_v19 = vor.u32 %v8265_v7, %v6144_v8  ;;  %v181_v8 = vld [vmem:[#allocation3 + $0x48] sm:$0xff] }
  0x61   :  { %v8301_v15 = vld [vmem:[#allocation6 + $0x65c] sm:$0xf0]  ;;  %v5760_v7 = vld [vmem:[#allocation6 + $0x260] sm:$0xf0] }
  0x62   :  { %v5470_v17 = vld [vmem:[#allocation6] sm:$0xf]  ;;  %v6271_v24 = vor.u32 %v8301_v15, %v6270_v14  ;;  %2199 = vmatpush.bf16.msra.mxu2 %v6015_v20  ;;  %v5635_v14 = vor.u32 %v8137_v0, %v5632_v1  ;;  %v5891_v15 = vor.u32 %v8201_v4, %v5888_v5  ;;  %v5856_v20 = vld [vmem:[#allocation6 + $0x320] sm:$0xf0]  ;;  %v5539_v0 = vor.u32 %v8113_v49, %v5536_v50  ;;  %v5670_v49 = vld [vmem:[#allocation6 + $0x188] sm:$0xf] }
  0x63   :  { %v8101_v18 = vld [vmem:[#allocation6 + $0x1c] sm:$0xf0]  ;;  %v5795_v1 = vor.u32 %v8177_v51, %v5792_v53  ;;  %v8169_v4 = vld [vmem:[#allocation6 + $0x244] sm:$0xf]  ;;  %v8150_v50 = vld [vmem:[#allocation6 + $0x1a4] sm:$0xf0] }
  0x64   :  { %v5726_v21 = vld [vmem:[#allocation6 + $0x200] sm:$0xf]  ;;  %v5471_v31 = vor.u32 %v8101_v18, %v5470_v17  ;;  %2213 = vmatpush.bf16.msra.mxu3 %v6271_v24  ;;  %v8193_v17 = vld [vmem:[#allocation6 + $0x304] sm:$0xf]  ;;  %v179_v18 = vld [vmem:[#allocation3 + $0x38] sm:$0xff] }
  0x65   :  { %v8165_v22 = vld [vmem:[#allocation6 + $0x21c] sm:$0xf0]  ;;  %v5859_v32 = vor.u32 %v8193_v17, %v5856_v20  ;;  %v8161_v20 = vld [vmem:[#allocation6 + $0x204] sm:$0xf]  ;;  %v8214_v53 = vld [vmem:[#allocation6 + $0x3a4] sm:$0xf0] }
  0x66   :  { %v5982_v23 = vld [vmem:[#allocation6 + $0x400] sm:$0xf]  ;;  %v5727_v35 = vor.u32 %v8165_v22, %v5726_v21  ;;  %2172 = vmatpush.bf16.msra.mxu0 %v5471_v31  ;;  %v8257_v21 = vld [vmem:[#allocation6 + $0x504] sm:$0xf]  ;;  %v5603_v31 = vor.u32 %v8129_v13, %v5600_v16 }
  0x67   :  { %v8229_v25 = vld [vmem:[#allocation6 + $0x41c] sm:$0xf0]  ;;  %v6112_v22 = vld [vmem:[#allocation6 + $0x520] sm:$0xf0] }
  0x68   :  { %v6238_v26 = vld [vmem:[#allocation6 + $0x600] sm:$0xf]  ;;  %v5983_v36 = vor.u32 %v8229_v25, %v5982_v23  ;;  %2186 = vmatpush.bf16.msra.mxu1 %v5727_v35  ;;  %v180_v25 = vld [vmem:[#allocation3 + $0x40] sm:$0xff]  ;;  %v8249_v35 = vld [vmem:[#allocation6 + $0x4c4] sm:$0xf] }
  0x69   :  { %v8293_v27 = vld [vmem:[#allocation6 + $0x61c] sm:$0xf0]  ;;  %v186_v30 = vpack.c.bf16 %v180_v25, %v179_v18  ;;  %v8097_v16 = vld [vmem:[#allocation6 + $0x4] sm:$0xf]  ;;  %v5763_v18 = vor.u32 %v8169_v4, %v5760_v7 }
  0x6a   :  { %v6718_v28 = vld [vmem:[#allocation6 + $0x9c0] sm:$0xf]  ;;  %v6239_v39 = vor.u32 %v8293_v27, %v6238_v26  ;;  %2200 = vmatpush.bf16.msra.mxu2 %v5983_v36  ;;  %v8121_v27 = vld [vmem:[#allocation6 + $0xc4] sm:$0xf]  ;;  %v6115_v36 = vor.u32 %v8257_v21, %v6112_v22 }
  0x6b   :  { %v8413_v29 = vld [vmem:[#allocation6 + $0x9dc] sm:$0xf0]  ;;  %193 = vst [vmem:[#allocation2 + $0x1c] sm:$0xff] %v186_v30  ;;  %v5728_v22 = vld [vmem:[#allocation6 + $0x220] sm:$0xf0] }
  0x6c   :  { %v6719_v40 = vor.u32 %v8413_v29, %v6718_v28  ;;  %v6686_v41 = vld [vmem:[#allocation6 + $0x980] sm:$0xf]  ;;  %2214 = vmatpush.bf16.msra.mxu3 %v6239_v39  ;;  %2235 = vmatpush.bf16.msrb.mxu1 %v5699_v43  ;;  %v5568_v28 = vld [vmem:[#allocation6 + $0xe0] sm:$0xf0]  ;;  %v5702_v30 = vld [vmem:[#allocation6 + $0x1c8] sm:$0xf] }
  0x6d   :  { %v8405_v42 = vld [vmem:[#allocation6 + $0x99c] sm:$0xf0]  ;;  %v8185_v29 = vld [vmem:[#allocation6 + $0x2c4] sm:$0xf]  ;;  %v5571_v47 = vor.u32 %v8121_v27, %v5568_v28 }
  0x6e   :  { %v6654_v52 = vld [vmem:[#allocation6 + $0x940] sm:$0xf]  ;;  %2221 = vmatpush.bf16.msrb.mxu0 %v6719_v40  ;;  %v6687_v56 = vor.u32 %v8405_v42, %v6686_v41  ;;  %2249 = vmatpush.bf16.msrb.mxu2 %v5955_v44  ;;  %v8092_v40 = vld [vmem:[#allocation2 + $0x4] sm:$0xf]  ;;  %v176_v42 = vld [vmem:[#allocation3 + $0x20] sm:$0xff] }
  0x6f   :  { %v8397_v57 = vld [vmem:[#allocation6 + $0x95c] sm:$0xf0]  ;;  %v8345_v25 = vld [vmem:[#allocation6 + $0x7c4] sm:$0xf] }
  0x70   :  { %v178_v58 = vld [vmem:[#allocation3 + $0x30] sm:$0xff]  ;;  %2263 = vmatpush.bf16.msrb.mxu3 %v6211_v48  ;;  %v6655_v10 = vor.u32 %v8397_v57, %v6654_v52  ;;  %2236 = vmatpush.bf16.msrb.mxu1 %v5667_v62  ;;  %v5827_v48 = vor.u32 %v8185_v29, %v5824_v34  ;;  %v6083_v52 = vor.u32 %v8249_v35, %v6080_v38  ;;  %v5958_v34 = vld [vmem:[#allocation6 + $0x3c8] sm:$0xf] }
  0x71   :  { %v174_v61 = vld [vmem:[#allocation3 + $0x10] sm:$0xff]  ;;  %v185_v2 = vpack.c.bf16 %v178_v58, %v177_v55  ;;  %v8222_v35 = vld [vmem:[#allocation6 + $0x3e4] sm:$0xf0] }
  0x72   :  { %v183_v9 = vpack.c.bf16 %v175_v6, %v174_v61  ;;  %2222 = vmatpush.bf16.msrb.mxu0 %v6687_v56  ;;  %v6622_v11 = vld [vmem:[#allocation6 + $0x900] sm:$0xf]  ;;  %2250 = vmatpush.bf16.msrb.mxu2 %v5923_v63  ;;  %v6048_v55 = vld [vmem:[#allocation6 + $0x4a0] sm:$0xf0]  ;;  %v184_v56 = vpack.c.bf16 %v176_v42, %v176_v42 }
  0x73   :  { %192 = vst [vmem:[#allocation2 + $0x14] sm:$0xff] %v185_v2  ;;  %v8389_v12 = vld [vmem:[#allocation6 + $0x91c] sm:$0xf0]  ;;  %v8105_v62 = vld [vmem:[#allocation6 + $0x44] sm:$0xf]  ;;  %v6051_v5 = vor.u32 %v8241_v54, %v6048_v55 }
  0x74   :  { %2264 = vmatpush.bf16.msrb.mxu3 %v6179_v3  ;;  %v6590_v23 = vld [vmem:[#allocation6 + $0x8c0] sm:$0xf]  ;;  %189 = vst [vmem:[#allocation2 + $0x8] sm:$0xff] %v183_v9  ;;  %v6623_v26 = vor.u32 %v8389_v12, %v6622_v11  ;;  %2237 = vmatpush.bf16.msrb.mxu1 %v5635_v14  ;;  %v5504_v63 = vld [vmem:[#allocation6 + $0x60] sm:$0xf0]  ;;  %v187_v12 = vpack.c.bf16 %v181_v8, %v181_v8 }
  0x75   :  { %v8381_v24 = vld [vmem:[#allocation6 + $0x8dc] sm:$0xf0]  ;;  %v8095_v2 = vld [vmem:[#allocation2 + $0x18] sm:$0xf0]  ;;  %v5460_v3 = vld [vmem:[#allocation2 + $0x1c] sm:$0xf0]  ;;  %v5507_v17 = vor.u32 %v8105_v62, %v5504_v63 }
  0x76   :  { %2223 = vmatpush.bf16.msrb.mxu0 %v6655_v10  ;;  %2251 = vmatpush.bf16.msrb.mxu2 %v5891_v15  ;;  %v6591_v43 = vor.u32 %v8381_v24, %v6590_v23  ;;  %v6558_v44 = vld [vmem:[#allocation6 + $0x880] sm:$0xf]  ;;  %191 = vst.msk [vmem:[#allocation2 + $0x10] sm:$0xf] %vm190_vm0, %v184_v56  ;;  %v8233_v10 = vld [vmem:[#allocation6 + $0x444] sm:$0xf]  ;;  %v5671_v56 = vor.u32 %v8150_v50, %v5670_v49 }
  0x77   :  { %v8373_v45 = vld [vmem:[#allocation6 + $0x89c] sm:$0xf0]  ;;  %v6016_v11 = vld [vmem:[#allocation6 + $0x460] sm:$0xf0]  ;;  %194 = vst.msk [vmem:[#allocation2 + $0x24] sm:$0xf] %vm190_vm0, %v187_v12 }
  0x78   :  { %2265 = vmatpush.bf16.msrb.mxu3 %v6147_v19  ;;  %2238 = vmatpush.bf16.msrb.mxu1 %v5603_v31  ;;  %v6526_v58 = vld [vmem:[#allocation6 + $0x840] sm:$0xf]  ;;  %v6559_v60 = vor.u32 %v8373_v45, %v6558_v44  ;;  %v5472_v19 = vld [vmem:[#allocation6 + $0x20] sm:$0xf0]  ;;  %v6019_v21 = vor.u32 %v8233_v10, %v6016_v11  ;;  %v8158_v31 = vld [vmem:[#allocation6 + $0x1e4] sm:$0xf0] }
  0x79   :  { %v8365_v59 = vld [vmem:[#allocation6 + $0x85c] sm:$0xf0]  ;;  %v8225_v23 = vld [vmem:[#allocation6 + $0x404] sm:$0xf]  ;;  %v5703_v42 = vor.u32 %v8158_v31, %v5702_v30  ;;  %v5638_v62 = vld [vmem:[#allocation6 + $0x148] sm:$0xf] }
  0x7a   :  { %v8094_v37 = vld [vmem:[#allocation2 + $0x10] sm:$0xf0]  ;;  %v5452_v41 = vld [vmem:[#allocation2 + $0x14] sm:$0xf0]  ;;  %2224 = vmatpush.bf16.msrb.mxu0 %v6623_v26  ;;  %2252 = vmatpush.bf16.msrb.mxu2 %v5859_v32  ;;  %v6527_v13 = vor.u32 %v8365_v59, %v6526_v58  ;;  %v5984_v24 = vld [vmem:[#allocation6 + $0x420] sm:$0xf0]  ;;  %v5475_v32 = vor.u32 %v8097_v16, %v5472_v19 }
  0x7b   :  { %v9130_v39 = vor.u32 %v8094_v37, %v5450_v33  ;;  %v9132_v46 = vor.u32 %v8092_v40, %v5452_v41  ;;  %v5458_v57 = vld [vmem:[#allocation2 + $0x8] sm:$0xf]  ;;  %v8093_v61 = vld [vmem:[#allocation2 + $0xc] sm:$0xf]  ;;  %v6494_v14 = vld [vmem:[#allocation6 + $0x800] sm:$0xf]  ;;  %v5731_v33 = vor.u32 %v8161_v20, %v5728_v22 }
  0x7c   :  { %2266 = vmatpush.bf16.msrb.mxu3 %v6115_v36  ;;  %2239 = vmatpush.bf16.msrb.mxu1 %v5571_v47  ;;  %v9136_v6 = vor.u32 %v8095_v2, %v5458_v57  ;;  %v9139_v9 = vor.u32 %v8093_v61, %v5460_v3  ;;  %v8357_v15 = vld [vmem:[#allocation6 + $0x81c] sm:$0xf0]  ;;  %v6464_v26 = vld [vmem:[#allocation6 + $0x7e0] sm:$0xf0]  ;;  %v5987_v36 = vor.u32 %v8225_v23, %v5984_v24  ;;  %v8142_v63 = vld [vmem:[#allocation6 + $0x164] sm:$0xf0] }
  0x7d   :  { %2173 = vmatmul.bf16.vlgmr.msra.gmra.mxu0 %v9130_v39  ;;  %2187 = vmatmul.bf16.vlgmr.msra.gmra.mxu1 %v9132_v46  ;;  %v8409_v27 = vld [vmem:[#allocation6 + $0x9c4] sm:$0xf]  ;;  %v6495_v28 = vor.u32 %v8357_v15, %v6494_v14  ;;  %v6467_v37 = vor.u32 %v8345_v25, %v6464_v26  ;;  %v5466_v38 = vld [vmem:[#allocation2 + $0x10] sm:$0xf]  ;;  %v5959_v47 = vor.u32 %v8222_v35, %v5958_v34  ;;  %v5606_v12 = vld [vmem:[#allocation6 + $0x108] sm:$0xf] }
  0x7e   :  { %2225 = vmatpush.bf16.msrb.mxu0 %v6591_v43  ;;  %2253 = vmatpush.bf16.msrb.mxu2 %v5827_v48  ;;  %v6720_v29 = vld [vmem:[#allocation6 + $0x9e0] sm:$0xf0]  ;;  %v8096_v48 = vld [vmem:[#allocation2 + $0x20] sm:$0xf0]  ;;  %v5639_v4 = vor.u32 %v8142_v63, %v5638_v62  ;;  %v5862_v14 = vld [vmem:[#allocation6 + $0x308] sm:$0xf] }
  0x7f   :  { %2201 = vmatmul.bf16.vlgmr.msra.gmra.mxu2 %v9136_v6  ;;  %2215 = vmatmul.bf16.vlgmr.msra.gmra.mxu3 %v9139_v9  ;;  %v8337_v40 = vld [vmem:[#allocation6 + $0x784] sm:$0xf]  ;;  %v6723_v41 = vor.u32 %v8409_v27, %v6720_v29  ;;  %v9144_v51 = vor.u32 %v8096_v48, %v5466_v38  ;;  %v8198_v15 = vld [vmem:[#allocation6 + $0x324] sm:$0xf0] }
  0x80   :  { %2267 = vmatpush.bf16.msrb.mxu3 %v6083_v52  ;;  %2240 = vmatpush.bf16.msrb.mxu1 %v5539_v0  ;;  %v6432_v43 = vld [vmem:[#allocation6 + $0x7a0] sm:$0xf0]  ;;  %v5926_v52 = vld [vmem:[#allocation6 + $0x388] sm:$0xf]  ;;  %v5863_v22 = vor.u32 %v8198_v15, %v5862_v14  ;;  %v8154_v14 = vld [vmem:[#allocation6 + $0x1cc] sm:$0xf] }
  0x81   :  { %v8401_v44 = vld [vmem:[#allocation6 + $0x984] sm:$0xf]  ;;  %v6435_v54 = vor.u32 %v8337_v40, %v6432_v43  ;;  %v5894_v0 = vld [vmem:[#allocation6 + $0x348] sm:$0xf]  ;;  %v5704_v15 = vld [vmem:[#allocation6 + $0x1e8] sm:$0xf0] }
  0x82   :  { %2226 = vmatpush.bf16.msrb.mxu0 %v6559_v60  ;;  %2254 = vmatpush.bf16.msrb.mxu2 %v5795_v1  ;;  %v6688_v45 = vld [vmem:[#allocation6 + $0x9a0] sm:$0xf0]  ;;  %v5927_v60 = vor.u32 %v8214_v53, %v5926_v52  ;;  %v8206_v1 = vld [vmem:[#allocation6 + $0x364] sm:$0xf0] }
  0x83   :  { %v6691_v55 = vor.u32 %v8401_v44, %v6688_v45  ;;  %v8329_v57 = vld [vmem:[#allocation6 + $0x744] sm:$0xf]  ;;  %v5895_v10 = vor.u32 %v8206_v1, %v5894_v0  ;;  %v5574_v24 = vld [vmem:[#allocation6 + $0xc8] sm:$0xf] }
  0x84   :  { %2268 = vmatpush.bf16.msrb.mxu3 %v6051_v5  ;;  %2241 = vmatpush.bf16.msrb.mxu1 %v5507_v17  ;;  %v6400_v58 = vld [vmem:[#allocation6 + $0x760] sm:$0xf0]  ;;  %v8126_v25 = vld [vmem:[#allocation6 + $0xe4] sm:$0xf0] }
  0x85   :  { %v8393_v59 = vld [vmem:[#allocation6 + $0x944] sm:$0xf]  ;;  %v6403_v2 = vor.u32 %v8329_v57, %v6400_v58  ;;  %v5830_v26 = vld [vmem:[#allocation6 + $0x2c8] sm:$0xf]  ;;  %v5575_v30 = vor.u32 %v8126_v25, %v5574_v24 }
  0x86   :  { %2227 = vmatpush.bf16.msrb.mxu0 %v6527_v13  ;;  %2255 = vmatpush.bf16.msrb.mxu2 %v5763_v18  ;;  %v6656_v61 = vld [vmem:[#allocation6 + $0x960] sm:$0xf0]  ;;  %v8134_v13 = vld [vmem:[#allocation6 + $0x124] sm:$0xf0] }
  0x87   :  { %v6659_v3 = vor.u32 %v8393_v59, %v6656_v61  ;;  %v8321_v5 = vld [vmem:[#allocation6 + $0x704] sm:$0xf]  ;;  %v5607_v18 = vor.u32 %v8134_v13, %v5606_v12  ;;  %v8190_v27 = vld [vmem:[#allocation6 + $0x2e4] sm:$0xf0] }
  0x88   :  { %2269 = vmatpush.bf16.msrb.mxu3 %v6019_v21  ;;  %2242 = vmatpush.bf16.msrb.mxu1 %v5475_v32  ;;  %v6368_v7 = vld [vmem:[#allocation6 + $0x720] sm:$0xf0]  ;;  %v5831_v34 = vor.u32 %v8190_v27, %v5830_v26  ;;  %v5798_v38 = vld [vmem:[#allocation6 + $0x288] sm:$0xf]  ;;  %v8146_v27 = vld [vmem:[#allocation6 + $0x18c] sm:$0xf] }
  0x89   :  { %v8385_v8 = vld [vmem:[#allocation6 + $0x904] sm:$0xf]  ;;  %v6371_v16 = vor.u32 %v8321_v5, %v6368_v7  ;;  %v8182_v40 = vld [vmem:[#allocation6 + $0x2a4] sm:$0xf0] }
  0x8a   :  { %2228 = vmatpush.bf16.msrb.mxu0 %v6495_v28  ;;  %2256 = vmatpush.bf16.msrb.mxu2 %v5731_v33  ;;  %v6624_v11 = vld [vmem:[#allocation6 + $0x920] sm:$0xf0]  ;;  %v5799_v48 = vor.u32 %v8182_v40, %v5798_v38  ;;  %v5510_v50 = vld [vmem:[#allocation6 + $0x48] sm:$0xf]  ;;  %v8138_v40 = vld [vmem:[#allocation6 + $0x14c] sm:$0xf] }
  0x8b   :  { %v6627_v17 = vor.u32 %v8385_v8, %v6624_v11  ;;  %v8313_v19 = vld [vmem:[#allocation6 + $0x6c4] sm:$0xf]  ;;  %v8110_v52 = vld [vmem:[#allocation6 + $0x64] sm:$0xf0] }
  0x8c   :  { %2270 = vmatpush.bf16.msrb.mxu3 %v5987_v36  ;;  %2291 = vmatpush.bf16.msra.mxu1 %v6723_v41  ;;  %v6336_v20 = vld [vmem:[#allocation6 + $0x6e0] sm:$0xf0]  ;;  %v5542_v36 = vld [vmem:[#allocation6 + $0x88] sm:$0xf]  ;;  %v5511_v59 = vor.u32 %v8110_v52, %v5510_v50 }
  0x8d   :  { %2229 = vmatmul.bf16.vlgmr.msrb.gmra.mxu0 %v9144_v51  ;;  %2243 = vmatmul.bf16.vlgmr.msrb.gmra.mxu1 %v9130_v39  ;;  %v8377_v21 = vld [vmem:[#allocation6 + $0x8c4] sm:$0xf]  ;;  %v6339_v28 = vor.u32 %v8313_v19, %v6336_v20  ;;  %v5766_v53 = vld [vmem:[#allocation6 + $0x248] sm:$0xf] }
  0x8e   :  { %2277 = vmatpush.bf16.msra.mxu0 %v6467_v37  ;;  %2305 = vmatpush.bf16.msra.mxu2 %v5703_v42  ;;  %v6592_v23 = vld [vmem:[#allocation6 + $0x8e0] sm:$0xf0]  ;;  %v8118_v37 = vld [vmem:[#allocation6 + $0xa4] sm:$0xf0] }
  0x8f   :  { %2257 = vmatmul.bf16.vlgmr.msrb.gmra.mxu2 %v9132_v46  ;;  %2271 = vmatmul.bf16.vlgmr.msrb.gmra.mxu3 %v9136_v6  ;;  %v6595_v29 = vor.u32 %v8377_v21, %v6592_v23  ;;  %v8305_v31 = vld [vmem:[#allocation6 + $0x684] sm:$0xf]  ;;  %v5543_v43 = vor.u32 %v8118_v37, %v5542_v36  ;;  %v5478_v62 = vld [vmem:[#allocation6 + $0x8] sm:$0xf]  ;;  %v5707_v23 = vor.u32 %v8154_v14, %v5704_v15 }
  0x90   :  { %2319 = vmatpush.bf16.msra.mxu3 %v5959_v47  ;;  %2292 = vmatpush.bf16.msra.mxu1 %v6691_v55  ;;  %v6304_v32 = vld [vmem:[#allocation6 + $0x6a0] sm:$0xf0]  ;;  %v8102_v0 = vld [vmem:[#allocation6 + $0x24] sm:$0xf0] }
  0x91   :  { %v8369_v33 = vld [vmem:[#allocation6 + $0x884] sm:$0xf]  ;;  %v6307_v41 = vor.u32 %v8305_v31, %v6304_v32  ;;  %v5734_v1 = vld [vmem:[#allocation6 + $0x208] sm:$0xf]  ;;  %v5479_v13 = vor.u32 %v8102_v0, %v5478_v62 }
  0x92   :  { %2278 = vmatpush.bf16.msra.mxu0 %v6435_v54  ;;  %2306 = vmatpush.bf16.msra.mxu2 %v5671_v56  ;;  %v6560_v35 = vld [vmem:[#allocation6 + $0x8a0] sm:$0xf0]  ;;  %v8174_v54 = vld [vmem:[#allocation6 + $0x264] sm:$0xf0] }
  0x93   :  { %v6563_v42 = vor.u32 %v8369_v33, %v6560_v35  ;;  %v8297_v44 = vld [vmem:[#allocation6 + $0x644] sm:$0xf]  ;;  %v5767_v63 = vor.u32 %v8174_v54, %v5766_v53  ;;  %v6470_v5 = vld [vmem:[#allocation6 + $0x7c8] sm:$0xf]  ;;  %v8130_v54 = vld [vmem:[#allocation6 + $0x10c] sm:$0xf] }
  0x94   :  { %2320 = vmatpush.bf16.msra.mxu3 %v5927_v60  ;;  %2293 = vmatpush.bf16.msra.mxu1 %v6659_v3  ;;  %v6272_v45 = vld [vmem:[#allocation6 + $0x660] sm:$0xf0]  ;;  %v6214_v3 = vld [vmem:[#allocation6 + $0x5c8] sm:$0xf] }
  0x95   :  { %v8361_v47 = vld [vmem:[#allocation6 + $0x844] sm:$0xf]  ;;  %v6275_v55 = vor.u32 %v8297_v44, %v6272_v45  ;;  %v8350_v8 = vld [vmem:[#allocation6 + $0x7e4] sm:$0xf0] }
  0x96   :  { %2279 = vmatpush.bf16.msra.mxu0 %v6403_v2  ;;  %2307 = vmatpush.bf16.msra.mxu2 %v5639_v4  ;;  %v6528_v49 = vld [vmem:[#allocation6 + $0x860] sm:$0xf0]  ;;  %v8166_v2 = vld [vmem:[#allocation6 + $0x224] sm:$0xf0] }
  0x97   :  { %v8289_v56 = vld [vmem:[#allocation6 + $0x604] sm:$0xf]  ;;  %v6531_v58 = vor.u32 %v8361_v47, %v6528_v49  ;;  %v8286_v4 = vld [vmem:[#allocation6 + $0x5e4] sm:$0xf0] }
  0x98   :  { %2321 = vmatpush.bf16.msra.mxu3 %v5895_v10  ;;  %2294 = vmatpush.bf16.msra.mxu1 %v6627_v17  ;;  %v6240_v57 = vld [vmem:[#allocation6 + $0x620] sm:$0xf0]  ;;  %v6726_v10 = vld [vmem:[#allocation6 + $0x9c8] sm:$0xf]  ;;  %v6215_v17 = vor.u32 %v8286_v4, %v6214_v3  ;;  %v5576_v3 = vld [vmem:[#allocation6 + $0xe8] sm:$0xf0] }
  0x99   :  { %v8353_v60 = vld [vmem:[#allocation6 + $0x804] sm:$0xf]  ;;  %v6243_v7 = vor.u32 %v8289_v56, %v6240_v57  ;;  %v8414_v11 = vld [vmem:[#allocation6 + $0x9e4] sm:$0xf0] }
  0x9a   :  { %2280 = vmatpush.bf16.msra.mxu0 %v6371_v16  ;;  %2308 = vmatpush.bf16.msra.mxu2 %v5607_v18  ;;  %v6496_v61 = vld [vmem:[#allocation6 + $0x820] sm:$0xf0]  ;;  %v5735_v16 = vor.u32 %v8166_v2, %v5734_v1  ;;  %v6471_v18 = vor.u32 %v8350_v8, %v6470_v5  ;;  %v6727_v19 = vor.u32 %v8414_v11, %v6726_v10  ;;  %v6182_v20 = vld [vmem:[#allocation6 + $0x588] sm:$0xf]  ;;  %v8122_v2 = vld [vmem:[#allocation6 + $0xcc] sm:$0xf] }
  0x9b   :  { %v6499_v12 = vor.u32 %v8353_v60, %v6496_v61  ;;  %v8278_v21 = vld [vmem:[#allocation6 + $0x5a4] sm:$0xf0] }
  0x9c   :  { %2322 = vmatpush.bf16.msra.mxu3 %v5863_v22  ;;  %2295 = vmatpush.bf16.msra.mxu1 %v6595_v29  ;;  %v6438_v22 = vld [vmem:[#allocation6 + $0x788] sm:$0xf]  ;;  %v6183_v29 = vor.u32 %v8278_v21, %v6182_v20 }
  0x9d   :  { %v8342_v24 = vld [vmem:[#allocation6 + $0x7a4] sm:$0xf0] }
  0x9e   :  { %2281 = vmatpush.bf16.msra.mxu0 %v6339_v28  ;;  %2309 = vmatpush.bf16.msra.mxu2 %v5575_v30  ;;  %v6694_v25 = vld [vmem:[#allocation6 + $0x988] sm:$0xf]  ;;  %v5672_v28 = vld [vmem:[#allocation6 + $0x1a8] sm:$0xf0]  ;;  %v6439_v30 = vor.u32 %v8342_v24, %v6438_v22 }
  0x9f   :  { %v8406_v26 = vld [vmem:[#allocation6 + $0x9a4] sm:$0xf0]  ;;  %v5675_v35 = vor.u32 %v8146_v27, %v5672_v28  ;;  %v8106_v28 = vld [vmem:[#allocation6 + $0x4c] sm:$0xf] }
  0xa0   :  { %2323 = vmatpush.bf16.msra.mxu3 %v5831_v34  ;;  %2296 = vmatpush.bf16.msra.mxu1 %v6563_v42  ;;  %v6695_v31 = vor.u32 %v8406_v26, %v6694_v25  ;;  %v6150_v32 = vld [vmem:[#allocation6 + $0x548] sm:$0xf] }
  0xa1   :  { %v8270_v33 = vld [vmem:[#allocation6 + $0x564] sm:$0xf0] }
  0xa2   :  { %2282 = vmatpush.bf16.msra.mxu0 %v6307_v41  ;;  %2310 = vmatpush.bf16.msra.mxu2 %v5543_v43  ;;  %v6406_v34 = vld [vmem:[#allocation6 + $0x748] sm:$0xf]  ;;  %v5640_v41 = vld [vmem:[#allocation6 + $0x168] sm:$0xf0]  ;;  %v6151_v42 = vor.u32 %v8270_v33, %v6150_v32 }
  0xa3   :  { %v8334_v36 = vld [vmem:[#allocation6 + $0x764] sm:$0xf0]  ;;  %v5643_v49 = vor.u32 %v8138_v40, %v5640_v41  ;;  %v8098_v41 = vld [vmem:[#allocation6 + $0xc] sm:$0xf] }
  0xa4   :  { %2324 = vmatpush.bf16.msra.mxu3 %v5799_v48  ;;  %2297 = vmatpush.bf16.msra.mxu1 %v6531_v58  ;;  %v6662_v37 = vld [vmem:[#allocation6 + $0x948] sm:$0xf]  ;;  %v6407_v43 = vor.u32 %v8334_v36, %v6406_v34 }
  0xa5   :  { %v8398_v38 = vld [vmem:[#allocation6 + $0x964] sm:$0xf0] }
  0xa6   :  { %2283 = vmatpush.bf16.msra.mxu0 %v6275_v55  ;;  %2311 = vmatpush.bf16.msra.mxu2 %v5511_v59  ;;  %v6663_v44 = vor.u32 %v8398_v38, %v6662_v37  ;;  %v6118_v45 = vld [vmem:[#allocation6 + $0x508] sm:$0xf]  ;;  %v5608_v55 = vld [vmem:[#allocation6 + $0x128] sm:$0xf0] }
  0xa7   :  { %v8262_v47 = vld [vmem:[#allocation6 + $0x524] sm:$0xf0]  ;;  %v5611_v62 = vor.u32 %v8130_v54, %v5608_v55  ;;  %v8410_v54 = vld [vmem:[#allocation6 + $0x9cc] sm:$0xf] }
  0xa8   :  { %2325 = vmatpush.bf16.msra.mxu3 %v5767_v63  ;;  %2298 = vmatpush.bf16.msra.mxu1 %v6499_v12  ;;  %v6374_v48 = vld [vmem:[#allocation6 + $0x708] sm:$0xf]  ;;  %v6119_v56 = vor.u32 %v8262_v47, %v6118_v45  ;;  %v5579_v12 = vor.u32 %v8122_v2, %v5576_v3  ;;  %v8282_v45 = vld [vmem:[#allocation6 + $0x5cc] sm:$0xf] }
  0xa9   :  { %v8326_v50 = vld [vmem:[#allocation6 + $0x724] sm:$0xf0]  ;;  %v6728_v55 = vld [vmem:[#allocation6 + $0x9e8] sm:$0xf0] }
  0xaa   :  { %2284 = vmatpush.bf16.msra.mxu0 %v6243_v7  ;;  %2312 = vmatpush.bf16.msra.mxu2 %v5479_v13  ;;  %v6630_v52 = vld [vmem:[#allocation6 + $0x908] sm:$0xf]  ;;  %v6375_v57 = vor.u32 %v8326_v50, %v6374_v48  ;;  %v6216_v48 = vld [vmem:[#allocation6 + $0x5e8] sm:$0xf0] }
  0xab   :  { %2299 = vmatmul.bf16.vlgmr.msra.gmra.mxu1 %v9144_v51  ;;  %v8390_v53 = vld [vmem:[#allocation6 + $0x924] sm:$0xf0]  ;;  %v6472_v50 = vld [vmem:[#allocation6 + $0x7e8] sm:$0xf0] }
  0xac   :  { %2326 = vmatpush.bf16.msra.mxu3 %v5735_v16  ;;  %2347 = vmatpush.bf16.msrb.mxu1 %v6471_v18  ;;  %v6631_v58 = vor.u32 %v8390_v53, %v6630_v52  ;;  %v6086_v59 = vld [vmem:[#allocation6 + $0x4c8] sm:$0xf]  ;;  %v8114_v16 = vld [vmem:[#allocation6 + $0x8c] sm:$0xf] }
  0xad   :  { %2285 = vmatmul.bf16.vlgmr.msra.gmra.mxu0 %v9139_v9  ;;  %2313 = vmatmul.bf16.vlgmr.msra.gmra.mxu2 %v9130_v39  ;;  %v8254_v60 = vld [vmem:[#allocation6 + $0x4e4] sm:$0xf0]  ;;  %v6440_v2 = vld [vmem:[#allocation6 + $0x7a8] sm:$0xf0] }
  0xae   :  { %2333 = vmatpush.bf16.msrb.mxu0 %v6215_v17  ;;  %2361 = vmatpush.bf16.msrb.mxu2 %v6727_v19  ;;  %v6342_v61 = vld [vmem:[#allocation6 + $0x6c8] sm:$0xf]  ;;  %v6087_v4 = vor.u32 %v8254_v60, %v6086_v59  ;;  %v5544_v17 = vld [vmem:[#allocation6 + $0xa8] sm:$0xf0] }
  0xaf   :  { %2327 = vmatmul.bf16.vlgmr.msra.gmra.mxu3 %v9132_v46  ;;  %v8318_v63 = vld [vmem:[#allocation6 + $0x6e4] sm:$0xf0]  ;;  %v5547_v24 = vor.u32 %v8114_v16, %v5544_v17  ;;  %v8210_v60 = vld [vmem:[#allocation6 + $0x38c] sm:$0xf] }
  0xb0   :  { %2375 = vmatpush.bf16.msrb.mxu3 %v5707_v23  ;;  %2348 = vmatpush.bf16.msrb.mxu1 %v6439_v30  ;;  %v6598_v0 = vld [vmem:[#allocation6 + $0x8c8] sm:$0xf]  ;;  %v6343_v5 = vor.u32 %v8318_v63, %v6342_v61  ;;  %v5928_v61 = vld [vmem:[#allocation6 + $0x3a8] sm:$0xf0]  ;;  %v6731_v63 = vor.u32 %v8410_v54, %v6728_v55 }
  0xb1   :  { %v8382_v1 = vld [vmem:[#allocation6 + $0x8e4] sm:$0xf0]  ;;  %v8402_v3 = vld [vmem:[#allocation6 + $0x98c] sm:$0xf] }
  0xb2   :  { %2334 = vmatpush.bf16.msrb.mxu0 %v6183_v29  ;;  %2362 = vmatpush.bf16.msrb.mxu2 %v6695_v31  ;;  %v6599_v7 = vor.u32 %v8382_v1, %v6598_v0  ;;  %v6054_v8 = vld [vmem:[#allocation6 + $0x488] sm:$0xf]  ;;  %v5512_v29 = vld [vmem:[#allocation6 + $0x68] sm:$0xf0] }
  0xb3   :  { %v8246_v10 = vld [vmem:[#allocation6 + $0x4a4] sm:$0xf0]  ;;  %v5515_v38 = vor.u32 %v8106_v28, %v5512_v29  ;;  %v6184_v0 = vld [vmem:[#allocation6 + $0x5a8] sm:$0xf0] }
  0xb4   :  { %2376 = vmatpush.bf16.msrb.mxu3 %v5675_v35  ;;  %2349 = vmatpush.bf16.msrb.mxu1 %v6407_v43  ;;  %v6310_v11 = vld [vmem:[#allocation6 + $0x688] sm:$0xf]  ;;  %v6055_v18 = vor.u32 %v8246_v10, %v6054_v8  ;;  %v8218_v43 = vld [vmem:[#allocation6 + $0x3cc] sm:$0xf] }
  0xb5   :  { %v8310_v13 = vld [vmem:[#allocation6 + $0x6a4] sm:$0xf0]  ;;  %v8338_v1 = vld [vmem:[#allocation6 + $0x78c] sm:$0xf] }
  0xb6   :  { %2335 = vmatpush.bf16.msrb.mxu0 %v6151_v42  ;;  %2363 = vmatpush.bf16.msrb.mxu2 %v6663_v44  ;;  %v6566_v14 = vld [vmem:[#allocation6 + $0x888] sm:$0xf]  ;;  %v6311_v19 = vor.u32 %v8310_v13, %v6310_v11  ;;  %v5480_v42 = vld [vmem:[#allocation6 + $0x28] sm:$0xf0]  ;;  %v6443_v8 = vor.u32 %v8338_v1, %v6440_v2 }
  0xb7   :  { %v8374_v15 = vld [vmem:[#allocation6 + $0x8a4] sm:$0xf0]  ;;  %v5960_v44 = vld [vmem:[#allocation6 + $0x3e8] sm:$0xf0] }
  0xb8   :  { %2377 = vmatpush.bf16.msrb.mxu3 %v5643_v49  ;;  %2350 = vmatpush.bf16.msrb.mxu1 %v6375_v57  ;;  %v6567_v20 = vor.u32 %v8374_v15, %v6566_v14  ;;  %v6022_v21 = vld [vmem:[#allocation6 + $0x448] sm:$0xf]  ;;  %v8346_v49 = vld [vmem:[#allocation6 + $0x7cc] sm:$0xf]  ;;  %v5963_v57 = vor.u32 %v8218_v43, %v5960_v44 }
  0xb9   :  { %v8238_v22 = vld [vmem:[#allocation6 + $0x464] sm:$0xf0]  ;;  %v6475_v59 = vor.u32 %v8346_v49, %v6472_v50  ;;  %v8202_v10 = vld [vmem:[#allocation6 + $0x34c] sm:$0xf] }
  0xba   :  { %2336 = vmatpush.bf16.msrb.mxu0 %v6119_v56  ;;  %2364 = vmatpush.bf16.msrb.mxu2 %v6631_v58  ;;  %v6278_v23 = vld [vmem:[#allocation6 + $0x648] sm:$0xf]  ;;  %v6023_v30 = vor.u32 %v8238_v22, %v6022_v21  ;;  %v5483_v56 = vor.u32 %v8098_v41, %v5480_v42  ;;  %v6219_v58 = vor.u32 %v8282_v45, %v6216_v48  ;;  %v5896_v11 = vld [vmem:[#allocation6 + $0x368] sm:$0xf0] }
  0xbb   :  { %v8302_v25 = vld [vmem:[#allocation6 + $0x664] sm:$0xf0]  ;;  %v6152_v14 = vld [vmem:[#allocation6 + $0x568] sm:$0xf0] }
  0xbc   :  { %2378 = vmatpush.bf16.msrb.mxu3 %v5611_v62  ;;  %2351 = vmatpush.bf16.msrb.mxu1 %v6343_v5  ;;  %v6534_v26 = vld [vmem:[#allocation6 + $0x848] sm:$0xf]  ;;  %v6279_v33 = vor.u32 %v8302_v25, %v6278_v23  ;;  %v8274_v62 = vld [vmem:[#allocation6 + $0x58c] sm:$0xf]  ;;  %v5931_v5 = vor.u32 %v8210_v60, %v5928_v61 }
  0xbd   :  { %v8366_v27 = vld [vmem:[#allocation6 + $0x864] sm:$0xf0]  ;;  %v8330_v15 = vld [vmem:[#allocation6 + $0x74c] sm:$0xf] }
  0xbe   :  { %2337 = vmatpush.bf16.msrb.mxu0 %v6087_v4  ;;  %2365 = vmatpush.bf16.msrb.mxu2 %v6599_v7  ;;  %v5990_v31 = vld [vmem:[#allocation6 + $0x408] sm:$0xf]  ;;  %v6535_v34 = vor.u32 %v8366_v27, %v6534_v26  ;;  %v6696_v4 = vld [vmem:[#allocation6 + $0x9a8] sm:$0xf0]  ;;  %v6187_v7 = vor.u32 %v8274_v62, %v6184_v0 }
  0xbf   :  { %v8230_v32 = vld [vmem:[#allocation6 + $0x424] sm:$0xf0]  ;;  %v6699_v13 = vor.u32 %v8402_v3, %v6696_v4  ;;  %v6408_v16 = vld [vmem:[#allocation6 + $0x768] sm:$0xf0] }
  0xc0   :  { %2379 = vmatpush.bf16.msrb.mxu3 %v5579_v12  ;;  %2352 = vmatpush.bf16.msrb.mxu1 %v6311_v19  ;;  %v6246_v35 = vld [vmem:[#allocation6 + $0x608] sm:$0xf]  ;;  %v5991_v47 = vor.u32 %v8230_v32, %v5990_v31  ;;  %v8266_v12 = vld [vmem:[#allocation6 + $0x54c] sm:$0xf]  ;;  %v5899_v19 = vor.u32 %v8202_v10, %v5896_v11  ;;  %v6411_v21 = vor.u32 %v8330_v15, %v6408_v16 }
  0xc1   :  { %v8294_v36 = vld [vmem:[#allocation6 + $0x624] sm:$0xf0]  ;;  %v8394_v17 = vld [vmem:[#allocation6 + $0x94c] sm:$0xf] }
  0xc2   :  { %2338 = vmatpush.bf16.msrb.mxu0 %v6055_v18  ;;  %2366 = vmatpush.bf16.msrb.mxu2 %v6567_v20  ;;  %v6502_v37 = vld [vmem:[#allocation6 + $0x808] sm:$0xf]  ;;  %v6247_v52 = vor.u32 %v8294_v36, %v6246_v35  ;;  %v6664_v18 = vld [vmem:[#allocation6 + $0x968] sm:$0xf0]  ;;  %v6155_v20 = vor.u32 %v8266_v12, %v6152_v14 }
  0xc3   :  { %v8358_v40 = vld [vmem:[#allocation6 + $0x824] sm:$0xf0]  ;;  %v8194_v22 = vld [vmem:[#allocation6 + $0x30c] sm:$0xf]  ;;  %v6667_v25 = vor.u32 %v8394_v17, %v6664_v18 }
  0xc4   :  { %2380 = vmatpush.bf16.msrb.mxu3 %v5547_v24  ;;  %2353 = vmatpush.bf16.msrb.mxu1 %v6279_v33  ;;  %v6503_v53 = vor.u32 %v8358_v40, %v6502_v37  ;;  %v5864_v23 = vld [vmem:[#allocation6 + $0x328] sm:$0xf0] }
  0xc5   :  { %v8258_v24 = vld [vmem:[#allocation6 + $0x50c] sm:$0xf]  ;;  %v5867_v31 = vor.u32 %v8194_v22, %v5864_v23  ;;  %v5966_v22 = vld [vmem:[#allocation6 + $0x3d0] sm:$0xf] }
  0xc6   :  { %2339 = vmatpush.bf16.msrb.mxu0 %v6023_v30  ;;  %2367 = vmatpush.bf16.msrb.mxu2 %v6535_v34  ;;  %v6120_v26 = vld [vmem:[#allocation6 + $0x528] sm:$0xf0] }
  0xc7   :  { %v8322_v27 = vld [vmem:[#allocation6 + $0x70c] sm:$0xf]  ;;  %v6123_v32 = vor.u32 %v8258_v24, %v6120_v26  ;;  %v8223_v24 = vld [vmem:[#allocation6 + $0x3ec] sm:$0xf0] }
  0xc8   :  { %2381 = vmatpush.bf16.msrb.mxu3 %v5515_v38  ;;  %2354 = vmatpush.bf16.msrb.mxu1 %v6247_v52  ;;  %v6376_v28 = vld [vmem:[#allocation6 + $0x728] sm:$0xf0]  ;;  %v8287_v26 = vld [vmem:[#allocation6 + $0x5ec] sm:$0xf0] }
  0xc9   :  { %v8386_v29 = vld [vmem:[#allocation6 + $0x90c] sm:$0xf]  ;;  %v6379_v33 = vor.u32 %v8322_v27, %v6376_v28 }
  0xca   :  { %2340 = vmatpush.bf16.msrb.mxu0 %v5991_v47  ;;  %2368 = vmatpush.bf16.msrb.mxu2 %v6503_v53  ;;  %v6632_v30 = vld [vmem:[#allocation6 + $0x928] sm:$0xf0] }
  0xcb   :  { %2355 = vmatmul.bf16.vlgmr.msrb.gmra.mxu1 %v9139_v9  ;;  %v8186_v34 = vld [vmem:[#allocation6 + $0x2cc] sm:$0xf]  ;;  %v6635_v37 = vor.u32 %v8386_v29, %v6632_v30  ;;  %v6478_v29 = vld [vmem:[#allocation6 + $0x7d0] sm:$0xf] }
  0xcc   :  { %2382 = vmatpush.bf16.msrb.mxu3 %v5483_v56  ;;  %2403 = vmatpush.bf16.msra.mxu1 %v6219_v58  ;;  %v5832_v35 = vld [vmem:[#allocation6 + $0x2e8] sm:$0xf0]  ;;  %v8351_v30 = vld [vmem:[#allocation6 + $0x7ec] sm:$0xf0] }
  0xcd   :  { %2341 = vmatmul.bf16.vlgmr.msrb.gmra.mxu0 %v9136_v6  ;;  %2369 = vmatmul.bf16.vlgmr.msrb.gmra.mxu2 %v9144_v51  ;;  %v8250_v36 = vld [vmem:[#allocation6 + $0x4cc] sm:$0xf]  ;;  %v5835_v44 = vor.u32 %v8186_v34, %v5832_v35  ;;  %v5678_v35 = vld [vmem:[#allocation6 + $0x190] sm:$0xf] }
  0xce   :  { %2389 = vmatpush.bf16.msra.mxu0 %v5963_v57  ;;  %2417 = vmatpush.bf16.msra.mxu2 %v6475_v59  ;;  %v6088_v38 = vld [vmem:[#allocation6 + $0x4e8] sm:$0xf0] }
  0xcf   :  { %2383 = vmatmul.bf16.vlgmr.msrb.gmra.mxu3 %v9130_v39  ;;  %v8314_v40 = vld [vmem:[#allocation6 + $0x6cc] sm:$0xf]  ;;  %v6091_v45 = vor.u32 %v8250_v36, %v6088_v38  ;;  %v8151_v36 = vld [vmem:[#allocation6 + $0x1ac] sm:$0xf0]  ;;  %v6479_v38 = vor.u32 %v8351_v30, %v6478_v29 }
  0xd0   :  { %2431 = vmatpush.bf16.msra.mxu3 %v6731_v63  ;;  %2404 = vmatpush.bf16.msra.mxu1 %v6187_v7  ;;  %v6344_v41 = vld [vmem:[#allocation6 + $0x6e8] sm:$0xf0]  ;;  %v8183_v29 = vld [vmem:[#allocation6 + $0x2ac] sm:$0xf0] }
  0xd1   :  { %v8378_v42 = vld [vmem:[#allocation6 + $0x8cc] sm:$0xf]  ;;  %v6347_v47 = vor.u32 %v8314_v40, %v6344_v41  ;;  %v8215_v40 = vld [vmem:[#allocation6 + $0x3ac] sm:$0xf0] }
  0xd2   :  { %2390 = vmatpush.bf16.msra.mxu0 %v5931_v5  ;;  %2418 = vmatpush.bf16.msra.mxu2 %v6443_v8  ;;  %v6600_v43 = vld [vmem:[#allocation6 + $0x8e8] sm:$0xf0]  ;;  %v6190_v41 = vld [vmem:[#allocation6 + $0x590] sm:$0xf] }
  0xd3   :  { %v8178_v48 = vld [vmem:[#allocation6 + $0x28c] sm:$0xf]  ;;  %v6603_v52 = vor.u32 %v8378_v42, %v6600_v43  ;;  %v8279_v42 = vld [vmem:[#allocation6 + $0x5ac] sm:$0xf0] }
  0xd4   :  { %2432 = vmatpush.bf16.msra.mxu3 %v6699_v13  ;;  %2405 = vmatpush.bf16.msra.mxu1 %v6155_v20  ;;  %v5800_v49 = vld [vmem:[#allocation6 + $0x2a8] sm:$0xf0]  ;;  %v5710_v20 = vld [vmem:[#allocation6 + $0x1d0] sm:$0xf] }
  0xd5   :  { %v8242_v50 = vld [vmem:[#allocation6 + $0x48c] sm:$0xf]  ;;  %v5803_v58 = vor.u32 %v8178_v48, %v5800_v49  ;;  %v6446_v43 = vld [vmem:[#allocation6 + $0x790] sm:$0xf]  ;;  %v6191_v48 = vor.u32 %v8279_v42, %v6190_v41 }
  0xd6   :  { %2391 = vmatpush.bf16.msra.mxu0 %v5899_v19  ;;  %2419 = vmatpush.bf16.msra.mxu2 %v6411_v21  ;;  %v6056_v53 = vld [vmem:[#allocation6 + $0x4a8] sm:$0xf0]  ;;  %v8159_v21 = vld [vmem:[#allocation6 + $0x1ec] sm:$0xf0] }
  0xd7   :  { %v8306_v54 = vld [vmem:[#allocation6 + $0x68c] sm:$0xf]  ;;  %v6059_v59 = vor.u32 %v8242_v50, %v6056_v53  ;;  %v5646_v49 = vld [vmem:[#allocation6 + $0x150] sm:$0xf] }
  0xd8   :  { %2433 = vmatpush.bf16.msra.mxu3 %v6667_v25  ;;  %2406 = vmatpush.bf16.msra.mxu1 %v6123_v32  ;;  %v6312_v55 = vld [vmem:[#allocation6 + $0x6a8] sm:$0xf0]  ;;  %v6222_v25 = vld [vmem:[#allocation6 + $0x5d0] sm:$0xf]  ;;  %v5711_v32 = vor.u32 %v8159_v21, %v5710_v20 }
  0xd9   :  { %v8370_v56 = vld [vmem:[#allocation6 + $0x88c] sm:$0xf]  ;;  %v6315_v60 = vor.u32 %v8306_v54, %v6312_v55  ;;  %v6223_v34 = vor.u32 %v8287_v26, %v6222_v25  ;;  %v8143_v50 = vld [vmem:[#allocation6 + $0x16c] sm:$0xf0] }
  0xda   :  { %2392 = vmatpush.bf16.msra.mxu0 %v5867_v31  ;;  %2420 = vmatpush.bf16.msra.mxu2 %v6379_v33  ;;  %v6568_v57 = vld [vmem:[#allocation6 + $0x8a8] sm:$0xf0]  ;;  %v5967_v33 = vor.u32 %v8223_v24, %v5966_v22  ;;  %v8207_v54 = vld [vmem:[#allocation6 + $0x36c] sm:$0xf0] }
  0xdb   :  { %v8170_v61 = vld [vmem:[#allocation6 + $0x24c] sm:$0xf]  ;;  %v6571_v0 = vor.u32 %v8370_v56, %v6568_v57  ;;  %v6158_v55 = vld [vmem:[#allocation6 + $0x550] sm:$0xf] }
  0xdc   :  { %2434 = vmatpush.bf16.msra.mxu3 %v6635_v37  ;;  %2407 = vmatpush.bf16.msra.mxu1 %v6091_v45  ;;  %v5768_v62 = vld [vmem:[#allocation6 + $0x268] sm:$0xf0]  ;;  %v5934_v37 = vld [vmem:[#allocation6 + $0x390] sm:$0xf]  ;;  %v5679_v45 = vor.u32 %v8151_v36, %v5678_v35 }
  0xdd   :  { %v8234_v63 = vld [vmem:[#allocation6 + $0x44c] sm:$0xf]  ;;  %v5771_v7 = vor.u32 %v8170_v61, %v5768_v62  ;;  %v8271_v56 = vld [vmem:[#allocation6 + $0x56c] sm:$0xf0] }
  0xde   :  { %2393 = vmatpush.bf16.msra.mxu0 %v5835_v44  ;;  %2421 = vmatpush.bf16.msra.mxu2 %v6347_v47  ;;  %v6024_v1 = vld [vmem:[#allocation6 + $0x468] sm:$0xf0]  ;;  %v8343_v44 = vld [vmem:[#allocation6 + $0x7ac] sm:$0xf0]  ;;  %v5935_v47 = vor.u32 %v8215_v40, %v5934_v37  ;;  %v6159_v61 = vor.u32 %v8271_v56, %v6158_v55 }
  0xdf   :  { %v8298_v2 = vld [vmem:[#allocation6 + $0x64c] sm:$0xf]  ;;  %v6027_v11 = vor.u32 %v8234_v63, %v6024_v1  ;;  %v6447_v53 = vor.u32 %v8343_v44, %v6446_v43  ;;  %v6414_v57 = vld [vmem:[#allocation6 + $0x750] sm:$0xf] }
  0xe0   :  { %2435 = vmatpush.bf16.msra.mxu3 %v6603_v52  ;;  %v6280_v3 = vld [vmem:[#allocation6 + $0x668] sm:$0xf0]  ;;  %2408 = vmatpush.bf16.msra.mxu1 %v6059_v59  ;;  %v5902_v52 = vld [vmem:[#allocation6 + $0x350] sm:$0xf]  ;;  %v5647_v59 = vor.u32 %v8143_v50, %v5646_v49 }
  0xe1   :  { %v8362_v4 = vld [vmem:[#allocation6 + $0x84c] sm:$0xf]  ;;  %v6283_v12 = vor.u32 %v8298_v2, %v6280_v3  ;;  %v5614_v62 = vld [vmem:[#allocation6 + $0x110] sm:$0xf] }
  0xe2   :  { %v6536_v5 = vld [vmem:[#allocation6 + $0x868] sm:$0xf0]  ;;  %2394 = vmatpush.bf16.msra.mxu0 %v5803_v58  ;;  %2422 = vmatpush.bf16.msra.mxu2 %v6315_v60  ;;  %v8335_v58 = vld [vmem:[#allocation6 + $0x76c] sm:$0xf0]  ;;  %v5903_v60 = vor.u32 %v8207_v54, %v5902_v52 }
  0xe3   :  { %v8162_v8 = vld [vmem:[#allocation6 + $0x20c] sm:$0xf]  ;;  %v6539_v16 = vor.u32 %v8362_v4, %v6536_v5  ;;  %v8135_v63 = vld [vmem:[#allocation6 + $0x12c] sm:$0xf0]  ;;  %v6415_v1 = vor.u32 %v8335_v58, %v6414_v57 }
  0xe4   :  { %v5736_v10 = vld [vmem:[#allocation6 + $0x228] sm:$0xf0]  ;;  %2436 = vmatpush.bf16.msra.mxu3 %v6571_v0  ;;  %2409 = vmatpush.bf16.msra.mxu1 %v6027_v11  ;;  %v5870_v0 = vld [vmem:[#allocation6 + $0x310] sm:$0xf] }
  0xe5   :  { %v8226_v13 = vld [vmem:[#allocation6 + $0x40c] sm:$0xf]  ;;  %v5739_v23 = vor.u32 %v8162_v8, %v5736_v10  ;;  %v8199_v2 = vld [vmem:[#allocation6 + $0x32c] sm:$0xf0]  ;;  %v5615_v8 = vor.u32 %v8135_v63, %v5614_v62 }
  0xe6   :  { %v5992_v14 = vld [vmem:[#allocation6 + $0x428] sm:$0xf0]  ;;  %2395 = vmatpush.bf16.msra.mxu0 %v5771_v7  ;;  %2423 = vmatpush.bf16.msra.mxu2 %v6283_v12  ;;  %v6126_v3 = vld [vmem:[#allocation6 + $0x510] sm:$0xf]  ;;  %v5871_v10 = vor.u32 %v8199_v2, %v5870_v0 }
  0xe7   :  { %v8290_v15 = vld [vmem:[#allocation6 + $0x60c] sm:$0xf]  ;;  %v5995_v27 = vor.u32 %v8226_v13, %v5992_v14  ;;  %v8263_v4 = vld [vmem:[#allocation6 + $0x52c] sm:$0xf0] }
  0xe8   :  { %v6248_v17 = vld [vmem:[#allocation6 + $0x628] sm:$0xf0]  ;;  %2437 = vmatpush.bf16.msra.mxu3 %v6539_v16  ;;  %v6382_v5 = vld [vmem:[#allocation6 + $0x710] sm:$0xf]  ;;  %v6127_v11 = vor.u32 %v8263_v4, %v6126_v3  ;;  %v8155_v4 = vld [vmem:[#allocation6 + $0x1d4] sm:$0xf] }
  0xe9   :  { %v8354_v18 = vld [vmem:[#allocation6 + $0x80c] sm:$0xf]  ;;  %v6251_v28 = vor.u32 %v8290_v15, %v6248_v17  ;;  %2410 = vmatpush.bf16.msra.mxu1 %v5995_v27  ;;  %v8327_v7 = vld [vmem:[#allocation6 + $0x72c] sm:$0xf0]  ;;  %v9162_v27 = vld [vmem:[#allocation8] sm:$0xff] }
  0xea   :  { %v6504_v19 = vld [vmem:[#allocation6 + $0x828] sm:$0xf0]  ;;  %2396 = vmatpush.bf16.msra.mxu0 %v5739_v23  ;;  %v5582_v12 = vld [vmem:[#allocation6 + $0xd0] sm:$0xf]  ;;  %v6383_v15 = vor.u32 %v8327_v7, %v6382_v5  ;;  %v523_v35 = vperm.slane %v9162_v27, 0 }
  0xeb   :  { %v6507_v31 = vor.u32 %v8354_v18, %v6504_v19  ;;  %2424 = vmatpush.bf16.msra.mxu2 %v6251_v28  ;;  %v8127_v13 = vld [vmem:[#allocation6 + $0xec] sm:$0xf0]  ;;  %v5712_v7 = vld [vmem:[#allocation6 + $0x1f0] sm:$0xf0] }
  0xec   :  { %2411 = vmatmul.bf16.vlgmr.msra.gmra.mxu1 %v9136_v6  ;;  %v5838_v14 = vld [vmem:[#allocation6 + $0x2d0] sm:$0xf]  ;;  %v5583_v21 = vor.u32 %v8127_v13, %v5582_v12  ;;  %v8283_v13 = vld [vmem:[#allocation6 + $0x5d4] sm:$0xf] }
  0xed   :  { %2438 = vmatpush.bf16.msra.mxu3 %v6507_v31  ;;  %2459 = vmatpush.bf16.msrb.mxu1 %v5967_v33  ;;  %v8191_v16 = vld [vmem:[#allocation6 + $0x2ec] sm:$0xf0] }
  0xee   :  { %2445 = vmatpush.bf16.msrb.mxu0 %v5711_v32  ;;  %2425 = vmatmul.bf16.vlgmr.msra.gmra.mxu2 %v9139_v9  ;;  %v6094_v17 = vld [vmem:[#allocation6 + $0x4d0] sm:$0xf]  ;;  %v5839_v23 = vor.u32 %v8191_v16, %v5838_v14  ;;  %v6224_v14 = vld [vmem:[#allocation6 + $0x5f0] sm:$0xf0] }
  0xef   :  { %2473 = vmatpush.bf16.msrb.mxu2 %v6223_v34  ;;  %2397 = vmatmul.bf16.vlgmr.msra.gmra.mxu0 %v9132_v46  ;;  %v8255_v18 = vld [vmem:[#allocation6 + $0x4ec] sm:$0xf0] }
  0xf0   :  { %2439 = vmatmul.bf16.vlgmr.msra.gmra.mxu3 %v9144_v51  ;;  %v6350_v19 = vld [vmem:[#allocation6 + $0x6d0] sm:$0xf]  ;;  %v6095_v24 = vor.u32 %v8255_v18, %v6094_v17  ;;  %v5715_v17 = vor.u32 %v8155_v4, %v5712_v7  ;;  %v5584_v4 = vld [vmem:[#allocation6 + $0xf0] sm:$0xf0] }
  0xf1   :  { %2487 = vmatpush.bf16.msrb.mxu3 %v6479_v38  ;;  %2460 = vmatpush.bf16.msrb.mxu1 %v5935_v47  ;;  %v8319_v20 = vld [vmem:[#allocation6 + $0x6ec] sm:$0xf0]  ;;  %v5840_v7 = vld [vmem:[#allocation6 + $0x2f0] sm:$0xf0] }
  0xf2   :  { %2446 = vmatpush.bf16.msrb.mxu0 %v5679_v45  ;;  %v5550_v22 = vld [vmem:[#allocation6 + $0x90] sm:$0xf]  ;;  %v6351_v28 = vor.u32 %v8319_v20, %v6350_v19 }
  0xf3   :  { %2474 = vmatpush.bf16.msrb.mxu2 %v6191_v48  ;;  %v8119_v25 = vld [vmem:[#allocation6 + $0xac] sm:$0xf0] }
  0xf4   :  { %v5806_v26 = vld [vmem:[#allocation6 + $0x290] sm:$0xf]  ;;  %v5551_v34 = vor.u32 %v8119_v25, %v5550_v22  ;;  %v6227_v22 = vor.u32 %v8283_v13, %v6224_v14  ;;  %v5936_v25 = vld [vmem:[#allocation6 + $0x3b0] sm:$0xf0] }
  0xf5   :  { %2488 = vmatpush.bf16.msrb.mxu3 %v6447_v53  ;;  %2461 = vmatpush.bf16.msrb.mxu1 %v5903_v60  ;;  %v6062_v30 = vld [vmem:[#allocation6 + $0x490] sm:$0xf]  ;;  %v5807_v36 = vor.u32 %v8183_v29, %v5806_v26  ;;  %v8275_v26 = vld [vmem:[#allocation6 + $0x594] sm:$0xf] }
  0xf6   :  { %2447 = vmatpush.bf16.msrb.mxu0 %v5647_v59  ;;  %v8247_v31 = vld [vmem:[#allocation6 + $0x4ac] sm:$0xf0] }
  0xf7   :  { %2475 = vmatpush.bf16.msrb.mxu2 %v6159_v61  ;;  %v6318_v32 = vld [vmem:[#allocation6 + $0x690] sm:$0xf]  ;;  %v6063_v37 = vor.u32 %v8247_v31, %v6062_v30 }
  0xf8   :  { %v8311_v33 = vld [vmem:[#allocation6 + $0x6ac] sm:$0xf0] }
  0xf9   :  { %2489 = vmatpush.bf16.msrb.mxu3 %v6415_v1  ;;  %2462 = vmatpush.bf16.msrb.mxu1 %v5871_v10  ;;  %v5518_v38 = vld [vmem:[#allocation6 + $0x50] sm:$0xf]  ;;  %v6319_v42 = vor.u32 %v8311_v33, %v6318_v32  ;;  %v5968_v10 = vld [vmem:[#allocation6 + $0x3f0] sm:$0xf0] }
  0xfa   :  { %2448 = vmatpush.bf16.msrb.mxu0 %v5615_v8  ;;  %v8111_v40 = vld [vmem:[#allocation6 + $0x6c] sm:$0xf0]  ;;  %v2174_v47 = vpop.f32.mrf.mxu0  ;;  %v2188_v60 = vpop.f32.mrf.mxu1  ;;  %v8219_v8 = vld [vmem:[#allocation6 + $0x3d4] sm:$0xf] }
  0xfb   :  { %2476 = vmatpush.bf16.msrb.mxu2 %v6127_v11  ;;  %v5774_v41 = vld [vmem:[#allocation6 + $0x250] sm:$0xf]  ;;  %v2175_v50 = vadd.f32 %v2174_v47, %v523_v35  ;;  %v5519_v52 = vor.u32 %v8111_v40, %v5518_v38  ;;  %v5971_v18 = vor.u32 %v8219_v8, %v5968_v10  ;;  %v5648_v40 = vld [vmem:[#allocation6 + $0x170] sm:$0xf0] }
  0xfc   :  { %v8175_v43 = vld [vmem:[#allocation6 + $0x26c] sm:$0xf0]  ;;  %v8251_v8 = vld [vmem:[#allocation6 + $0x4d4] sm:$0xf] }
  0xfd   :  { %2490 = vmatpush.bf16.msrb.mxu3 %v6383_v15  ;;  %2463 = vmatpush.bf16.msrb.mxu1 %v5839_v23  ;;  %v6030_v44 = vld [vmem:[#allocation6 + $0x450] sm:$0xf]  ;;  %v5775_v55 = vor.u32 %v8175_v43, %v5774_v41  ;;  %v2189_v1 = vadd.f32 %v2188_v60, %v2175_v50  ;;  %v5680_v23 = vld [vmem:[#allocation6 + $0x1b0] sm:$0xf0] }
  0xfe   :  { %2449 = vmatpush.bf16.msrb.mxu0 %v5583_v21  ;;  %v8239_v45 = vld [vmem:[#allocation6 + $0x46c] sm:$0xf0]  ;;  %v8147_v21 = vld [vmem:[#allocation6 + $0x194] sm:$0xf] }
  0xff   :  { %2477 = vmatpush.bf16.msrb.mxu2 %v6095_v24  ;;  %v6286_v48 = vld [vmem:[#allocation6 + $0x650] sm:$0xf]  ;;  %v6031_v56 = vor.u32 %v8239_v45, %v6030_v44  ;;  %v8211_v24 = vld [vmem:[#allocation6 + $0x394] sm:$0xf]  ;;  %v5683_v30 = vor.u32 %v8147_v21, %v5680_v23 }
 0x100   :  { %v8303_v49 = vld [vmem:[#allocation6 + $0x66c] sm:$0xf0]  ;;  %v5939_v31 = vor.u32 %v8211_v24, %v5936_v25  ;;  %v8203_v41 = vld [vmem:[#allocation6 + $0x354] sm:$0xf] }
 0x101   :  { %2491 = vmatpush.bf16.msrb.mxu3 %v6351_v28  ;;  %v5486_v53 = vld [vmem:[#allocation6 + $0x10] sm:$0xf]  ;;  %2464 = vmatpush.bf16.msrb.mxu1 %v5807_v36  ;;  %v6287_v61 = vor.u32 %v8303_v49, %v6286_v48  ;;  %v6192_v28 = vld [vmem:[#allocation6 + $0x5b0] sm:$0xf0] }
 0x102   :  { %2450 = vmatpush.bf16.msrb.mxu0 %v5551_v34  ;;  %v8103_v54 = vld [vmem:[#allocation6 + $0x2c] sm:$0xf0]  ;;  %v2202_v32 = vpop.f32.mrf.mxu2  ;;  %v8139_v36 = vld [vmem:[#allocation6 + $0x154] sm:$0xf]  ;;  %v2216_v47 = vpop.f32.mrf.mxu3 }
 0x103   :  { %2478 = vmatpush.bf16.msrb.mxu2 %v6063_v37  ;;  %v5742_v57 = vld [vmem:[#allocation6 + $0x210] sm:$0xf]  ;;  %v5487_v5 = vor.u32 %v8103_v54, %v5486_v53  ;;  %v6195_v37 = vor.u32 %v8275_v26, %v6192_v28  ;;  %v2203_v38 = vadd.f32 %v2202_v32, %v2189_v1  ;;  %v8267_v43 = vld [vmem:[#allocation6 + $0x554] sm:$0xf]  ;;  %v5651_v48 = vor.u32 %v8139_v36, %v5648_v40 }
 0x104   :  { %v8167_v58 = vld [vmem:[#allocation6 + $0x22c] sm:$0xf0]  ;;  %v6160_v44 = vld [vmem:[#allocation6 + $0x570] sm:$0xf0] }
 0x105   :  { %v5998_v59 = vld [vmem:[#allocation6 + $0x410] sm:$0xf]  ;;  %2492 = vmatpush.bf16.msrb.mxu3 %v6319_v42  ;;  %2465 = vmatpush.bf16.msrb.mxu1 %v5775_v55  ;;  %v5743_v11 = vor.u32 %v8167_v58, %v5742_v57  ;;  %v5904_v42 = vld [vmem:[#allocation6 + $0x370] sm:$0xf0]  ;;  %v9171_v50 = vadd.f32 %v2216_v47, %v2203_v38  ;;  %v6163_v55 = vor.u32 %v8267_v43, %v6160_v44 }
 0x106   :  { %v8231_v62 = vld [vmem:[#allocation6 + $0x42c] sm:$0xf0]  ;;  %2451 = vmatpush.bf16.msrb.mxu0 %v5519_v52  ;;  %v5907_v49 = vor.u32 %v8203_v41, %v5904_v42  ;;  %v8131_v54 = vld [vmem:[#allocation6 + $0x114] sm:$0xf] }
 0x107   :  { %v6254_v63 = vld [vmem:[#allocation6 + $0x610] sm:$0xf]  ;;  %2479 = vmatpush.bf16.msrb.mxu2 %v6031_v56  ;;  %v5999_v12 = vor.u32 %v8231_v62, %v5998_v59  ;;  %v5616_v56 = vld [vmem:[#allocation6 + $0x130] sm:$0xf0] }
 0x108   :  { %v8295_v0 = vld [vmem:[#allocation6 + $0x62c] sm:$0xf0]  ;;  %v8195_v57 = vld [vmem:[#allocation6 + $0x314] sm:$0xf]  ;;  %v5619_v62 = vor.u32 %v8131_v54, %v5616_v56 }
 0x109   :  { %v6734_v2 = vld [vmem:[#allocation6 + $0x9d0] sm:$0xf]  ;;  %2493 = vmatpush.bf16.msrb.mxu3 %v6287_v61  ;;  %v6255_v15 = vor.u32 %v8295_v0, %v6254_v63  ;;  %2466 = vmatpush.bf16.msrb.mxu1 %v5743_v11  ;;  %v5872_v58 = vld [vmem:[#allocation6 + $0x330] sm:$0xf0] }
 0x10a   :  { %v8415_v3 = vld [vmem:[#allocation6 + $0x9ec] sm:$0xf0]  ;;  %2452 = vmatpush.bf16.msrb.mxu0 %v5487_v5  ;;  %v8259_v59 = vld [vmem:[#allocation6 + $0x514] sm:$0xf]  ;;  %v5875_v63 = vor.u32 %v8195_v57, %v5872_v58  ;;  %v5718_v58 = vld [vmem:[#allocation6 + $0x1d8] sm:$0xf] }
 0x10b   :  { %v6735_v16 = vor.u32 %v8415_v3, %v6734_v2  ;;  %v6702_v19 = vld [vmem:[#allocation6 + $0x990] sm:$0xf]  ;;  %2480 = vmatpush.bf16.msrb.mxu2 %v5999_v12  ;;  %v6128_v60 = vld [vmem:[#allocation6 + $0x530] sm:$0xf0] }
 0x10c   :  { %v8407_v20 = vld [vmem:[#allocation6 + $0x9ac] sm:$0xf0]  ;;  %2467 = vmatmul.bf16.vlgmr.msrb.gmra.mxu1 %v9132_v46  ;;  %v8123_v2 = vld [vmem:[#allocation6 + $0xd4] sm:$0xf]  ;;  %v6131_v3 = vor.u32 %v8259_v59, %v6128_v60  ;;  %v8160_v59 = vld [vmem:[#allocation6 + $0x1f4] sm:$0xf0] }
 0x10d   :  { %2494 = vmatpush.bf16.msrb.mxu3 %v6255_v15  ;;  %v6703_v29 = vor.u32 %v8407_v20, %v6702_v19  ;;  %2515 = vmatpush.bf16.msra.mxu1 %v5715_v17  ;;  %v6670_v33 = vld [vmem:[#allocation6 + $0x950] sm:$0xf]  ;;  %v8187_v5 = vld [vmem:[#allocation6 + $0x2d4] sm:$0xf]  ;;  %v5587_v12 = vor.u32 %v8123_v2, %v5584_v4 }
 0x10e   :  { %2501 = vmatpush.bf16.msra.mxu0 %v6735_v16  ;;  %v8399_v34 = vld [vmem:[#allocation6 + $0x96c] sm:$0xf0]  ;;  %2481 = vmatmul.bf16.vlgmr.msrb.gmra.mxu2 %v9136_v6  ;;  %v6096_v10 = vld [vmem:[#allocation6 + $0x4f0] sm:$0xf0]  ;;  %v5843_v13 = vor.u32 %v8187_v5, %v5840_v7 }
 0x10f   :  { %2529 = vmatpush.bf16.msra.mxu2 %v5971_v18  ;;  %2453 = vmatmul.bf16.vlgmr.msrb.gmra.mxu0 %v9130_v39  ;;  %v6671_v45 = vor.u32 %v8399_v34, %v6670_v33  ;;  %v6638_v52 = vld [vmem:[#allocation6 + $0x910] sm:$0xf]  ;;  %v8115_v16 = vld [vmem:[#allocation6 + $0x94] sm:$0xf]  ;;  %v6099_v17 = vor.u32 %v8251_v8, %v6096_v10 }
 0x110   :  { %2495 = vmatmul.bf16.vlgmr.msrb.gmra.mxu3 %v9139_v9  ;;  %v8391_v53 = vld [vmem:[#allocation6 + $0x92c] sm:$0xf0]  ;;  %v5552_v18 = vld [vmem:[#allocation6 + $0xb0] sm:$0xf0] }
 0x111   :  { %2543 = vmatpush.bf16.msra.mxu3 %v6227_v22  ;;  %2516 = vmatpush.bf16.msra.mxu1 %v5683_v30  ;;  %v6639_v61 = vor.u32 %v8391_v53, %v6638_v52  ;;  %v6606_v0 = vld [vmem:[#allocation6 + $0x8d0] sm:$0xf]  ;;  %v8179_v19 = vld [vmem:[#allocation6 + $0x294] sm:$0xf]  ;;  %v5555_v24 = vor.u32 %v8115_v16, %v5552_v18 }
 0x112   :  { %2502 = vmatpush.bf16.msra.mxu0 %v6703_v29  ;;  %v8383_v1 = vld [vmem:[#allocation6 + $0x8ec] sm:$0xf0]  ;;  %v5808_v20 = vld [vmem:[#allocation6 + $0x2b0] sm:$0xf0] }
 0x113   :  { %2530 = vmatpush.bf16.msra.mxu2 %v5939_v31  ;;  %v6607_v11 = vor.u32 %v8383_v1, %v6606_v0  ;;  %v6574_v14 = vld [vmem:[#allocation6 + $0x890] sm:$0xf]  ;;  %v8243_v21 = vld [vmem:[#allocation6 + $0x494] sm:$0xf]  ;;  %v5811_v25 = vor.u32 %v8179_v19, %v5808_v20 }
 0x114   :  { %v8375_v15 = vld [vmem:[#allocation6 + $0x8ac] sm:$0xf0]  ;;  %v6064_v22 = vld [vmem:[#allocation6 + $0x4b0] sm:$0xf0] }
 0x115   :  { %2544 = vmatpush.bf16.msra.mxu3 %v6195_v37  ;;  %2517 = vmatpush.bf16.msra.mxu1 %v5651_v48  ;;  %v6575_v23 = vor.u32 %v8375_v15, %v6574_v14  ;;  %v6542_v26 = vld [vmem:[#allocation6 + $0x850] sm:$0xf]  ;;  %v8107_v29 = vld [vmem:[#allocation6 + $0x54] sm:$0xf]  ;;  %v6067_v30 = vor.u32 %v8243_v21, %v6064_v22  ;;  %v8216_v14 = vld [vmem:[#allocation6 + $0x3b4] sm:$0xf0] }
 0x116   :  { %2503 = vmatpush.bf16.msra.mxu0 %v6671_v45  ;;  %v8367_v28 = vld [vmem:[#allocation6 + $0x86c] sm:$0xf0]  ;;  %v5520_v31 = vld [vmem:[#allocation6 + $0x70] sm:$0xf0] }
 0x117   :  { %2531 = vmatpush.bf16.msra.mxu2 %v5907_v49  ;;  %v8171_v32 = vld [vmem:[#allocation6 + $0x254] sm:$0xf]  ;;  %v6543_v37 = vor.u32 %v8367_v28, %v6542_v26  ;;  %v6510_v38 = vld [vmem:[#allocation6 + $0x810] sm:$0xf]  ;;  %v5523_v41 = vor.u32 %v8107_v29, %v5520_v31  ;;  %v8208_v26 = vld [vmem:[#allocation6 + $0x374] sm:$0xf0] }
 0x118   :  { %v5776_v33 = vld [vmem:[#allocation6 + $0x270] sm:$0xf0]  ;;  %v8359_v40 = vld [vmem:[#allocation6 + $0x82c] sm:$0xf0] }
 0x119   :  { %2545 = vmatpush.bf16.msra.mxu3 %v6163_v55  ;;  %2518 = vmatpush.bf16.msra.mxu1 %v5619_v62  ;;  %v8235_v34 = vld [vmem:[#allocation6 + $0x454] sm:$0xf]  ;;  %v5779_v42 = vor.u32 %v8171_v32, %v5776_v33  ;;  %v6511_v56 = vor.u32 %v8359_v40, %v6510_v38  ;;  %v5974_v62 = vld [vmem:[#allocation6 + $0x3d8] sm:$0xf] }
 0x11a   :  { %2504 = vmatpush.bf16.msra.mxu0 %v6639_v61  ;;  %v6032_v36 = vld [vmem:[#allocation6 + $0x470] sm:$0xf0]  ;;  %v8136_v38 = vld [vmem:[#allocation6 + $0x134] sm:$0xf0] }
 0x11b   :  { %2532 = vmatpush.bf16.msra.mxu2 %v5875_v63  ;;  %v8099_v43 = vld [vmem:[#allocation6 + $0x14] sm:$0xf]  ;;  %v6035_v47 = vor.u32 %v8235_v34, %v6032_v36  ;;  %v8224_v63 = vld [vmem:[#allocation6 + $0x3f4] sm:$0xf0] }
 0x11c   :  { %v5488_v44 = vld [vmem:[#allocation6 + $0x30] sm:$0xf0]  ;;  %v5975_v8 = vor.u32 %v8224_v63, %v5974_v62  ;;  %v5878_v40 = vld [vmem:[#allocation6 + $0x318] sm:$0xf] }
 0x11d   :  { %2546 = vmatpush.bf16.msra.mxu3 %v6131_v3  ;;  %2519 = vmatpush.bf16.msra.mxu1 %v5587_v12  ;;  %v8163_v45 = vld [vmem:[#allocation6 + $0x214] sm:$0xf]  ;;  %v5491_v60 = vor.u32 %v8099_v43, %v5488_v44  ;;  %v5719_v3 = vor.u32 %v8160_v59, %v5718_v58  ;;  %v8152_v12 = vld [vmem:[#allocation6 + $0x1b4] sm:$0xf0] }
 0x11e   :  { %2505 = vmatpush.bf16.msra.mxu0 %v6607_v11  ;;  %v5744_v48 = vld [vmem:[#allocation6 + $0x230] sm:$0xf0]  ;;  %v5686_v11 = vld [vmem:[#allocation6 + $0x198] sm:$0xf] }
 0x11f   :  { %2533 = vmatpush.bf16.msra.mxu2 %v5843_v13  ;;  %v8227_v49 = vld [vmem:[#allocation6 + $0x414] sm:$0xf]  ;;  %v5747_v61 = vor.u32 %v8163_v45, %v5744_v48  ;;  %v5942_v13 = vld [vmem:[#allocation6 + $0x398] sm:$0xf] }
 0x120   :  { %v6000_v52 = vld [vmem:[#allocation6 + $0x430] sm:$0xf0]  ;;  %v5943_v21 = vor.u32 %v8216_v14, %v5942_v13 }
 0x121   :  { %2547 = vmatpush.bf16.msra.mxu3 %v6099_v17  ;;  %2520 = vmatpush.bf16.msra.mxu1 %v5555_v24  ;;  %v8347_v53 = vld [vmem:[#allocation6 + $0x7d4] sm:$0xf]  ;;  %v6003_v0 = vor.u32 %v8227_v49, %v6000_v52  ;;  %v5687_v17 = vor.u32 %v8152_v12, %v5686_v11  ;;  %v8144_v24 = vld [vmem:[#allocation6 + $0x174] sm:$0xf0] }
 0x122   :  { %2506 = vmatpush.bf16.msra.mxu0 %v6575_v23  ;;  %v6480_v54 = vld [vmem:[#allocation6 + $0x7f0] sm:$0xf0]  ;;  %v5654_v23 = vld [vmem:[#allocation6 + $0x158] sm:$0xf] }
 0x123   :  { %2534 = vmatpush.bf16.msra.mxu2 %v5811_v25  ;;  %v8411_v55 = vld [vmem:[#allocation6 + $0x9d4] sm:$0xf]  ;;  %v6483_v1 = vor.u32 %v8347_v53, %v6480_v54  ;;  %v5910_v25 = vld [vmem:[#allocation6 + $0x358] sm:$0xf] }
 0x124   :  { %v6736_v57 = vld [vmem:[#allocation6 + $0x9f0] sm:$0xf0]  ;;  %v5911_v34 = vor.u32 %v8208_v26, %v5910_v25  ;;  %v5590_v53 = vld [vmem:[#allocation6 + $0xd8] sm:$0xf] }
 0x125   :  { %2548 = vmatpush.bf16.msra.mxu3 %v6067_v30  ;;  %2521 = vmatpush.bf16.msra.mxu1 %v5523_v41  ;;  %v6739_v2 = vor.u32 %v8411_v55, %v6736_v57  ;;  %v8339_v4 = vld [vmem:[#allocation6 + $0x794] sm:$0xf]  ;;  %v5655_v30 = vor.u32 %v8144_v24, %v5654_v23  ;;  %v8200_v41 = vld [vmem:[#allocation6 + $0x334] sm:$0xf0] }
 0x126   :  { %2507 = vmatpush.bf16.msra.mxu0 %v6543_v37  ;;  %v6448_v5 = vld [vmem:[#allocation6 + $0x7b0] sm:$0xf0]  ;;  %v5622_v37 = vld [vmem:[#allocation6 + $0x118] sm:$0xf]  ;;  %v5879_v49 = vor.u32 %v8200_v41, %v5878_v40  ;;  %v9177_v41 = vpop.f32.mrf.mxu0 }
 0x127   :  { %2535 = vmatpush.bf16.msra.mxu2 %v5779_v42  ;;  %v8403_v7 = vld [vmem:[#allocation6 + $0x994] sm:$0xf]  ;;  %v6451_v15 = vor.u32 %v8339_v4, %v6448_v5  ;;  %v5623_v44 = vor.u32 %v8136_v38, %v5622_v37  ;;  %v8128_v54 = vld [vmem:[#allocation6 + $0xf4] sm:$0xf0] }
 0x128   :  { %v6704_v10 = vld [vmem:[#allocation6 + $0x9b0] sm:$0xf0]  ;;  %v5846_v55 = vld [vmem:[#allocation6 + $0x2d8] sm:$0xf]  ;;  %v5591_v59 = vor.u32 %v8128_v54, %v5590_v53 }
 0x129   :  { %2549 = vmatpush.bf16.msra.mxu3 %v6035_v47  ;;  %2522 = vmatpush.bf16.msra.mxu1 %v5491_v60  ;;  %v6707_v16 = vor.u32 %v8403_v7, %v6704_v10  ;;  %v8331_v18 = vld [vmem:[#allocation6 + $0x754] sm:$0xf]  ;;  %v8184_v4 = vld [vmem:[#allocation6 + $0x2b4] sm:$0xf0] }
 0x12a   :  { %2508 = vmatpush.bf16.msra.mxu0 %v6511_v56  ;;  %v6416_v19 = vld [vmem:[#allocation6 + $0x770] sm:$0xf0]  ;;  %v8192_v56 = vld [vmem:[#allocation6 + $0x2f4] sm:$0xf0] }
 0x12b   :  { %2536 = vmatpush.bf16.msra.mxu2 %v5747_v61  ;;  %v8395_v20 = vld [vmem:[#allocation6 + $0x954] sm:$0xf]  ;;  %v6419_v28 = vor.u32 %v8331_v18, %v6416_v19  ;;  %v5847_v63 = vor.u32 %v8192_v56, %v5846_v55  ;;  %v8176_v18 = vld [vmem:[#allocation6 + $0x274] sm:$0xf0] }
 0x12c   :  { %v6672_v22 = vld [vmem:[#allocation6 + $0x970] sm:$0xf0]  ;;  %2523 = vmatmul.bf16.vlgmr.msra.gmra.mxu1 %v9130_v39  ;;  %v5494_v26 = vld [vmem:[#allocation6 + $0x18] sm:$0xf] }
 0x12d   :  { %2550 = vmatpush.bf16.msra.mxu3 %v6003_v0  ;;  %2571 = vmatpush.bf16.msrb.mxu1 %v6739_v2  ;;  %v6675_v29 = vor.u32 %v8395_v20, %v6672_v22  ;;  %v8323_v31 = vld [vmem:[#allocation6 + $0x714] sm:$0xf]  ;;  %v8120_v2 = vld [vmem:[#allocation6 + $0xb4] sm:$0xf0] }
 0x12e   :  { %2557 = vmatpush.bf16.msrb.mxu0 %v6483_v1  ;;  %2537 = vmatmul.bf16.vlgmr.msra.gmra.mxu2 %v9132_v46  ;;  %v6384_v32 = vld [vmem:[#allocation6 + $0x730] sm:$0xf0]  ;;  %v5558_v1 = vld [vmem:[#allocation6 + $0x98] sm:$0xf] }
 0x12f   :  { %2585 = vmatpush.bf16.msrb.mxu2 %v5719_v3  ;;  %2509 = vmatmul.bf16.vlgmr.msra.gmra.mxu0 %v9144_v51  ;;  %v8387_v33 = vld [vmem:[#allocation6 + $0x914] sm:$0xf]  ;;  %v6387_v42 = vor.u32 %v8323_v31, %v6384_v32  ;;  %v5814_v3 = vld [vmem:[#allocation6 + $0x298] sm:$0xf] }
 0x130   :  { %2551 = vmatmul.bf16.vlgmr.msra.gmra.mxu3 %v9136_v6  ;;  %v6640_v36 = vld [vmem:[#allocation6 + $0x930] sm:$0xf0]  ;;  %v5815_v13 = vor.u32 %v8184_v4, %v5814_v3  ;;  %v8168_v31 = vld [vmem:[#allocation6 + $0x234] sm:$0xf0] }
 0x131   :  { %2599 = vmatpush.bf16.msrb.mxu3 %v5975_v8  ;;  %2572 = vmatpush.bf16.msrb.mxu1 %v6707_v16  ;;  %v6643_v43 = vor.u32 %v8387_v33, %v6640_v36  ;;  %v8315_v45 = vld [vmem:[#allocation6 + $0x6d4] sm:$0xf]  ;;  %v5559_v8 = vor.u32 %v8120_v2, %v5558_v1  ;;  %v8112_v16 = vld [vmem:[#allocation6 + $0x74] sm:$0xf0] }
 0x132   :  { %2558 = vmatpush.bf16.msrb.mxu0 %v6451_v15  ;;  %v6352_v47 = vld [vmem:[#allocation6 + $0x6f0] sm:$0xf0]  ;;  %v5526_v15 = vld [vmem:[#allocation6 + $0x58] sm:$0xf] }
 0x133   :  { %2586 = vmatpush.bf16.msrb.mxu2 %v5687_v17  ;;  %v8379_v48 = vld [vmem:[#allocation6 + $0x8d4] sm:$0xf]  ;;  %v6355_v57 = vor.u32 %v8315_v45, %v6352_v47  ;;  %v5782_v17 = vld [vmem:[#allocation6 + $0x258] sm:$0xf]  ;;  %v5527_v23 = vor.u32 %v8112_v16, %v5526_v15  ;;  %v5720_v45 = vld [vmem:[#allocation6 + $0x1f8] sm:$0xf0]  ;;  %v9187_v15 = vpop.f32.mrf.mxu0  ;;  %v9189_v16 = vpop.f32.mrf.mxu3 }
 0x134   :  { %v6608_v52 = vld [vmem:[#allocation6 + $0x8f0] sm:$0xf0]  ;;  %v6230_v32 = vld [vmem:[#allocation6 + $0x5d8] sm:$0xf] }
 0x135   :  { %2600 = vmatpush.bf16.msrb.mxu3 %v5943_v21  ;;  %2573 = vmatpush.bf16.msrb.mxu1 %v6675_v29  ;;  %v6611_v58 = vor.u32 %v8379_v48, %v6608_v52  ;;  %v8307_v60 = vld [vmem:[#allocation6 + $0x694] sm:$0xf]  ;;  %v8104_v29 = vld [vmem:[#allocation6 + $0x34] sm:$0xf0] }
 0x136   :  { %2559 = vmatpush.bf16.msrb.mxu0 %v6419_v28  ;;  %v6320_v61 = vld [vmem:[#allocation6 + $0x6b0] sm:$0xf0]  ;;  %v5783_v28 = vor.u32 %v8176_v18, %v5782_v17  ;;  %v8288_v33 = vld [vmem:[#allocation6 + $0x5f4] sm:$0xf0] }
 0x137   :  { %2587 = vmatpush.bf16.msrb.mxu2 %v5655_v30  ;;  %v8371_v62 = vld [vmem:[#allocation6 + $0x894] sm:$0xf]  ;;  %v6323_v5 = vor.u32 %v8307_v60, %v6320_v61  ;;  %v5750_v30 = vld [vmem:[#allocation6 + $0x218] sm:$0xf]  ;;  %v6231_v48 = vor.u32 %v8288_v33, %v6230_v32  ;;  %v9179_v60 = vpop.f32.mrf.mxu1  ;;  %v8148_v61 = vld [vmem:[#allocation6 + $0x19c] sm:$0xf] }
 0x138   :  { %v6576_v0 = vld [vmem:[#allocation6 + $0x8b0] sm:$0xf0]  ;;  %v8352_v37 = vld [vmem:[#allocation6 + $0x7f4] sm:$0xf0]  ;;  %v5751_v47 = vor.u32 %v8168_v31, %v5750_v30 }
 0x139   :  { %2601 = vmatpush.bf16.msrb.mxu3 %v5911_v34  ;;  %2574 = vmatpush.bf16.msrb.mxu1 %v6643_v43  ;;  %v6579_v7 = vor.u32 %v8371_v62, %v6576_v0  ;;  %v8299_v10 = vld [vmem:[#allocation6 + $0x654] sm:$0xf]  ;;  %v6486_v34 = vld [vmem:[#allocation6 + $0x7d8] sm:$0xf]  ;;  %v5495_v43 = vor.u32 %v8104_v29, %v5494_v26  ;;  %v5688_v62 = vld [vmem:[#allocation6 + $0x1b8] sm:$0xf0]  ;;  %v9181_v0 = vpop.f32.mrf.mxu2 }
 0x13a   :  { %2560 = vmatpush.bf16.msrb.mxu0 %v6387_v42  ;;  %v6288_v11 = vld [vmem:[#allocation6 + $0x670] sm:$0xf0]  ;;  %v6742_v38 = vld [vmem:[#allocation6 + $0x9d8] sm:$0xf]  ;;  %v5624_v29 = vld [vmem:[#allocation6 + $0x138] sm:$0xf0] }
 0x13b   :  { %2588 = vmatpush.bf16.msrb.mxu2 %v5623_v44  ;;  %v8363_v12 = vld [vmem:[#allocation6 + $0x854] sm:$0xf]  ;;  %v6291_v19 = vor.u32 %v8299_v10, %v6288_v11  ;;  %v8416_v40 = vld [vmem:[#allocation6 + $0x9f4] sm:$0xf0]  ;;  %v8156_v44 = vld [vmem:[#allocation6 + $0x1dc] sm:$0xf] }
 0x13c   :  { %v6544_v14 = vld [vmem:[#allocation6 + $0x870] sm:$0xf0]  ;;  %v6743_v52 = vor.u32 %v8416_v40, %v6742_v38  ;;  %v6198_v53 = vld [vmem:[#allocation6 + $0x598] sm:$0xf]  ;;  %v5723_v56 = vor.u32 %v8156_v44, %v5720_v45  ;;  %v8124_v44 = vld [vmem:[#allocation6 + $0xdc] sm:$0xf] }
 0x13d   :  { %2602 = vmatpush.bf16.msrb.mxu3 %v5879_v49  ;;  %2575 = vmatpush.bf16.msrb.mxu1 %v6611_v58  ;;  %v8291_v20 = vld [vmem:[#allocation6 + $0x614] sm:$0xf]  ;;  %v6547_v22 = vor.u32 %v8363_v12, %v6544_v14  ;;  %v6487_v49 = vor.u32 %v8352_v37, %v6486_v34  ;;  %v8280_v54 = vld [vmem:[#allocation6 + $0x5b4] sm:$0xf0]  ;;  %v8140_v12 = vld [vmem:[#allocation6 + $0x15c] sm:$0xf] }
 0x13e   :  { %2561 = vmatpush.bf16.msrb.mxu0 %v6355_v57  ;;  %v6256_v21 = vld [vmem:[#allocation6 + $0x630] sm:$0xf0]  ;;  %v6454_v55 = vld [vmem:[#allocation6 + $0x798] sm:$0xf]  ;;  %v5592_v45 = vld [vmem:[#allocation6 + $0xf8] sm:$0xf0] }
 0x13f   :  { %2589 = vmatpush.bf16.msrb.mxu2 %v5591_v59  ;;  %v8355_v24 = vld [vmem:[#allocation6 + $0x814] sm:$0xf]  ;;  %v6259_v36 = vor.u32 %v8291_v20, %v6256_v21  ;;  %v8344_v57 = vld [vmem:[#allocation6 + $0x7b4] sm:$0xf0]  ;;  %v9191_v26 = vpop.f32.mrf.mxu1 }
 0x140   :  { %v6512_v25 = vld [vmem:[#allocation6 + $0x830] sm:$0xf0]  ;;  %v6710_v58 = vld [vmem:[#allocation6 + $0x998] sm:$0xf]  ;;  %v6455_v1 = vor.u32 %v8344_v57, %v6454_v55 }
 0x141   :  { %2603 = vmatpush.bf16.msrb.mxu3 %v5847_v63  ;;  %2576 = vmatpush.bf16.msrb.mxu1 %v6579_v7  ;;  %v6515_v42 = vor.u32 %v8355_v24, %v6512_v25  ;;  %v8408_v59 = vld [vmem:[#allocation6 + $0x9b4] sm:$0xf0]  ;;  %v6199_v63 = vor.u32 %v8280_v54, %v6198_v53  ;;  %v5691_v7 = vor.u32 %v8148_v61, %v5688_v62  ;;  %v9193_v31 = vpop.f32.mrf.mxu2  ;;  %v9197_v61 = vpop.f32.mrf.mxu0  ;;  %v8116_v62 = vld [vmem:[#allocation6 + $0x9c] sm:$0xf] }
 0x142   :  { %2562 = vmatpush.bf16.msrb.mxu0 %v6323_v5  ;;  %v6711_v2 = vor.u32 %v8408_v59, %v6710_v58  ;;  %v6166_v3 = vld [vmem:[#allocation6 + $0x558] sm:$0xf] }
 0x143   :  { %2590 = vmatpush.bf16.msrb.mxu2 %v5559_v8  ;;  %v8272_v4 = vld [vmem:[#allocation6 + $0x574] sm:$0xf0] }
 0x144   :  { %v6422_v5 = vld [vmem:[#allocation6 + $0x758] sm:$0xf]  ;;  %v6167_v14 = vor.u32 %v8272_v4, %v6166_v3 }
 0x145   :  { %2604 = vmatpush.bf16.msrb.mxu3 %v5815_v13  ;;  %2577 = vmatpush.bf16.msrb.mxu1 %v6547_v22  ;;  %v8336_v8 = vld [vmem:[#allocation6 + $0x774] sm:$0xf0]  ;;  %v5656_v13 = vld [vmem:[#allocation6 + $0x178] sm:$0xf0] }
 0x146   :  { %2563 = vmatpush.bf16.msrb.mxu0 %v6291_v19  ;;  %v6678_v10 = vld [vmem:[#allocation6 + $0x958] sm:$0xf]  ;;  %v6423_v17 = vor.u32 %v8336_v8, %v6422_v5  ;;  %v5659_v22 = vor.u32 %v8140_v12, %v5656_v13 }
 0x147   :  { %2591 = vmatpush.bf16.msrb.mxu2 %v5527_v23  ;;  %v8400_v11 = vld [vmem:[#allocation6 + $0x974] sm:$0xf0] }
 0x148   :  { %v6679_v18 = vor.u32 %v8400_v11, %v6678_v10  ;;  %v6134_v19 = vld [vmem:[#allocation6 + $0x518] sm:$0xf] }
 0x149   :  { %2605 = vmatpush.bf16.msrb.mxu3 %v5783_v28  ;;  %2578 = vmatpush.bf16.msrb.mxu1 %v6515_v42  ;;  %v8264_v20 = vld [vmem:[#allocation6 + $0x534] sm:$0xf0]  ;;  %v8132_v28 = vld [vmem:[#allocation6 + $0x11c] sm:$0xf] }
 0x14a   :  { %2564 = vmatpush.bf16.msrb.mxu0 %v6259_v36  ;;  %v6390_v21 = vld [vmem:[#allocation6 + $0x718] sm:$0xf]  ;;  %v6135_v30 = vor.u32 %v8264_v20, %v6134_v19  ;;  %v5627_v38 = vor.u32 %v8132_v28, %v5624_v29 }
 0x14b   :  { %2592 = vmatpush.bf16.msrb.mxu2 %v5495_v43  ;;  %v8328_v23 = vld [vmem:[#allocation6 + $0x734] sm:$0xf0] }
 0x14c   :  { %2579 = vmatmul.bf16.vlgmr.msrb.gmra.mxu1 %v9144_v51  ;;  %v6646_v24 = vld [vmem:[#allocation6 + $0x918] sm:$0xf]  ;;  %v6391_v32 = vor.u32 %v8328_v23, %v6390_v21 }
 0x14d   :  { %2606 = vmatpush.bf16.msrb.mxu3 %v5751_v47  ;;  %2627 = vmatpush.bf16.msra.mxu1 %v6487_v49  ;;  %v8392_v25 = vld [vmem:[#allocation6 + $0x934] sm:$0xf0] }
 0x14e   :  { %2613 = vmatpush.bf16.msra.mxu0 %v6231_v48  ;;  %2593 = vmatmul.bf16.vlgmr.msrb.gmra.mxu2 %v9130_v39  ;;  %v6647_v33 = vor.u32 %v8392_v25, %v6646_v24  ;;  %v6102_v34 = vld [vmem:[#allocation6 + $0x4d8] sm:$0xf]  ;;  %v9195_v48 = vpop.f32.mrf.mxu3 }
 0x14f   :  { %2641 = vmatpush.bf16.msra.mxu2 %v6743_v52  ;;  %2565 = vmatmul.bf16.vlgmr.msrb.gmra.mxu0 %v9139_v9  ;;  %v8256_v36 = vld [vmem:[#allocation6 + $0x4f4] sm:$0xf0] }
 0x150   :  { %2607 = vmatmul.bf16.vlgmr.msrb.gmra.mxu3 %v9132_v46  ;;  %v6358_v37 = vld [vmem:[#allocation6 + $0x6d8] sm:$0xf]  ;;  %v6103_v47 = vor.u32 %v8256_v36, %v6102_v34  ;;  %v9203_v34 = vpop.f32.mrf.mxu0 }
 0x151   :  { %2655 = vmatpush.bf16.msra.mxu3 %v5723_v56  ;;  %2628 = vmatpush.bf16.msra.mxu1 %v6455_v1  ;;  %v8320_v40 = vld [vmem:[#allocation6 + $0x6f4] sm:$0xf0]  ;;  %v5595_v56 = vor.u32 %v8124_v44, %v5592_v45  ;;  %v8348_v44 = vld [vmem:[#allocation6 + $0x7dc] sm:$0xf] }
 0x152   :  { %2614 = vmatpush.bf16.msra.mxu0 %v6199_v63  ;;  %v6614_v42 = vld [vmem:[#allocation6 + $0x8d8] sm:$0xf]  ;;  %v6359_v49 = vor.u32 %v8320_v40, %v6358_v37  ;;  %v5560_v63 = vld [vmem:[#allocation6 + $0xb8] sm:$0xf0] }
 0x153   :  { %2642 = vmatpush.bf16.msra.mxu2 %v6711_v2  ;;  %v8384_v43 = vld [vmem:[#allocation6 + $0x8f4] sm:$0xf0]  ;;  %v9199_v2 = vpop.f32.mrf.mxu1  ;;  %v5563_v10 = vor.u32 %v8116_v62, %v5560_v63  ;;  %v8220_v37 = vld [vmem:[#allocation6 + $0x3dc] sm:$0xf] }
 0x154   :  { %v6615_v52 = vor.u32 %v8384_v43, %v6614_v42  ;;  %v6070_v53 = vld [vmem:[#allocation6 + $0x498] sm:$0xf]  ;;  %v8284_v40 = vld [vmem:[#allocation6 + $0x5dc] sm:$0xf] }
 0x155   :  { %2656 = vmatpush.bf16.msra.mxu3 %v5691_v7  ;;  %2629 = vmatpush.bf16.msra.mxu1 %v6423_v17  ;;  %v8248_v54 = vld [vmem:[#allocation6 + $0x4b4] sm:$0xf0]  ;;  %v8108_v17 = vld [vmem:[#allocation6 + $0x5c] sm:$0xf] }
 0x156   :  { %2615 = vmatpush.bf16.msra.mxu0 %v6167_v14  ;;  %v6326_v55 = vld [vmem:[#allocation6 + $0x698] sm:$0xf]  ;;  %v6071_v1 = vor.u32 %v8248_v54, %v6070_v53  ;;  %v9201_v14 = vpop.f32.mrf.mxu2  ;;  %v9205_v36 = vpop.f32.mrf.mxu3  ;;  %v6232_v43 = vld [vmem:[#allocation6 + $0x5f8] sm:$0xf0] }
 0x157   :  { %2643 = vmatpush.bf16.msra.mxu2 %v6679_v18  ;;  %v8312_v57 = vld [vmem:[#allocation6 + $0x6b4] sm:$0xf0]  ;;  %v5528_v18 = vld [vmem:[#allocation6 + $0x78] sm:$0xf0] }
 0x158   :  { %v6582_v58 = vld [vmem:[#allocation6 + $0x898] sm:$0xf]  ;;  %v6327_v3 = vor.u32 %v8312_v57, %v6326_v55  ;;  %v5531_v29 = vor.u32 %v8108_v17, %v5528_v18  ;;  %v6488_v45 = vld [vmem:[#allocation6 + $0x7f8] sm:$0xf0] }
 0x159   :  { %2657 = vmatpush.bf16.msra.mxu3 %v5659_v22  ;;  %2630 = vmatpush.bf16.msra.mxu1 %v6391_v32  ;;  %v8376_v59 = vld [vmem:[#allocation6 + $0x8b4] sm:$0xf0]  ;;  %v8100_v32 = vld [vmem:[#allocation6 + $0x1c] sm:$0xf] }
 0x15a   :  { %2616 = vmatpush.bf16.msra.mxu0 %v6135_v30  ;;  %v6583_v4 = vor.u32 %v8376_v59, %v6582_v58  ;;  %v6038_v5 = vld [vmem:[#allocation6 + $0x458] sm:$0xf]  ;;  %v6744_v53 = vld [vmem:[#allocation6 + $0x9f8] sm:$0xf0]  ;;  %v6235_v58 = vor.u32 %v8284_v40, %v6232_v43  ;;  %v6491_v59 = vor.u32 %v8348_v44, %v6488_v45 }
 0x15b   :  { %2644 = vmatpush.bf16.msra.mxu2 %v6647_v33  ;;  %v8240_v7 = vld [vmem:[#allocation6 + $0x474] sm:$0xf0]  ;;  %v5496_v33 = vld [vmem:[#allocation6 + $0x38] sm:$0xf0] }
 0x15c   :  { %v6294_v8 = vld [vmem:[#allocation6 + $0x658] sm:$0xf]  ;;  %v6039_v19 = vor.u32 %v8240_v7, %v6038_v5  ;;  %v5499_v54 = vor.u32 %v8100_v32, %v5496_v33  ;;  %v8212_v62 = vld [vmem:[#allocation6 + $0x39c] sm:$0xf] }
 0x15d   :  { %2658 = vmatpush.bf16.msra.mxu3 %v5627_v38  ;;  %2631 = vmatpush.bf16.msra.mxu1 %v6359_v49  ;;  %v8304_v11 = vld [vmem:[#allocation6 + $0x674] sm:$0xf0]  ;;  %v5976_v38 = vld [vmem:[#allocation6 + $0x3f8] sm:$0xf0] }
 0x15e   :  { %2617 = vmatpush.bf16.msra.mxu0 %v6103_v47  ;;  %v6550_v12 = vld [vmem:[#allocation6 + $0x858] sm:$0xf]  ;;  %v6295_v22 = vor.u32 %v8304_v11, %v6294_v8  ;;  %v5979_v55 = vor.u32 %v8220_v37, %v5976_v38  ;;  %v9209_v57 = vpop.f32.mrf.mxu2  ;;  %v5944_v63 = vld [vmem:[#allocation6 + $0x3b8] sm:$0xf0] }
 0x15f   :  { %2645 = vmatpush.bf16.msra.mxu2 %v6615_v52  ;;  %v8368_v13 = vld [vmem:[#allocation6 + $0x874] sm:$0xf0]  ;;  %v8412_v52 = vld [vmem:[#allocation6 + $0x9dc] sm:$0xf]  ;;  %v5947_v11 = vor.u32 %v8212_v62, %v5944_v63 }
 0x160   :  { %v6006_v20 = vld [vmem:[#allocation6 + $0x418] sm:$0xf]  ;;  %v6551_v23 = vor.u32 %v8368_v13, %v6550_v12  ;;  %v8340_v5 = vld [vmem:[#allocation6 + $0x79c] sm:$0xf]  ;;  %v9211_v12 = vpop.f32.mrf.mxu3 }
 0x161   :  { %2659 = vmatpush.bf16.msra.mxu3 %v5595_v56  ;;  %v8232_v21 = vld [vmem:[#allocation6 + $0x434] sm:$0xf0]  ;;  %2632 = vmatpush.bf16.msra.mxu1 %v6327_v3  ;;  %v9207_v56 = vpop.f32.mrf.mxu1  ;;  %v6747_v3 = vor.u32 %v8412_v52, %v6744_v53  ;;  %v6456_v7 = vld [vmem:[#allocation6 + $0x7b8] sm:$0xf0] }
 0x162   :  { %2618 = vmatpush.bf16.msra.mxu0 %v6071_v1  ;;  %v6262_v24 = vld [vmem:[#allocation6 + $0x618] sm:$0xf]  ;;  %v6007_v42 = vor.u32 %v8232_v21, %v6006_v20  ;;  %v8276_v1 = vld [vmem:[#allocation6 + $0x59c] sm:$0xf]  ;;  %v6459_v17 = vor.u32 %v8340_v5, %v6456_v7 }
 0x163   :  { %2646 = vmatpush.bf16.msra.mxu2 %v6583_v4  ;;  %v8296_v25 = vld [vmem:[#allocation6 + $0x634] sm:$0xf0]  ;;  %v6200_v4 = vld [vmem:[#allocation6 + $0x5b8] sm:$0xf0] }
 0x164   :  { %v6518_v28 = vld [vmem:[#allocation6 + $0x818] sm:$0xf]  ;;  %v6263_v47 = vor.u32 %v8296_v25, %v6262_v24  ;;  %v8404_v8 = vld [vmem:[#allocation6 + $0x99c] sm:$0xf]  ;;  %v6203_v13 = vor.u32 %v8276_v1, %v6200_v4  ;;  %v9214_v25 = vpop.f32.mrf.mxu0 }
 0x165   :  { %2660 = vmatpush.bf16.msra.mxu3 %v5563_v10  ;;  %v8360_v30 = vld [vmem:[#allocation6 + $0x834] sm:$0xf0]  ;;  %2633 = vmatpush.bf16.msra.mxu1 %v6295_v22  ;;  %v6712_v10 = vld [vmem:[#allocation6 + $0x9b8] sm:$0xf0] }
 0x166   :  { %2619 = vmatpush.bf16.msra.mxu0 %v6039_v19  ;;  %v6519_v49 = vor.u32 %v8360_v30, %v6518_v28  ;;  %v8204_v18 = vld [vmem:[#allocation6 + $0x35c] sm:$0xf]  ;;  %v6715_v21 = vor.u32 %v8404_v8, %v6712_v10 }
 0x167   :  { %2647 = vmatpush.bf16.msra.mxu2 %v6551_v23  ;;  %v5912_v19 = vld [vmem:[#allocation6 + $0x378] sm:$0xf0] }
 0x168   :  { %v8268_v20 = vld [vmem:[#allocation6 + $0x55c] sm:$0xf]  ;;  %v5915_v30 = vor.u32 %v8204_v18, %v5912_v19  ;;  %v9225_v7 = vpop.f32.mrf.mxu3 }
 0x169   :  { %2661 = vmatpush.bf16.msra.mxu3 %v5531_v29  ;;  %2634 = vmatpush.bf16.msra.mxu1 %v6263_v47  ;;  %v6168_v22 = vld [vmem:[#allocation6 + $0x578] sm:$0xf0]  ;;  %v9219_v47 = vpop.f32.mrf.mxu1 }
 0x16a   :  { %2620 = vmatpush.bf16.msra.mxu0 %v6007_v42  ;;  %v8332_v23 = vld [vmem:[#allocation6 + $0x75c] sm:$0xf]  ;;  %v6171_v32 = vor.u32 %v8268_v20, %v6168_v22 }
 0x16b   :  { %2648 = vmatpush.bf16.msra.mxu2 %v6519_v49  ;;  %v6424_v24 = vld [vmem:[#allocation6 + $0x778] sm:$0xf0]  ;;  %v9221_v49 = vpop.f32.mrf.mxu2 }
 0x16c   :  { %2635 = vmatmul.bf16.vlgmr.msra.gmra.mxu1 %v9139_v9  ;;  %v8396_v28 = vld [vmem:[#allocation6 + $0x95c] sm:$0xf]  ;;  %v6427_v33 = vor.u32 %v8332_v23, %v6424_v24  ;;  %v9223_v5 = vpop.f32.mrf.mxu0 }
 0x16d   :  { %2662 = vmatpush.bf16.msra.mxu3 %v5499_v54  ;;  %2683 = vmatpush.bf16.msrb.mxu1 %v6235_v58  ;;  %v6680_v29 = vld [vmem:[#allocation6 + $0x978] sm:$0xf0] }
 0x16e   :  { %2669 = vmatpush.bf16.msrb.mxu0 %v5979_v55  ;;  %2649 = vmatmul.bf16.vlgmr.msra.gmra.mxu2 %v9144_v51  ;;  %v8196_v37 = vld [vmem:[#allocation6 + $0x31c] sm:$0xf]  ;;  %v6683_v42 = vor.u32 %v8396_v28, %v6680_v29 }
 0x16f   :  { %2697 = vmatpush.bf16.msrb.mxu2 %v6491_v59  ;;  %2621 = vmatmul.bf16.vlgmr.msra.gmra.mxu0 %v9136_v6  ;;  %v5880_v38 = vld [vmem:[#allocation6 + $0x338] sm:$0xf0] }
 0x170   :  { %2663 = vmatmul.bf16.vlgmr.msra.gmra.mxu3 %v9130_v39  ;;  %v8260_v40 = vld [vmem:[#allocation6 + $0x51c] sm:$0xf]  ;;  %v5883_v39 = vor.u32 %v8196_v37, %v5880_v38 }
 0x171   :  { %2711 = vmatpush.bf16.msrb.mxu3 %v6747_v3  ;;  %2684 = vmatpush.bf16.msrb.mxu1 %v6203_v13  ;;  %v6136_v43 = vld [vmem:[#allocation6 + $0x538] sm:$0xf0]  ;;  %v9227_v28 = vpop.f32.mrf.mxu1 }
 0x172   :  { %2670 = vmatpush.bf16.msrb.mxu0 %v5947_v11  ;;  %v8324_v44 = vld [vmem:[#allocation6 + $0x71c] sm:$0xf]  ;;  %v6139_v54 = vor.u32 %v8260_v40, %v6136_v43 }
 0x173   :  { %2698 = vmatpush.bf16.msrb.mxu2 %v6459_v17  ;;  %v6392_v45 = vld [vmem:[#allocation6 + $0x738] sm:$0xf0] }
 0x174   :  { %v8388_v52 = vld [vmem:[#allocation6 + $0x91c] sm:$0xf]  ;;  %v6395_v55 = vor.u32 %v8324_v44, %v6392_v45 }
 0x175   :  { %2712 = vmatpush.bf16.msrb.mxu3 %v6715_v21  ;;  %v6648_v53 = vld [vmem:[#allocation6 + $0x938] sm:$0xf0]  ;;  %2685 = vmatpush.bf16.msrb.mxu1 %v6171_v32 }
 0x176   :  { %2671 = vmatpush.bf16.msrb.mxu0 %v5915_v30  ;;  %v8188_v58 = vld [vmem:[#allocation6 + $0x2dc] sm:$0xf]  ;;  %v6651_v63 = vor.u32 %v8388_v52, %v6648_v53 }
 0x177   :  { %2699 = vmatpush.bf16.msrb.mxu2 %v6427_v33  ;;  %v5848_v59 = vld [vmem:[#allocation6 + $0x2f8] sm:$0xf0]  ;;  %v9229_v33 = vpop.f32.mrf.mxu2 }
 0x178   :  { %v8252_v62 = vld [vmem:[#allocation6 + $0x4dc] sm:$0xf]  ;;  %v5851_v11 = vor.u32 %v8188_v58, %v5848_v59 }
 0x179   :  { %2713 = vmatpush.bf16.msrb.mxu3 %v6683_v42  ;;  %v6104_v1 = vld [vmem:[#allocation6 + $0x4f8] sm:$0xf0]  ;;  %2686 = vmatpush.bf16.msrb.mxu1 %v6139_v54 }
 0x17a   :  { %v8316_v3 = vld [vmem:[#allocation6 + $0x6dc] sm:$0xf]  ;;  %2672 = vmatpush.bf16.msrb.mxu0 %v5883_v39  ;;  %v6107_v13 = vor.u32 %v8252_v62, %v6104_v1  ;;  %v9231_v39 = vpop.f32.mrf.mxu3 }
 0x17b   :  { %v6360_v4 = vld [vmem:[#allocation6 + $0x6f8] sm:$0xf0]  ;;  %2700 = vmatpush.bf16.msrb.mxu2 %v6395_v55 }
 0x17c   :  { %v8380_v8 = vld [vmem:[#allocation6 + $0x8dc] sm:$0xf]  ;;  %v6363_v17 = vor.u32 %v8316_v3, %v6360_v4 }
 0x17d   :  { %v6616_v10 = vld [vmem:[#allocation6 + $0x8f8] sm:$0xf0]  ;;  %2714 = vmatpush.bf16.msrb.mxu3 %v6651_v63  ;;  %2687 = vmatpush.bf16.msrb.mxu1 %v6107_v13  ;;  %v9233_v63 = vpop.f32.mrf.mxu0 }
 0x17e   :  { %v8180_v18 = vld [vmem:[#allocation6 + $0x29c] sm:$0xf]  ;;  %v6619_v21 = vor.u32 %v8380_v8, %v6616_v10  ;;  %2673 = vmatpush.bf16.msrb.mxu0 %v5851_v11 }
 0x17f   :  { %v5816_v19 = vld [vmem:[#allocation6 + $0x2b8] sm:$0xf0]  ;;  %2701 = vmatpush.bf16.msrb.mxu2 %v6363_v17 }
 0x180   :  { %v8244_v20 = vld [vmem:[#allocation6 + $0x49c] sm:$0xf]  ;;  %v5819_v32 = vor.u32 %v8180_v18, %v5816_v19  ;;  %v6862_v19 = vld [vmem:[#allocation9 + $0xe0] sm:$0xf] }
 0x181   :  { %v6072_v22 = vld [vmem:[#allocation6 + $0x4b8] sm:$0xf0]  ;;  %2715 = vmatpush.bf16.msrb.mxu3 %v6619_v21  ;;  %v6990_v21 = vld [vmem:[#allocation9 + $0x1e0] sm:$0xf] }
 0x182   :  { %v8308_v23 = vld [vmem:[#allocation6 + $0x69c] sm:$0xf]  ;;  %v6075_v37 = vor.u32 %v8244_v20, %v6072_v22  ;;  %2674 = vmatpush.bf16.msrb.mxu0 %v5819_v32  ;;  %v8447_v20 = vld [vmem:[#allocation9 + $0xec] sm:$0xf0] }
 0x183   :  { %v6328_v24 = vld [vmem:[#allocation6 + $0x6b8] sm:$0xf0] }
 0x184   :  { %v8372_v29 = vld [vmem:[#allocation6 + $0x89c] sm:$0xf]  ;;  %v6331_v38 = vor.u32 %v8308_v23, %v6328_v24  ;;  %2688 = vmatpush.bf16.msrb.mxu1 %v6075_v37  ;;  %v8479_v23 = vld [vmem:[#allocation9 + $0x1ec] sm:$0xf0]  ;;  %v7118_v24 = vld [vmem:[#allocation9 + $0x2e0] sm:$0xf] }
 0x185   :  { %v6584_v30 = vld [vmem:[#allocation6 + $0x8b8] sm:$0xf0] }
 0x186   :  { %v8172_v40 = vld [vmem:[#allocation6 + $0x25c] sm:$0xf]  ;;  %v6587_v44 = vor.u32 %v8372_v29, %v6584_v30  ;;  %2702 = vmatpush.bf16.msrb.mxu2 %v6331_v38  ;;  %v8511_v29 = vld [vmem:[#allocation9 + $0x2ec] sm:$0xf0]  ;;  %v9235_v30 = vpop.f32.mrf.mxu1  ;;  %v7246_v38 = vld [vmem:[#allocation9 + $0x3e0] sm:$0xf] }
 0x187   :  { %v5784_v42 = vld [vmem:[#allocation6 + $0x278] sm:$0xf0] }
 0x188   :  { %v8236_v43 = vld [vmem:[#allocation6 + $0x45c] sm:$0xf]  ;;  %v5787_v58 = vor.u32 %v8172_v40, %v5784_v42  ;;  %2716 = vmatpush.bf16.msrb.mxu3 %v6587_v44  ;;  %v8543_v40 = vld [vmem:[#allocation9 + $0x3ec] sm:$0xf0]  ;;  %v9237_v44 = vpop.f32.mrf.mxu2 }
 0x189   :  { %v6040_v45 = vld [vmem:[#allocation6 + $0x478] sm:$0xf0] }
 0x18a   :  { %v8300_v52 = vld [vmem:[#allocation6 + $0x65c] sm:$0xf]  ;;  %v6043_v1 = vor.u32 %v8236_v43, %v6040_v45  ;;  %2675 = vmatpush.bf16.msrb.mxu0 %v5787_v58  ;;  %v6863_v43 = vor.u32 %v8447_v20, %v6862_v19  ;;  %v6991_v45 = vor.u32 %v8479_v23, %v6990_v21  ;;  %v7247_v58 = vor.u32 %v8543_v40, %v7246_v38  ;;  %v8439_v20 = vld [vmem:[#allocation9 + $0xac] sm:$0xf0]  ;;  %v6958_v21 = vld [vmem:[#allocation9 + $0x1a0] sm:$0xf] }
 0x18b   :  { %v6296_v53 = vld [vmem:[#allocation6 + $0x678] sm:$0xf0]  ;;  %v8471_v23 = vld [vmem:[#allocation9 + $0x1ac] sm:$0xf0] }
 0x18c   :  { %v8364_v54 = vld [vmem:[#allocation6 + $0x85c] sm:$0xf]  ;;  %v6299_v3 = vor.u32 %v8300_v52, %v6296_v53  ;;  %2689 = vmatpush.bf16.msrb.mxu1 %v6043_v1  ;;  %v7119_v52 = vor.u32 %v8511_v29, %v7118_v24  ;;  %v6846_v53 = vld [vmem:[#allocation9 + $0xc0] sm:$0xf]  ;;  %v8507_v1 = vld [vmem:[#allocation9 + $0x2cc] sm:$0xf0] }
 0x18d   :  { %v6552_v55 = vld [vmem:[#allocation6 + $0x878] sm:$0xf0]  ;;  %v7086_v24 = vld [vmem:[#allocation9 + $0x2a0] sm:$0xf]  ;;  %v8503_v29 = vld [vmem:[#allocation9 + $0x2ac] sm:$0xf0] }
 0x18e   :  { %v8164_v59 = vld [vmem:[#allocation6 + $0x21c] sm:$0xf]  ;;  %v6555_v11 = vor.u32 %v8364_v54, %v6552_v55  ;;  %2703 = vmatpush.bf16.msrb.mxu2 %v6299_v3  ;;  %v8443_v54 = vld [vmem:[#allocation9 + $0xcc] sm:$0xf0]  ;;  %v6974_v55 = vld [vmem:[#allocation9 + $0x1c0] sm:$0xf]  ;;  %v2177_v3 = vadd.f32 %v9177_v41, %v523_v35  ;;  %v9252_v40 = vpop.f32.mrf.mxu1 }
 0x18f   :  { %v5752_v62 = vld [vmem:[#allocation6 + $0x238] sm:$0xf0]  ;;  %v6847_v19 = vor.u32 %v8443_v54, %v6846_v53  ;;  %v6830_v41 = vld [vmem:[#allocation9 + $0xa0] sm:$0xf] }
 0x190   :  { %v8228_v4 = vld [vmem:[#allocation6 + $0x41c] sm:$0xf]  ;;  %v5755_v22 = vor.u32 %v8164_v59, %v5752_v62  ;;  %2717 = vmatpush.bf16.msrb.mxu3 %v6555_v11  ;;  %v8475_v59 = vld [vmem:[#allocation9 + $0x1cc] sm:$0xf0]  ;;  %v7102_v62 = vld [vmem:[#allocation9 + $0x2c0] sm:$0xf]  ;;  %v9245_v11 = vpop.f32.mrf.mxu0 }
 0x191   :  { %v6008_v8 = vld [vmem:[#allocation6 + $0x438] sm:$0xf0]  ;;  %v6975_v27 = vor.u32 %v8475_v59, %v6974_v55  ;;  %v7103_v35 = vor.u32 %v8507_v1, %v7102_v62  ;;  %v6814_v53 = vld [vmem:[#allocation9 + $0x80] sm:$0xf]  ;;  %v8467_v55 = vld [vmem:[#allocation9 + $0x18c] sm:$0xf0] }
 0x192   :  { %v8292_v10 = vld [vmem:[#allocation6 + $0x61c] sm:$0xf]  ;;  %v6011_v32 = vor.u32 %v8228_v4, %v6008_v8  ;;  %2676 = vmatpush.bf16.msrb.mxu0 %v5755_v22  ;;  %v9242_v4 = vld [vmem:[#allocation8] sm:$0xff]  ;;  %v6942_v54 = vld [vmem:[#allocation9 + $0x180] sm:$0xf] }
 0x193   :  { %v6264_v13 = vld [vmem:[#allocation6 + $0x638] sm:$0xf0]  ;;  %v524_v8 = vperm.slane %v9242_v4, 1  ;;  %v7198_v1 = vld [vmem:[#allocation9 + $0x380] sm:$0xf] }
 0x194   :  { %v8356_v17 = vld [vmem:[#allocation6 + $0x81c] sm:$0xf]  ;;  %v6267_v37 = vor.u32 %v8292_v10, %v6264_v13  ;;  %v2386_v10 = vpop.f32.mrf.mxu3  ;;  %2690 = vmatpush.bf16.msrb.mxu1 %v6011_v32  ;;  %v7230_v13 = vld [vmem:[#allocation9 + $0x3c0] sm:$0xf]  ;;  %v2191_v32 = vadd.f32 %v9179_v60, %v2177_v3  ;;  %v6831_v60 = vor.u32 %v8439_v20, %v6830_v41  ;;  %v8531_v3 = vld [vmem:[#allocation9 + $0x38c] sm:$0xf0] }
 0x195   :  { %v6520_v18 = vld [vmem:[#allocation6 + $0x838] sm:$0xf0]  ;;  %2677 = vmatmul.bf16.vlgmr.msrb.gmra.mxu0 %v9132_v46  ;;  %v2247_v38 = vadd.f32 %v9199_v2, %v524_v8  ;;  %v7087_v2 = vor.u32 %v8503_v29, %v7086_v24  ;;  %v6798_v20 = vld [vmem:[#allocation9 + $0x60] sm:$0xf]  ;;  %v8527_v29 = vld [vmem:[#allocation9 + $0x36c] sm:$0xf0] }
 0x196   :  { %v6523_v42 = vor.u32 %v8356_v17, %v6520_v18  ;;  %2704 = vmatpush.bf16.msrb.mxu2 %v6267_v37  ;;  %v8539_v17 = vld [vmem:[#allocation9 + $0x3cc] sm:$0xf0]  ;;  %v525_v18 = vperm.slane %v9242_v4, 2  ;;  %4295 = vmatpush.bf16.msra.mxu0 %v6863_v43  ;;  %v2245_v37 = vadd.f32 %v9191_v26, %v524_v8  ;;  %v6959_v26 = vor.u32 %v8471_v23, %v6958_v21  ;;  %v6926_v21 = vld [vmem:[#allocation9 + $0x160] sm:$0xf] }
 0x197   :  { %v7231_v22 = vor.u32 %v8539_v17, %v7230_v13  ;;  %2691 = vmatmul.bf16.vlgmr.msrb.gmra.mxu1 %v9136_v6  ;;  %v8535_v43 = vld [vmem:[#allocation9 + $0x3ac] sm:$0xf0]  ;;  %v2205_v59 = vadd.f32 %v9181_v0, %v2191_v32  ;;  %v2261_v62 = vadd.f32 %v9201_v14, %v2247_v38  ;;  %v6943_v0 = vor.u32 %v8467_v55, %v6942_v54  ;;  %v7182_v24 = vld [vmem:[#allocation9 + $0x360] sm:$0xf] }
 0x198   :  { %2718 = vmatpush.bf16.msrb.mxu3 %v6523_v42  ;;  %4309 = vmatpush.bf16.msra.mxu1 %v6991_v45  ;;  %v7214_v42 = vld [vmem:[#allocation9 + $0x3a0] sm:$0xf]  ;;  %v2315_v46 = vadd.f32 %v9209_v57, %v525_v18  ;;  %v526_v45 = vperm.slane %v9242_v4, 3  ;;  %v8435_v6 = vld [vmem:[#allocation9 + $0x8c] sm:$0xf0]  ;;  %v2317_v8 = vadd.f32 %v9221_v49, %v525_v18 }
 0x199   :  { %2705 = vmatmul.bf16.vlgmr.msrb.gmra.mxu2 %v9139_v9  ;;  %v7215_v9 = vor.u32 %v8535_v43, %v7214_v42  ;;  %v8499_v57 = vld [vmem:[#allocation9 + $0x28c] sm:$0xf0]  ;;  %v7054_v18 = vld [vmem:[#allocation9 + $0x260] sm:$0xf] }
 0x19a   :  { %4323 = vmatpush.bf16.msra.mxu2 %v7119_v52  ;;  %4296 = vmatpush.bf16.msra.mxu0 %v6847_v19  ;;  %v9259_v52 = vpop.f32.mrf.mxu2  ;;  %v2329_v13 = vadd.f32 %v9211_v12, %v2315_v46  ;;  %v2387_v17 = vadd.f32 %v2386_v10, %v526_v45  ;;  %v6815_v19 = vor.u32 %v8435_v6, %v6814_v53  ;;  %v8431_v14 = vld [vmem:[#allocation9 + $0x6c] sm:$0xf0]  ;;  %v2414_v46 = vpop.f32.mrf.mxu1  ;;  %v7038_v53 = vld [vmem:[#allocation9 + $0x240] sm:$0xf] }
 0x19b   :  { %2719 = vmatmul.bf16.vlgmr.msrb.gmra.mxu3 %v9144_v51  ;;  %v2259_v51 = vadd.f32 %v9193_v31, %v2245_v37  ;;  %v8463_v49 = vld [vmem:[#allocation9 + $0x16c] sm:$0xf0]  ;;  %v2219_v10 = vadd.f32 %v9189_v16, %v2205_v59  ;;  %v2331_v37 = vadd.f32 %v9225_v7, %v2317_v8  ;;  %v6799_v42 = vor.u32 %v8431_v14, %v6798_v20  ;;  %v7166_v55 = vld [vmem:[#allocation9 + $0x340] sm:$0xf] }
 0x19c   :  { %4337 = vmatpush.bf16.msra.mxu3 %v7247_v58  ;;  %4310 = vmatpush.bf16.msra.mxu1 %v6975_v27  ;;  %v7070_v58 = vld [vmem:[#allocation9 + $0x280] sm:$0xf]  ;;  %v2385_v27 = vadd.f32 %v9231_v39, %v526_v45  ;;  %v9267_v41 = vpop.f32.mrf.mxu3  ;;  %v8495_v12 = vld [vmem:[#allocation9 + $0x26c] sm:$0xf0]  ;;  %v2275_v39 = vadd.f32 %v9205_v36, %v2261_v62  ;;  %v2343_v32 = vadd.f32 %v9223_v5, %v2329_v13 }
 0x19d   :  { %v7071_v31 = vor.u32 %v8499_v57, %v7070_v58  ;;  %v2273_v23 = vadd.f32 %v9195_v48, %v2259_v51  ;;  %v6927_v45 = vor.u32 %v8463_v49, %v6926_v21  ;;  %v7055_v16 = vor.u32 %v8495_v12, %v7054_v18  ;;  %v8427_v48 = vld [vmem:[#allocation9 + $0x4c] sm:$0xf0]  ;;  %v6750_v49 = vld [vmem:[#allocation9] sm:$0xf] }
 0x19e   :  { %4324 = vmatpush.bf16.msra.mxu2 %v7103_v35  ;;  %4297 = vmatpush.bf16.msra.mxu0 %v6831_v60  ;;  %v2400_v35 = vpop.f32.mrf.mxu0  ;;  %v2399_v43 = vadd.f32 %v9245_v11, %v2385_v27  ;;  %v6782_v60 = vld [vmem:[#allocation9 + $0x40] sm:$0xf]  ;;  %v7183_v36 = vor.u32 %v8527_v29, %v7182_v24  ;;  %v8491_v5 = vld [vmem:[#allocation9 + $0x24c] sm:$0xf0]  ;;  %v9277_v7 = vadd.f32 %v9187_v15, %v9171_v50 }
 0x19f   :  { %v2401_v38 = vadd.f32 %v2400_v35, %v2387_v17  ;;  %v9280_v6 = vadd.f32 %v9197_v61, %v2219_v10  ;;  %v2287_v11 = vadd.f32 %v9203_v34, %v2273_v23  ;;  %v2289_v54 = vadd.f32 %v9214_v25, %v2275_v39  ;;  %v8523_v58 = vld [vmem:[#allocation9 + $0x34c] sm:$0xf0]  ;;  %v7022_v17 = vld [vmem:[#allocation9 + $0x220] sm:$0xf] }
 0x1a0   :  { %4338 = vmatpush.bf16.msra.mxu3 %v7231_v22  ;;  %4311 = vmatpush.bf16.msra.mxu1 %v6959_v26  ;;  %v7199_v22 = vor.u32 %v8531_v3, %v7198_v1  ;;  %v6910_v26 = vld [vmem:[#allocation9 + $0x140] sm:$0xf]  ;;  %v2357_v57 = vadd.f32 %v9227_v28, %v2343_v32  ;;  %v2345_v59 = vadd.f32 %v9233_v63, %v2331_v37  ;;  %v8423_v34 = vld [vmem:[#allocation9 + $0x2c] sm:$0xf0] }
 0x1a1   :  { %v2415_v51 = vadd.f32 %v2414_v46, %v2401_v38  ;;  %v6783_v62 = vor.u32 %v8427_v48, %v6782_v60  ;;  %v2413_v50 = vadd.f32 %v9252_v40, %v2399_v43  ;;  %v7039_v61 = vor.u32 %v8491_v5, %v7038_v53  ;;  %v6766_v1 = vld [vmem:[#allocation9 + $0x20] sm:$0xf]  ;;  %v8455_v28 = vld [vmem:[#allocation9 + $0x12c] sm:$0xf0] }
 0x1a2   :  { %4325 = vmatpush.bf16.msra.mxu2 %v7087_v2  ;;  %4298 = vmatpush.bf16.msra.mxu0 %v6815_v19  ;;  %v8459_v2 = vld [vmem:[#allocation9 + $0x14c] sm:$0xf0]  ;;  %v6894_v3 = vld [vmem:[#allocation9 + $0x120] sm:$0xf]  ;;  %v7167_v8 = vor.u32 %v8523_v58, %v7166_v55  ;;  %v2725_v19 = vmax.f32 %v9277_v7, 0.0  ;;  %v2733_v27 = vmax.f32 %v9280_v6, 0.0  ;;  %v2301_v40 = vadd.f32 %v9207_v56, %v2287_v11  ;;  %v2468_v7 = vpop.f32.mrf.mxu1 }
 0x1a3   :  { %v6911_v15 = vor.u32 %v8459_v2, %v6910_v26  ;;  %v8487_v63 = vld [vmem:[#allocation9 + $0x22c] sm:$0xf0]  ;;  %v2303_v20 = vadd.f32 %v9219_v47, %v2289_v54  ;;  %v2371_v14 = vadd.f32 %v9229_v33, %v2357_v57  ;;  %v2359_v21 = vadd.f32 %v9235_v30, %v2345_v59  ;;  %v6878_v56 = vld [vmem:[#allocation9 + $0x100] sm:$0xf] }
 0x1a4   :  { %4339 = vmatpush.bf16.msra.mxu3 %v7215_v9  ;;  %4312 = vmatpush.bf16.msra.mxu1 %v6943_v0  ;;  %v2428_v9 = vpop.f32.mrf.mxu2  ;;  %v2442_v35 = vpop.f32.mrf.mxu3  ;;  %v7150_v0 = vld [vmem:[#allocation9 + $0x320] sm:$0xf]  ;;  %v2427_v18 = vadd.f32 %v9259_v52, %v2413_v50  ;;  %v6895_v12 = vor.u32 %v8455_v28, %v6894_v3  ;;  %v7023_v10 = vor.u32 %v8487_v63, %v7022_v17  ;;  %v8419_v23 = vld [vmem:[#allocation9 + $0xc] sm:$0xf0]  ;;  %v2726_v43 = vmax.f32 %v2301_v40, 0.0 }
 0x1a5   :  { %v2429_v25 = vadd.f32 %v2428_v9, %v2415_v51  ;;  %v8451_v39 = vld [vmem:[#allocation9 + $0x10c] sm:$0xf0]  ;;  %v2373_v24 = vadd.f32 %v9237_v44, %v2359_v21  ;;  %v7006_v33 = vld [vmem:[#allocation9 + $0x200] sm:$0xf]  ;;  %v2734_v52 = vmax.f32 %v2303_v20, 0.0  ;;  %v6751_v46 = vor.u32 %v8419_v23, %v6750_v49 }
 0x1a6   :  { %4326 = vmatpush.bf16.msra.mxu2 %v7071_v31  ;;  %4299 = vmatpush.bf16.msra.mxu0 %v6799_v42  ;;  %v9287_v13 = vpop.f32.mrf.mxu0  ;;  %v8519_v31 = vld [vmem:[#allocation9 + $0x32c] sm:$0xf0]  ;;  %v7134_v30 = vld [vmem:[#allocation9 + $0x300] sm:$0xf]  ;;  %v2727_v60 = vmax.f32 %v2371_v14, 0.0  ;;  %v2441_v48 = vadd.f32 %v9267_v41, %v2427_v18  ;;  %v6879_v44 = vor.u32 %v8451_v39, %v6878_v56  ;;  %v9298_v41 = vpack.c.bf16 %v2733_v27, %v2725_v19 }
 0x1a7   :  { %v2443_v29 = vadd.f32 %v2442_v35, %v2429_v25  ;;  %v7151_v47 = vor.u32 %v8519_v31, %v7150_v0  ;;  %v8483_v32 = vld [vmem:[#allocation9 + $0x20c] sm:$0xf0]  ;;  %v7374_v38 = vld [vmem:[#allocation9 + $0x4e0] sm:$0xf]  ;;  %v9300_v50 = vpack.c.bf16 %v2734_v52, %v2726_v43 }
 0x1a8   :  { %4340 = vmatpush.bf16.msra.mxu3 %v7199_v22  ;;  %4313 = vmatpush.bf16.msra.mxu1 %v6927_v45  ;;  %v6767_v22 = vor.u32 %v8423_v34, %v6766_v1  ;;  %v8515_v37 = vld [vmem:[#allocation9 + $0x30c] sm:$0xf0]  ;;  %v7502_v45 = vld [vmem:[#allocation9 + $0x5e0] sm:$0xf]  ;;  %v7007_v26 = vor.u32 %v8483_v32, %v7006_v33  ;;  %v2728_v51 = vmax.f32 %v2441_v48, 0.0 }
 0x1a9   :  { %v8575_v42 = vld [vmem:[#allocation9 + $0x4ec] sm:$0xf0]  ;;  %v2736_v2 = vmax.f32 %v2443_v29, 0.0  ;;  %v7135_v53 = vor.u32 %v8515_v37, %v7134_v30  ;;  %v7358_v11 = vld [vmem:[#allocation9 + $0x4c0] sm:$0xf] }
 0x1aa   :  { %4327 = vmatpush.bf16.msra.mxu2 %v7055_v16  ;;  %4300 = vmatpush.bf16.msra.mxu0 %v6783_v62  ;;  %v8607_v16 = vld [vmem:[#allocation9 + $0x5ec] sm:$0xf0]  ;;  %v7375_v5 = vor.u32 %v8575_v42, %v7374_v38  ;;  %v7486_v9 = vld [vmem:[#allocation9 + $0x5c0] sm:$0xf] }
 0x1ab   :  { %v7503_v6 = vor.u32 %v8607_v16, %v7502_v45  ;;  %v8571_v54 = vld [vmem:[#allocation9 + $0x4cc] sm:$0xf0]  ;;  %v7630_v57 = vld [vmem:[#allocation9 + $0x6e0] sm:$0xf]  ;;  %v9305_v3 = vpack.c.bf16 %v2736_v2, %v2728_v51 }
 0x1ac   :  { %4341 = vmatpush.bf16.msra.mxu3 %v7183_v36  ;;  %4314 = vmatpush.bf16.msra.mxu1 %v6911_v15  ;;  %v2735_v36 = vmax.f32 %v2373_v24, 0.0  ;;  %v8603_v58 = vld [vmem:[#allocation9 + $0x5cc] sm:$0xf0]  ;;  %v7359_v1 = vor.u32 %v8571_v54, %v7358_v11  ;;  %v2482_v34 = vpop.f32.mrf.mxu2  ;;  %v7470_v17 = vld [vmem:[#allocation9 + $0x5a0] sm:$0xf]  ;;  %v2496_v0 = vpop.f32.mrf.mxu3 }
 0x1ad   :  { %v8639_v59 = vld [vmem:[#allocation9 + $0x6ec] sm:$0xf0]  ;;  %v7487_v25 = vor.u32 %v8603_v58, %v7486_v9  ;;  %v7614_v19 = vld [vmem:[#allocation9 + $0x6c0] sm:$0xf] }
 0x1ae   :  { %4328 = vmatpush.bf16.msra.mxu2 %v7039_v61  ;;  %4301 = vmatpush.bf16.msra.mxu0 %v6767_v22  ;;  %v2456_v55 = vpop.f32.mrf.mxu0  ;;  %v7631_v62 = vor.u32 %v8639_v59, %v7630_v57  ;;  %v9302_v15 = vpack.c.bf16 %v2735_v36, %v2727_v60  ;;  %v527_v61 = vperm.slane %v9242_v4, 4  ;;  %v8567_v28 = vld [vmem:[#allocation9 + $0x4ac] sm:$0xf0]  ;;  %v7326_v21 = vld [vmem:[#allocation9 + $0x480] sm:$0xf] }
 0x1af   :  { %v8599_v63 = vld [vmem:[#allocation9 + $0x5ac] sm:$0xf0]  ;;  %v7454_v49 = vld [vmem:[#allocation9 + $0x580] sm:$0xf] }
 0x1b0   :  { %4342 = vmatpush.bf16.msra.mxu3 %v7167_v8  ;;  %4315 = vmatpush.bf16.msra.mxu1 %v6895_v12  ;;  %v7342_v8 = vld [vmem:[#allocation9 + $0x4a0] sm:$0xf]  ;;  %v8635_v27 = vld [vmem:[#allocation9 + $0x6cc] sm:$0xf0]  ;;  %v2455_v31 = vadd.f32 %v9287_v13, %v527_v61  ;;  %v2457_v20 = vadd.f32 %v2456_v55, %v527_v61  ;;  %v7471_v14 = vor.u32 %v8599_v63, %v7470_v17  ;;  %v2470_v12 = vpop.f32.mrf.mxu1 }
 0x1b1   :  { %v7615_v40 = vor.u32 %v8635_v27, %v7614_v19  ;;  %v7343_v35 = vor.u32 %v8567_v28, %v7342_v8  ;;  %v8563_v22 = vld [vmem:[#allocation9 + $0x48c] sm:$0xf0]  ;;  %v7310_v13 = vld [vmem:[#allocation9 + $0x460] sm:$0xf] }
 0x1b2   :  { %4329 = vmatpush.bf16.msra.mxu2 %v7023_v10  ;;  %4302 = vmatpush.bf16.msra.mxu0 %v6751_v46  ;;  %v8595_v18 = vld [vmem:[#allocation9 + $0x58c] sm:$0xf0]  ;;  %v7598_v10 = vld [vmem:[#allocation9 + $0x6a0] sm:$0xf]  ;;  %v7327_v24 = vor.u32 %v8563_v22, %v7326_v21  ;;  %v2469_v29 = vadd.f32 %v2468_v7, %v2455_v31  ;;  %v2471_v33 = vadd.f32 %v2470_v12, %v2457_v20  ;;  %v6992_v21 = vld [vmem:[#allocation9 + $0x1f0] sm:$0xf0] }
 0x1b3   :  { %v8631_v23 = vld [vmem:[#allocation9 + $0x6ac] sm:$0xf0]  ;;  %v7438_v30 = vld [vmem:[#allocation9 + $0x560] sm:$0xf] }
 0x1b4   :  { %4343 = vmatpush.bf16.msra.mxu3 %v7151_v47  ;;  %4316 = vmatpush.bf16.msra.mxu1 %v6879_v44  ;;  %v7599_v56 = vor.u32 %v8631_v23, %v7598_v10  ;;  %v7455_v47 = vor.u32 %v8595_v18, %v7454_v49  ;;  %v8559_v32 = vld [vmem:[#allocation9 + $0x46c] sm:$0xf0]  ;;  %v2484_v37 = vpop.f32.mrf.mxu2  ;;  %v7582_v42 = vld [vmem:[#allocation9 + $0x680] sm:$0xf]  ;;  %v2483_v45 = vadd.f32 %v2482_v34, %v2469_v29  ;;  %v2498_v36 = vpop.f32.mrf.mxu3  ;;  %v528_v49 = vperm.slane %v9242_v4, 5 }
 0x1b5   :  { %4303 = vmatmul.bf16.vlgmr.msra.gmra.mxu0 %v9298_v41  ;;  %v8591_v38 = vld [vmem:[#allocation9 + $0x56c] sm:$0xf0]  ;;  %v7311_v46 = vor.u32 %v8559_v32, %v7310_v13  ;;  %v2485_v16 = vadd.f32 %v2484_v37, %v2471_v33  ;;  %v7294_v48 = vld [vmem:[#allocation9 + $0x440] sm:$0xf]  ;;  %v8473_v33 = vld [vmem:[#allocation9 + $0x1c4] sm:$0xf] }
 0x1b6   :  { %4330 = vmatpush.bf16.msra.mxu2 %v7007_v26  ;;  %4351 = vmatpush.bf16.msrb.mxu0 %v7375_v5  ;;  %v2510_v39 = vpop.f32.mrf.mxu0  ;;  %v8627_v43 = vld [vmem:[#allocation9 + $0x68c] sm:$0xf0]  ;;  %v7439_v60 = vor.u32 %v8591_v38, %v7438_v30  ;;  %v7422_v26 = vld [vmem:[#allocation9 + $0x540] sm:$0xf]  ;;  %v2497_v11 = vadd.f32 %v2496_v0, %v2483_v45  ;;  %v6864_v0 = vld [vmem:[#allocation9 + $0xf0] sm:$0xf0] }
 0x1b7   :  { %4317 = vmatmul.bf16.vlgmr.msra.gmra.mxu1 %v9300_v50  ;;  %v7583_v52 = vor.u32 %v8627_v43, %v7582_v42  ;;  %v8555_v44 = vld [vmem:[#allocation9 + $0x44c] sm:$0xf0]  ;;  %v2499_v54 = vadd.f32 %v2498_v36, %v2485_v16  ;;  %v7278_v55 = vld [vmem:[#allocation9 + $0x420] sm:$0xf]  ;;  %v6976_v30 = vld [vmem:[#allocation9 + $0x1d0] sm:$0xf0] }
 0x1b8   :  { %4344 = vmatpush.bf16.msra.mxu3 %v7135_v53  ;;  %4365 = vmatpush.bf16.msrb.mxu1 %v7503_v6  ;;  %v8587_v2 = vld [vmem:[#allocation9 + $0x54c] sm:$0xf0]  ;;  %v7566_v53 = vld [vmem:[#allocation9 + $0x660] sm:$0xf]  ;;  %v7295_v6 = vor.u32 %v8555_v44, %v7294_v48  ;;  %v2511_v17 = vadd.f32 %v2510_v39, %v2497_v11  ;;  %v8441_v39 = vld [vmem:[#allocation9 + $0xc4] sm:$0xf] }
 0x1b9   :  { %4331 = vmatmul.bf16.vlgmr.msra.gmra.mxu2 %v9302_v15  ;;  %v8623_v5 = vld [vmem:[#allocation9 + $0x66c] sm:$0xf0]  ;;  %v7423_v9 = vor.u32 %v8587_v2, %v7422_v26  ;;  %v7406_v57 = vld [vmem:[#allocation9 + $0x520] sm:$0xf]  ;;  %v8509_v38 = vld [vmem:[#allocation9 + $0x2e4] sm:$0xf]  ;;  %v6979_v26 = vor.u32 %v8473_v33, %v6976_v30 }
 0x1ba   :  { %4379 = vmatpush.bf16.msrb.mxu2 %v7631_v62  ;;  %4352 = vmatpush.bf16.msrb.mxu0 %v7359_v1  ;;  %v7567_v7 = vor.u32 %v8623_v5, %v7566_v53  ;;  %v8551_v58 = vld [vmem:[#allocation9 + $0x42c] sm:$0xf0]  ;;  %v2524_v62 = vpop.f32.mrf.mxu1  ;;  %v7550_v61 = vld [vmem:[#allocation9 + $0x640] sm:$0xf]  ;;  %v2729_v12 = vmax.f32 %v2511_v17, 0.0 }
 0x1bb   :  { %4345 = vmatmul.bf16.vlgmr.msra.gmra.mxu3 %v9305_v3  ;;  %v8583_v51 = vld [vmem:[#allocation9 + $0x52c] sm:$0xf0]  ;;  %v7262_v8 = vld [vmem:[#allocation9 + $0x400] sm:$0xf]  ;;  %v7120_v42 = vld [vmem:[#allocation9 + $0x2f0] sm:$0xf0]  ;;  %v2525_v43 = vadd.f32 %v2524_v62, %v528_v49 }
 0x1bc   :  { %4366 = vmatpush.bf16.msrb.mxu1 %v7487_v25  ;;  %v8619_v1 = vld [vmem:[#allocation9 + $0x64c] sm:$0xf0]  ;;  %v7279_v25 = vor.u32 %v8551_v58, %v7278_v55  ;;  %v7407_v19 = vor.u32 %v8583_v51, %v7406_v57  ;;  %v7390_v27 = vld [vmem:[#allocation9 + $0x500] sm:$0xf]  ;;  %v2538_v29 = vpop.f32.mrf.mxu2  ;;  %v8437_v36 = vld [vmem:[#allocation9 + $0xa4] sm:$0xf] }
 0x1bd   :  { %v7551_v34 = vor.u32 %v8619_v1, %v7550_v61  ;;  %v8547_v28 = vld [vmem:[#allocation9 + $0x40c] sm:$0xf0]  ;;  %v7534_v31 = vld [vmem:[#allocation9 + $0x620] sm:$0xf]  ;;  %v6832_v2 = vld [vmem:[#allocation9 + $0xb0] sm:$0xf0] }
 0x1be   :  { %4380 = vmatpush.bf16.msrb.mxu2 %v7615_v40  ;;  %4353 = vmatpush.bf16.msrb.mxu0 %v7343_v35  ;;  %v2512_v59 = vpop.f32.mrf.mxu0  ;;  %v8579_v40 = vld [vmem:[#allocation9 + $0x50c] sm:$0xf0]  ;;  %v8445_v35 = vld [vmem:[#allocation9 + $0xe4] sm:$0xf]  ;;  %v7263_v18 = vor.u32 %v8547_v28, %v7262_v8  ;;  %v7518_v13 = vld [vmem:[#allocation9 + $0x600] sm:$0xf]  ;;  %v6835_v55 = vor.u32 %v8437_v36, %v6832_v2 }
 0x1bf   :  { %v2513_v63 = vadd.f32 %v2512_v59, %v2499_v54  ;;  %v8615_v20 = vld [vmem:[#allocation9 + $0x62c] sm:$0xf0]  ;;  %v7391_v23 = vor.u32 %v8579_v40, %v7390_v27  ;;  %v7758_v48 = vld [vmem:[#allocation9 + $0x7e0] sm:$0xf]  ;;  %v8469_v53 = vld [vmem:[#allocation9 + $0x1a4] sm:$0xf]  ;;  %v2539_v54 = vadd.f32 %v2538_v29, %v2525_v43 }
 0x1c0   :  { %4367 = vmatpush.bf16.msrb.mxu1 %v7471_v14  ;;  %v8477_v14 = vld [vmem:[#allocation9 + $0x1e4] sm:$0xf]  ;;  %v7535_v22 = vor.u32 %v8615_v20, %v7534_v31  ;;  %v8611_v32 = vld [vmem:[#allocation9 + $0x60c] sm:$0xf0]  ;;  %v7104_v11 = vld [vmem:[#allocation9 + $0x2d0] sm:$0xf0] }
 0x1c1   :  { %v2737_v10 = vmax.f32 %v2513_v63, 0.0  ;;  %v7519_v37 = vor.u32 %v8611_v32, %v7518_v13  ;;  %v8671_v44 = vld [vmem:[#allocation9 + $0x7ec] sm:$0xf0]  ;;  %v7742_v58 = vld [vmem:[#allocation9 + $0x7c0] sm:$0xf] }
 0x1c2   :  { %4381 = vmatpush.bf16.msrb.mxu2 %v7599_v56  ;;  %4354 = vmatpush.bf16.msrb.mxu0 %v7327_v24  ;;  %v6867_v56 = vor.u32 %v8445_v35, %v6864_v0  ;;  %v6848_v24 = vld [vmem:[#allocation9 + $0xd0] sm:$0xf0]  ;;  %v7759_v5 = vor.u32 %v8671_v44, %v7758_v48  ;;  %v8667_v57 = vld [vmem:[#allocation9 + $0x7cc] sm:$0xf0]  ;;  %v8433_v62 = vld [vmem:[#allocation9 + $0x84] sm:$0xf] }
 0x1c3   :  { %v9313_v45 = vpack.c.bf16 %v2737_v10, %v2729_v12  ;;  %v6851_v16 = vor.u32 %v8441_v39, %v6848_v24  ;;  %v6816_v61 = vld [vmem:[#allocation9 + $0x90] sm:$0xf0]  ;;  %v8465_v1 = vld [vmem:[#allocation9 + $0x184] sm:$0xf]  ;;  %v7726_v35 = vld [vmem:[#allocation9 + $0x7a0] sm:$0xf] }
 0x1c4   :  { %4368 = vmatpush.bf16.msrb.mxu1 %v7455_v47  ;;  %v6995_v47 = vor.u32 %v8477_v14, %v6992_v21  ;;  %4393 = vmatpush.bf16.msrb.mxu3 %v7759_v5  ;;  %v2540_v8 = vpop.f32.mrf.mxu2  ;;  %v8501_v28 = vld [vmem:[#allocation9 + $0x2a4] sm:$0xf]  ;;  %v7088_v17 = vld [vmem:[#allocation9 + $0x2b0] sm:$0xf0]  ;;  %v6819_v40 = vor.u32 %v8433_v62, %v6816_v61  ;;  %v8663_v0 = vld [vmem:[#allocation9 + $0x7ac] sm:$0xf0] }
 0x1c5   :  { %v8429_v21 = vld [vmem:[#allocation9 + $0x64] sm:$0xf]  ;;  %v6928_v12 = vld [vmem:[#allocation9 + $0x170] sm:$0xf0]  ;;  %v8659_v33 = vld [vmem:[#allocation9 + $0x78c] sm:$0xf0] }
 0x1c6   :  { %4382 = vmatpush.bf16.msrb.mxu2 %v7583_v52  ;;  %4355 = vmatpush.bf16.msrb.mxu0 %v7311_v46  ;;  %v2526_v52 = vpop.f32.mrf.mxu1  ;;  %v7123_v46 = vor.u32 %v8509_v38, %v7120_v42  ;;  %v8425_v30 = vld [vmem:[#allocation9 + $0x44] sm:$0xf]  ;;  %v6912_v43 = vld [vmem:[#allocation9 + $0x150] sm:$0xf0]  ;;  %v8655_v36 = vld [vmem:[#allocation9 + $0x76c] sm:$0xf0] }
 0x1c7   :  { %v2527_v59 = vadd.f32 %v2526_v52, %v528_v49  ;;  %v8461_v49 = vld [vmem:[#allocation9 + $0x164] sm:$0xf]  ;;  %v6752_v62 = vld [vmem:[#allocation9 + $0x10] sm:$0xf0] }
 0x1c8   :  { %4369 = vmatpush.bf16.msrb.mxu1 %v7439_v60  ;;  %v2552_v60 = vpop.f32.mrf.mxu3  ;;  %v6931_v13 = vor.u32 %v8461_v49, %v6928_v12  ;;  %v8457_v38 = vld [vmem:[#allocation9 + $0x144] sm:$0xf]  ;;  %v7662_v49 = vld [vmem:[#allocation9 + $0x720] sm:$0xf] }
 0x1c9   :  { %v2553_v63 = vadd.f32 %v2552_v60, %v2539_v54  ;;  %v2541_v14 = vadd.f32 %v2540_v8, %v2527_v59  ;;  %v8493_v52 = vld [vmem:[#allocation9 + $0x264] sm:$0xf]  ;;  %v8651_v8 = vld [vmem:[#allocation9 + $0x74c] sm:$0xf0] }
 0x1ca   :  { %4383 = vmatpush.bf16.msrb.mxu2 %v7567_v7  ;;  %4356 = vmatpush.bf16.msrb.mxu0 %v7295_v6  ;;  %v6960_v7 = vld [vmem:[#allocation9 + $0x1b0] sm:$0xf0]  ;;  %v8505_v6 = vld [vmem:[#allocation9 + $0x2c4] sm:$0xf] }
 0x1cb   :  { %v6963_v51 = vor.u32 %v8469_v53, %v6960_v7  ;;  %v6915_v53 = vor.u32 %v8457_v38, %v6912_v43  ;;  %v8421_v7 = vld [vmem:[#allocation9 + $0x24] sm:$0xf]  ;;  %v8643_v38 = vld [vmem:[#allocation9 + $0x70c] sm:$0xf0] }
 0x1cc   :  { %4370 = vmatpush.bf16.msrb.mxu1 %v7423_v9  ;;  %v7107_v9 = vor.u32 %v8505_v6, %v7104_v11  ;;  %v2566_v27 = vpop.f32.mrf.mxu0  ;;  %v6768_v6 = vld [vmem:[#allocation9 + $0x30] sm:$0xf0]  ;;  %v8453_v11 = vld [vmem:[#allocation9 + $0x124] sm:$0xf] }
 0x1cd   :  { %v2567_v39 = vadd.f32 %v2566_v27, %v2553_v63  ;;  %v6880_v63 = vld [vmem:[#allocation9 + $0x110] sm:$0xf0]  ;;  %v8565_v43 = vld [vmem:[#allocation9 + $0x4a4] sm:$0xf] }
 0x1ce   :  { %4384 = vmatpush.bf16.msrb.mxu2 %v7551_v34  ;;  %4357 = vmatpush.bf16.msrb.mxu0 %v7279_v25  ;;  %v7743_v34 = vor.u32 %v8667_v57, %v7742_v58  ;;  %v6944_v25 = vld [vmem:[#allocation9 + $0x190] sm:$0xf0]  ;;  %v2580_v20 = vpop.f32.mrf.mxu1 }
 0x1cf   :  { %v6947_v31 = vor.u32 %v8465_v1, %v6944_v25  ;;  %v7040_v58 = vld [vmem:[#allocation9 + $0x250] sm:$0xf0]  ;;  %v6771_v1 = vor.u32 %v8421_v7, %v6768_v6  ;;  %v7678_v25 = vld [vmem:[#allocation9 + $0x740] sm:$0xf]  ;;  %v8537_v7 = vld [vmem:[#allocation9 + $0x3c4] sm:$0xf] }
 0x1d0   :  { %4371 = vmatpush.bf16.msrb.mxu1 %v7407_v19  ;;  %4394 = vmatpush.bf16.msrb.mxu3 %v7743_v34  ;;  %v7091_v19 = vor.u32 %v8501_v28, %v7088_v17  ;;  %v2554_v10 = vpop.f32.mrf.mxu3  ;;  %v8449_v34 = vld [vmem:[#allocation9 + $0x104] sm:$0xf]  ;;  %v7679_v27 = vor.u32 %v8651_v8, %v7678_v25  ;;  %v7232_v6 = vld [vmem:[#allocation9 + $0x3d0] sm:$0xf0] }
 0x1d1   :  { %v2555_v32 = vadd.f32 %v2554_v10, %v2541_v14  ;;  %v7504_v14 = vld [vmem:[#allocation9 + $0x5f0] sm:$0xf0]  ;;  %v6883_v12 = vor.u32 %v8449_v34, %v6880_v63  ;;  %v8557_v25 = vld [vmem:[#allocation9 + $0x464] sm:$0xf] }
 0x1d2   :  { %4385 = vmatpush.bf16.msrb.mxu2 %v7535_v22  ;;  %4358 = vmatpush.bf16.msrb.mxu0 %v7263_v18  ;;  %v6800_v22 = vld [vmem:[#allocation9 + $0x70] sm:$0xf0]  ;;  %v7727_v18 = vor.u32 %v8663_v0, %v7726_v35  ;;  %v8485_v35 = vld [vmem:[#allocation9 + $0x224] sm:$0xf] }
 0x1d3   :  { %v6803_v29 = vor.u32 %v8429_v21, %v6800_v22  ;;  %v7024_v0 = vld [vmem:[#allocation9 + $0x230] sm:$0xf0]  ;;  %v8589_v63 = vld [vmem:[#allocation9 + $0x564] sm:$0xf] }
 0x1d4   :  { %4372 = vmatpush.bf16.msrb.mxu1 %v7391_v23  ;;  %v8497_v23 = vld [vmem:[#allocation9 + $0x284] sm:$0xf]  ;;  %4395 = vmatpush.bf16.msrb.mxu3 %v7727_v18  ;;  %v2568_v48 = vpop.f32.mrf.mxu0  ;;  %v7027_v21 = vor.u32 %v8485_v35, %v7024_v0  ;;  %v8647_v18 = vld [vmem:[#allocation9 + $0x72c] sm:$0xf0]  ;;  %v7312_v8 = vld [vmem:[#allocation9 + $0x470] sm:$0xf0] }
 0x1d5   :  { %4359 = vmatmul.bf16.vlgmr.msrb.gmra.mxu0 %v9313_v45  ;;  %v2569_v2 = vadd.f32 %v2568_v48, %v2555_v32  ;;  %v7488_v32 = vld [vmem:[#allocation9 + $0x5d0] sm:$0xf0]  ;;  %v7315_v0 = vor.u32 %v8557_v25, %v7312_v8 }
 0x1d6   :  { %4407 = vmatpush.bf16.msra.mxu0 %v6867_v56  ;;  %4386 = vmatpush.bf16.msrb.mxu2 %v7519_v37  ;;  %v7072_v56 = vld [vmem:[#allocation9 + $0x290] sm:$0xf0]  ;;  %v2582_v5 = vpop.f32.mrf.mxu1 }
 0x1d7   :  { %v7075_v24 = vor.u32 %v8497_v23, %v7072_v56  ;;  %v6784_v37 = vld [vmem:[#allocation9 + $0x50] sm:$0xf0]  ;;  %v2583_v59 = vadd.f32 %v2582_v5, %v2569_v2  ;;  %v2594_v23 = vpop.f32.mrf.mxu2  ;;  %v8569_v56 = vld [vmem:[#allocation9 + $0x4c4] sm:$0xf] }
 0x1d8   :  { %4421 = vmatpush.bf16.msra.mxu1 %v6995_v47  ;;  %v7710_v47 = vld [vmem:[#allocation9 + $0x780] sm:$0xf]  ;;  %v6787_v44 = vor.u32 %v8425_v30, %v6784_v37  ;;  %v7248_v48 = vld [vmem:[#allocation9 + $0x3f0] sm:$0xf0] }
 0x1d9   :  { %v7711_v42 = vor.u32 %v8659_v33, %v7710_v47  ;;  %v2738_v28 = vmax.f32 %v2583_v59, 0.0  ;;  %v8481_v47 = vld [vmem:[#allocation9 + $0x204] sm:$0xf]  ;;  %v7008_v33 = vld [vmem:[#allocation9 + $0x210] sm:$0xf0] }
 0x1da   :  { %4435 = vmatpush.bf16.msra.mxu2 %v7123_v46  ;;  %4408 = vmatpush.bf16.msra.mxu0 %v6851_v16  ;;  %v7056_v46 = vld [vmem:[#allocation9 + $0x270] sm:$0xf0]  ;;  %v2581_v16 = vadd.f32 %v2580_v20, %v2567_v39  ;;  %v8605_v20 = vld [vmem:[#allocation9 + $0x5e4] sm:$0xf]  ;;  %v7663_v39 = vor.u32 %v8647_v18, %v7662_v49  ;;  %v7011_v30 = vor.u32 %v8481_v47, %v7008_v33  ;;  %v7646_v37 = vld [vmem:[#allocation9 + $0x700] sm:$0xf] }
 0x1db   :  { %4396 = vmatpush.bf16.msrb.mxu3 %v7711_v42  ;;  %v7059_v60 = vor.u32 %v8493_v52, %v7056_v46  ;;  %v7647_v52 = vor.u32 %v8643_v38, %v7646_v37  ;;  %v7456_v59 = vld [vmem:[#allocation9 + $0x590] sm:$0xf0]  ;;  %v8581_v38 = vld [vmem:[#allocation9 + $0x524] sm:$0xf] }
 0x1dc   :  { %4422 = vmatpush.bf16.msra.mxu1 %v6979_v26  ;;  %v7694_v26 = vld [vmem:[#allocation9 + $0x760] sm:$0xf]  ;;  %v2730_v57 = vmax.f32 %v2581_v16, 0.0  ;;  %v7344_v16 = vld [vmem:[#allocation9 + $0x4b0] sm:$0xf0] }
 0x1dd   :  { %v7695_v54 = vor.u32 %v8655_v36, %v7694_v26  ;;  %v8597_v26 = vld [vmem:[#allocation9 + $0x5a4] sm:$0xf]  ;;  %v7472_v36 = vld [vmem:[#allocation9 + $0x5b0] sm:$0xf0]  ;;  %v7347_v5 = vor.u32 %v8565_v43, %v7344_v16 }
 0x1de   :  { %4436 = vmatpush.bf16.msra.mxu2 %v7107_v9  ;;  %4409 = vmatpush.bf16.msra.mxu0 %v6835_v55  ;;  %v6896_v9 = vld [vmem:[#allocation9 + $0x130] sm:$0xf0]  ;;  %v8489_v55 = vld [vmem:[#allocation9 + $0x244] sm:$0xf] }
 0x1df   :  { %4397 = vmatpush.bf16.msrb.mxu3 %v7695_v54  ;;  %v7043_v61 = vor.u32 %v8489_v55, %v7040_v58  ;;  %v6899_v17 = vor.u32 %v8453_v11, %v6896_v9  ;;  %v7475_v11 = vor.u32 %v8597_v26, %v7472_v36  ;;  %v8561_v54 = vld [vmem:[#allocation9 + $0x484] sm:$0xf]  ;;  %v7328_v9 = vld [vmem:[#allocation9 + $0x490] sm:$0xf0]  ;;  %v7235_v55 = vor.u32 %v8537_v7, %v7232_v6  ;;  %v2596_v58 = vpop.f32.mrf.mxu2  ;;  %v8448_v7 = vld [vmem:[#allocation9 + $0xf4] sm:$0xf0] }
 0x1e0   :  { %4423 = vmatpush.bf16.msra.mxu1 %v6963_v51  ;;  %v8417_v51 = vld [vmem:[#allocation9 + $0x4] sm:$0xf]  ;;  %v7296_v49 = vld [vmem:[#allocation9 + $0x450] sm:$0xf0] }
 0x1e1   :  { %v6755_v22 = vor.u32 %v8417_v51, %v6752_v62  ;;  %v7331_v62 = vor.u32 %v8561_v54, %v7328_v9  ;;  %v7184_v47 = vld [vmem:[#allocation9 + $0x370] sm:$0xf0]  ;;  %v8577_v36 = vld [vmem:[#allocation9 + $0x504] sm:$0xf]  ;;  %v6998_v9 = vld [vmem:[#allocation9 + $0x1e8] sm:$0xf] }
 0x1e2   :  { %4437 = vmatpush.bf16.msra.mxu2 %v7091_v19  ;;  %4410 = vmatpush.bf16.msra.mxu0 %v6819_v40  ;;  %v8573_v19 = vld [vmem:[#allocation9 + $0x4e4] sm:$0xf]  ;;  %v7376_v40 = vld [vmem:[#allocation9 + $0x4f0] sm:$0xf0] }
 0x1e3   :  { %4398 = vmatpush.bf16.msrb.mxu3 %v7679_v27  ;;  %v7379_v10 = vor.u32 %v8573_v19, %v7376_v40  ;;  %v7440_v19 = vld [vmem:[#allocation9 + $0x570] sm:$0xf0] }
 0x1e4   :  { %4424 = vmatpush.bf16.msra.mxu1 %v6947_v31  ;;  %v9316_v31 = vpack.c.bf16 %v2738_v28, %v2730_v57  ;;  %v8593_v57 = vld [vmem:[#allocation9 + $0x584] sm:$0xf]  ;;  %v7264_v26 = vld [vmem:[#allocation9 + $0x410] sm:$0xf0] }
 0x1e5   :  { %v7459_v34 = vor.u32 %v8593_v57, %v7456_v59  ;;  %v8517_v59 = vld [vmem:[#allocation9 + $0x324] sm:$0xf] }
 0x1e6   :  { %4438 = vmatpush.bf16.msra.mxu2 %v7075_v24  ;;  %4411 = vmatpush.bf16.msra.mxu0 %v6803_v29  ;;  %v7507_v24 = vor.u32 %v8605_v20, %v7504_v14  ;;  %v7360_v29 = vld [vmem:[#allocation9 + $0x4d0] sm:$0xf0]  ;;  %v8529_v20 = vld [vmem:[#allocation9 + $0x384] sm:$0xf] }
 0x1e7   :  { %4373 = vmatmul.bf16.vlgmr.msrb.gmra.mxu1 %v9316_v31  ;;  %4399 = vmatpush.bf16.msrb.mxu3 %v7663_v39  ;;  %v7363_v42 = vor.u32 %v8569_v56, %v7360_v29  ;;  %v7200_v14 = vld [vmem:[#allocation9 + $0x390] sm:$0xf0]  ;;  %v8525_v29 = vld [vmem:[#allocation9 + $0x364] sm:$0xf] }
 0x1e8   :  { %4425 = vmatpush.bf16.msra.mxu1 %v6931_v13  ;;  %v8601_v13 = vld [vmem:[#allocation9 + $0x5c4] sm:$0xf]  ;;  %v7203_v18 = vor.u32 %v8529_v20, %v7200_v14  ;;  %v7187_v37 = vor.u32 %v8525_v29, %v7184_v47  ;;  %v7136_v20 = vld [vmem:[#allocation9 + $0x310] sm:$0xf0] }
 0x1e9   :  { %v7491_v46 = vor.u32 %v8601_v13, %v7488_v32  ;;  %v8549_v32 = vld [vmem:[#allocation9 + $0x424] sm:$0xf] }
 0x1ea   :  { %4439 = vmatpush.bf16.msra.mxu2 %v7059_v60  ;;  %4412 = vmatpush.bf16.msra.mxu0 %v6787_v44  ;;  %v8541_v60 = vld [vmem:[#allocation9 + $0x3e4] sm:$0xf]  ;;  %v2608_v44 = vpop.f32.mrf.mxu3 }
 0x1eb   :  { %v7251_v2 = vor.u32 %v8541_v60, %v7248_v48  ;;  %4400 = vmatpush.bf16.msrb.mxu3 %v7647_v52  ;;  %v8545_v60 = vld [vmem:[#allocation9 + $0x404] sm:$0xf] }
 0x1ec   :  { %4426 = vmatpush.bf16.msra.mxu1 %v6915_v53  ;;  %v529_v53 = vperm.slane %v9242_v4, 6  ;;  %v7216_v4 = vld [vmem:[#allocation9 + $0x3b0] sm:$0xf0]  ;;  %v8521_v48 = vld [vmem:[#allocation9 + $0x344] sm:$0xf]  ;;  %v7267_v57 = vor.u32 %v8545_v60, %v7264_v26  ;;  %v8776_v26 = vld [vmem:[#allocation8] sm:$0xff] }
 0x1ee   :  { %4440 = vmatpush.bf16.msra.mxu2 %v7043_v61  ;;  %4413 = vmatpush.bf16.msra.mxu0 %v6771_v1  ;;  %v2595_v51 = vadd.f32 %v2594_v23, %v529_v53  ;;  %v8533_v61 = vld [vmem:[#allocation9 + $0x3a4] sm:$0xf]  ;;  %v2622_v1 = vpop.f32.mrf.mxu0  ;;  %v2597_v40 = vadd.f32 %v2596_v58, %v529_v53  ;;  %v7392_v53 = vld [vmem:[#allocation9 + $0x510] sm:$0xf0] }
 0x1ef   :  { %4449 = vmatpush.bf16.msra.mxu3 %v7251_v2  ;;  %v7219_v28 = vor.u32 %v8533_v61, %v7216_v4  ;;  %v7168_v2 = vld [vmem:[#allocation9 + $0x350] sm:$0xf0]  ;;  %v7395_v61 = vor.u32 %v8577_v36, %v7392_v53  ;;  %v530_v36 = vperm.slane %v8776_v26, 7  ;;  %v8512_v26 = vld [vmem:[#allocation9 + $0x2f4] sm:$0xf0] }
 0x1f0   :  { %4427 = vmatpush.bf16.msra.mxu1 %v6899_v17  ;;  %v2636_v17 = vpop.f32.mrf.mxu1  ;;  %v2609_v27 = vadd.f32 %v2608_v44, %v2595_v51  ;;  %v7171_v6 = vor.u32 %v8521_v48, %v7168_v2  ;;  %v7152_v51 = vld [vmem:[#allocation9 + $0x330] sm:$0xf0]  ;;  %v6806_v48 = vld [vmem:[#allocation9 + $0x68] sm:$0xf] }
 0x1f1   :  { %v2650_v39 = vpop.f32.mrf.mxu2  ;;  %v7155_v25 = vor.u32 %v8517_v59, %v7152_v51  ;;  %v8428_v59 = vld [vmem:[#allocation9 + $0x54] sm:$0xf0] }
 0x1f2   :  { %4441 = vmatpush.bf16.msra.mxu2 %v7027_v21  ;;  %4414 = vmatpush.bf16.msra.mxu0 %v6755_v22  ;;  %v2610_v35 = vpop.f32.mrf.mxu3  ;;  %v7443_v21 = vor.u32 %v8589_v63, %v7440_v19  ;;  %v8553_v22 = vld [vmem:[#allocation9 + $0x444] sm:$0xf]  ;;  %v2623_v23 = vadd.f32 %v2622_v1, %v2609_v27  ;;  %v6982_v27 = vld [vmem:[#allocation9 + $0x1c8] sm:$0xf] }
 0x1f3   :  { %4450 = vmatpush.bf16.msra.mxu3 %v7235_v55  ;;  %v2611_v56 = vadd.f32 %v2610_v35, %v2597_v40  ;;  %v8480_v55 = vld [vmem:[#allocation9 + $0x1f4] sm:$0xf0]  ;;  %v8637_v1 = vld [vmem:[#allocation9 + $0x6e4] sm:$0xf] }
 0x1f4   :  { %4428 = vmatpush.bf16.msra.mxu1 %v6883_v12  ;;  %v8585_v12 = vld [vmem:[#allocation9 + $0x544] sm:$0xf]  ;;  %v2637_v43 = vadd.f32 %v2636_v17, %v2623_v23  ;;  %v6999_v8 = vor.u32 %v8480_v55, %v6998_v9  ;;  %v8444_v17 = vld [vmem:[#allocation9 + $0xd4] sm:$0xf0]  ;;  %v6838_v23 = vld [vmem:[#allocation9 + $0xa8] sm:$0xf] }
 0x1f5   :  { %4415 = vmatmul.bf16.vlgmr.msra.gmra.mxu0 %v9298_v41  ;;  %v8476_v40 = vld [vmem:[#allocation9 + $0x1d4] sm:$0xf0]  ;;  %v7568_v9 = vld [vmem:[#allocation9 + $0x670] sm:$0xf0] }
 0x1f6   :  { %4463 = vmatpush.bf16.msrb.mxu0 %v7379_v10  ;;  %4442 = vmatpush.bf16.msra.mxu2 %v7011_v30  ;;  %v7424_v10 = vld [vmem:[#allocation9 + $0x550] sm:$0xf0]  ;;  %v2624_v33 = vpop.f32.mrf.mxu0 }
 0x1f7   :  { %4451 = vmatpush.bf16.msra.mxu3 %v7219_v28  ;;  %4429 = vmatmul.bf16.vlgmr.msra.gmra.mxu1 %v9300_v50  ;;  %v7427_v13 = vor.u32 %v8585_v12, %v7424_v10  ;;  %v7280_v30 = vld [vmem:[#allocation9 + $0x430] sm:$0xf0]  ;;  %v2625_v52 = vadd.f32 %v2624_v33, %v2611_v56  ;;  %v6854_v28 = vld [vmem:[#allocation9 + $0xc8] sm:$0xf]  ;;  %v6983_v10 = vor.u32 %v8476_v40, %v6982_v27  ;;  %v8440_v56 = vld [vmem:[#allocation9 + $0xb4] sm:$0xf0] }
 0x1f8   :  { %4477 = vmatpush.bf16.msrb.mxu1 %v7507_v24  ;;  %v7299_v24 = vor.u32 %v8553_v22, %v7296_v49  ;;  %v7283_v16 = vor.u32 %v8549_v32, %v7280_v30  ;;  %v6855_v22 = vor.u32 %v8444_v17, %v6854_v28  ;;  %v8633_v49 = vld [vmem:[#allocation9 + $0x6c4] sm:$0xf]  ;;  %v6839_v47 = vor.u32 %v8440_v56, %v6838_v23  ;;  %v6822_v30 = vld [vmem:[#allocation9 + $0x88] sm:$0xf] }
 0x1f9   :  { %v2652_v58 = vpop.f32.mrf.mxu2  ;;  %v8629_v33 = vld [vmem:[#allocation9 + $0x6a4] sm:$0xf]  ;;  %v6758_v56 = vld [vmem:[#allocation9 + $0x8] sm:$0xf] }
 0x1fa   :  { %4464 = vmatpush.bf16.msrb.mxu0 %v7363_v42  ;;  %v7408_v42 = vld [vmem:[#allocation9 + $0x530] sm:$0xf0]  ;;  %v2664_v14 = vpop.f32.mrf.mxu3 }
 0x1fb   :  { %4452 = vmatpush.bf16.msra.mxu3 %v7203_v18  ;;  %v7411_v44 = vor.u32 %v8581_v38, %v7408_v42  ;;  %v7616_v18 = vld [vmem:[#allocation9 + $0x6d0] sm:$0xf0]  ;;  %v6950_v38 = vld [vmem:[#allocation9 + $0x188] sm:$0xf]  ;;  %v8468_v42 = vld [vmem:[#allocation9 + $0x194] sm:$0xf0]  ;;  %v2665_v51 = vadd.f32 %v2664_v14, %v530_v36 }
 0x1fc   :  { %4478 = vmatpush.bf16.msrb.mxu1 %v7491_v46  ;;  %v2638_v46 = vpop.f32.mrf.mxu1  ;;  %v7619_v29 = vor.u32 %v8633_v49, %v7616_v18  ;;  %v6951_v60 = vor.u32 %v8468_v42, %v6950_v38  ;;  %v8608_v38 = vld [vmem:[#allocation9 + $0x5f4] sm:$0xf0] }
 0x1fd   :  { %v2639_v54 = vadd.f32 %v2638_v46, %v2625_v52  ;;  %v8625_v46 = vld [vmem:[#allocation9 + $0x684] sm:$0xf] }
 0x1fe   :  { %4465 = vmatpush.bf16.msrb.mxu0 %v7347_v5  ;;  %v6870_v5 = vld [vmem:[#allocation9 + $0xe8] sm:$0xf] }
 0x1ff   :  { %4453 = vmatpush.bf16.msra.mxu3 %v7187_v37  ;;  %v6871_v4 = vor.u32 %v8448_v7, %v6870_v5  ;;  %v8436_v37 = vld [vmem:[#allocation9 + $0x94] sm:$0xf0]  ;;  %v6934_v5 = vld [vmem:[#allocation9 + $0x168] sm:$0xf] }
 0x200   :  { %4479 = vmatpush.bf16.msrb.mxu1 %v7475_v11  ;;  %v2651_v11 = vadd.f32 %v2650_v39, %v2637_v43  ;;  %v6966_v39 = vld [vmem:[#allocation9 + $0x1a8] sm:$0xf]  ;;  %v6823_v52 = vor.u32 %v8436_v37, %v6822_v30  ;;  %v8464_v7 = vld [vmem:[#allocation9 + $0x174] sm:$0xf0] }
 0x201   :  { %v7510_v37 = vld [vmem:[#allocation9 + $0x5e8] sm:$0xf] }
 0x202   :  { %4466 = vmatpush.bf16.msrb.mxu0 %v7331_v62  ;;  %v2653_v62 = vadd.f32 %v2652_v58, %v2639_v54  ;;  %v2731_v63 = vmax.f32 %v2651_v11, 0.0  ;;  %v2666_v2 = vpop.f32.mrf.mxu3  ;;  %v8621_v54 = vld [vmem:[#allocation9 + $0x664] sm:$0xf]  ;;  %v6935_v58 = vor.u32 %v8464_v7, %v6934_v5  ;;  %v7366_v5 = vld [vmem:[#allocation9 + $0x4c8] sm:$0xf] }
 0x203   :  { %4454 = vmatpush.bf16.msra.mxu3 %v7171_v6  ;;  %v2667_v27 = vadd.f32 %v2666_v2, %v530_v36  ;;  %v8572_v7 = vld [vmem:[#allocation9 + $0x4d4] sm:$0xf0] }
 0x204   :  { %4480 = vmatpush.bf16.msrb.mxu1 %v7459_v34  ;;  %v7632_v34 = vld [vmem:[#allocation9 + $0x6f0] sm:$0xf0]  ;;  %v2739_v19 = vmax.f32 %v2653_v62, 0.0  ;;  %v6918_v62 = vld [vmem:[#allocation9 + $0x148] sm:$0xf] }
 0x205   :  { %v7635_v35 = vor.u32 %v8637_v1, %v7632_v34 }
 0x206   :  { %4467 = vmatpush.bf16.msrb.mxu0 %v7315_v0  ;;  %v8513_v0 = vld [vmem:[#allocation9 + $0x304] sm:$0xf] }
 0x207   :  { %4455 = vmatpush.bf16.msra.mxu3 %v7155_v25  ;;  %v7139_v12 = vor.u32 %v8513_v0, %v7136_v20  ;;  %v8617_v25 = vld [vmem:[#allocation9 + $0x644] sm:$0xf]  ;;  %v6902_v0 = vld [vmem:[#allocation9 + $0x128] sm:$0xf]  ;;  %v8456_v20 = vld [vmem:[#allocation9 + $0x134] sm:$0xf0] }
 0x208   :  { %4481 = vmatpush.bf16.msrb.mxu1 %v7443_v21  ;;  %v9322_v21 = vpack.c.bf16 %v2739_v19, %v2731_v63  ;;  %v6774_v63 = vld [vmem:[#allocation9 + $0x28] sm:$0xf]  ;;  %v8424_v19 = vld [vmem:[#allocation9 + $0x34] sm:$0xf0]  ;;  %v6903_v23 = vor.u32 %v8456_v20, %v6902_v0 }
 0x209   :  { %v6775_v18 = vor.u32 %v8424_v19, %v6774_v63  ;;  %v8600_v63 = vld [vmem:[#allocation9 + $0x5b4] sm:$0xf0]  ;;  %v7094_v20 = vld [vmem:[#allocation9 + $0x2a8] sm:$0xf] }
 0x20a   :  { %4468 = vmatpush.bf16.msrb.mxu0 %v7299_v24  ;;  %4387 = vmatmul.bf16.vlgmr.msrb.gmra.mxu2 %v9322_v21  ;;  %v8472_v24 = vld [vmem:[#allocation9 + $0x1b4] sm:$0xf0] }
 0x20b   :  { %4491 = vmatpush.bf16.msrb.mxu2 %v7635_v35  ;;  %4456 = vmatpush.bf16.msra.mxu3 %v7139_v12  ;;  %v6967_v32 = vor.u32 %v8472_v24, %v6966_v39  ;;  %v8613_v12 = vld [vmem:[#allocation9 + $0x624] sm:$0xf]  ;;  %v8420_v39 = vld [vmem:[#allocation9 + $0x14] sm:$0xf0]  ;;  %v6886_v24 = vld [vmem:[#allocation9 + $0x108] sm:$0xf] }
 0x20c   :  { %4482 = vmatpush.bf16.msrb.mxu1 %v7427_v13  ;;  %v7600_v13 = vld [vmem:[#allocation9 + $0x6b0] sm:$0xf0] }
 0x20d   :  { %v7603_v43 = vor.u32 %v8629_v33, %v7600_v13  ;;  %v7382_v33 = vld [vmem:[#allocation9 + $0x4e8] sm:$0xf]  ;;  %v8576_v13 = vld [vmem:[#allocation9 + $0x4f4] sm:$0xf0] }
 0x20e   :  { %4469 = vmatpush.bf16.msrb.mxu0 %v7283_v16  ;;  %v7584_v16 = vld [vmem:[#allocation9 + $0x690] sm:$0xf0] }
 0x20f   :  { %4492 = vmatpush.bf16.msrb.mxu2 %v7619_v29  ;;  %v7587_v6 = vor.u32 %v8625_v46, %v7584_v16  ;;  %v7520_v46 = vld [vmem:[#allocation9 + $0x610] sm:$0xf0] }
 0x210   :  { %4483 = vmatpush.bf16.msrb.mxu1 %v7411_v44  ;;  %v8432_v44 = vld [vmem:[#allocation9 + $0x74] sm:$0xf0] }
 0x211   :  { %v6807_v11 = vor.u32 %v8432_v44, %v6806_v48  ;;  %v7383_v48 = vor.u32 %v8576_v13, %v7382_v33  ;;  %v7126_v44 = vld [vmem:[#allocation9 + $0x2e8] sm:$0xf]  ;;  %v8500_v33 = vld [vmem:[#allocation9 + $0x294] sm:$0xf0] }
 0x212   :  { %4470 = vmatpush.bf16.msrb.mxu0 %v7267_v57  ;;  %v2678_v53 = vpop.f32.mrf.mxu0  ;;  %v6790_v57 = vld [vmem:[#allocation9 + $0x48] sm:$0xf] }
 0x213   :  { %4493 = vmatpush.bf16.msrb.mxu2 %v7603_v43  ;;  %v2679_v1 = vadd.f32 %v2678_v53, %v2665_v51  ;;  %v6791_v34 = vor.u32 %v8428_v59, %v6790_v57  ;;  %v6759_v43 = vor.u32 %v8420_v39, %v6758_v56  ;;  %v7511_v53 = vor.u32 %v8608_v38, %v7510_v37  ;;  %v8669_v57 = vld [vmem:[#allocation9 + $0x7e4] sm:$0xf]  ;;  %v7760_v59 = vld [vmem:[#allocation9 + $0x7f0] sm:$0xf0]  ;;  %v7446_v38 = vld [vmem:[#allocation9 + $0x568] sm:$0xf] }
 0x214   :  { %4484 = vmatpush.bf16.msrb.mxu1 %v7395_v61  ;;  %v2692_v55 = vpop.f32.mrf.mxu1  ;;  %v8460_v61 = vld [vmem:[#allocation9 + $0x154] sm:$0xf0]  ;;  %v7367_v51 = vor.u32 %v8572_v7, %v7366_v5  ;;  %v8661_v39 = vld [vmem:[#allocation9 + $0x7a4] sm:$0xf] }
 0x215   :  { %4471 = vmatmul.bf16.vlgmr.msrb.gmra.mxu0 %v9313_v45  ;;  %v6919_v17 = vor.u32 %v8460_v61, %v6918_v62  ;;  %v7110_v62 = vld [vmem:[#allocation9 + $0x2c8] sm:$0xf]  ;;  %v8508_v61 = vld [vmem:[#allocation9 + $0x2d4] sm:$0xf0] }
 0x216   :  { %4519 = vmatpush.bf16.msra.mxu0 %v6871_v4  ;;  %v7571_v4 = vor.u32 %v8621_v54, %v7568_v9  ;;  %v7494_v54 = vld [vmem:[#allocation9 + $0x5c8] sm:$0xf]  ;;  %v8604_v9 = vld [vmem:[#allocation9 + $0x5d4] sm:$0xf0] }
 0x217   :  { %4485 = vmatmul.bf16.vlgmr.msrb.gmra.mxu1 %v9316_v31  ;;  %4494 = vmatpush.bf16.msrb.mxu2 %v7587_v6  ;;  %v8588_v5 = vld [vmem:[#allocation9 + $0x554] sm:$0xf0] }
 0x218   :  { %4533 = vmatpush.bf16.msra.mxu1 %v6999_v8  ;;  %v7552_v8 = vld [vmem:[#allocation9 + $0x650] sm:$0xf0] }
 0x219   :  { %v7555_v14 = vor.u32 %v8617_v25, %v7552_v8  ;;  %v7350_v25 = vld [vmem:[#allocation9 + $0x4a8] sm:$0xf]  ;;  %v8568_v8 = vld [vmem:[#allocation9 + $0x4b4] sm:$0xf0] }
 0x21a   :  { %4520 = vmatpush.bf16.msra.mxu0 %v6855_v22  ;;  %v2680_v35 = vpop.f32.mrf.mxu0  ;;  %4443 = vmatmul.bf16.vlgmr.msra.gmra.mxu2 %v9302_v15  ;;  %v2693_v22 = vadd.f32 %v2692_v55, %v2679_v1  ;;  %v7351_v0 = vor.u32 %v8568_v8, %v7350_v25  ;;  %v7030_v8 = vld [vmem:[#allocation9 + $0x228] sm:$0xf] }
 0x21b   :  { %4495 = vmatpush.bf16.msrb.mxu2 %v7571_v4  ;;  %v2681_v49 = vadd.f32 %v2680_v35, %v2667_v27  ;;  %v7111_v27 = vor.u32 %v8508_v61, %v7110_v62  ;;  %v7744_v35 = vld [vmem:[#allocation9 + $0x7d0] sm:$0xf0]  ;;  %v7414_v62 = vld [vmem:[#allocation9 + $0x528] sm:$0xf]  ;;  %v8584_v61 = vld [vmem:[#allocation9 + $0x534] sm:$0xf0] }
 0x21c   :  { %4534 = vmatpush.bf16.msra.mxu1 %v6983_v10  ;;  %v2706_v28 = vpop.f32.mrf.mxu2  ;;  %v7536_v10 = vld [vmem:[#allocation9 + $0x630] sm:$0xf0] }
 0x21d   :  { %v2707_v29 = vadd.f32 %v2706_v28, %v2693_v22  ;;  %v7539_v30 = vor.u32 %v8613_v12, %v7536_v10  ;;  %v7763_v28 = vor.u32 %v8669_v57, %v7760_v59  ;;  %v7462_v10 = vld [vmem:[#allocation9 + $0x588] sm:$0xf]  ;;  %v8552_v59 = vld [vmem:[#allocation9 + $0x434] sm:$0xf0] }
 0x21e   :  { %4521 = vmatpush.bf16.msra.mxu0 %v6839_v47  ;;  %v2720_v40 = vpop.f32.mrf.mxu3  ;;  %v8452_v47 = vld [vmem:[#allocation9 + $0x114] sm:$0xf0]  ;;  %v7286_v57 = vld [vmem:[#allocation9 + $0x428] sm:$0xf] }
 0x21f   :  { %4496 = vmatpush.bf16.msrb.mxu2 %v7555_v14  ;;  %v2721_v36 = vadd.f32 %v2720_v40, %v2707_v29  ;;  %v8665_v40 = vld [vmem:[#allocation9 + $0x7c4] sm:$0xf]  ;;  %v8504_v14 = vld [vmem:[#allocation9 + $0x2b4] sm:$0xf0]  ;;  %v7287_v25 = vor.u32 %v8552_v59, %v7286_v57  ;;  %v7606_v59 = vld [vmem:[#allocation9 + $0x6a8] sm:$0xf] }
 0x220   :  { %4535 = vmatpush.bf16.msra.mxu1 %v6967_v32  ;;  %v2694_v32 = vpop.f32.mrf.mxu1  ;;  %v7747_v12 = vor.u32 %v8665_v40, %v7744_v35  ;;  %v7095_v56 = vor.u32 %v8504_v14, %v7094_v20  ;;  %v7398_v40 = vld [vmem:[#allocation9 + $0x508] sm:$0xf]  ;;  %v8580_v35 = vld [vmem:[#allocation9 + $0x514] sm:$0xf0]  ;;  %v8645_v20 = vld [vmem:[#allocation9 + $0x724] sm:$0xf] }
 0x221   :  { %v2695_v42 = vadd.f32 %v2694_v32, %v2681_v49  ;;  %v2732_v4 = vmax.f32 %v2721_v36, 0.0  ;;  %v7334_v49 = vld [vmem:[#allocation9 + $0x488] sm:$0xf]  ;;  %v8556_v36 = vld [vmem:[#allocation9 + $0x454] sm:$0xf0] }
 0x222   :  { %4522 = vmatpush.bf16.msra.mxu0 %v6823_v52  ;;  %v8609_v52 = vld [vmem:[#allocation9 + $0x604] sm:$0xf]  ;;  %v7318_v32 = vld [vmem:[#allocation9 + $0x468] sm:$0xf]  ;;  %v8446_v14 = vld [vmem:[#allocation9 + $0xec] sm:$0xf] }
 0x223   :  { %4497 = vmatpush.bf16.msrb.mxu2 %v7539_v30  ;;  %v8560_v30 = vld [vmem:[#allocation9 + $0x474] sm:$0xf0] }
 0x224   :  { %4536 = vmatpush.bf16.msra.mxu1 %v6951_v60  ;;  %v2708_v16 = vpop.f32.mrf.mxu2  ;;  %v6887_v60 = vor.u32 %v8452_v47, %v6886_v24  ;;  %v7728_v24 = vld [vmem:[#allocation9 + $0x7b0] sm:$0xf0]  ;;  %v7078_v47 = vld [vmem:[#allocation9 + $0x288] sm:$0xf] }
 0x225   :  { %v2709_v2 = vadd.f32 %v2708_v16, %v2695_v42  ;;  %v7731_v37 = vor.u32 %v8661_v39, %v7728_v24  ;;  %v8592_v42 = vld [vmem:[#allocation9 + $0x574] sm:$0xf0]  ;;  %v7319_v16 = vor.u32 %v8560_v30, %v7318_v32  ;;  %v7399_v24 = vor.u32 %v8580_v35, %v7398_v40  ;;  %v8641_v30 = vld [vmem:[#allocation9 + $0x704] sm:$0xf] }
 0x226   :  { %4523 = vmatpush.bf16.msra.mxu0 %v6807_v11  ;;  %v2722_v6 = vpop.f32.mrf.mxu3  ;;  %v7523_v11 = vor.u32 %v8609_v52, %v7520_v46  ;;  %v8657_v52 = vld [vmem:[#allocation9 + $0x784] sm:$0xf]  ;;  %v7712_v46 = vld [vmem:[#allocation9 + $0x790] sm:$0xf0]  ;;  %v8484_v39 = vld [vmem:[#allocation9 + $0x214] sm:$0xf0] }
 0x227   :  { %v2723_v55 = vadd.f32 %v2722_v6, %v2709_v2  ;;  %v7715_v2 = vor.u32 %v8657_v52, %v7712_v46  ;;  %v8653_v6 = vld [vmem:[#allocation9 + $0x764] sm:$0xf]  ;;  %v8474_v52 = vld [vmem:[#allocation9 + $0x1cc] sm:$0xf]  ;;  %v6984_v46 = vld [vmem:[#allocation9 + $0x1d8] sm:$0xf0] }
 0x228   :  { %4537 = vmatpush.bf16.msra.mxu1 %v6935_v58  ;;  %v7127_v58 = vor.u32 %v8512_v26, %v7126_v44  ;;  %4498 = vmatpush.bf16.msrb.mxu2 %v7523_v11  ;;  %v7447_v44 = vor.u32 %v8592_v42, %v7446_v38  ;;  %v7302_v26 = vld [vmem:[#allocation9 + $0x448] sm:$0xf]  ;;  %v7696_v11 = vld [vmem:[#allocation9 + $0x770] sm:$0xf0]  ;;  %v6856_v38 = vld [vmem:[#allocation9 + $0xd8] sm:$0xf0] }
 0x229   :  { %v2740_v1 = vmax.f32 %v2723_v55, 0.0  ;;  %v8492_v55 = vld [vmem:[#allocation9 + $0x254] sm:$0xf0] }
 0x22a   :  { %4524 = vmatpush.bf16.msra.mxu0 %v6791_v34  ;;  %v7495_v34 = vor.u32 %v8604_v9, %v7494_v54  ;;  %v7303_v54 = vor.u32 %v8556_v36, %v7302_v26  ;;  %v7046_v9 = vld [vmem:[#allocation9 + $0x248] sm:$0xf]  ;;  %v8636_v36 = vld [vmem:[#allocation9 + $0x6d4] sm:$0xf0] }
 0x22b   :  { %v9329_v19 = vpack.c.bf16 %v2740_v1, %v2732_v4  ;;  %4499 = vmatmul.bf16.vlgmr.msrb.gmra.mxu2 %v9322_v21  ;;  %v7047_v4 = vor.u32 %v8492_v55, %v7046_v9  ;;  %v8649_v1 = vld [vmem:[#allocation9 + $0x744] sm:$0xf]  ;;  %v7622_v26 = vld [vmem:[#allocation9 + $0x6c8] sm:$0xf]  ;;  %v8628_v40 = vld [vmem:[#allocation9 + $0x694] sm:$0xf0] }
 0x22c   :  { %4538 = vmatpush.bf16.msra.mxu1 %v6919_v17  ;;  %v7478_v17 = vld [vmem:[#allocation9 + $0x5a8] sm:$0xf]  ;;  %4547 = vmatpush.bf16.msra.mxu2 %v7127_v58  ;;  %v7623_v9 = vor.u32 %v8636_v36, %v7622_v26  ;;  %v6904_v26 = vld [vmem:[#allocation9 + $0x138] sm:$0xf0] }
 0x22d   :  { %4401 = vmatmul.bf16.vlgmr.msrb.gmra.mxu3 %v9329_v19  ;;  %v7479_v22 = vor.u32 %v8600_v63, %v7478_v17  ;;  %v7270_v17 = vld [vmem:[#allocation9 + $0x408] sm:$0xf]  ;;  %v7415_v63 = vor.u32 %v8584_v61, %v7414_v62  ;;  %v8434_v61 = vld [vmem:[#allocation9 + $0x8c] sm:$0xf] }
 0x22e   :  { %4525 = vmatpush.bf16.msra.mxu0 %v6775_v18  ;;  %v8564_v18 = vld [vmem:[#allocation9 + $0x494] sm:$0xf0]  ;;  %4505 = vmatpush.bf16.msrb.mxu3 %v7763_v28  ;;  %v7238_v55 = vld [vmem:[#allocation9 + $0x3c8] sm:$0xf] }
 0x22f   :  { %v7335_v29 = vor.u32 %v8564_v18, %v7334_v49  ;;  %v8488_v28 = vld [vmem:[#allocation9 + $0x234] sm:$0xf0]  ;;  %v7664_v18 = vld [vmem:[#allocation9 + $0x730] sm:$0xf0] }
 0x230   :  { %4539 = vmatpush.bf16.msra.mxu1 %v6903_v23  ;;  %v8596_v23 = vld [vmem:[#allocation9 + $0x594] sm:$0xf0]  ;;  %4548 = vmatpush.bf16.msra.mxu2 %v7111_v27  ;;  %v7031_v49 = vor.u32 %v8488_v28, %v7030_v8  ;;  %v7222_v28 = vld [vmem:[#allocation9 + $0x3a8] sm:$0xf] }
 0x231   :  { %v7463_v13 = vor.u32 %v8596_v23, %v7462_v10  ;;  %v8548_v27 = vld [vmem:[#allocation9 + $0x414] sm:$0xf0]  ;;  %v7000_v10 = vld [vmem:[#allocation9 + $0x1f8] sm:$0xf0] }
 0x232   :  { %4526 = vmatpush.bf16.msra.mxu0 %v6759_v43  ;;  %4506 = vmatpush.bf16.msrb.mxu3 %v7747_v12  ;;  %v7079_v43 = vor.u32 %v8500_v33, %v7078_v47  ;;  %v8478_v12 = vld [vmem:[#allocation9 + $0x1ec] sm:$0xf]  ;;  %v7271_v23 = vor.u32 %v8548_v27, %v7270_v17  ;;  %v7638_v47 = vld [vmem:[#allocation9 + $0x6e8] sm:$0xf]  ;;  %v8640_v33 = vld [vmem:[#allocation9 + $0x6f4] sm:$0xf0] }
 0x233   :  { %v7003_v32 = vor.u32 %v8478_v12, %v7000_v10  ;;  %v8536_v17 = vld [vmem:[#allocation9 + $0x3b4] sm:$0xf0]  ;;  %v7590_v27 = vld [vmem:[#allocation9 + $0x688] sm:$0xf] }
 0x234   :  { %4540 = vmatpush.bf16.msra.mxu1 %v6887_v60  ;;  %4549 = vmatpush.bf16.msra.mxu2 %v7095_v56  ;;  %v7062_v60 = vld [vmem:[#allocation9 + $0x268] sm:$0xf]  ;;  %v8532_v10 = vld [vmem:[#allocation9 + $0x394] sm:$0xf0] }
 0x235   :  { %4527 = vmatmul.bf16.vlgmr.msra.gmra.mxu0 %v9298_v41  ;;  %v7014_v56 = vld [vmem:[#allocation9 + $0x208] sm:$0xf] }
 0x236   :  { %4575 = vmatpush.bf16.msrb.mxu0 %v7383_v48  ;;  %v8496_v48 = vld [vmem:[#allocation9 + $0x274] sm:$0xf0]  ;;  %4507 = vmatpush.bf16.msrb.mxu3 %v7731_v37  ;;  %v8442_v37 = vld [vmem:[#allocation9 + $0xcc] sm:$0xf]  ;;  %v7015_v42 = vor.u32 %v8484_v39, %v7014_v56  ;;  %v7206_v12 = vld [vmem:[#allocation9 + $0x388] sm:$0xf] }
 0x237   :  { %4541 = vmatmul.bf16.vlgmr.msra.gmra.mxu1 %v9300_v50  ;;  %v7063_v7 = vor.u32 %v8496_v48, %v7062_v60  ;;  %v7254_v60 = vld [vmem:[#allocation9 + $0x3e8] sm:$0xf]  ;;  %v8544_v48 = vld [vmem:[#allocation9 + $0x3f4] sm:$0xf0] }
 0x238   :  { %4589 = vmatpush.bf16.msrb.mxu1 %v7511_v53  ;;  %v7430_v53 = vld [vmem:[#allocation9 + $0x548] sm:$0xf]  ;;  %4550 = vmatpush.bf16.msra.mxu2 %v7079_v43  ;;  %v7648_v43 = vld [vmem:[#allocation9 + $0x710] sm:$0xf0]  ;;  %v8624_v39 = vld [vmem:[#allocation9 + $0x674] sm:$0xf0] }
 0x239   :  { %v7431_v58 = vor.u32 %v8588_v5, %v7430_v53  ;;  %v6987_v53 = vor.u32 %v8474_v52, %v6984_v46  ;;  %v8438_v5 = vld [vmem:[#allocation9 + $0xac] sm:$0xf]  ;;  %v7574_v56 = vld [vmem:[#allocation9 + $0x668] sm:$0xf]  ;;  %v8620_v52 = vld [vmem:[#allocation9 + $0x654] sm:$0xf0] }
 0x23a   :  { %4576 = vmatpush.bf16.msrb.mxu0 %v7367_v51  ;;  %4508 = vmatpush.bf16.msrb.mxu3 %v7715_v2  ;;  %v7699_v51 = vor.u32 %v8653_v6, %v7696_v11  ;;  %v7651_v2 = vor.u32 %v8641_v30, %v7648_v43  ;;  %v7255_v6 = vor.u32 %v8544_v48, %v7254_v60  ;;  %v8470_v11 = vld [vmem:[#allocation9 + $0x1ac] sm:$0xf]  ;;  %v7558_v43 = vld [vmem:[#allocation9 + $0x648] sm:$0xf]  ;;  %v6776_v60 = vld [vmem:[#allocation9 + $0x38] sm:$0xf0] }
 0x23b   :  { %v7575_v30 = vor.u32 %v8624_v39, %v7574_v56  ;;  %v7559_v36 = vor.u32 %v8620_v52, %v7558_v43  ;;  %v7766_v56 = vld [vmem:[#allocation9 + $0x7e8] sm:$0xf]  ;;  %v8672_v39 = vld [vmem:[#allocation9 + $0x7f4] sm:$0xf0] }
 0x23c   :  { %4590 = vmatpush.bf16.msrb.mxu1 %v7495_v34  ;;  %4551 = vmatpush.bf16.msra.mxu2 %v7063_v7  ;;  %v7680_v34 = vld [vmem:[#allocation9 + $0x750] sm:$0xf0]  ;;  %v6840_v7 = vld [vmem:[#allocation9 + $0xb8] sm:$0xf0]  ;;  %v7750_v52 = vld [vmem:[#allocation9 + $0x7c8] sm:$0xf] }
 0x23d   :  { %4457 = vmatmul.bf16.vlgmr.msra.gmra.mxu3 %v9305_v3  ;;  %v6843_v57 = vor.u32 %v8438_v5, %v6840_v7  ;;  %v7542_v7 = vld [vmem:[#allocation9 + $0x628] sm:$0xf] }
 0x23e   :  { %4577 = vmatpush.bf16.msrb.mxu0 %v7351_v0  ;;  %4509 = vmatpush.bf16.msrb.mxu3 %v7699_v51  ;;  %v7683_v0 = vor.u32 %v8649_v1, %v7680_v34  ;;  %v8632_v51 = vld [vmem:[#allocation9 + $0x6b4] sm:$0xf0]  ;;  %v8466_v34 = vld [vmem:[#allocation9 + $0x18c] sm:$0xf] }
 0x23f   :  { %v7607_v8 = vor.u32 %v8632_v51, %v7606_v59  ;;  %v7158_v59 = vld [vmem:[#allocation9 + $0x328] sm:$0xf]  ;;  %v8574_v51 = vld [vmem:[#allocation9 + $0x4ec] sm:$0xf] }
 0x240   :  { %4591 = vmatpush.bf16.msrb.mxu1 %v7479_v22  ;;  %v6872_v22 = vld [vmem:[#allocation9 + $0xf8] sm:$0xf0]  ;;  %4552 = vmatpush.bf16.msra.mxu2 %v7047_v4 }
 0x241   :  { %v6824_v4 = vld [vmem:[#allocation9 + $0x98] sm:$0xf0] }
 0x242   :  { %4578 = vmatpush.bf16.msrb.mxu0 %v7335_v29  ;;  %v6875_v29 = vor.u32 %v8446_v14, %v6872_v22  ;;  %4510 = vmatpush.bf16.msrb.mxu3 %v7683_v0  ;;  %v8430_v0 = vld [vmem:[#allocation9 + $0x6c] sm:$0xf]  ;;  %v7223_v14 = vor.u32 %v8536_v17, %v7222_v28  ;;  %v8612_v28 = vld [vmem:[#allocation9 + $0x614] sm:$0xf0] }
 0x243   :  { %v8462_v22 = vld [vmem:[#allocation9 + $0x16c] sm:$0xf] }
 0x244   :  { %4592 = vmatpush.bf16.msrb.mxu1 %v7463_v13  ;;  %v7667_v13 = vor.u32 %v8645_v20, %v7664_v18  ;;  %4553 = vmatpush.bf16.msra.mxu2 %v7031_v49  ;;  %v6808_v20 = vld [vmem:[#allocation9 + $0x78] sm:$0xf0]  ;;  %v7591_v18 = vor.u32 %v8628_v40, %v7590_v27  ;;  %v8510_v27 = vld [vmem:[#allocation9 + $0x2ec] sm:$0xf] }
 0x245   :  { %v6936_v49 = vld [vmem:[#allocation9 + $0x178] sm:$0xf0] }
 0x246   :  { %4579 = vmatpush.bf16.msrb.mxu0 %v7319_v16  ;;  %v7639_v16 = vor.u32 %v8640_v33, %v7638_v47  ;;  %4511 = vmatpush.bf16.msrb.mxu3 %v7667_v13  ;;  %v6792_v47 = vld [vmem:[#allocation9 + $0x58] sm:$0xf0]  ;;  %v7207_v33 = vor.u32 %v8532_v10, %v7206_v12  ;;  %v8458_v13 = vld [vmem:[#allocation9 + $0x14c] sm:$0xf] }
 0x247   :  { %v7128_v40 = vld [vmem:[#allocation9 + $0x2f8] sm:$0xf0]  ;;  %v8602_v12 = vld [vmem:[#allocation9 + $0x5cc] sm:$0xf] }
 0x248   :  { %4593 = vmatpush.bf16.msrb.mxu1 %v7447_v44  ;;  %v6859_v44 = vor.u32 %v8442_v37, %v6856_v38  ;;  %4554 = vmatpush.bf16.msra.mxu2 %v7015_v42  ;;  %v7190_v37 = vld [vmem:[#allocation9 + $0x368] sm:$0xf]  ;;  %v8528_v38 = vld [vmem:[#allocation9 + $0x374] sm:$0xf0]  ;;  %v7496_v10 = vld [vmem:[#allocation9 + $0x5d8] sm:$0xf0] }
 0x249   :  { %v7191_v48 = vor.u32 %v8528_v38, %v7190_v37  ;;  %v7767_v37 = vor.u32 %v8672_v39, %v7766_v56  ;;  %v8598_v38 = vld [vmem:[#allocation9 + $0x5ac] sm:$0xf]  ;;  %v7416_v39 = vld [vmem:[#allocation9 + $0x538] sm:$0xf0] }
 0x24a   :  { %4580 = vmatpush.bf16.msrb.mxu0 %v7303_v54  ;;  %v6968_v54 = vld [vmem:[#allocation9 + $0x1b8] sm:$0xf0]  ;;  %4512 = vmatpush.bf16.msrb.mxu3 %v7651_v2  ;;  %v7174_v2 = vld [vmem:[#allocation9 + $0x348] sm:$0xf]  ;;  %v8582_v56 = vld [vmem:[#allocation9 + $0x52c] sm:$0xf] }
 0x24b   :  { %v6971_v62 = vor.u32 %v8470_v11, %v6968_v54  ;;  %4555 = vmatmul.bf16.vlgmr.msra.gmra.mxu2 %v9302_v15  ;;  %v8418_v11 = vld [vmem:[#allocation9 + $0xc] sm:$0xf] }
 0x24c   :  { %4594 = vmatpush.bf16.msrb.mxu1 %v7431_v58  ;;  %4603 = vmatpush.bf16.msrb.mxu2 %v7639_v16  ;;  %v8540_v58 = vld [vmem:[#allocation9 + $0x3d4] sm:$0xf0]  ;;  %v8422_v16 = vld [vmem:[#allocation9 + $0x2c] sm:$0xf] }
 0x24d   :  { %v7239_v1 = vor.u32 %v8540_v58, %v7238_v55  ;;  %4513 = vmatmul.bf16.vlgmr.msrb.gmra.mxu3 %v9329_v19  ;;  %v6779_v5 = vor.u32 %v8422_v16, %v6776_v60  ;;  %v8450_v55 = vld [vmem:[#allocation9 + $0x10c] sm:$0xf]  ;;  %v6888_v58 = vld [vmem:[#allocation9 + $0x118] sm:$0xf0] }
 0x24e   :  { %4581 = vmatpush.bf16.msrb.mxu0 %v7287_v25  ;;  %4561 = vmatpush.bf16.msra.mxu3 %v7255_v6  ;;  %v6952_v25 = vld [vmem:[#allocation9 + $0x198] sm:$0xf0]  ;;  %v8616_v6 = vld [vmem:[#allocation9 + $0x634] sm:$0xf0]  ;;  %v6891_v17 = vor.u32 %v8450_v55, %v6888_v58  ;;  %v8502_v60 = vld [vmem:[#allocation9 + $0x2ac] sm:$0xf] }
 0x24f   :  { %v6955_v35 = vor.u32 %v8466_v34, %v6952_v25  ;;  %v7512_v34 = vld [vmem:[#allocation9 + $0x5f8] sm:$0xf0]  ;;  %v8558_v55 = vld [vmem:[#allocation9 + $0x46c] sm:$0xf] }
 0x250   :  { %4595 = vmatpush.bf16.msrb.mxu1 %v7415_v63  ;;  %4604 = vmatpush.bf16.msrb.mxu2 %v7623_v9  ;;  %v6827_v63 = vor.u32 %v8434_v61, %v6824_v4  ;;  %v6760_v9 = vld [vmem:[#allocation9 + $0x18] sm:$0xf0]  ;;  %v7543_v61 = vor.u32 %v8616_v6, %v7542_v7  ;;  %v8520_v4 = vld [vmem:[#allocation9 + $0x334] sm:$0xf0] }
 0x251   :  { %v6763_v25 = vor.u32 %v8418_v11, %v6760_v9  ;;  %v8664_v7 = vld [vmem:[#allocation9 + $0x7b4] sm:$0xf0]  ;;  %v8498_v11 = vld [vmem:[#allocation9 + $0x28c] sm:$0xf]  ;;  %v7320_v58 = vld [vmem:[#allocation9 + $0x478] sm:$0xf0] }
 0x252   :  { %4582 = vmatpush.bf16.msrb.mxu0 %v7271_v23  ;;  %4562 = vmatpush.bf16.msra.mxu3 %v7239_v1  ;;  %v6811_v23 = vor.u32 %v8430_v0, %v6808_v20  ;;  %v8606_v1 = vld [vmem:[#allocation9 + $0x5ec] sm:$0xf]  ;;  %v7142_v20 = vld [vmem:[#allocation9 + $0x308] sm:$0xf] }
 0x253   :  { %v7515_v0 = vor.u32 %v8606_v1, %v7512_v34  ;;  %v7323_v1 = vor.u32 %v8558_v55, %v7320_v58  ;;  %v8494_v34 = vld [vmem:[#allocation9 + $0x26c] sm:$0xf]  ;;  %v8644_v55 = vld [vmem:[#allocation9 + $0x714] sm:$0xf0] }
 0x254   :  { %4596 = vmatpush.bf16.msrb.mxu1 %v7399_v24  ;;  %4605 = vmatpush.bf16.msrb.mxu2 %v7607_v8  ;;  %v6939_v24 = vor.u32 %v8462_v22, %v6936_v49  ;;  %v7526_v8 = vld [vmem:[#allocation9 + $0x608] sm:$0xf]  ;;  %v7368_v22 = vld [vmem:[#allocation9 + $0x4d8] sm:$0xf0] }
 0x255   :  { %4583 = vmatmul.bf16.vlgmr.msrb.gmra.mxu0 %v9313_v45  ;;  %v7527_v49 = vor.u32 %v8612_v28, %v7526_v8  ;;  %v8554_v28 = vld [vmem:[#allocation9 + $0x44c] sm:$0xf] }
 0x256   :  { %4631 = vmatpush.bf16.msra.mxu0 %v6875_v29  ;;  %v8426_v29 = vld [vmem:[#allocation9 + $0x4c] sm:$0xf]  ;;  %4563 = vmatpush.bf16.msra.mxu3 %v7223_v14 }
 0x257   :  { %4597 = vmatmul.bf16.vlgmr.msrb.gmra.mxu1 %v9316_v31  ;;  %v6795_v42 = vor.u32 %v8426_v29, %v6792_v47  ;;  %v8570_v14 = vld [vmem:[#allocation9 + $0x4cc] sm:$0xf]  ;;  %v7112_v47 = vld [vmem:[#allocation9 + $0x2d8] sm:$0xf0] }
 0x258   :  { %4645 = vmatpush.bf16.msra.mxu1 %v7003_v32  ;;  %v6920_v32 = vld [vmem:[#allocation9 + $0x158] sm:$0xf0]  ;;  %4606 = vmatpush.bf16.msrb.mxu2 %v7591_v18  ;;  %v8516_v18 = vld [vmem:[#allocation9 + $0x314] sm:$0xf0]  ;;  %v8506_v29 = vld [vmem:[#allocation9 + $0x2cc] sm:$0xf] }
 0x259   :  { %v6923_v46 = vor.u32 %v8458_v13, %v6920_v32  ;;  %v7499_v13 = vor.u32 %v8602_v12, %v7496_v10  ;;  %v8566_v32 = vld [vmem:[#allocation9 + $0x4ac] sm:$0xf]  ;;  %v7115_v43 = vor.u32 %v8506_v29, %v7112_v47  ;;  %v7288_v10 = vld [vmem:[#allocation9 + $0x438] sm:$0xf0]  ;;  %v7686_v29 = vld [vmem:[#allocation9 + $0x748] sm:$0xf] }
 0x25a   :  { %4632 = vmatpush.bf16.msra.mxu0 %v6859_v44  ;;  %4564 = vmatpush.bf16.msra.mxu3 %v7207_v33  ;;  %v8454_v44 = vld [vmem:[#allocation9 + $0x12c] sm:$0xf]  ;;  %v7143_v33 = vor.u32 %v8516_v18, %v7142_v20  ;;  %v8656_v20 = vld [vmem:[#allocation9 + $0x774] sm:$0xf0] }
 0x25b   :  { %v6907_v54 = vor.u32 %v8454_v44, %v6904_v26  ;;  %v8562_v26 = vld [vmem:[#allocation9 + $0x48c] sm:$0xf]  ;;  %v8652_v47 = vld [vmem:[#allocation9 + $0x754] sm:$0xf0] }
 0x25c   :  { %4646 = vmatpush.bf16.msra.mxu1 %v6987_v53  ;;  %4607 = vmatpush.bf16.msrb.mxu2 %v7575_v30  ;;  %v8524_v53 = vld [vmem:[#allocation9 + $0x354] sm:$0xf0]  ;;  %v7352_v30 = vld [vmem:[#allocation9 + $0x4b8] sm:$0xf0]  ;;  %v8550_v12 = vld [vmem:[#allocation9 + $0x42c] sm:$0xf] }
 0x25d   :  { %v7355_v16 = vor.u32 %v8566_v32, %v7352_v30  ;;  %v7032_v32 = vld [vmem:[#allocation9 + $0x238] sm:$0xf0]  ;;  %v7419_v30 = vor.u32 %v8582_v56, %v7416_v39  ;;  %v8530_v56 = vld [vmem:[#allocation9 + $0x38c] sm:$0xf] }
 0x25e   :  { %4633 = vmatpush.bf16.msra.mxu0 %v6843_v57  ;;  %4565 = vmatpush.bf16.msra.mxu3 %v7191_v48  ;;  %v7175_v57 = vor.u32 %v8524_v53, %v7174_v2  ;;  %v7096_v48 = vld [vmem:[#allocation9 + $0x2b8] sm:$0xf0]  ;;  %v8594_v2 = vld [vmem:[#allocation9 + $0x58c] sm:$0xf] }
 0x25f   :  { %v7464_v53 = vld [vmem:[#allocation9 + $0x598] sm:$0xf0] }
 0x260   :  { %4647 = vmatpush.bf16.msra.mxu1 %v6971_v62  ;;  %v7384_v62 = vld [vmem:[#allocation9 + $0x4f8] sm:$0xf0]  ;;  %4608 = vmatpush.bf16.msrb.mxu2 %v7559_v36  ;;  %v7467_v9 = vor.u32 %v8594_v2, %v7464_v53  ;;  %v8638_v53 = vld [vmem:[#allocation9 + $0x6ec] sm:$0xf] }
 0x261   :  { %v7336_v36 = vld [vmem:[#allocation9 + $0x498] sm:$0xf0] }
 0x262   :  { %4634 = vmatpush.bf16.msra.mxu0 %v6827_v63  ;;  %v7387_v63 = vor.u32 %v8574_v51, %v7384_v62  ;;  %4566 = vmatpush.bf16.msra.mxu3 %v7175_v57  ;;  %v7339_v6 = vor.u32 %v8562_v26, %v7336_v36  ;;  %v7448_v51 = vld [vmem:[#allocation9 + $0x578] sm:$0xf0]  ;;  %v8482_v36 = vld [vmem:[#allocation9 + $0x20c] sm:$0xf] }
 0x263   :  { %v7208_v39 = vld [vmem:[#allocation9 + $0x398] sm:$0xf0] }
 0x264   :  { %4648 = vmatpush.bf16.msra.mxu1 %v6955_v35  ;;  %v7159_v35 = vor.u32 %v8520_v4, %v7158_v59  ;;  %4609 = vmatpush.bf16.msrb.mxu2 %v7543_v61  ;;  %v8590_v59 = vld [vmem:[#allocation9 + $0x56c] sm:$0xf]  ;;  %v7718_v61 = vld [vmem:[#allocation9 + $0x788] sm:$0xf]  ;;  %v8660_v4 = vld [vmem:[#allocation9 + $0x794] sm:$0xf0] }
 0x265   :  { %v7451_v8 = vor.u32 %v8590_v59, %v7448_v51  ;;  %v7256_v59 = vld [vmem:[#allocation9 + $0x3f8] sm:$0xf0]  ;;  %v8634_v51 = vld [vmem:[#allocation9 + $0x6cc] sm:$0xf] }
 0x266   :  { %4635 = vmatpush.bf16.msra.mxu0 %v6811_v23  ;;  %v7131_v23 = vor.u32 %v8510_v27, %v7128_v40  ;;  %4567 = vmatpush.bf16.msra.mxu3 %v7159_v35  ;;  %v8586_v27 = vld [vmem:[#allocation9 + $0x54c] sm:$0xf]  ;;  %v7432_v40 = vld [vmem:[#allocation9 + $0x558] sm:$0xf0] }
 0x267   :  { %v7435_v18 = vor.u32 %v8586_v27, %v7432_v40  ;;  %v7608_v27 = vld [vmem:[#allocation9 + $0x6b8] sm:$0xf0] }
 0x268   :  { %4649 = vmatpush.bf16.msra.mxu1 %v6939_v24  ;;  %v7371_v24 = vor.u32 %v8570_v14, %v7368_v22  ;;  %4610 = vmatpush.bf16.msrb.mxu2 %v7527_v49  ;;  %v8490_v22 = vld [vmem:[#allocation9 + $0x24c] sm:$0xf]  ;;  %v7048_v49 = vld [vmem:[#allocation9 + $0x258] sm:$0xf0] }
 0x26a   :  { %4636 = vmatpush.bf16.msra.mxu0 %v6795_v42  ;;  %v7480_v42 = vld [vmem:[#allocation9 + $0x5b8] sm:$0xf0]  ;;  %4568 = vmatpush.bf16.msra.mxu3 %v7143_v33  ;;  %v7291_v33 = vor.u32 %v8550_v12, %v7288_v10  ;;  %v7798_v12 = vld [vmem:[#allocation12 + $0x30] sm:$0xf] }
 0x26b   :  { %v7483_v44 = vor.u32 %v8598_v38, %v7480_v42  ;;  %4611 = vmatmul.bf16.vlgmr.msrb.gmra.mxu2 %v9322_v21  ;;  %v7272_v38 = vld [vmem:[#allocation9 + $0x418] sm:$0xf0]  ;;  %v8578_v42 = vld [vmem:[#allocation9 + $0x50c] sm:$0xf] }
 0x26c   :  { %4650 = vmatpush.bf16.msra.mxu1 %v6923_v46  ;;  %4659 = vmatpush.bf16.msra.mxu2 %v7131_v23  ;;  %v8668_v46 = vld [vmem:[#allocation9 + $0x7d4] sm:$0xf0]  ;;  %v8680_v10 = vld [vmem:[#allocation12 + $0x34] sm:$0xf0] }
 0x26d   :  { %4569 = vmatmul.bf16.vlgmr.msra.gmra.mxu3 %v9305_v3 }
 0x26e   :  { %4637 = vmatpush.bf16.msra.mxu0 %v6779_v5  ;;  %4617 = vmatpush.bf16.msrb.mxu3 %v7767_v37  ;;  %v7734_v5 = vld [vmem:[#allocation9 + $0x7a8] sm:$0xf]  ;;  %v8546_v37 = vld [vmem:[#allocation9 + $0x40c] sm:$0xf] }
 0x26f   :  { %v7735_v57 = vor.u32 %v8664_v7, %v7734_v5  ;;  %v7275_v26 = vor.u32 %v8546_v37, %v7272_v38  ;;  %v9349_v37 = vpop.f32.mrf.mxu1 }
 0x270   :  { %4651 = vmatpush.bf16.msra.mxu1 %v6907_v54  ;;  %4660 = vmatpush.bf16.msra.mxu2 %v7115_v43  ;;  %v7080_v54 = vld [vmem:[#allocation9 + $0x298] sm:$0xf0]  ;;  %v7687_v43 = vor.u32 %v8652_v47, %v7686_v29  ;;  %v7799_v47 = vor.u32 %v8680_v10, %v7798_v12  ;;  %v9357_v12 = vld [vmem:[#allocation11] sm:$0xf] }
 0x271   :  { %v7083_v62 = vor.u32 %v8498_v11, %v7080_v54  ;;  %v8686_v11 = vld [vmem:[#allocation12 + $0x64] sm:$0xf0]  ;;  %v7576_v29 = vld [vmem:[#allocation9 + $0x678] sm:$0xf0] }
 0x272   :  { %4638 = vmatpush.bf16.msra.mxu0 %v6763_v25  ;;  %v7064_v25 = vld [vmem:[#allocation9 + $0x278] sm:$0xf0] }
 0x273   :  { %v7067_v35 = vor.u32 %v8494_v34, %v7064_v25  ;;  %v8684_v34 = vld [vmem:[#allocation12 + $0x54] sm:$0xf0] }
 0x274   :  { %4652 = vmatpush.bf16.msra.mxu1 %v6891_v17  ;;  %v7304_v17 = vld [vmem:[#allocation9 + $0x458] sm:$0xf0] }
 0x275   :  { %4639 = vmatmul.bf16.vlgmr.msra.gmra.mxu0 %v9298_v41  ;;  %v7751_v41 = vor.u32 %v8668_v46, %v7750_v52  ;;  %v7307_v14 = vor.u32 %v8554_v28, %v7304_v17  ;;  %v7400_v52 = vld [vmem:[#allocation9 + $0x518] sm:$0xf0]  ;;  %v7830_v46 = vld [vmem:[#allocation12 + $0x70] sm:$0xf]  ;;  %v8538_v28 = vld [vmem:[#allocation9 + $0x3cc] sm:$0xf] }
 0x276   :  { %4687 = vmatpush.bf16.msrb.mxu0 %v7387_v63  ;;  %v7719_v63 = vor.u32 %v8660_v4, %v7718_v61  ;;  %v7403_v2 = vor.u32 %v8578_v42, %v7400_v52  ;;  %v7240_v17 = vld [vmem:[#allocation9 + $0x3d8] sm:$0xf0]  ;;  %v8526_v42 = vld [vmem:[#allocation9 + $0x36c] sm:$0xf] }
 0x277   :  { %4653 = vmatmul.bf16.vlgmr.msra.gmra.mxu1 %v9300_v50  ;;  %v7099_v50 = vor.u32 %v8502_v60, %v7096_v48  ;;  %4618 = vmatpush.bf16.msrb.mxu3 %v7751_v41  ;;  %v7670_v48 = vld [vmem:[#allocation9 + $0x728] sm:$0xf]  ;;  %v7016_v41 = vld [vmem:[#allocation9 + $0x218] sm:$0xf0]  ;;  %v8618_v52 = vld [vmem:[#allocation9 + $0x64c] sm:$0xf] }
 0x278   :  { %4701 = vmatpush.bf16.msrb.mxu1 %v7515_v0  ;;  %v7702_v0 = vld [vmem:[#allocation9 + $0x768] sm:$0xf]  ;;  %v7019_v54 = vor.u32 %v8482_v36, %v7016_v41  ;;  %v8704_v36 = vld [vmem:[#allocation12 + $0xf4] sm:$0xf0]  ;;  %v9351_v41 = vpop.f32.mrf.mxu2 }
 0x279   :  { %4661 = vmatpush.bf16.msra.mxu2 %v7099_v50  ;;  %v7703_v23 = vor.u32 %v8656_v20, %v7702_v0  ;;  %v7640_v50 = vld [vmem:[#allocation9 + $0x6f8] sm:$0xf0]  ;;  %v8682_v0 = vld [vmem:[#allocation12 + $0x44] sm:$0xf0]  ;;  %v7243_v20 = vor.u32 %v8538_v28, %v7240_v17  ;;  %v9355_v17 = vpop.f32.mrf.mxu1 }
 0x27a   :  { %4688 = vmatpush.bf16.msrb.mxu0 %v7371_v24  ;;  %v7051_v24 = vor.u32 %v8490_v22, %v7048_v49  ;;  %v7643_v58 = vor.u32 %v8638_v53, %v7640_v50  ;;  %v7224_v22 = vld [vmem:[#allocation9 + $0x3b8] sm:$0xf0]  ;;  %v8522_v53 = vld [vmem:[#allocation9 + $0x34c] sm:$0xf] }
 0x27b   :  { %4619 = vmatpush.bf16.msrb.mxu3 %v7735_v57  ;;  %v8542_v57 = vld [vmem:[#allocation9 + $0x3ec] sm:$0xf]  ;;  %v7592_v49 = vld [vmem:[#allocation9 + $0x698] sm:$0xf0] }
 0x27c   :  { %4702 = vmatpush.bf16.msrb.mxu1 %v7499_v13  ;;  %v8486_v13 = vld [vmem:[#allocation9 + $0x22c] sm:$0xf]  ;;  %v7259_v25 = vor.u32 %v8542_v57, %v7256_v59  ;;  %v7176_v50 = vld [vmem:[#allocation9 + $0x358] sm:$0xf0]  ;;  %v7832_v57 = vld [vmem:[#allocation12 + $0x78] sm:$0xf0] }
 0x27d   :  { %4662 = vmatpush.bf16.msra.mxu2 %v7083_v62  ;;  %v7035_v60 = vor.u32 %v8486_v13, %v7032_v32  ;;  %v7624_v62 = vld [vmem:[#allocation9 + $0x6d8] sm:$0xf0]  ;;  %v8678_v13 = vld [vmem:[#allocation12 + $0x24] sm:$0xf0]  ;;  %v7211_v32 = vor.u32 %v8530_v56, %v7208_v39  ;;  %v7886_v59 = vld [vmem:[#allocation12 + $0xe0] sm:$0xf] }
 0x27e   :  { %4689 = vmatpush.bf16.msrb.mxu0 %v7355_v16  ;;  %v8688_v16 = vld [vmem:[#allocation12 + $0x74] sm:$0xf0]  ;;  %v7816_v39 = vld [vmem:[#allocation12 + $0x58] sm:$0xf0] }
 0x27f   :  { %4620 = vmatpush.bf16.msrb.mxu3 %v7719_v63  ;;  %v7831_v5 = vor.u32 %v8688_v16, %v7830_v46  ;;  %v8630_v63 = vld [vmem:[#allocation9 + $0x6ac] sm:$0xf]  ;;  %v7560_v46 = vld [vmem:[#allocation9 + $0x658] sm:$0xf0] }
 0x280   :  { %4703 = vmatpush.bf16.msrb.mxu1 %v7483_v44  ;;  %v8648_v44 = vld [vmem:[#allocation9 + $0x734] sm:$0xf0]  ;;  %v9359_v10 = vpop.f32.mrf.mxu2 }
 0x281   :  { %4663 = vmatpush.bf16.msra.mxu2 %v7067_v35  ;;  %v7671_v7 = vor.u32 %v8648_v44, %v7670_v48  ;;  %v7806_v35 = vld [vmem:[#allocation12 + $0x40] sm:$0xf]  ;;  %v8676_v48 = vld [vmem:[#allocation12 + $0x14] sm:$0xf0] }
 0x282   :  { %4690 = vmatpush.bf16.msrb.mxu0 %v7339_v6  ;;  %v7822_v6 = vld [vmem:[#allocation12 + $0x60] sm:$0xf] }
 0x283   :  { %4621 = vmatpush.bf16.msrb.mxu3 %v7703_v23  ;;  %v7823_v61 = vor.u32 %v8686_v11, %v7822_v6  ;;  %v7544_v6 = vld [vmem:[#allocation9 + $0x638] sm:$0xf0] }
 0x284   :  { %4704 = vmatpush.bf16.msrb.mxu1 %v7467_v9  ;;  %v7654_v9 = vld [vmem:[#allocation9 + $0x708] sm:$0xf] }
 0x285   :  { %4664 = vmatpush.bf16.msra.mxu2 %v7051_v24  ;;  %v7655_v4 = vor.u32 %v8644_v55, %v7654_v9  ;;  %v8622_v24 = vld [vmem:[#allocation9 + $0x66c] sm:$0xf]  ;;  %v8687_v55 = vld [vmem:[#allocation12 + $0x74] sm:$0xf] }
 0x286   :  { %4691 = vmatpush.bf16.msrb.mxu0 %v7323_v1  ;;  %v7814_v1 = vld [vmem:[#allocation12 + $0x50] sm:$0xf]  ;;  %v7579_v38 = vor.u32 %v8622_v24, %v7576_v29  ;;  %v8674_v9 = vld [vmem:[#allocation12 + $0x4] sm:$0xf0]  ;;  %v7870_v24 = vld [vmem:[#allocation12 + $0xc0] sm:$0xf] }
 0x287   :  { %4622 = vmatpush.bf16.msrb.mxu3 %v7687_v43  ;;  %v7815_v40 = vor.u32 %v8684_v34, %v7814_v1  ;;  %v7192_v43 = vld [vmem:[#allocation9 + $0x378] sm:$0xf0]  ;;  %v8610_v34 = vld [vmem:[#allocation9 + $0x60c] sm:$0xf] }
 0x288   :  { %4705 = vmatpush.bf16.msrb.mxu1 %v7451_v8  ;;  %v7627_v8 = vor.u32 %v8634_v51, %v7624_v62  ;;  %v7195_v44 = vor.u32 %v8526_v42, %v7192_v43  ;;  %v8702_v51 = vld [vmem:[#allocation12 + $0xe4] sm:$0xf0]  ;;  %v3007_v42 = vperm.slane %v9357_v12, 0 }
 0x289   :  { %4665 = vmatpush.bf16.msra.mxu2 %v7035_v60  ;;  %v7782_v60 = vld [vmem:[#allocation12 + $0x10] sm:$0xf]  ;;  %v7887_v1 = vor.u32 %v8702_v51, %v7886_v59  ;;  %v8698_v29 = vld [vmem:[#allocation12 + $0xc4] sm:$0xf0]  ;;  %v7720_v59 = vld [vmem:[#allocation9 + $0x798] sm:$0xf0] }
 0x28a   :  { %4692 = vmatpush.bf16.msrb.mxu0 %v7307_v14  ;;  %v8534_v14 = vld [vmem:[#allocation9 + $0x3ac] sm:$0xf]  ;;  %v7783_v11 = vor.u32 %v8676_v48, %v7782_v60  ;;  %v7808_v60 = vld [vmem:[#allocation12 + $0x48] sm:$0xf0]  ;;  %v7862_v48 = vld [vmem:[#allocation12 + $0xb0] sm:$0xf] }
 0x28b   :  { %4623 = vmatpush.bf16.msrb.mxu3 %v7671_v7  ;;  %v7227_v23 = vor.u32 %v8534_v14, %v7224_v22  ;;  %v8614_v7 = vld [vmem:[#allocation9 + $0x62c] sm:$0xf]  ;;  %v7144_v22 = vld [vmem:[#allocation9 + $0x318] sm:$0xf0] }
 0x28c   :  { %4706 = vmatpush.bf16.msrb.mxu1 %v7435_v18  ;;  %v7807_v18 = vor.u32 %v8682_v0, %v7806_v35  ;;  %v7547_v62 = vor.u32 %v8614_v7, %v7544_v6  ;;  %v7824_v35 = vld [vmem:[#allocation12 + $0x68] sm:$0xf0]  ;;  %v7878_v0 = vld [vmem:[#allocation12 + $0xd0] sm:$0xf]  ;;  %v8514_v14 = vld [vmem:[#allocation9 + $0x30c] sm:$0xf] }
 0x28d   :  { %4666 = vmatpush.bf16.msra.mxu2 %v7019_v54  ;;  %v7774_v54 = vld [vmem:[#allocation12] sm:$0xf]  ;;  %v7147_v56 = vor.u32 %v8514_v14, %v7144_v22  ;;  %v8679_v7 = vld [vmem:[#allocation12 + $0x34] sm:$0xf]  ;;  %v8690_v22 = vld [vmem:[#allocation12 + $0x84] sm:$0xf0] }
 0x28e   :  { %4693 = vmatpush.bf16.msrb.mxu0 %v7291_v33  ;;  %v7790_v33 = vld [vmem:[#allocation12 + $0x20] sm:$0xf] }
 0x28f   :  { %4624 = vmatpush.bf16.msrb.mxu3 %v7655_v4  ;;  %v7791_v16 = vor.u32 %v8678_v13, %v7790_v33  ;;  %v7160_v4 = vld [vmem:[#allocation9 + $0x338] sm:$0xf0]  ;;  %v7871_v13 = vor.u32 %v8698_v29, %v7870_v24  ;;  %v7838_v14 = vld [vmem:[#allocation12 + $0x80] sm:$0xf] }
 0x290   :  { %4707 = vmatpush.bf16.msrb.mxu1 %v7419_v30  ;;  %4667 = vmatmul.bf16.vlgmr.msra.gmra.mxu2 %v9302_v15  ;;  %v9347_v30 = vpop.f32.mrf.mxu0 }
 0x291   :  { %4715 = vmatpush.bf16.msrb.mxu2 %v7643_v58  ;;  %v7179_v58 = vor.u32 %v8522_v53, %v7176_v50  ;;  %v7736_v53 = vld [vmem:[#allocation9 + $0x7b8] sm:$0xf0]  ;;  %v9369_v50 = vpop.f32.mrf.mxu2  ;;  %v4305_v6 = vadd.f32 %v9347_v30, %v3007_v42  ;;  %v7846_v30 = vld [vmem:[#allocation12 + $0x90] sm:$0xf] }
 0x292   :  { %4694 = vmatpush.bf16.msrb.mxu0 %v7275_v26  ;;  %4625 = vmatmul.bf16.vlgmr.msrb.gmra.mxu3 %v9329_v19  ;;  %v7894_v26 = vld [vmem:[#allocation12 + $0xf0] sm:$0xf] }
 0x293   :  { %4673 = vmatpush.bf16.msra.mxu3 %v7259_v25  ;;  %v7528_v25 = vld [vmem:[#allocation9 + $0x618] sm:$0xf0] }
 0x294   :  { %4708 = vmatpush.bf16.msrb.mxu1 %v7403_v2  ;;  %v7563_v2 = vor.u32 %v8618_v52, %v7560_v46  ;;  %v9366_v52 = vpop.f32.mrf.mxu1 }
 0x295   :  { %4695 = vmatmul.bf16.vlgmr.msrb.gmra.mxu0 %v9313_v45  ;;  %4716 = vmatpush.bf16.msrb.mxu2 %v7627_v8  ;;  %v7611_v45 = vor.u32 %v8630_v63, %v7608_v27  ;;  %v7775_v8 = vor.u32 %v8674_v9, %v7774_v54  ;;  %v7835_v63 = vor.u32 %v8687_v55, %v7832_v57  ;;  %v8685_v27 = vld [vmem:[#allocation12 + $0x64] sm:$0xf]  ;;  %v8694_v54 = vld [vmem:[#allocation12 + $0xa4] sm:$0xf0] }
 0x296   :  { %5145 = vmatpush.bf16.msra.mxu0 %v7831_v5  ;;  %v7895_v5 = vor.u32 %v8704_v36, %v7894_v26  ;;  %v8658_v57 = vld [vmem:[#allocation9 + $0x78c] sm:$0xf] }
 0x297   :  { %4709 = vmatmul.bf16.vlgmr.msrb.gmra.mxu1 %v9316_v31  ;;  %v8626_v31 = vld [vmem:[#allocation9 + $0x68c] sm:$0xf]  ;;  %4674 = vmatpush.bf16.msra.mxu3 %v7243_v20  ;;  %v8700_v20 = vld [vmem:[#allocation12 + $0xd4] sm:$0xf0] }
 0x298   :  { %v7595_v15 = vor.u32 %v8626_v31, %v7592_v49  ;;  %5159 = vmatpush.bf16.msra.mxu1 %v7895_v5  ;;  %v9353_v28 = vpop.f32.mrf.mxu0  ;;  %v7879_v31 = vor.u32 %v8700_v20, %v7878_v0  ;;  %v8670_v49 = vld [vmem:[#allocation9 + $0x7ec] sm:$0xf]  ;;  %v8675_v20 = vld [vmem:[#allocation12 + $0x14] sm:$0xf] }
 0x299   :  { %4717 = vmatpush.bf16.msrb.mxu2 %v7611_v45  ;;  %v7531_v45 = vor.u32 %v8610_v34, %v7528_v25 }
 0x29a   :  { %5146 = vmatpush.bf16.msra.mxu0 %v7823_v61  ;;  %v8518_v61 = vld [vmem:[#allocation9 + $0x32c] sm:$0xf] }
 0x29b   :  { %4675 = vmatpush.bf16.msra.mxu3 %v7227_v23  ;;  %v7827_v23 = vor.u32 %v8685_v27, %v7824_v35  ;;  %v7704_v35 = vld [vmem:[#allocation9 + $0x778] sm:$0xf0] }
 0x29c   :  { %5160 = vmatpush.bf16.msra.mxu1 %v7887_v1  ;;  %v8692_v1 = vld [vmem:[#allocation12 + $0x94] sm:$0xf0]  ;;  %v4376_v25 = vpop.f32.mrf.mxu1 }
 0x29d   :  { %4718 = vmatpush.bf16.msrb.mxu2 %v7595_v15  ;;  %v8683_v15 = vld [vmem:[#allocation12 + $0x54] sm:$0xf] }
 0x29e   :  { %5147 = vmatpush.bf16.msra.mxu0 %v7815_v40  ;;  %v7163_v40 = vor.u32 %v8518_v61, %v7160_v4  ;;  %v7819_v46 = vor.u32 %v8683_v15, %v7816_v39  ;;  %v4319_v61 = vadd.f32 %v9349_v37, %v4305_v6  ;;  %v7792_v4 = vld [vmem:[#allocation12 + $0x28] sm:$0xf0]  ;;  %v7896_v15 = vld [vmem:[#allocation12 + $0xf8] sm:$0xf0] }
 0x29f   :  { %4676 = vmatpush.bf16.msra.mxu3 %v7211_v32  ;;  %v8666_v32 = vld [vmem:[#allocation9 + $0x7cc] sm:$0xf]  ;;  %v7880_v6 = vld [vmem:[#allocation12 + $0xd8] sm:$0xf0] }
 0x2a0   :  { %5161 = vmatpush.bf16.msra.mxu1 %v7879_v31  ;;  %v9364_v43 = vpop.f32.mrf.mxu0  ;;  %v4333_v27 = vadd.f32 %v9351_v41, %v4319_v61  ;;  %v4390_v31 = vpop.f32.mrf.mxu2 }
 0x2a1   :  { %4719 = vmatpush.bf16.msrb.mxu2 %v7579_v38  ;;  %v7752_v38 = vld [vmem:[#allocation9 + $0x7d8] sm:$0xf0] }
 0x2a2   :  { %5148 = vmatpush.bf16.msra.mxu0 %v7807_v18  ;;  %v7768_v18 = vld [vmem:[#allocation9 + $0x7f8] sm:$0xf0]  ;;  %v7755_v26 = vor.u32 %v8666_v32, %v7752_v38  ;;  %v7776_v32 = vld [vmem:[#allocation12 + $0x8] sm:$0xf0] }
 0x2a3   :  { %4677 = vmatpush.bf16.msra.mxu3 %v7195_v44  ;;  %v7771_v33 = vor.u32 %v8670_v49, %v7768_v18  ;;  %v8696_v44 = vld [vmem:[#allocation12 + $0xb4] sm:$0xf0]  ;;  %v7839_v18 = vor.u32 %v8690_v22, %v7838_v14  ;;  %v7848_v14 = vld [vmem:[#allocation12 + $0x98] sm:$0xf0] }
 0x2a4   :  { %5162 = vmatpush.bf16.msra.mxu1 %v7871_v13  ;;  %v7863_v36 = vor.u32 %v8696_v44, %v7862_v48  ;;  %v8673_v13 = vld [vmem:[#allocation12 + $0x4] sm:$0xf]  ;;  %v8646_v48 = vld [vmem:[#allocation9 + $0x72c] sm:$0xf]  ;;  %v7672_v44 = vld [vmem:[#allocation9 + $0x738] sm:$0xf0] }
 0x2a5   :  { %4720 = vmatpush.bf16.msrb.mxu2 %v7563_v2  ;;  %v8662_v2 = vld [vmem:[#allocation9 + $0x7ac] sm:$0xf] }
 0x2a6   :  { %5149 = vmatpush.bf16.msra.mxu0 %v7799_v47  ;;  %v9361_v47 = vpop.f32.mrf.mxu3  ;;  %v7739_v9 = vor.u32 %v8662_v2, %v7736_v53  ;;  %v7779_v2 = vor.u32 %v8673_v13, %v7776_v32 }
 0x2a7   :  { %4678 = vmatpush.bf16.msra.mxu3 %v7179_v58  ;;  %v4307_v58 = vadd.f32 %v9353_v28, %v3007_v42  ;;  %v4347_v41 = vadd.f32 %v9361_v47, %v4333_v27 }
 0x2a8   :  { %5163 = vmatpush.bf16.msra.mxu1 %v7863_v36  ;;  %v4362_v34 = vpop.f32.mrf.mxu0  ;;  %v4430_v36 = vpop.f32.mrf.mxu1 }
 0x2a9   :  { %4721 = vmatpush.bf16.msrb.mxu2 %v7547_v62  ;;  %v4321_v28 = vadd.f32 %v9355_v17, %v4307_v58  ;;  %v8650_v17 = vld [vmem:[#allocation9 + $0x74c] sm:$0xf] }
 0x2aa   :  { %5150 = vmatpush.bf16.msra.mxu0 %v7791_v16  ;;  %v8681_v16 = vld [vmem:[#allocation12 + $0x44] sm:$0xf] }
 0x2ab   :  { %4679 = vmatpush.bf16.msra.mxu3 %v7163_v40  ;;  %v7811_v5 = vor.u32 %v8681_v16, %v7808_v60  ;;  %v8654_v40 = vld [vmem:[#allocation9 + $0x76c] sm:$0xf]  ;;  %v4335_v37 = vadd.f32 %v9359_v10, %v4321_v28  ;;  %v4361_v10 = vadd.f32 %v9364_v43, %v4347_v41  ;;  %v7888_v16 = vld [vmem:[#allocation12 + $0xe8] sm:$0xf0] }
 0x2ac   :  { %v7707_v49 = vor.u32 %v8654_v40, %v7704_v35  ;;  %v8693_v40 = vld [vmem:[#allocation12 + $0xa4] sm:$0xf]  ;;  %v7856_v35 = vld [vmem:[#allocation12 + $0xa8] sm:$0xf0] }
 0x2ad   :  { %4722 = vmatpush.bf16.msrb.mxu2 %v7531_v45  ;;  %v7784_v45 = vld [vmem:[#allocation12 + $0x18] sm:$0xf0]  ;;  %v4375_v47 = vadd.f32 %v9366_v52, %v4361_v10  ;;  %v4444_v52 = vpop.f32.mrf.mxu2  ;;  %v7840_v10 = vld [vmem:[#allocation12 + $0x88] sm:$0xf0] }
 0x2ae   :  { %5151 = vmatpush.bf16.msra.mxu0 %v7783_v11  ;;  %v7800_v11 = vld [vmem:[#allocation12 + $0x38] sm:$0xf0]  ;;  %v4348_v51 = vpop.f32.mrf.mxu3  ;;  %v7787_v29 = vor.u32 %v8675_v20, %v7784_v45  ;;  %v7859_v20 = vor.u32 %v8693_v40, %v7856_v35  ;;  %v8691_v45 = vld [vmem:[#allocation12 + $0x94] sm:$0xf]  ;;  %v8717_v35 = vld [vmem:[#allocation12 + $0x164] sm:$0xf] }
 0x2af   :  { %4680 = vmatpush.bf16.msra.mxu3 %v7147_v56  ;;  %v7803_v62 = vor.u32 %v8679_v7, %v7800_v11  ;;  %v7688_v56 = vld [vmem:[#allocation9 + $0x758] sm:$0xf0]  ;;  %v4389_v43 = vadd.f32 %v9369_v50, %v4375_v47  ;;  %v8699_v7 = vld [vmem:[#allocation12 + $0xd4] sm:$0xf] }
 0x2b0   :  { %4723 = vmatmul.bf16.vlgmr.msrb.gmra.mxu2 %v9322_v21  ;;  %v7854_v21 = vld [vmem:[#allocation12 + $0xa0] sm:$0xf]  ;;  %v4416_v38 = vpop.f32.mrf.mxu0  ;;  %v7691_v42 = vor.u32 %v8650_v17, %v7688_v56 }
 0x2b1   :  { %v7855_v55 = vor.u32 %v8694_v54, %v7854_v21  ;;  %v8642_v54 = vld [vmem:[#allocation9 + $0x70c] sm:$0xf] }
 0x2b2   :  { %5152 = vmatpush.bf16.msra.mxu0 %v7775_v8  ;;  %4681 = vmatmul.bf16.vlgmr.msra.gmra.mxu3 %v9305_v3  ;;  %v8677_v3 = vld [vmem:[#allocation12 + $0x24] sm:$0xf]  ;;  %v7723_v8 = vor.u32 %v8658_v57, %v7720_v59 }
 0x2b3   :  { %4729 = vmatpush.bf16.msrb.mxu3 %v7771_v33  ;;  %5164 = vmatpush.bf16.msra.mxu1 %v7855_v55  ;;  %v7795_v0 = vor.u32 %v8677_v3, %v7792_v4  ;;  %v4349_v33 = vadd.f32 %v4348_v51, %v4335_v37  ;;  %v7883_v55 = vor.u32 %v8699_v7, %v7880_v6  ;;  %v8697_v51 = vld [vmem:[#allocation12 + $0xc4] sm:$0xf]  ;;  %v7934_v6 = vld [vmem:[#allocation12 + $0x140] sm:$0xf] }
 0x2b5   :  { %v4363_v60 = vadd.f32 %v4362_v34, %v4349_v33  ;;  %v8695_v34 = vld [vmem:[#allocation12 + $0xb4] sm:$0xf]  ;;  %v4446_v28 = vpop.f32.mrf.mxu2 }
 0x2b6   :  { %5201 = vmatpush.bf16.msrb.mxu0 %v7835_v63  ;;  %v7847_v63 = vor.u32 %v8692_v1, %v7846_v30  ;;  %v4402_v24 = vpop.f32.mrf.mxu3  ;;  %v4432_v1 = vpop.f32.mrf.mxu1 }
 0x2b7   :  { %4730 = vmatpush.bf16.msrb.mxu3 %v7755_v26  ;;  %v4377_v53 = vadd.f32 %v4376_v25, %v4363_v60  ;;  %v4403_v21 = vadd.f32 %v4402_v24, %v4389_v43  ;;  %v7864_v25 = vld [vmem:[#allocation12 + $0xb8] sm:$0xf0]  ;;  %v8689_v24 = vld [vmem:[#allocation12 + $0x84] sm:$0xf] }
 0x2b8   :  { %5165 = vmatpush.bf16.msra.mxu1 %v7847_v63  ;;  %v4418_v4 = vpop.f32.mrf.mxu0  ;;  %v7867_v63 = vor.u32 %v8695_v34, %v7864_v25  ;;  %v7843_v32 = vor.u32 %v8689_v24, %v7840_v10  ;;  %v7902_v25 = vld [vmem:[#allocation12 + $0x100] sm:$0xf] }
 0x2b9   :  { %v4391_v11 = vadd.f32 %v4390_v31, %v4377_v53  ;;  %v4743_v50 = vmax.f32 %v4403_v21, 0.0 }
 0x2ba   :  { %5202 = vmatpush.bf16.msrb.mxu0 %v7827_v23  ;;  %v8703_v23 = vld [vmem:[#allocation12 + $0xf4] sm:$0xf] }
 0x2bb   :  { %4731 = vmatpush.bf16.msrb.mxu3 %v7739_v9  ;;  %v7899_v39 = vor.u32 %v8703_v23, %v7896_v15  ;;  %v7656_v9 = vld [vmem:[#allocation9 + $0x718] sm:$0xf0] }
 0x2bc   :  { %5166 = vmatpush.bf16.msra.mxu1 %v7839_v18  ;;  %v7659_v59 = vor.u32 %v8642_v54, %v7656_v9 }
 0x2bd   :  { %v4500_v13 = vpop.f32.mrf.mxu2 }
 0x2be   :  { %5203 = vmatpush.bf16.msrb.mxu0 %v7819_v46  ;;  %v8701_v46 = vld [vmem:[#allocation12 + $0xe4] sm:$0xf]  ;;  %v4404_v58 = vpop.f32.mrf.mxu3  ;;  %v4486_v15 = vpop.f32.mrf.mxu1 }
 0x2bf   :  { %4732 = vmatpush.bf16.msrb.mxu3 %v7723_v8  ;;  %v7891_v26 = vor.u32 %v8701_v46, %v7888_v16  ;;  %v4405_v57 = vadd.f32 %v4404_v58, %v4391_v11  ;;  %v3008_v8 = vperm.slane %v9357_v12, 1  ;;  %v7950_v46 = vld [vmem:[#allocation12 + $0x160] sm:$0xf]  ;;  %v8718_v16 = vld [vmem:[#allocation12 + $0x164] sm:$0xf0] }
 0x2c0   :  { %5215 = vmatpush.bf16.msrb.mxu1 %v7899_v39  ;;  %v4472_v37 = vpop.f32.mrf.mxu0  ;;  %v8720_v39 = vld [vmem:[#allocation12 + $0x174] sm:$0xf0]  ;;  %v7951_v47 = vor.u32 %v8718_v16, %v7950_v46  ;;  %v8714_v11 = vld [vmem:[#allocation12 + $0x144] sm:$0xf0] }
 0x2c1   :  { %v4747_v3 = vmax.f32 %v4405_v57, 0.0  ;;  %v4419_v22 = vadd.f32 %v4418_v4, %v3008_v8  ;;  %v7935_v9 = vor.u32 %v8714_v11, %v7934_v6  ;;  %v8712_v58 = vld [vmem:[#allocation12 + $0x134] sm:$0xf0]  ;;  %v8022_v11 = vld [vmem:[#allocation12 + $0x1f0] sm:$0xf] }
 0x2c2   :  { %5204 = vmatpush.bf16.msrb.mxu0 %v7811_v5  ;;  %v7675_v5 = vor.u32 %v8646_v48, %v7672_v44 }
 0x2c3   :  { %4733 = vmatpush.bf16.msrb.mxu3 %v7707_v49  ;;  %v4751_v30 = vpack.c.bf16 %v4747_v3, %v4743_v50  ;;  %v7851_v49 = vor.u32 %v8691_v45, %v7848_v14  ;;  %v4433_v18 = vadd.f32 %v4432_v1, %v4419_v22  ;;  %v7918_v3 = vld [vmem:[#allocation12 + $0x120] sm:$0xf]  ;;  %v8708_v1 = vld [vmem:[#allocation12 + $0x114] sm:$0xf0]  ;;  %v8715_v45 = vld [vmem:[#allocation12 + $0x154] sm:$0xf] }
 0x2c4   :  { %5216 = vmatpush.bf16.msrb.mxu1 %v7891_v26  ;;  %v7944_v14 = vld [vmem:[#allocation12 + $0x158] sm:$0xf0] }
 0x2c5   :  { %5153 = vmatmul.bf16.vlgmr.msra.gmra.mxu0 %v4751_v30  ;;  %v4447_v17 = vadd.f32 %v4446_v28, %v4433_v18  ;;  %v4502_v7 = vpop.f32.mrf.mxu2  ;;  %v7960_v28 = vld [vmem:[#allocation12 + $0x178] sm:$0xf0]  ;;  %v7936_v18 = vld [vmem:[#allocation12 + $0x148] sm:$0xf0] }
 0x2c6   :  { %5205 = vmatpush.bf16.msrb.mxu0 %v7803_v62  ;;  %v7872_v62 = vld [vmem:[#allocation12 + $0xc8] sm:$0xf0]  ;;  %v4458_v27 = vpop.f32.mrf.mxu3  ;;  %v4488_v26 = vpop.f32.mrf.mxu1 }
 0x2c7   :  { %4734 = vmatpush.bf16.msrb.mxu3 %v7691_v42  ;;  %v7875_v61 = vor.u32 %v8697_v51, %v7872_v62 }
 0x2c8   :  { %5217 = vmatpush.bf16.msrb.mxu1 %v7883_v55  ;;  %v4474_v42 = vpop.f32.mrf.mxu0 }
 0x2ca   :  { %5206 = vmatpush.bf16.msrb.mxu0 %v7795_v0  ;;  %v4417_v0 = vadd.f32 %v4416_v38, %v3008_v8  ;;  %v8706_v8 = vld [vmem:[#allocation12 + $0x104] sm:$0xf0] }
 0x2cb   :  { %4735 = vmatpush.bf16.msrb.mxu3 %v7675_v5 }
 0x2cc   :  { %5218 = vmatpush.bf16.msrb.mxu1 %v7875_v61  ;;  %v4431_v31 = vadd.f32 %v4430_v36, %v4417_v0  ;;  %v7942_v36 = vld [vmem:[#allocation12 + $0x150] sm:$0xf]  ;;  %v8710_v61 = vld [vmem:[#allocation12 + $0x124] sm:$0xf0]  ;;  %v7952_v0 = vld [vmem:[#allocation12 + $0x168] sm:$0xf0] }
 0x2cd   :  { %v7919_v4 = vor.u32 %v8710_v61, %v7918_v3 }
 0x2ce   :  { %5207 = vmatpush.bf16.msrb.mxu0 %v7787_v29  ;;  %v4445_v23 = vadd.f32 %v4444_v52, %v4431_v31  ;;  %v4460_v41 = vpop.f32.mrf.mxu3  ;;  %v7926_v52 = vld [vmem:[#allocation12 + $0x130] sm:$0xf]  ;;  %v4542_v22 = vpop.f32.mrf.mxu1  ;;  %v7947_v31 = vor.u32 %v8715_v45, %v7944_v14 }
 0x2cf   :  { %4736 = vmatpush.bf16.msrb.mxu3 %v7659_v59  ;;  %v4461_v29 = vadd.f32 %v4460_v41, %v4447_v17  ;;  %v7927_v59 = vor.u32 %v8712_v58, %v7926_v52  ;;  %v3009_v17 = vperm.slane %v9357_v12, 2 }
 0x2d0   :  { %5219 = vmatpush.bf16.msrb.mxu1 %v7867_v63  ;;  %v4459_v56 = vadd.f32 %v4458_v27, %v4445_v23  ;;  %v7903_v63 = vor.u32 %v8706_v8, %v7902_v25  ;;  %v8719_v27 = vld [vmem:[#allocation12 + $0x174] sm:$0xf]  ;;  %v4556_v23 = vpop.f32.mrf.mxu2 }
 0x2d1   :  { %v4475_v60 = vadd.f32 %v4474_v42, %v4461_v29  ;;  %v7963_v40 = vor.u32 %v8719_v27, %v7960_v28  ;;  %v8709_v29 = vld [vmem:[#allocation12 + $0x124] sm:$0xf]  ;;  %v7912_v42 = vld [vmem:[#allocation12 + $0x118] sm:$0xf0]  ;;  %v8730_v27 = vld [vmem:[#allocation12 + $0x1c4] sm:$0xf0] }
 0x2d2   :  { %5208 = vmatpush.bf16.msrb.mxu0 %v7779_v2  ;;  %4737 = vmatmul.bf16.vlgmr.msrb.gmra.mxu3 %v9329_v19  ;;  %v7958_v19 = vld [vmem:[#allocation12 + $0x170] sm:$0xf]  ;;  %v4473_v38 = vadd.f32 %v4472_v37, %v4459_v56  ;;  %v8716_v2 = vld [vmem:[#allocation12 + $0x154] sm:$0xf0]  ;;  %v7955_v37 = vor.u32 %v8717_v35, %v7952_v0  ;;  %v8711_v56 = vld [vmem:[#allocation12 + $0x134] sm:$0xf] }
 0x2d3   :  { %v7959_v33 = vor.u32 %v8720_v39, %v7958_v19  ;;  %v4489_v53 = vadd.f32 %v4488_v26, %v4475_v60  ;;  %v7943_v43 = vor.u32 %v8716_v2, %v7942_v36  ;;  %v7928_v19 = vld [vmem:[#allocation12 + $0x138] sm:$0xf0] }
 0x2d4   :  { %5220 = vmatpush.bf16.msrb.mxu1 %v7859_v20  ;;  %v4487_v44 = vadd.f32 %v4486_v15, %v4473_v38  ;;  %v4528_v20 = vpop.f32.mrf.mxu0  ;;  %v7931_v24 = vor.u32 %v8711_v56, %v7928_v19  ;;  %v8707_v38 = vld [vmem:[#allocation12 + $0x114] sm:$0xf]  ;;  %v7966_v19 = vld [vmem:[#allocation12 + $0x180] sm:$0xf] }
 0x2d5   :  { %5173 = vmatpush.bf16.msra.mxu2 %v7959_v33  ;;  %5209 = vmatmul.bf16.vlgmr.msrb.gmra.mxu0 %v4751_v30  ;;  %v4503_v54 = vadd.f32 %v4502_v7, %v4489_v53  ;;  %v7910_v30 = vld [vmem:[#allocation12 + $0x110] sm:$0xf]  ;;  %v7920_v33 = vld [vmem:[#allocation12 + $0x128] sm:$0xf0] }
 0x2d6   :  { %v4514_v48 = vpop.f32.mrf.mxu3  ;;  %v4501_v5 = vadd.f32 %v4500_v13, %v4487_v44  ;;  %v7911_v34 = vor.u32 %v8708_v1, %v7910_v30  ;;  %v4544_v10 = vpop.f32.mrf.mxu1  ;;  %v7923_v13 = vor.u32 %v8709_v29, %v7920_v33  ;;  %v7904_v7 = vld [vmem:[#allocation12 + $0x108] sm:$0xf0]  ;;  %v8732_v30 = vld [vmem:[#allocation12 + $0x1d4] sm:$0xf0]  ;;  %v8735_v29 = vld [vmem:[#allocation12 + $0x1f4] sm:$0xf] }
 0x2d7   :  { %v8024_v33 = vld [vmem:[#allocation12 + $0x1f8] sm:$0xf0] }
 0x2d8   :  { %5221 = vmatpush.bf16.msrb.mxu1 %v7851_v49  ;;  %v4515_v21 = vadd.f32 %v4514_v48, %v4501_v5  ;;  %v8713_v49 = vld [vmem:[#allocation12 + $0x144] sm:$0xf]  ;;  %v4558_v60 = vpop.f32.mrf.mxu2 }
 0x2d9   :  { %5174 = vmatpush.bf16.msra.mxu2 %v7951_v47  ;;  %v7939_v15 = vor.u32 %v8713_v49, %v7936_v18  ;;  %v7915_v47 = vor.u32 %v8707_v38, %v7912_v42  ;;  %v8705_v5 = vld [vmem:[#allocation12 + $0x104] sm:$0xf] }
 0x2da   :  { %v4744_v51 = vmax.f32 %v4515_v21, 0.0  ;;  %v7907_v6 = vor.u32 %v8705_v5, %v7904_v7  ;;  %v8736_v21 = vld [vmem:[#allocation12 + $0x1f4] sm:$0xf0]  ;;  %v7992_v5 = vld [vmem:[#allocation12 + $0x1b8] sm:$0xf0] }
 0x2dc   :  { %5222 = vmatpush.bf16.msrb.mxu1 %v7843_v32  ;;  %v4530_v41 = vpop.f32.mrf.mxu0  ;;  %v4529_v32 = vadd.f32 %v4528_v20, %v3009_v17  ;;  %v7990_v20 = vld [vmem:[#allocation12 + $0x1b0] sm:$0xf] }
 0x2dd   :  { %5175 = vmatpush.bf16.msra.mxu2 %v7943_v43  ;;  %v4531_v46 = vadd.f32 %v4530_v41, %v3009_v17  ;;  %v7974_v41 = vld [vmem:[#allocation12 + $0x190] sm:$0xf]  ;;  %v8724_v17 = vld [vmem:[#allocation12 + $0x194] sm:$0xf0] }
 0x2de   :  { %v4516_v55 = vpop.f32.mrf.mxu3  ;;  %v4543_v48 = vadd.f32 %v4542_v22, %v4529_v32  ;;  %v4598_v36 = vpop.f32.mrf.mxu1  ;;  %v7982_v22 = vld [vmem:[#allocation12 + $0x1a0] sm:$0xf]  ;;  %v7975_v56 = vor.u32 %v8724_v17, %v7974_v41  ;;  %v8016_v32 = vld [vmem:[#allocation12 + $0x1e8] sm:$0xf0] }
 0x2df   :  { %v4517_v57 = vadd.f32 %v4516_v55, %v4503_v54  ;;  %v4545_v44 = vadd.f32 %v4544_v10, %v4531_v46  ;;  %v8027_v10 = vor.u32 %v8735_v29, %v8024_v33  ;;  %v8731_v46 = vld [vmem:[#allocation12 + $0x1d4] sm:$0xf]  ;;  %v8740_v29 = vld [vmem:[#allocation15 + $0x18] sm:$0xff] }
 0x2e0   :  { %v4557_v26 = vadd.f32 %v4556_v23, %v4543_v48  ;;  %v8729_v48 = vld [vmem:[#allocation12 + $0x1c4] sm:$0xf]  ;;  %v8752_v33 = vld [vmem:[#allocation15 + $0x78] sm:$0xff] }
 0x2e1   :  { %5176 = vmatpush.bf16.msra.mxu2 %v7935_v9  ;;  %v4748_v62 = vmax.f32 %v4517_v57, 0.0  ;;  %v4559_v53 = vadd.f32 %v4558_v60, %v4545_v44  ;;  %v8023_v9 = vor.u32 %v8736_v21, %v8022_v11  ;;  %v8014_v57 = vld [vmem:[#allocation12 + $0x1e0] sm:$0xf]  ;;  %v8000_v44 = vld [vmem:[#allocation12 + $0x1c8] sm:$0xf0] }
 0x2e3   :  { %v4752_v50 = vpack.c.bf16 %v4748_v62, %v4744_v51  ;;  %5187 = vmatpush.bf16.msra.mxu3 %v8023_v9  ;;  %v7984_v9 = vld [vmem:[#allocation12 + $0x1a8] sm:$0xf0] }
 0x2e4   :  { %v4584_v16 = vpop.f32.mrf.mxu0 }
 0x2e5   :  { %5177 = vmatpush.bf16.msra.mxu2 %v7927_v59  ;;  %5167 = vmatmul.bf16.vlgmr.msra.gmra.mxu1 %v4752_v50  ;;  %v8734_v59 = vld [vmem:[#allocation12 + $0x1e4] sm:$0xf0] }
 0x2e6   :  { %v8015_v62 = vor.u32 %v8734_v59, %v8014_v57  ;;  %v4600_v61 = vpop.f32.mrf.mxu1  ;;  %5409 = vmatpush.bf16.msra.mxu1 %v8752_v33 }
 0x2e8   :  { %5188 = vmatpush.bf16.msra.mxu3 %v8015_v62 }
 0x2e9   :  { %5178 = vmatpush.bf16.msra.mxu2 %v7919_v4  ;;  %v8006_v4 = vld [vmem:[#allocation12 + $0x1d0] sm:$0xf] }
 0x2ec   :  { %v4586_v58 = vpop.f32.mrf.mxu0 }
 0x2ed   :  { %5179 = vmatpush.bf16.msra.mxu2 %v7911_v34  ;;  %v8007_v34 = vor.u32 %v8732_v30, %v8006_v4 }
 0x2ee   :  { %v4612_v55 = vpop.f32.mrf.mxu2 }
 0x2ef   :  { %5189 = vmatpush.bf16.msra.mxu3 %v8007_v34  ;;  %v8721_v34 = vld [vmem:[#allocation12 + $0x184] sm:$0xf] }
 0x2f0   :  { %v4570_v39 = vpop.f32.mrf.mxu3 }
 0x2f1   :  { %5180 = vmatpush.bf16.msra.mxu2 %v7903_v63  ;;  %v4571_v43 = vadd.f32 %v4570_v39, %v4557_v26  ;;  %v7998_v63 = vld [vmem:[#allocation12 + $0x1c0] sm:$0xf]  ;;  %v8722_v39 = vld [vmem:[#allocation12 + $0x184] sm:$0xf0] }
 0x2f2   :  { %v7999_v35 = vor.u32 %v8730_v27, %v7998_v63 }
 0x2f3   :  { %v4585_v52 = vadd.f32 %v4584_v16, %v4571_v43  ;;  %v8008_v16 = vld [vmem:[#allocation12 + $0x1d8] sm:$0xf0]  ;;  %v8727_v43 = vld [vmem:[#allocation12 + $0x1b4] sm:$0xf] }
 0x2f4   :  { %5190 = vmatpush.bf16.msra.mxu3 %v7999_v35  ;;  %v4640_v38 = vpop.f32.mrf.mxu0  ;;  %v4654_v60 = vpop.f32.mrf.mxu1 }
 0x2f5   :  { %5229 = vmatpush.bf16.msrb.mxu2 %v7963_v40  ;;  %5223 = vmatmul.bf16.vlgmr.msrb.gmra.mxu1 %v4752_v50  ;;  %v4599_v3 = vadd.f32 %v4598_v36, %v4585_v52  ;;  %v8003_v36 = vor.u32 %v8729_v48, %v8000_v44 }
 0x2f6   :  { %v4614_v8 = vpop.f32.mrf.mxu2 }
 0x2f7   :  { %v4613_v25 = vadd.f32 %v4612_v55, %v4599_v3  ;;  %v8723_v55 = vld [vmem:[#allocation12 + $0x194] sm:$0xf] }
 0x2f8   :  { %v4572_v2 = vpop.f32.mrf.mxu3 }
 0x2f9   :  { %5230 = vmatpush.bf16.msrb.mxu2 %v7955_v37  ;;  %v4573_v54 = vadd.f32 %v4572_v2, %v4559_v53  ;;  %v8728_v37 = vld [vmem:[#allocation12 + $0x1b4] sm:$0xf0]  ;;  %v3010_v53 = vperm.slane %v9357_v12, 3 }
 0x2fa   :  { %v7991_v14 = vor.u32 %v8728_v37, %v7990_v20 }
 0x2fb   :  { %v4587_v51 = vadd.f32 %v4586_v58, %v4573_v54  ;;  %v4641_v21 = vadd.f32 %v4640_v38, %v3010_v53  ;;  %v8725_v54 = vld [vmem:[#allocation12 + $0x1a4] sm:$0xf]  ;;  %v7976_v58 = vld [vmem:[#allocation12 + $0x198] sm:$0xf0]  ;;  %v8750_v38 = vld [vmem:[#allocation15 + $0x68] sm:$0xff] }
 0x2fc   :  { %5191 = vmatpush.bf16.msra.mxu3 %v7991_v14  ;;  %v4642_v2 = vpop.f32.mrf.mxu0  ;;  %v4656_v11 = vpop.f32.mrf.mxu1  ;;  %v7987_v52 = vor.u32 %v8725_v54, %v7984_v9  ;;  %v7979_v62 = vor.u32 %v8723_v55, %v7976_v58 }
 0x2fd   :  { %5231 = vmatpush.bf16.msrb.mxu2 %v7947_v31  ;;  %v4601_v1 = vadd.f32 %v4600_v61, %v4587_v51  ;;  %v8726_v31 = vld [vmem:[#allocation12 + $0x1a4] sm:$0xf0]  ;;  %v4643_v57 = vadd.f32 %v4642_v2, %v3010_v53 }
 0x2fe   :  { %v8745_v2 = vld [vmem:[#allocation15 + $0x40] sm:$0xff] }
 0x2ff   :  { %v4615_v40 = vadd.f32 %v4614_v8, %v4601_v1  ;;  %v4657_v3 = vadd.f32 %v4656_v11, %v4643_v57 }
 0x301   :  { %5232 = vmatpush.bf16.msrb.mxu2 %v7939_v15  ;;  %v7983_v15 = vor.u32 %v8726_v31, %v7982_v22 }
 0x303   :  { %5192 = vmatpush.bf16.msra.mxu3 %v7983_v15 }
 0x305   :  { %5233 = vmatpush.bf16.msrb.mxu2 %v7931_v24  ;;  %v7967_v24 = vor.u32 %v8722_v39, %v7966_v19  ;;  %v8743_v19 = vld [vmem:[#allocation15 + $0x30] sm:$0xff]  ;;  %v8742_v39 = vld [vmem:[#allocation15 + $0x28] sm:$0xff] }
 0x307   :  { %5193 = vmatpush.bf16.msra.mxu3 %v7975_v56  ;;  %v8744_v56 = vld [vmem:[#allocation15 + $0x38] sm:$0xff] }
 0x308   :  { %5395 = vmatpush.bf16.msra.mxu0 %v8744_v56 }
 0x309   :  { %5234 = vmatpush.bf16.msrb.mxu2 %v7923_v13  ;;  %v8733_v13 = vld [vmem:[#allocation12 + $0x1e4] sm:$0xf] }
 0x30a   :  { %v8019_v42 = vor.u32 %v8733_v13, %v8016_v32  ;;  %v8751_v13 = vld [vmem:[#allocation15 + $0x70] sm:$0xff]  ;;  %v8738_v32 = vld [vmem:[#allocation15 + $0x8] sm:$0xff] }
 0x30b   :  { %5194 = vmatpush.bf16.msra.mxu3 %v7967_v24  ;;  %v8741_v24 = vld [vmem:[#allocation15 + $0x20] sm:$0xff]  ;;  %5410 = vmatpush.bf16.msra.mxu1 %v8751_v13 }
 0x30c   :  { %5396 = vmatpush.bf16.msra.mxu0 %v8743_v19 }
 0x30d   :  { %5235 = vmatpush.bf16.msrb.mxu2 %v7915_v47  ;;  %v8011_v47 = vor.u32 %v8731_v46, %v8008_v16  ;;  %v8749_v46 = vld [vmem:[#allocation15 + $0x60] sm:$0xff]  ;;  %v8748_v16 = vld [vmem:[#allocation15 + $0x58] sm:$0xff] }
 0x30f   :  { %5243 = vmatpush.bf16.msrb.mxu3 %v8027_v10  ;;  %v8739_v10 = vld [vmem:[#allocation15 + $0x10] sm:$0xff]  ;;  %5411 = vmatpush.bf16.msra.mxu1 %v8750_v38 }
 0x310   :  { %5397 = vmatpush.bf16.msra.mxu0 %v8742_v39 }
 0x311   :  { %5236 = vmatpush.bf16.msrb.mxu2 %v7907_v6  ;;  %v7995_v6 = vor.u32 %v8727_v43, %v7992_v5 }
 0x312   :  { %v4696_v59 = vpop.f32.mrf.mxu0 }
 0x313   :  { %5244 = vmatpush.bf16.msrb.mxu3 %v8019_v42  ;;  %v4668_v26 = vpop.f32.mrf.mxu2  ;;  %v8737_v42 = vld [vmem:[#allocation15] sm:$0xff]  ;;  %5412 = vmatpush.bf16.msra.mxu1 %v8749_v46 }
 0x314   :  { %v4710_v61 = vpop.f32.mrf.mxu1  ;;  %5398 = vmatpush.bf16.msra.mxu0 %v8741_v24 }
 0x315   :  { %v4626_v50 = vpop.f32.mrf.mxu3 }
 0x316   :  { %v4627_v28 = vadd.f32 %v4626_v50, %v4613_v25  ;;  %v4655_v50 = vadd.f32 %v4654_v60, %v4641_v21  ;;  %v7968_v25 = vld [vmem:[#allocation12 + $0x188] sm:$0xf0] }
 0x317   :  { %5245 = vmatpush.bf16.msrb.mxu3 %v8011_v47  ;;  %v7971_v8 = vor.u32 %v8721_v34, %v7968_v25  ;;  %5413 = vmatpush.bf16.msra.mxu1 %v8748_v16  ;;  %v8747_v47 = vld [vmem:[#allocation15 + $0x50] sm:$0xff] }
 0x318   :  { %v4745_v49 = vmax.f32 %v4627_v28, 0.0  ;;  %v4669_v12 = vadd.f32 %v4668_v26, %v4655_v50  ;;  %5399 = vmatpush.bf16.msra.mxu0 %v8740_v29  ;;  %v8746_v26 = vld [vmem:[#allocation15 + $0x48] sm:$0xff] }
 0x31b   :  { %5246 = vmatpush.bf16.msrb.mxu3 %v8003_v36  ;;  %v4670_v51 = vpop.f32.mrf.mxu2  ;;  %5414 = vmatpush.bf16.msra.mxu1 %v8747_v47  ;;  %v4819_v36 = vld [vmem:[#allocation14] sm:$0x3] }
 0x31c   :  { %v4671_v30 = vadd.f32 %v4670_v51, %v4657_v3  ;;  %v4712_v37 = vpop.f32.mrf.mxu1  ;;  %5400 = vmatpush.bf16.msra.mxu0 %v8739_v10  ;;  %v4821_v43 = vperm.slane %v4819_v36, 0 }
 0x31d   :  { %v4628_v0 = vpop.f32.mrf.mxu3 }
 0x31e   :  { %v4629_v45 = vadd.f32 %v4628_v0, %v4615_v40  ;;  %v4698_v40 = vpop.f32.mrf.mxu0 }
 0x31f   :  { %5247 = vmatpush.bf16.msrb.mxu3 %v7995_v6  ;;  %5415 = vmatpush.bf16.msra.mxu1 %v8746_v26 }
 0x320   :  { %v4749_v18 = vmax.f32 %v4629_v45, 0.0  ;;  %5401 = vmatpush.bf16.msra.mxu0 %v8738_v32 }
 0x322   :  { %v4753_v23 = vpack.c.bf16 %v4749_v18, %v4745_v49 }
 0x323   :  { %5248 = vmatpush.bf16.msrb.mxu3 %v7987_v52  ;;  %5416 = vmatpush.bf16.msra.mxu1 %v8745_v2 }
 0x324   :  { %5181 = vmatmul.bf16.vlgmr.msra.gmra.mxu2 %v4753_v23  ;;  %5402 = vmatpush.bf16.msra.mxu0 %v8737_v42 }
 0x327   :  { %5249 = vmatpush.bf16.msrb.mxu3 %v7979_v62 }
 0x32b   :  { %5250 = vmatpush.bf16.msrb.mxu3 %v7971_v8 }
 0x333   :  { %v4724_v27 = vpop.f32.mrf.mxu2 }
 0x334   :  { %5237 = vmatmul.bf16.vlgmr.msrb.gmra.mxu2 %v4753_v23 }
 0x335   :  { %v4682_v7 = vpop.f32.mrf.mxu3 }
 0x336   :  { %v4683_v1 = vadd.f32 %v4682_v7, %v4669_v12 }
 0x338   :  { %v4697_v28 = vadd.f32 %v4696_v59, %v4683_v1 }
 0x33a   :  { %v4711_v20 = vadd.f32 %v4710_v61, %v4697_v28  ;;  %v4822_v61 = vperm.slane %v4819_v36, 1 }
 0x33b   :  { %v4726_v22 = vpop.f32.mrf.mxu2 }
 0x33c   :  { %v4725_v14 = vadd.f32 %v4724_v27, %v4711_v20 }
 0x33d   :  { %v4684_v4 = vpop.f32.mrf.mxu3 }
 0x33e   :  { %v4685_v63 = vadd.f32 %v4684_v4, %v4671_v30 }
 0x340   :  { %v4699_v35 = vadd.f32 %v4698_v40, %v4685_v63 }
 0x342   :  { %v4713_v45 = vadd.f32 %v4712_v37, %v4699_v35  ;;  %v5154_v60 = vpop.f32.mrf.mxu0 }
 0x343   :  { %v5155_v11 = vadd.f32 %v5154_v60, %v4821_v43 }
 0x344   :  { %v4727_v49 = vadd.f32 %v4726_v22, %v4713_v45 }
 0x34a   :  { %v5156_v53 = vpop.f32.mrf.mxu0 }
 0x34b   :  { %v5157_v21 = vadd.f32 %v5156_v53, %v4821_v43 }
 0x352   :  { %v5210_v52 = vpop.f32.mrf.mxu0 }
 0x353   :  { %v5211_v34 = vadd.f32 %v5210_v52, %v4822_v61 }
 0x355   :  { %v4738_v0 = vpop.f32.mrf.mxu3 }
 0x356   :  { %v4739_v31 = vadd.f32 %v4738_v0, %v4725_v14 }
 0x358   :  { %v4746_v15 = vmax.f32 %v4739_v31, 0.0 }
 0x35a   :  { %v5212_v30 = vpop.f32.mrf.mxu0 }
 0x35b   :  { %v5213_v8 = vadd.f32 %v5212_v30, %v4822_v61 }
 0x35d   :  { %v4740_v18 = vpop.f32.mrf.mxu3 }
 0x35e   :  { %v4741_v23 = vadd.f32 %v4740_v18, %v4727_v49  ;;  %v8774_v49 = vld [vmem:[#allocation17] ss:$0 sm:$0xff] }
 0x360   :  { %v4750_v41 = vmax.f32 %v4741_v23, 0.0 }
 0x362   :  { %v4754_v17 = vpack.c.bf16 %v4750_v41, %v4746_v15  ;;  %v5168_v48 = vpop.f32.mrf.mxu1 }
 0x363   :  { %v5169_v54 = vadd.f32 %v5168_v48, %v5155_v11 }
 0x364   :  { %5195 = vmatmul.bf16.vlgmr.msra.gmra.mxu3 %v4754_v17 }
 0x36a   :  { %v5170_v5 = vpop.f32.mrf.mxu1 }
 0x36b   :  { %v5171_v9 = vadd.f32 %v5170_v5, %v5157_v21 }
 0x372   :  { %v5224_v59 = vpop.f32.mrf.mxu1 }
 0x373   :  { %v5225_v63 = vadd.f32 %v5224_v59, %v5211_v34 }
 0x374   :  { %5251 = vmatmul.bf16.vlgmr.msrb.gmra.mxu3 %v4754_v17 }
 0x37a   :  { %v5226_v25 = vpop.f32.mrf.mxu1 }
 0x37b   :  { %v5227_v28 = vadd.f32 %v5226_v25, %v5213_v8 }
 0x3a7   :  { %v5182_v44 = vpop.f32.mrf.mxu2 }
 0x3a8   :  { %v5183_v55 = vadd.f32 %v5182_v44, %v5169_v54 }
 0x3af   :  { %v5184_v7 = vpop.f32.mrf.mxu2 }
 0x3b0   :  { %v5185_v58 = vadd.f32 %v5184_v7, %v5171_v9 }
 0x3b7   :  { %v5238_v50 = vpop.f32.mrf.mxu2 }
 0x3b8   :  { %v5239_v40 = vadd.f32 %v5238_v50, %v5225_v63 }
 0x3bf   :  { %v5240_v27 = vpop.f32.mrf.mxu2 }
 0x3c0   :  { %v5241_v35 = vadd.f32 %v5240_v27, %v5227_v28 }
 0x3e7   :  { %v5196_v6 = vpop.f32.mrf.mxu3 }
 0x3e8   :  { %v5197_v57 = vadd.f32 %v5196_v6, %v5183_v55 }
 0x3ea   :  { %v5257_v3 = vmax.f32 %v5197_v57, 0.0 }
 0x3ef   :  { %v5198_v51 = vpop.f32.mrf.mxu3 }
 0x3f0   :  { %v5199_v62 = vadd.f32 %v5198_v51, %v5185_v58 }
 0x3f2   :  { %v5259_v12 = vmax.f32 %v5199_v62, 0.0 }
 0x3f4   :  { %v5261_v4 = vpack.c.bf16 %v5259_v12, %v5257_v3 }
 0x3f6   :  { %5403 = vmatmul.bf16.vlgmr.msra.gmra.mxu0 %v5261_v4 }
 0x3f7   :  { %v5252_v1 = vpop.f32.mrf.mxu3 }
 0x3f8   :  { %v5253_v0 = vadd.f32 %v5252_v1, %v5239_v40 }
 0x3fa   :  { %v5258_v45 = vmax.f32 %v5253_v0, 0.0 }
 0x3ff   :  { %v5254_v20 = vpop.f32.mrf.mxu3 }
 0x400   :  { %v5255_v37 = vadd.f32 %v5254_v20, %v5241_v35 }
 0x402   :  { %v5260_v14 = vmax.f32 %v5255_v37, 0.0 }
 0x404   :  { %v5262_v22 = vpack.c.bf16 %v5260_v14, %v5258_v45 }
 0x406   :  { %5417 = vmatmul.bf16.vlgmr.msra.gmra.mxu1 %v5262_v22 }
 0x473   :  { %v5404_v31 = vpop.f32.mrf.mxu0 }
 0x474   :  { %v5405_v18 = vadd.f32 %v8774_v49, %v5404_v31 }
 0x47b   :  { %v5406_v41 = vpop.f32.mrf.mxu0 }
 0x47c   :  { %v5407_v17 = vadd.f32 %v8774_v49, %v5406_v41 }
 0x483   :  { %v5418_v23 = vpop.f32.mrf.mxu1 }
 0x484   :  { %v5419_v15 = vadd.f32 %v5418_v23, %v5405_v18 }
 0x486   :  { %5423 = vst [vmem:[#allocation18] sm:$0xff] %v5419_v15 }
 0x48b   :  { %v5420_v56 = vpop.f32.mrf.mxu1 }
 0x48c   :  { %v5421_v19 = vadd.f32 %v5420_v56, %v5407_v17 }
 0x48e   :  { %5424 = vst [vmem:[#allocation18 + $0x8] sm:$0xff] %v5421_v19 }
 0x48f   :  { %5437 = dma.vmem_to_hbm [thread:$0]  %s5430_s8, 256, %s5432_s16, [#allocation5], %s9036_s29, %s9036_s29, %s9037_s30  }
 0x490   :  { %9027 = dma.done.wait [#allocation5], 256  }
 0x491   :  { %9028 = vsyncadd [#allocation5], 4294967040 }
 0x492   :  { %5442 = vsyncpa [#allocation4], 1 }
 0x493   :  { %5443 = vsyncpa [#allocation7], 1 }
 0x494   :  { %5444 = vsyncpa [#allocation10], 1 }
 0x495   :  { %5445 = vsyncpa [#allocation13], 1 }
 0x496   :  { %5446 = vsyncpa [#allocation16], 1 }
 0x497   :  { %5447 = vsyncpa [#allocation5], 1 }

// kernel: tpu_custom_call.1
= control target key start
LH: loop header
LB: loop body
LE: loop exit
PB: predicated region body
PF: predicated region fallthrough
CT: control target
= control target key end

     0   :  { %14 = vsyncpa [#allocation4], 0  ;;  %s9392_s0 = inlined_call_operand.hbm [shape: f32[16,555], index: 0, kind: input, shape index: {}]   ;;  %s9393_s1 = inlined_call_operand.hbm [shape: bf16[640,1024], index: 1, kind: input, shape index: {}]   ;;  %s9394_s2 = inlined_call_operand.hbm [shape: f32[1,1024], index: 2, kind: input, shape index: {}]   ;;  %s9395_s3 = inlined_call_operand.hbm [shape: bf16[1024,512], index: 3, kind: input, shape index: {}]   ;;  %s9396_s4 = inlined_call_operand.hbm [shape: f32[1,512], index: 4, kind: input, shape index: {}]   ;;  %s9397_s5 = inlined_call_operand.hbm [shape: bf16[512,256], index: 5, kind: input, shape index: {}]   ;;  %s9398_s6 = inlined_call_operand.hbm [shape: f32[1,256], index: 6, kind: input, shape index: {}]   ;;  %s9399_s7 = inlined_call_operand.hbm [shape: bf16[256,128], index: 7, kind: input, shape index: {}]   ;;  %s9400_s8 = inlined_call_operand.hbm [shape: f32[1,128], index: 8, kind: input, shape index: {}]   ;;  %s9401_s9 = inlined_call_operand.hbm [shape: f32[16,128], index: 9, kind: output, shape index: {}]  }
   0x1   :  { %15 = vsyncpa [#allocation7], 0 }
   0x2   :  { %16 = vsyncpa [#allocation10], 0 }
   0x3   :  { %17 = vsyncpa [#allocation13], 0 }
   0x4   :  { %18 = vsyncpa [#allocation16], 0  ;;  %s37_s11 = sshll.u32 %s9393_s1, 4  ;;  %s38_s11 = int_to_ptr.hbm [resolvable:$true] %s37_s11 }
   0x5   :  { %19 = vsyncpa [#allocation5], 0  ;;  %s9029_s12 = smov [#allocation6]   ;;  %s61_s16 = sshll.u32 %s9395_s3, 4  ;;  %s62_s16 = int_to_ptr.hbm [resolvable:$true] %s61_s16 }
   0x6   :  { %s39_s13 = sshll.u32 %s9029_s12, 4  ;;  %s9030_s17 = smov 512   ;;  %s40_s13 = int_to_ptr.vmem [resolvable:$true] %s39_s13 }
   0x7   :  { %s9031_s18 = smov 32   ;;  %s9032_s19 = smov [#allocation9]  }
   0x8   :  { %45 = dma.hbm_to_vmem [thread:$0]  %s38_s11, 40960, %s40_s13, [#allocation7], %s9030_s17, %s9030_s17, %s9031_s18  }
   0x9   :  { %s63_s20 = sshll.u32 %s9032_s19, 4  ;;  %s9033_s21 = smov 256   ;;  %s64_s20 = int_to_ptr.vmem [resolvable:$true] %s63_s20 }
   0xa   :  { %s9034_s22 = smov 16   ;;  %s85_s24 = sshll.u32 %s9397_s5, 4  ;;  %s86_s24 = int_to_ptr.hbm [resolvable:$true] %s85_s24 }
   0xb   :  { %69 = dma.hbm_to_vmem [thread:$0]  %s62_s16, 32768, %s64_s20, [#allocation10], %s9033_s21, %s9033_s21, %s9034_s22  }
   0xc   :  { %s9035_s25 = smov [#allocation12]   ;;  %s109_s28 = sshll.u32 %s9399_s7, 4  ;;  %s110_s28 = int_to_ptr.hbm [resolvable:$true] %s109_s28 }
   0xd   :  { %s87_s26 = sshll.u32 %s9035_s25, 4  ;;  %s9036_s29 = smov 128   ;;  %s88_s26 = int_to_ptr.vmem [resolvable:$true] %s87_s26 }
   0xe   :  { %s9037_s30 = smov 8   ;;  %s9038_s10 = smov [#allocation15]  }
   0xf   :  { %93 = dma.hbm_to_vmem [thread:$0]  %s86_s24, 8192, %s88_s26, [#allocation13], %s9036_s29, %s9036_s29, %s9037_s30  }
  0x10   :  { %s111_s11 = sshll.u32 %s9038_s10, 4  ;;  %s9039_s12 = smov 64   ;;  %s112_s11 = int_to_ptr.vmem [resolvable:$true] %s111_s11 }
  0x11   :  { %s9040_s5 = smov 4   ;;  %s24_s15 = sshll.u32 %s9392_s0, 4  ;;  %s25_s15 = int_to_ptr.hbm [resolvable:$true] %s24_s15 }
  0x12   :  { %117 = dma.hbm_to_vmem [thread:$0]  %s110_s28, 2048, %s112_s11, [#allocation16], %s9039_s12, %s9039_s12, %s9040_s5  }
  0x13   :  { %s9041_s16 = smov [#allocation3]   ;;  %s51_s19 = sshll.u32 %s9394_s2, 4  ;;  %s52_s19 = int_to_ptr.hbm [resolvable:$true] %s51_s19 }
  0x14   :  { %s26_s7 = sshll.u32 %s9041_s16, 4  ;;  %s9042_s20 = smov 640   ;;  %s27_s7 = int_to_ptr.vmem [resolvable:$true] %s26_s7 }
  0x15   :  { %s9043_s21 = smov 40   ;;  %s9044_s22 = smov [#allocation8]  }
  0x16   :  { %32 = dma.hbm_to_vmem [thread:$0]  %s25_s15, 1280, %s27_s7, [#allocation4], %s9042_s20, %s9042_s20, %s9043_s21  }
  0x17   :  { %s53_s1 = sshll.u32 %s9044_s22, 4  ;;  %s75_s25 = sshll.u32 %s9396_s4, 4  ;;  %s54_s1 = int_to_ptr.vmem [resolvable:$true] %s53_s1  ;;  %s76_s25 = int_to_ptr.hbm [resolvable:$true] %s75_s25 }
  0x18   :  { %56 = dma.hbm_to_vmem [thread:$0]  %s52_s19, 128, %s54_s1, [#allocation7]  }
  0x19   :  { %s99_s27 = sshll.u32 %s9398_s6, 4  ;;  %s9045_s3 = smov [#allocation11]   ;;  %s100_s27 = int_to_ptr.hbm [resolvable:$true] %s99_s27 }
  0x1a   :  { %s77_s28 = sshll.u32 %s9045_s3, 4  ;;  %s9046_s2 = smov [#allocation14]   ;;  %s78_s28 = int_to_ptr.vmem [resolvable:$true] %s77_s28 }
  0x1b   :  { %80 = dma.hbm_to_vmem [thread:$0]  %s76_s25, 64, %s78_s28, [#allocation10]  }
  0x1c   :  { %s101_s10 = sshll.u32 %s9046_s2, 4  ;;  %s123_s5 = sshll.u32 %s9400_s8, 4  ;;  %s102_s10 = int_to_ptr.vmem [resolvable:$true] %s101_s10  ;;  %s124_s5 = int_to_ptr.hbm [resolvable:$true] %s123_s5 }
  0x1d   :  { %104 = dma.hbm_to_vmem [thread:$0]  %s100_s27, 32, %s102_s10, [#allocation13]  }
  0x1e   :  { %s9047_s4 = smov [#allocation17]  }
  0x1f   :  { %s125_s13 = sshll.u32 %s9047_s4, 4  ;;  %s126_s13 = int_to_ptr.vmem [resolvable:$true] %s125_s13 }
  0x20   :  { %128 = dma.hbm_to_vmem [thread:$0]  %s124_s5, 16, %s126_s13, [#allocation16]  }
  0x21   :  { %9017 = dma.done.wait [#allocation4], 1280  }
  0x22   :  { %9018 = vsyncadd [#allocation4], 4294966016 }
  0x23   :  { %9019 = dma.done.wait [#allocation7], 41088  }
  0x24   :  { %9020 = vsyncadd [#allocation7], 4294926208 }
  0x25   :  { %9021 = dma.done.wait [#allocation10], 32832  }
  0x26   :  { %9022 = vsyncadd [#allocation10], 4294934464 }
  0x27   :  { %9023 = dma.done.wait [#allocation13], 8224  }
  0x28   :  { %9024 = vsyncadd [#allocation13], 4294959072 }
  0x29   :  { %9025 = dma.done.wait [#allocation16], 2064  }
  0x2a   :  { %9026 = vsyncadd [#allocation16], 4294965232  ;;  %v5694_v0 = vld [vmem:[#allocation6 + $0x1c0] sm:$0xf]  ;;  %vm190_vm0 = vcmask 347136   ;;  %s9049_s6 = smov [#allocation18]  }
  0x2b   :  { %v8157_v1 = vld [vmem:[#allocation6 + $0x1dc] sm:$0xf0]  ;;  %s5429_s8 = sshll.u32 %s9049_s6, 4  ;;  %s5431_s16 = sshll.u32 %s9401_s9, 4  ;;  %s5430_s8 = int_to_ptr.vmem [resolvable:$true] %s5429_s8  ;;  %s5432_s16 = int_to_ptr.hbm [resolvable:$true] %s5431_s16 }
  0x2c   :  { %v5950_v2 = vld [vmem:[#allocation6 + $0x3c0] sm:$0xf]  ;;  %v5695_v3 = vor.u32 %v8157_v1, %v5694_v0 }
  0x2d   :  { %v8221_v4 = vld [vmem:[#allocation6 + $0x3dc] sm:$0xf0] }
  0x2e   :  { %v6206_v5 = vld [vmem:[#allocation6 + $0x5c0] sm:$0xf]  ;;  %v5951_v7 = vor.u32 %v8221_v4, %v5950_v2  ;;  %2165 = vmatpush.bf16.msra.mxu0 %v5695_v3 }
  0x2f   :  { %v8285_v6 = vld [vmem:[#allocation6 + $0x5dc] sm:$0xf0] }
  0x30   :  { %v6207_v8 = vor.u32 %v8285_v6, %v6206_v5  ;;  %v6462_v9 = vld [vmem:[#allocation6 + $0x7c0] sm:$0xf]  ;;  %2179 = vmatpush.bf16.msra.mxu1 %v5951_v7 }
  0x31   :  { %v8349_v10 = vld [vmem:[#allocation6 + $0x7dc] sm:$0xf0] }
  0x32   :  { %v5662_v11 = vld [vmem:[#allocation6 + $0x180] sm:$0xf]  ;;  %v6463_v12 = vor.u32 %v8349_v10, %v6462_v9  ;;  %2193 = vmatpush.bf16.msra.mxu2 %v6207_v8 }
  0x33   :  { %v8149_v13 = vld [vmem:[#allocation6 + $0x19c] sm:$0xf0] }
  0x34   :  { %v5918_v14 = vld [vmem:[#allocation6 + $0x380] sm:$0xf]  ;;  %v5663_v16 = vor.u32 %v8149_v13, %v5662_v11  ;;  %2207 = vmatpush.bf16.msra.mxu3 %v6463_v12 }
  0x35   :  { %v8213_v15 = vld [vmem:[#allocation6 + $0x39c] sm:$0xf0] }
  0x36   :  { %v5919_v17 = vor.u32 %v8213_v15, %v5918_v14  ;;  %v6174_v18 = vld [vmem:[#allocation6 + $0x580] sm:$0xf]  ;;  %2166 = vmatpush.bf16.msra.mxu0 %v5663_v16 }
  0x37   :  { %v8277_v19 = vld [vmem:[#allocation6 + $0x59c] sm:$0xf0] }
  0x38   :  { %v6430_v20 = vld [vmem:[#allocation6 + $0x780] sm:$0xf]  ;;  %v6175_v21 = vor.u32 %v8277_v19, %v6174_v18  ;;  %2180 = vmatpush.bf16.msra.mxu1 %v5919_v17 }
  0x39   :  { %v8341_v22 = vld [vmem:[#allocation6 + $0x79c] sm:$0xf0] }
  0x3a   :  { %v5630_v23 = vld [vmem:[#allocation6 + $0x140] sm:$0xf]  ;;  %v6431_v25 = vor.u32 %v8341_v22, %v6430_v20  ;;  %2194 = vmatpush.bf16.msra.mxu2 %v6175_v21 }
  0x3b   :  { %v8141_v24 = vld [vmem:[#allocation6 + $0x15c] sm:$0xf0] }
  0x3c   :  { %v5886_v26 = vld [vmem:[#allocation6 + $0x340] sm:$0xf]  ;;  %v5631_v29 = vor.u32 %v8141_v24, %v5630_v23  ;;  %2208 = vmatpush.bf16.msra.mxu3 %v6431_v25 }
  0x3d   :  { %v8205_v27 = vld [vmem:[#allocation6 + $0x35c] sm:$0xf0] }
  0x3e   :  { %v6142_v28 = vld [vmem:[#allocation6 + $0x540] sm:$0xf]  ;;  %v5887_v33 = vor.u32 %v8205_v27, %v5886_v26  ;;  %2167 = vmatpush.bf16.msra.mxu0 %v5631_v29 }
  0x3f   :  { %v8269_v30 = vld [vmem:[#allocation6 + $0x55c] sm:$0xf0] }
  0x40   :  { %v6398_v31 = vld [vmem:[#allocation6 + $0x740] sm:$0xf]  ;;  %v6143_v34 = vor.u32 %v8269_v30, %v6142_v28  ;;  %2181 = vmatpush.bf16.msra.mxu1 %v5887_v33  ;;  %v8153_v30 = vld [vmem:[#allocation6 + $0x1c4] sm:$0xf] }
  0x41   :  { %v8333_v32 = vld [vmem:[#allocation6 + $0x75c] sm:$0xf0]  ;;  %v8217_v33 = vld [vmem:[#allocation6 + $0x3c4] sm:$0xf] }
  0x42   :  { %v5598_v35 = vld [vmem:[#allocation6 + $0x100] sm:$0xf]  ;;  %v6399_v38 = vor.u32 %v8333_v32, %v6398_v31  ;;  %2195 = vmatpush.bf16.msra.mxu2 %v6143_v34  ;;  %v5696_v32 = vld [vmem:[#allocation6 + $0x1e0] sm:$0xf0] }
  0x43   :  { %v8133_v36 = vld [vmem:[#allocation6 + $0x11c] sm:$0xf0]  ;;  %v5952_v34 = vld [vmem:[#allocation6 + $0x3e0] sm:$0xf0] }
  0x44   :  { %v5854_v37 = vld [vmem:[#allocation6 + $0x300] sm:$0xf]  ;;  %v5599_v44 = vor.u32 %v8133_v36, %v5598_v35  ;;  %2209 = vmatpush.bf16.msra.mxu3 %v6399_v38  ;;  %v6208_v38 = vld [vmem:[#allocation6 + $0x5e0] sm:$0xf0] }
  0x45   :  { %v8197_v39 = vld [vmem:[#allocation6 + $0x31c] sm:$0xf0] }
  0x46   :  { %v6110_v40 = vld [vmem:[#allocation6 + $0x500] sm:$0xf]  ;;  %v5855_v45 = vor.u32 %v8197_v39, %v5854_v37  ;;  %2168 = vmatpush.bf16.msra.mxu0 %v5599_v44  ;;  %v8281_v37 = vld [vmem:[#allocation6 + $0x5c4] sm:$0xf]  ;;  %v5955_v44 = vor.u32 %v8217_v33, %v5952_v34 }
  0x47   :  { %v8261_v41 = vld [vmem:[#allocation6 + $0x51c] sm:$0xf0]  ;;  %v5824_v34 = vld [vmem:[#allocation6 + $0x2e0] sm:$0xf0] }
  0x48   :  { %v6366_v42 = vld [vmem:[#allocation6 + $0x700] sm:$0xf]  ;;  %v6111_v46 = vor.u32 %v8261_v41, %v6110_v40  ;;  %2182 = vmatpush.bf16.msra.mxu1 %v5855_v45  ;;  %v8145_v45 = vld [vmem:[#allocation6 + $0x184] sm:$0xf] }
  0x49   :  { %v8325_v43 = vld [vmem:[#allocation6 + $0x71c] sm:$0xf0] }
  0x4a   :  { %v5566_v47 = vld [vmem:[#allocation6 + $0xc0] sm:$0xf]  ;;  %v6367_v50 = vor.u32 %v8325_v43, %v6366_v42  ;;  %2196 = vmatpush.bf16.msra.mxu2 %v6111_v46  ;;  %v5699_v43 = vor.u32 %v8153_v30, %v5696_v32  ;;  %v5664_v46 = vld [vmem:[#allocation6 + $0x1a0] sm:$0xf0] }
  0x4b   :  { %v8125_v48 = vld [vmem:[#allocation6 + $0xdc] sm:$0xf0] }
  0x4c   :  { %v5822_v49 = vld [vmem:[#allocation6 + $0x2c0] sm:$0xf]  ;;  %v5567_v56 = vor.u32 %v8125_v48, %v5566_v47  ;;  %2210 = vmatpush.bf16.msra.mxu3 %v6367_v50  ;;  %v8209_v47 = vld [vmem:[#allocation6 + $0x384] sm:$0xf]  ;;  %v6211_v48 = vor.u32 %v8281_v37, %v6208_v38 }
  0x4d   :  { %v8189_v51 = vld [vmem:[#allocation6 + $0x2dc] sm:$0xf0]  ;;  %v8273_v50 = vld [vmem:[#allocation6 + $0x584] sm:$0xf] }
  0x4e   :  { %v6078_v52 = vld [vmem:[#allocation6 + $0x4c0] sm:$0xf]  ;;  %v5823_v57 = vor.u32 %v8189_v51, %v5822_v49  ;;  %2169 = vmatpush.bf16.msra.mxu0 %v5567_v56  ;;  %v5920_v49 = vld [vmem:[#allocation6 + $0x3a0] sm:$0xf0] }
  0x4f   :  { %v8253_v53 = vld [vmem:[#allocation6 + $0x4dc] sm:$0xf0]  ;;  %v6176_v51 = vld [vmem:[#allocation6 + $0x5a0] sm:$0xf0] }
  0x50   :  { %v6334_v54 = vld [vmem:[#allocation6 + $0x6c0] sm:$0xf]  ;;  %v6079_v58 = vor.u32 %v8253_v53, %v6078_v52  ;;  %2183 = vmatpush.bf16.msra.mxu1 %v5823_v57  ;;  %v172_v53 = vld [vmem:[#allocation3] sm:$0xff]  ;;  %v6080_v38 = vld [vmem:[#allocation6 + $0x4e0] sm:$0xf0] }
  0x51   :  { %v8317_v55 = vld [vmem:[#allocation6 + $0x6dc] sm:$0xf0] }
  0x52   :  { %v5534_v59 = vld [vmem:[#allocation6 + $0x80] sm:$0xf]  ;;  %v6335_v62 = vor.u32 %v8317_v55, %v6334_v54  ;;  %2197 = vmatpush.bf16.msra.mxu2 %v6079_v58  ;;  %v173_v54 = vld [vmem:[#allocation3 + $0x8] sm:$0xff] }
  0x53   :  { %v8117_v60 = vld [vmem:[#allocation6 + $0x9c] sm:$0xf0]  ;;  %v177_v55 = vld [vmem:[#allocation3 + $0x28] sm:$0xff] }
  0x54   :  { %v5790_v61 = vld [vmem:[#allocation6 + $0x280] sm:$0xf]  ;;  %v5535_v4 = vor.u32 %v8117_v60, %v5534_v59  ;;  %2211 = vmatpush.bf16.msra.mxu3 %v6335_v62  ;;  %v182_v59 = vpack.c.bf16 %v173_v54, %v172_v53  ;;  %v9048_v60 = vmov 0   ;;  %v5667_v62 = vor.u32 %v8145_v45, %v5664_v46  ;;  %v5792_v53 = vld [vmem:[#allocation6 + $0x2a0] sm:$0xf0] }
  0x55   :  { %v8181_v63 = vld [vmem:[#allocation6 + $0x29c] sm:$0xf0]  ;;  %168 = vst [vmem:[#allocation2 + $0x10] sm:$0xf] %v9048_v60  ;;  %v8241_v54 = vld [vmem:[#allocation6 + $0x484] sm:$0xf] }
  0x56   :  { %v6046_v0 = vld [vmem:[#allocation6 + $0x480] sm:$0xf]  ;;  %v5791_v5 = vor.u32 %v8181_v63, %v5790_v61  ;;  %2170 = vmatpush.bf16.msra.mxu0 %v5535_v4  ;;  %v5923_v63 = vor.u32 %v8209_v47, %v5920_v49  ;;  %171 = vst [vmem:[#allocation2 + $0x24] sm:$0xf] %v9048_v60  ;;  %v8201_v4 = vld [vmem:[#allocation6 + $0x344] sm:$0xf] }
  0x57   :  { %v8245_v1 = vld [vmem:[#allocation6 + $0x49c] sm:$0xf0]  ;;  %188 = vst [vmem:[#allocation2] sm:$0xff] %v182_v59  ;;  %v8113_v49 = vld [vmem:[#allocation6 + $0x84] sm:$0xf] }
  0x58   :  { %v6302_v2 = vld [vmem:[#allocation6 + $0x680] sm:$0xf]  ;;  %v6047_v6 = vor.u32 %v8245_v1, %v6046_v0  ;;  %2184 = vmatpush.bf16.msra.mxu1 %v5791_v5  ;;  %v8137_v0 = vld [vmem:[#allocation6 + $0x144] sm:$0xf] }
  0x59   :  { %v8309_v3 = vld [vmem:[#allocation6 + $0x69c] sm:$0xf0]  ;;  %v5632_v1 = vld [vmem:[#allocation6 + $0x160] sm:$0xf0] }
  0x5a   :  { %v5502_v7 = vld [vmem:[#allocation6 + $0x40] sm:$0xf]  ;;  %v6303_v10 = vor.u32 %v8309_v3, %v6302_v2  ;;  %2198 = vmatpush.bf16.msra.mxu2 %v6047_v6  ;;  %v6179_v3 = vor.u32 %v8273_v50, %v6176_v51  ;;  %v5888_v5 = vld [vmem:[#allocation6 + $0x360] sm:$0xf0]  ;;  %v175_v6 = vld [vmem:[#allocation3 + $0x18] sm:$0xff] }
  0x5b   :  { %v8109_v8 = vld [vmem:[#allocation6 + $0x5c] sm:$0xf0]  ;;  %v5536_v50 = vld [vmem:[#allocation6 + $0xa0] sm:$0xf0] }
  0x5c   :  { %v5758_v9 = vld [vmem:[#allocation6 + $0x240] sm:$0xf]  ;;  %v5503_v16 = vor.u32 %v8109_v8, %v5502_v7  ;;  %2212 = vmatpush.bf16.msra.mxu3 %v6303_v10  ;;  %v8265_v7 = vld [vmem:[#allocation6 + $0x544] sm:$0xf] }
  0x5d   :  { %v8173_v11 = vld [vmem:[#allocation6 + $0x25c] sm:$0xf0]  ;;  %v6144_v8 = vld [vmem:[#allocation6 + $0x560] sm:$0xf0] }
  0x5e   :  { %v6014_v12 = vld [vmem:[#allocation6 + $0x440] sm:$0xf]  ;;  %v5759_v19 = vor.u32 %v8173_v11, %v5758_v9  ;;  %2171 = vmatpush.bf16.msra.mxu0 %v5503_v16  ;;  %v5600_v16 = vld [vmem:[#allocation6 + $0x120] sm:$0xf0]  ;;  %v5450_v33 = vld [vmem:[#allocation2] sm:$0xf] }
  0x5f   :  { %v8237_v13 = vld [vmem:[#allocation6 + $0x45c] sm:$0xf0]  ;;  %v8177_v51 = vld [vmem:[#allocation6 + $0x284] sm:$0xf] }
  0x60   :  { %v6270_v14 = vld [vmem:[#allocation6 + $0x640] sm:$0xf]  ;;  %v6015_v20 = vor.u32 %v8237_v13, %v6014_v12  ;;  %2185 = vmatpush.bf16.msra.mxu1 %v5759_v19  ;;  %v8129_v13 = vld [vmem:[#allocation6 + $0x104] sm:$0xf]  ;;  %v6147_v19 = vor.u32 %v8265_v7, %v6144_v8  ;;  %v181_v8 = vld [vmem:[#allocation3 + $0x48] sm:$0xff] }
  0x61   :  { %v8301_v15 = vld [vmem:[#allocation6 + $0x65c] sm:$0xf0]  ;;  %v5760_v7 = vld [vmem:[#allocation6 + $0x260] sm:$0xf0] }
  0x62   :  { %v5470_v17 = vld [vmem:[#allocation6] sm:$0xf]  ;;  %v6271_v24 = vor.u32 %v8301_v15, %v6270_v14  ;;  %2199 = vmatpush.bf16.msra.mxu2 %v6015_v20  ;;  %v5635_v14 = vor.u32 %v8137_v0, %v5632_v1  ;;  %v5891_v15 = vor.u32 %v8201_v4, %v5888_v5  ;;  %v5856_v20 = vld [vmem:[#allocation6 + $0x320] sm:$0xf0]  ;;  %v5539_v0 = vor.u32 %v8113_v49, %v5536_v50  ;;  %v5670_v49 = vld [vmem:[#allocation6 + $0x188] sm:$0xf] }
  0x63   :  { %v8101_v18 = vld [vmem:[#allocation6 + $0x1c] sm:$0xf0]  ;;  %v5795_v1 = vor.u32 %v8177_v51, %v5792_v53  ;;  %v8169_v4 = vld [vmem:[#allocation6 + $0x244] sm:$0xf]  ;;  %v8150_v50 = vld [vmem:[#allocation6 + $0x1a4] sm:$0xf0] }
  0x64   :  { %v5726_v21 = vld [vmem:[#allocation6 + $0x200] sm:$0xf]  ;;  %v5471_v31 = vor.u32 %v8101_v18, %v5470_v17  ;;  %2213 = vmatpush.bf16.msra.mxu3 %v6271_v24  ;;  %v8193_v17 = vld [vmem:[#allocation6 + $0x304] sm:$0xf]  ;;  %v179_v18 = vld [vmem:[#allocation3 + $0x38] sm:$0xff] }
  0x65   :  { %v8165_v22 = vld [vmem:[#allocation6 + $0x21c] sm:$0xf0]  ;;  %v5859_v32 = vor.u32 %v8193_v17, %v5856_v20  ;;  %v8161_v20 = vld [vmem:[#allocation6 + $0x204] sm:$0xf]  ;;  %v8214_v53 = vld [vmem:[#allocation6 + $0x3a4] sm:$0xf0] }
  0x66   :  { %v5982_v23 = vld [vmem:[#allocation6 + $0x400] sm:$0xf]  ;;  %v5727_v35 = vor.u32 %v8165_v22, %v5726_v21  ;;  %2172 = vmatpush.bf16.msra.mxu0 %v5471_v31  ;;  %v8257_v21 = vld [vmem:[#allocation6 + $0x504] sm:$0xf]  ;;  %v5603_v31 = vor.u32 %v8129_v13, %v5600_v16 }
  0x67   :  { %v8229_v25 = vld [vmem:[#allocation6 + $0x41c] sm:$0xf0]  ;;  %v6112_v22 = vld [vmem:[#allocation6 + $0x520] sm:$0xf0] }
  0x68   :  { %v6238_v26 = vld [vmem:[#allocation6 + $0x600] sm:$0xf]  ;;  %v5983_v36 = vor.u32 %v8229_v25, %v5982_v23  ;;  %2186 = vmatpush.bf16.msra.mxu1 %v5727_v35  ;;  %v180_v25 = vld [vmem:[#allocation3 + $0x40] sm:$0xff]  ;;  %v8249_v35 = vld [vmem:[#allocation6 + $0x4c4] sm:$0xf] }
  0x69   :  { %v8293_v27 = vld [vmem:[#allocation6 + $0x61c] sm:$0xf0]  ;;  %v186_v30 = vpack.c.bf16 %v180_v25, %v179_v18  ;;  %v8097_v16 = vld [vmem:[#allocation6 + $0x4] sm:$0xf]  ;;  %v5763_v18 = vor.u32 %v8169_v4, %v5760_v7 }
  0x6a   :  { %v6718_v28 = vld [vmem:[#allocation6 + $0x9c0] sm:$0xf]  ;;  %v6239_v39 = vor.u32 %v8293_v27, %v6238_v26  ;;  %2200 = vmatpush.bf16.msra.mxu2 %v5983_v36  ;;  %v8121_v27 = vld [vmem:[#allocation6 + $0xc4] sm:$0xf]  ;;  %v6115_v36 = vor.u32 %v8257_v21, %v6112_v22 }
  0x6b   :  { %v8413_v29 = vld [vmem:[#allocation6 + $0x9dc] sm:$0xf0]  ;;  %193 = vst [vmem:[#allocation2 + $0x1c] sm:$0xff] %v186_v30  ;;  %v5728_v22 = vld [vmem:[#allocation6 + $0x220] sm:$0xf0] }
  0x6c   :  { %v6719_v40 = vor.u32 %v8413_v29, %v6718_v28  ;;  %v6686_v41 = vld [vmem:[#allocation6 + $0x980] sm:$0xf]  ;;  %2214 = vmatpush.bf16.msra.mxu3 %v6239_v39  ;;  %2235 = vmatpush.bf16.msrb.mxu1 %v5699_v43  ;;  %v5568_v28 = vld [vmem:[#allocation6 + $0xe0] sm:$0xf0]  ;;  %v5702_v30 = vld [vmem:[#allocation6 + $0x1c8] sm:$0xf] }
  0x6d   :  { %v8405_v42 = vld [vmem:[#allocation6 + $0x99c] sm:$0xf0]  ;;  %v8185_v29 = vld [vmem:[#allocation6 + $0x2c4] sm:$0xf]  ;;  %v5571_v47 = vor.u32 %v8121_v27, %v5568_v28 }
  0x6e   :  { %v6654_v52 = vld [vmem:[#allocation6 + $0x940] sm:$0xf]  ;;  %2221 = vmatpush.bf16.msrb.mxu0 %v6719_v40  ;;  %v6687_v56 = vor.u32 %v8405_v42, %v6686_v41  ;;  %2249 = vmatpush.bf16.msrb.mxu2 %v5955_v44  ;;  %v8092_v40 = vld [vmem:[#allocation2 + $0x4] sm:$0xf]  ;;  %v176_v42 = vld [vmem:[#allocation3 + $0x20] sm:$0xff] }
  0x6f   :  { %v8397_v57 = vld [vmem:[#allocation6 + $0x95c] sm:$0xf0]  ;;  %v8345_v25 = vld [vmem:[#allocation6 + $0x7c4] sm:$0xf] }
  0x70   :  { %v178_v58 = vld [vmem:[#allocation3 + $0x30] sm:$0xff]  ;;  %2263 = vmatpush.bf16.msrb.mxu3 %v6211_v48  ;;  %v6655_v10 = vor.u32 %v8397_v57, %v6654_v52  ;;  %2236 = vmatpush.bf16.msrb.mxu1 %v5667_v62  ;;  %v5827_v48 = vor.u32 %v8185_v29, %v5824_v34  ;;  %v6083_v52 = vor.u32 %v8249_v35, %v6080_v38  ;;  %v5958_v34 = vld [vmem:[#allocation6 + $0x3c8] sm:$0xf] }
  0x71   :  { %v174_v61 = vld [vmem:[#allocation3 + $0x10] sm:$0xff]  ;;  %v185_v2 = vpack.c.bf16 %v178_v58, %v177_v55  ;;  %v8222_v35 = vld [vmem:[#allocation6 + $0x3e4] sm:$0xf0] }
  0x72   :  { %v183_v9 = vpack.c.bf16 %v175_v6, %v174_v61  ;;  %2222 = vmatpush.bf16.msrb.mxu0 %v6687_v56  ;;  %v6622_v11 = vld [vmem:[#allocation6 + $0x900] sm:$0xf]  ;;  %2250 = vmatpush.bf16.msrb.mxu2 %v5923_v63  ;;  %v6048_v55 = vld [vmem:[#allocation6 + $0x4a0] sm:$0xf0]  ;;  %v184_v56 = vpack.c.bf16 %v176_v42, %v176_v42 }
  0x73   :  { %192 = vst [vmem:[#allocation2 + $0x14] sm:$0xff] %v185_v2  ;;  %v8389_v12 = vld [vmem:[#allocation6 + $0x91c] sm:$0xf0]  ;;  %v8105_v62 = vld [vmem:[#allocation6 + $0x44] sm:$0xf]  ;;  %v6051_v5 = vor.u32 %v8241_v54, %v6048_v55 }
  0x74   :  { %2264 = vmatpush.bf16.msrb.mxu3 %v6179_v3  ;;  %v6590_v23 = vld [vmem:[#allocation6 + $0x8c0] sm:$0xf]  ;;  %189 = vst [vmem:[#allocation2 + $0x8] sm:$0xff] %v183_v9  ;;  %v6623_v26 = vor.u32 %v8389_v12, %v6622_v11  ;;  %2237 = vmatpush.bf16.msrb.mxu1 %v5635_v14  ;;  %v5504_v63 = vld [vmem:[#allocation6 + $0x60] sm:$0xf0]  ;;  %v187_v12 = vpack.c.bf16 %v181_v8, %v181_v8 }
  0x75   :  { %v8381_v24 = vld [vmem:[#allocation6 + $0x8dc] sm:$0xf0]  ;;  %v8095_v2 = vld [vmem:[#allocation2 + $0x18] sm:$0xf0]  ;;  %v5460_v3 = vld [vmem:[#allocation2 + $0x1c] sm:$0xf0]  ;;  %v5507_v17 = vor.u32 %v8105_v62, %v5504_v63 }
  0x76   :  { %2223 = vmatpush.bf16.msrb.mxu0 %v6655_v10  ;;  %2251 = vmatpush.bf16.msrb.mxu2 %v5891_v15  ;;  %v6591_v43 = vor.u32 %v8381_v24, %v6590_v23  ;;  %v6558_v44 = vld [vmem:[#allocation6 + $0x880] sm:$0xf]  ;;  %191 = vst.msk [vmem:[#allocation2 + $0x10] sm:$0xf] %vm190_vm0, %v184_v56  ;;  %v8233_v10 = vld [vmem:[#allocation6 + $0x444] sm:$0xf]  ;;  %v5671_v56 = vor.u32 %v8150_v50, %v5670_v49 }
  0x77   :  { %v8373_v45 = vld [vmem:[#allocation6 + $0x89c] sm:$0xf0]  ;;  %v6016_v11 = vld [vmem:[#allocation6 + $0x460] sm:$0xf0]  ;;  %194 = vst.msk [vmem:[#allocation2 + $0x24] sm:$0xf] %vm190_vm0, %v187_v12 }
  0x78   :  { %2265 = vmatpush.bf16.msrb.mxu3 %v6147_v19  ;;  %2238 = vmatpush.bf16.msrb.mxu1 %v5603_v31  ;;  %v6526_v58 = vld [vmem:[#allocation6 + $0x840] sm:$0xf]  ;;  %v6559_v60 = vor.u32 %v8373_v45, %v6558_v44  ;;  %v5472_v19 = vld [vmem:[#allocation6 + $0x20] sm:$0xf0]  ;;  %v6019_v21 = vor.u32 %v8233_v10, %v6016_v11  ;;  %v8158_v31 = vld [vmem:[#allocation6 + $0x1e4] sm:$0xf0] }
  0x79   :  { %v8365_v59 = vld [vmem:[#allocation6 + $0x85c] sm:$0xf0]  ;;  %v8225_v23 = vld [vmem:[#allocation6 + $0x404] sm:$0xf]  ;;  %v5703_v42 = vor.u32 %v8158_v31, %v5702_v30  ;;  %v5638_v62 = vld [vmem:[#allocation6 + $0x148] sm:$0xf] }
  0x7a   :  { %v8094_v37 = vld [vmem:[#allocation2 + $0x10] sm:$0xf0]  ;;  %v5452_v41 = vld [vmem:[#allocation2 + $0x14] sm:$0xf0]  ;;  %2224 = vmatpush.bf16.msrb.mxu0 %v6623_v26  ;;  %2252 = vmatpush.bf16.msrb.mxu2 %v5859_v32  ;;  %v6527_v13 = vor.u32 %v8365_v59, %v6526_v58  ;;  %v5984_v24 = vld [vmem:[#allocation6 + $0x420] sm:$0xf0]  ;;  %v5475_v32 = vor.u32 %v8097_v16, %v5472_v19 }
  0x7b   :  { %v9130_v39 = vor.u32 %v8094_v37, %v5450_v33  ;;  %v9132_v46 = vor.u32 %v8092_v40, %v5452_v41  ;;  %v5458_v57 = vld [vmem:[#allocation2 + $0x8] sm:$0xf]  ;;  %v8093_v61 = vld [vmem:[#allocation2 + $0xc] sm:$0xf]  ;;  %v6494_v14 = vld [vmem:[#allocation6 + $0x800] sm:$0xf]  ;;  %v5731_v33 = vor.u32 %v8161_v20, %v5728_v22 }
  0x7c   :  { %2266 = vmatpush.bf16.msrb.mxu3 %v6115_v36  ;;  %2239 = vmatpush.bf16.msrb.mxu1 %v5571_v47  ;;  %v9136_v6 = vor.u32 %v8095_v2, %v5458_v57  ;;  %v9139_v9 = vor.u32 %v8093_v61, %v5460_v3  ;;  %v8357_v15 = vld [vmem:[#allocation6 + $0x81c] sm:$0xf0]  ;;  %v6464_v26 = vld [vmem:[#allocation6 + $0x7e0] sm:$0xf0]  ;;  %v5987_v36 = vor.u32 %v8225_v23, %v5984_v24  ;;  %v8142_v63 = vld [vmem:[#allocation6 + $0x164] sm:$0xf0] }
  0x7d   :  { %2173 = vmatmul.bf16.vlgmr.msra.gmra.mxu0 %v9130_v39  ;;  %2187 = vmatmul.bf16.vlgmr.msra.gmra.mxu1 %v9132_v46  ;;  %v8409_v27 = vld [vmem:[#allocation6 + $0x9c4] sm:$0xf]  ;;  %v6495_v28 = vor.u32 %v8357_v15, %v6494_v14  ;;  %v6467_v37 = vor.u32 %v8345_v25, %v6464_v26  ;;  %v5466_v38 = vld [vmem:[#allocation2 + $0x10] sm:$0xf]  ;;  %v5959_v47 = vor.u32 %v8222_v35, %v5958_v34  ;;  %v5606_v12 = vld [vmem:[#allocation6 + $0x108] sm:$0xf] }
  0x7e   :  { %2225 = vmatpush.bf16.msrb.mxu0 %v6591_v43  ;;  %2253 = vmatpush.bf16.msrb.mxu2 %v5827_v48  ;;  %v6720_v29 = vld [vmem:[#allocation6 + $0x9e0] sm:$0xf0]  ;;  %v8096_v48 = vld [vmem:[#allocation2 + $0x20] sm:$0xf0]  ;;  %v5639_v4 = vor.u32 %v8142_v63, %v5638_v62  ;;  %v5862_v14 = vld [vmem:[#allocation6 + $0x308] sm:$0xf] }
  0x7f   :  { %2201 = vmatmul.bf16.vlgmr.msra.gmra.mxu2 %v9136_v6  ;;  %2215 = vmatmul.bf16.vlgmr.msra.gmra.mxu3 %v9139_v9  ;;  %v8337_v40 = vld [vmem:[#allocation6 + $0x784] sm:$0xf]  ;;  %v6723_v41 = vor.u32 %v8409_v27, %v6720_v29  ;;  %v9144_v51 = vor.u32 %v8096_v48, %v5466_v38  ;;  %v8198_v15 = vld [vmem:[#allocation6 + $0x324] sm:$0xf0] }
  0x80   :  { %2267 = vmatpush.bf16.msrb.mxu3 %v6083_v52  ;;  %2240 = vmatpush.bf16.msrb.mxu1 %v5539_v0  ;;  %v6432_v43 = vld [vmem:[#allocation6 + $0x7a0] sm:$0xf0]  ;;  %v5926_v52 = vld [vmem:[#allocation6 + $0x388] sm:$0xf]  ;;  %v5863_v22 = vor.u32 %v8198_v15, %v5862_v14  ;;  %v8154_v14 = vld [vmem:[#allocation6 + $0x1cc] sm:$0xf] }
  0x81   :  { %v8401_v44 = vld [vmem:[#allocation6 + $0x984] sm:$0xf]  ;;  %v6435_v54 = vor.u32 %v8337_v40, %v6432_v43  ;;  %v5894_v0 = vld [vmem:[#allocation6 + $0x348] sm:$0xf]  ;;  %v5704_v15 = vld [vmem:[#allocation6 + $0x1e8] sm:$0xf0] }
  0x82   :  { %2226 = vmatpush.bf16.msrb.mxu0 %v6559_v60  ;;  %2254 = vmatpush.bf16.msrb.mxu2 %v5795_v1  ;;  %v6688_v45 = vld [vmem:[#allocation6 + $0x9a0] sm:$0xf0]  ;;  %v5927_v60 = vor.u32 %v8214_v53, %v5926_v52  ;;  %v8206_v1 = vld [vmem:[#allocation6 + $0x364] sm:$0xf0] }
  0x83   :  { %v6691_v55 = vor.u32 %v8401_v44, %v6688_v45  ;;  %v8329_v57 = vld [vmem:[#allocation6 + $0x744] sm:$0xf]  ;;  %v5895_v10 = vor.u32 %v8206_v1, %v5894_v0  ;;  %v5574_v24 = vld [vmem:[#allocation6 + $0xc8] sm:$0xf] }
  0x84   :  { %2268 = vmatpush.bf16.msrb.mxu3 %v6051_v5  ;;  %2241 = vmatpush.bf16.msrb.mxu1 %v5507_v17  ;;  %v6400_v58 = vld [vmem:[#allocation6 + $0x760] sm:$0xf0]  ;;  %v8126_v25 = vld [vmem:[#allocation6 + $0xe4] sm:$0xf0] }
  0x85   :  { %v8393_v59 = vld [vmem:[#allocation6 + $0x944] sm:$0xf]  ;;  %v6403_v2 = vor.u32 %v8329_v57, %v6400_v58  ;;  %v5830_v26 = vld [vmem:[#allocation6 + $0x2c8] sm:$0xf]  ;;  %v5575_v30 = vor.u32 %v8126_v25, %v5574_v24 }
  0x86   :  { %2227 = vmatpush.bf16.msrb.mxu0 %v6527_v13  ;;  %2255 = vmatpush.bf16.msrb.mxu2 %v5763_v18  ;;  %v6656_v61 = vld [vmem:[#allocation6 + $0x960] sm:$0xf0]  ;;  %v8134_v13 = vld [vmem:[#allocation6 + $0x124] sm:$0xf0] }
  0x87   :  { %v6659_v3 = vor.u32 %v8393_v59, %v6656_v61  ;;  %v8321_v5 = vld [vmem:[#allocation6 + $0x704] sm:$0xf]  ;;  %v5607_v18 = vor.u32 %v8134_v13, %v5606_v12  ;;  %v8190_v27 = vld [vmem:[#allocation6 + $0x2e4] sm:$0xf0] }
  0x88   :  { %2269 = vmatpush.bf16.msrb.mxu3 %v6019_v21  ;;  %2242 = vmatpush.bf16.msrb.mxu1 %v5475_v32  ;;  %v6368_v7 = vld [vmem:[#allocation6 + $0x720] sm:$0xf0]  ;;  %v5831_v34 = vor.u32 %v8190_v27, %v5830_v26  ;;  %v5798_v38 = vld [vmem:[#allocation6 + $0x288] sm:$0xf]  ;;  %v8146_v27 = vld [vmem:[#allocation6 + $0x18c] sm:$0xf] }
  0x89   :  { %v8385_v8 = vld [vmem:[#allocation6 + $0x904] sm:$0xf]  ;;  %v6371_v16 = vor.u32 %v8321_v5, %v6368_v7  ;;  %v8182_v40 = vld [vmem:[#allocation6 + $0x2a4] sm:$0xf0] }
  0x8a   :  { %2228 = vmatpush.bf16.msrb.mxu0 %v6495_v28  ;;  %2256 = vmatpush.bf16.msrb.mxu2 %v5731_v33  ;;  %v6624_v11 = vld [vmem:[#allocation6 + $0x920] sm:$0xf0]  ;;  %v5799_v48 = vor.u32 %v8182_v40, %v5798_v38  ;;  %v5510_v50 = vld [vmem:[#allocation6 + $0x48] sm:$0xf]  ;;  %v8138_v40 = vld [vmem:[#allocation6 + $0x14c] sm:$0xf] }
  0x8b   :  { %v6627_v17 = vor.u32 %v8385_v8, %v6624_v11  ;;  %v8313_v19 = vld [vmem:[#allocation6 + $0x6c4] sm:$0xf]  ;;  %v8110_v52 = vld [vmem:[#allocation6 + $0x64] sm:$0xf0] }
  0x8c   :  { %2270 = vmatpush.bf16.msrb.mxu3 %v5987_v36  ;;  %2291 = vmatpush.bf16.msra.mxu1 %v6723_v41  ;;  %v6336_v20 = vld [vmem:[#allocation6 + $0x6e0] sm:$0xf0]  ;;  %v5542_v36 = vld [vmem:[#allocation6 + $0x88] sm:$0xf]  ;;  %v5511_v59 = vor.u32 %v8110_v52, %v5510_v50 }
  0x8d   :  { %2229 = vmatmul.bf16.vlgmr.msrb.gmra.mxu0 %v9144_v51  ;;  %2243 = vmatmul.bf16.vlgmr.msrb.gmra.mxu1 %v9130_v39  ;;  %v8377_v21 = vld [vmem:[#allocation6 + $0x8c4] sm:$0xf]  ;;  %v6339_v28 = vor.u32 %v8313_v19, %v6336_v20  ;;  %v5766_v53 = vld [vmem:[#allocation6 + $0x248] sm:$0xf] }
  0x8e   :  { %2277 = vmatpush.bf16.msra.mxu0 %v6467_v37  ;;  %2305 = vmatpush.bf16.msra.mxu2 %v5703_v42  ;;  %v6592_v23 = vld [vmem:[#allocation6 + $0x8e0] sm:$0xf0]  ;;  %v8118_v37 = vld [vmem:[#allocation6 + $0xa4] sm:$0xf0] }
  0x8f   :  { %2257 = vmatmul.bf16.vlgmr.msrb.gmra.mxu2 %v9132_v46  ;;  %2271 = vmatmul.bf16.vlgmr.msrb.gmra.mxu3 %v9136_v6  ;;  %v6595_v29 = vor.u32 %v8377_v21, %v6592_v23  ;;  %v8305_v31 = vld [vmem:[#allocation6 + $0x684] sm:$0xf]  ;;  %v5543_v43 = vor.u32 %v8118_v37, %v5542_v36  ;;  %v5478_v62 = vld [vmem:[#allocation6 + $0x8] sm:$0xf]  ;;  %v5707_v23 = vor.u32 %v8154_v14, %v5704_v15 }
  0x90   :  { %2319 = vmatpush.bf16.msra.mxu3 %v5959_v47  ;;  %2292 = vmatpush.bf16.msra.mxu1 %v6691_v55  ;;  %v6304_v32 = vld [vmem:[#allocation6 + $0x6a0] sm:$0xf0]  ;;  %v8102_v0 = vld [vmem:[#allocation6 + $0x24] sm:$0xf0] }
  0x91   :  { %v8369_v33 = vld [vmem:[#allocation6 + $0x884] sm:$0xf]  ;;  %v6307_v41 = vor.u32 %v8305_v31, %v6304_v32  ;;  %v5734_v1 = vld [vmem:[#allocation6 + $0x208] sm:$0xf]  ;;  %v5479_v13 = vor.u32 %v8102_v0, %v5478_v62 }
  0x92   :  { %2278 = vmatpush.bf16.msra.mxu0 %v6435_v54  ;;  %2306 = vmatpush.bf16.msra.mxu2 %v5671_v56  ;;  %v6560_v35 = vld [vmem:[#allocation6 + $0x8a0] sm:$0xf0]  ;;  %v8174_v54 = vld [vmem:[#allocation6 + $0x264] sm:$0xf0] }
  0x93   :  { %v6563_v42 = vor.u32 %v8369_v33, %v6560_v35  ;;  %v8297_v44 = vld [vmem:[#allocation6 + $0x644] sm:$0xf]  ;;  %v5767_v63 = vor.u32 %v8174_v54, %v5766_v53  ;;  %v6470_v5 = vld [vmem:[#allocation6 + $0x7c8] sm:$0xf]  ;;  %v8130_v54 = vld [vmem:[#allocation6 + $0x10c] sm:$0xf] }
  0x94   :  { %2320 = vmatpush.bf16.msra.mxu3 %v5927_v60  ;;  %2293 = vmatpush.bf16.msra.mxu1 %v6659_v3  ;;  %v6272_v45 = vld [vmem:[#allocation6 + $0x660] sm:$0xf0]  ;;  %v6214_v3 = vld [vmem:[#allocation6 + $0x5c8] sm:$0xf] }
  0x95   :  { %v8361_v47 = vld [vmem:[#allocation6 + $0x844] sm:$0xf]  ;;  %v6275_v55 = vor.u32 %v8297_v44, %v6272_v45  ;;  %v8350_v8 = vld [vmem:[#allocation6 + $0x7e4] sm:$0xf0] }
  0x96   :  { %2279 = vmatpush.bf16.msra.mxu0 %v6403_v2  ;;  %2307 = vmatpush.bf16.msra.mxu2 %v5639_v4  ;;  %v6528_v49 = vld [vmem:[#allocation6 + $0x860] sm:$0xf0]  ;;  %v8166_v2 = vld [vmem:[#allocation6 + $0x224] sm:$0xf0] }
  0x97   :  { %v8289_v56 = vld [vmem:[#allocation6 + $0x604] sm:$0xf]  ;;  %v6531_v58 = vor.u32 %v8361_v47, %v6528_v49  ;;  %v8286_v4 = vld [vmem:[#allocation6 + $0x5e4] sm:$0xf0] }
  0x98   :  { %2321 = vmatpush.bf16.msra.mxu3 %v5895_v10  ;;  %2294 = vmatpush.bf16.msra.mxu1 %v6627_v17  ;;  %v6240_v57 = vld [vmem:[#allocation6 + $0x620] sm:$0xf0]  ;;  %v6726_v10 = vld [vmem:[#allocation6 + $0x9c8] sm:$0xf]  ;;  %v6215_v17 = vor.u32 %v8286_v4, %v6214_v3  ;;  %v5576_v3 = vld [vmem:[#allocation6 + $0xe8] sm:$0xf0] }
  0x99   :  { %v8353_v60 = vld [vmem:[#allocation6 + $0x804] sm:$0xf]  ;;  %v6243_v7 = vor.u32 %v8289_v56, %v6240_v57  ;;  %v8414_v11 = vld [vmem:[#allocation6 + $0x9e4] sm:$0xf0] }
  0x9a   :  { %2280 = vmatpush.bf16.msra.mxu0 %v6371_v16  ;;  %2308 = vmatpush.bf16.msra.mxu2 %v5607_v18  ;;  %v6496_v61 = vld [vmem:[#allocation6 + $0x820] sm:$0xf0]  ;;  %v5735_v16 = vor.u32 %v8166_v2, %v5734_v1  ;;  %v6471_v18 = vor.u32 %v8350_v8, %v6470_v5  ;;  %v6727_v19 = vor.u32 %v8414_v11, %v6726_v10  ;;  %v6182_v20 = vld [vmem:[#allocation6 + $0x588] sm:$0xf]  ;;  %v8122_v2 = vld [vmem:[#allocation6 + $0xcc] sm:$0xf] }
  0x9b   :  { %v6499_v12 = vor.u32 %v8353_v60, %v6496_v61  ;;  %v8278_v21 = vld [vmem:[#allocation6 + $0x5a4] sm:$0xf0] }
  0x9c   :  { %2322 = vmatpush.bf16.msra.mxu3 %v5863_v22  ;;  %2295 = vmatpush.bf16.msra.mxu1 %v6595_v29  ;;  %v6438_v22 = vld [vmem:[#allocation6 + $0x788] sm:$0xf]  ;;  %v6183_v29 = vor.u32 %v8278_v21, %v6182_v20 }
  0x9d   :  { %v8342_v24 = vld [vmem:[#allocation6 + $0x7a4] sm:$0xf0] }
  0x9e   :  { %2281 = vmatpush.bf16.msra.mxu0 %v6339_v28  ;;  %2309 = vmatpush.bf16.msra.mxu2 %v5575_v30  ;;  %v6694_v25 = vld [vmem:[#allocation6 + $0x988] sm:$0xf]  ;;  %v5672_v28 = vld [vmem:[#allocation6 + $0x1a8] sm:$0xf0]  ;;  %v6439_v30 = vor.u32 %v8342_v24, %v6438_v22 }
  0x9f   :  { %v8406_v26 = vld [vmem:[#allocation6 + $0x9a4] sm:$0xf0]  ;;  %v5675_v35 = vor.u32 %v8146_v27, %v5672_v28  ;;  %v8106_v28 = vld [vmem:[#allocation6 + $0x4c] sm:$0xf] }
  0xa0   :  { %2323 = vmatpush.bf16.msra.mxu3 %v5831_v34  ;;  %2296 = vmatpush.bf16.msra.mxu1 %v6563_v42  ;;  %v6695_v31 = vor.u32 %v8406_v26, %v6694_v25  ;;  %v6150_v32 = vld [vmem:[#allocation6 + $0x548] sm:$0xf] }
  0xa1   :  { %v8270_v33 = vld [vmem:[#allocation6 + $0x564] sm:$0xf0] }
  0xa2   :  { %2282 = vmatpush.bf16.msra.mxu0 %v6307_v41  ;;  %2310 = vmatpush.bf16.msra.mxu2 %v5543_v43  ;;  %v6406_v34 = vld [vmem:[#allocation6 + $0x748] sm:$0xf]  ;;  %v5640_v41 = vld [vmem:[#allocation6 + $0x168] sm:$0xf0]  ;;  %v6151_v42 = vor.u32 %v8270_v33, %v6150_v32 }
  0xa3   :  { %v8334_v36 = vld [vmem:[#allocation6 + $0x764] sm:$0xf0]  ;;  %v5643_v49 = vor.u32 %v8138_v40, %v5640_v41  ;;  %v8098_v41 = vld [vmem:[#allocation6 + $0xc] sm:$0xf] }
  0xa4   :  { %2324 = vmatpush.bf16.msra.mxu3 %v5799_v48  ;;  %2297 = vmatpush.bf16.msra.mxu1 %v6531_v58  ;;  %v6662_v37 = vld [vmem:[#allocation6 + $0x948] sm:$0xf]  ;;  %v6407_v43 = vor.u32 %v8334_v36, %v6406_v34 }
  0xa5   :  { %v8398_v38 = vld [vmem:[#allocation6 + $0x964] sm:$0xf0] }
  0xa6   :  { %2283 = vmatpush.bf16.msra.mxu0 %v6275_v55  ;;  %2311 = vmatpush.bf16.msra.mxu2 %v5511_v59  ;;  %v6663_v44 = vor.u32 %v8398_v38, %v6662_v37  ;;  %v6118_v45 = vld [vmem:[#allocation6 + $0x508] sm:$0xf]  ;;  %v5608_v55 = vld [vmem:[#allocation6 + $0x128] sm:$0xf0] }
  0xa7   :  { %v8262_v47 = vld [vmem:[#allocation6 + $0x524] sm:$0xf0]  ;;  %v5611_v62 = vor.u32 %v8130_v54, %v5608_v55  ;;  %v8410_v54 = vld [vmem:[#allocation6 + $0x9cc] sm:$0xf] }
  0xa8   :  { %2325 = vmatpush.bf16.msra.mxu3 %v5767_v63  ;;  %2298 = vmatpush.bf16.msra.mxu1 %v6499_v12  ;;  %v6374_v48 = vld [vmem:[#allocation6 + $0x708] sm:$0xf]  ;;  %v6119_v56 = vor.u32 %v8262_v47, %v6118_v45  ;;  %v5579_v12 = vor.u32 %v8122_v2, %v5576_v3  ;;  %v8282_v45 = vld [vmem:[#allocation6 + $0x5cc] sm:$0xf] }
  0xa9   :  { %v8326_v50 = vld [vmem:[#allocation6 + $0x724] sm:$0xf0]  ;;  %v6728_v55 = vld [vmem:[#allocation6 + $0x9e8] sm:$0xf0] }
  0xaa   :  { %2284 = vmatpush.bf16.msra.mxu0 %v6243_v7  ;;  %2312 = vmatpush.bf16.msra.mxu2 %v5479_v13  ;;  %v6630_v52 = vld [vmem:[#allocation6 + $0x908] sm:$0xf]  ;;  %v6375_v57 = vor.u32 %v8326_v50, %v6374_v48  ;;  %v6216_v48 = vld [vmem:[#allocation6 + $0x5e8] sm:$0xf0] }
  0xab   :  { %2299 = vmatmul.bf16.vlgmr.msra.gmra.mxu1 %v9144_v51  ;;  %v8390_v53 = vld [vmem:[#allocation6 + $0x924] sm:$0xf0]  ;;  %v6472_v50 = vld [vmem:[#allocation6 + $0x7e8] sm:$0xf0] }
  0xac   :  { %2326 = vmatpush.bf16.msra.mxu3 %v5735_v16  ;;  %2347 = vmatpush.bf16.msrb.mxu1 %v6471_v18  ;;  %v6631_v58 = vor.u32 %v8390_v53, %v6630_v52  ;;  %v6086_v59 = vld [vmem:[#allocation6 + $0x4c8] sm:$0xf]  ;;  %v8114_v16 = vld [vmem:[#allocation6 + $0x8c] sm:$0xf] }
  0xad   :  { %2285 = vmatmul.bf16.vlgmr.msra.gmra.mxu0 %v9139_v9  ;;  %2313 = vmatmul.bf16.vlgmr.msra.gmra.mxu2 %v9130_v39  ;;  %v8254_v60 = vld [vmem:[#allocation6 + $0x4e4] sm:$0xf0]  ;;  %v6440_v2 = vld [vmem:[#allocation6 + $0x7a8] sm:$0xf0] }
  0xae   :  { %2333 = vmatpush.bf16.msrb.mxu0 %v6215_v17  ;;  %2361 = vmatpush.bf16.msrb.mxu2 %v6727_v19  ;;  %v6342_v61 = vld [vmem:[#allocation6 + $0x6c8] sm:$0xf]  ;;  %v6087_v4 = vor.u32 %v8254_v60, %v6086_v59  ;;  %v5544_v17 = vld [vmem:[#allocation6 + $0xa8] sm:$0xf0] }
  0xaf   :  { %2327 = vmatmul.bf16.vlgmr.msra.gmra.mxu3 %v9132_v46  ;;  %v8318_v63 = vld [vmem:[#allocation6 + $0x6e4] sm:$0xf0]  ;;  %v5547_v24 = vor.u32 %v8114_v16, %v5544_v17  ;;  %v8210_v60 = vld [vmem:[#allocation6 + $0x38c] sm:$0xf] }
  0xb0   :  { %2375 = vmatpush.bf16.msrb.mxu3 %v5707_v23  ;;  %2348 = vmatpush.bf16.msrb.mxu1 %v6439_v30  ;;  %v6598_v0 = vld [vmem:[#allocation6 + $0x8c8] sm:$0xf]  ;;  %v6343_v5 = vor.u32 %v8318_v63, %v6342_v61  ;;  %v5928_v61 = vld [vmem:[#allocation6 + $0x3a8] sm:$0xf0]  ;;  %v6731_v63 = vor.u32 %v8410_v54, %v6728_v55 }
  0xb1   :  { %v8382_v1 = vld [vmem:[#allocation6 + $0x8e4] sm:$0xf0]  ;;  %v8402_v3 = vld [vmem:[#allocation6 + $0x98c] sm:$0xf] }
  0xb2   :  { %2334 = vmatpush.bf16.msrb.mxu0 %v6183_v29  ;;  %2362 = vmatpush.bf16.msrb.mxu2 %v6695_v31  ;;  %v6599_v7 = vor.u32 %v8382_v1, %v6598_v0  ;;  %v6054_v8 = vld [vmem:[#allocation6 + $0x488] sm:$0xf]  ;;  %v5512_v29 = vld [vmem:[#allocation6 + $0x68] sm:$0xf0] }
  0xb3   :  { %v8246_v10 = vld [vmem:[#allocation6 + $0x4a4] sm:$0xf0]  ;;  %v5515_v38 = vor.u32 %v8106_v28, %v5512_v29  ;;  %v6184_v0 = vld [vmem:[#allocation6 + $0x5a8] sm:$0xf0] }
  0xb4   :  { %2376 = vmatpush.bf16.msrb.mxu3 %v5675_v35  ;;  %2349 = vmatpush.bf16.msrb.mxu1 %v6407_v43  ;;  %v6310_v11 = vld [vmem:[#allocation6 + $0x688] sm:$0xf]  ;;  %v6055_v18 = vor.u32 %v8246_v10, %v6054_v8  ;;  %v8218_v43 = vld [vmem:[#allocation6 + $0x3cc] sm:$0xf] }
  0xb5   :  { %v8310_v13 = vld [vmem:[#allocation6 + $0x6a4] sm:$0xf0]  ;;  %v8338_v1 = vld [vmem:[#allocation6 + $0x78c] sm:$0xf] }
  0xb6   :  { %2335 = vmatpush.bf16.msrb.mxu0 %v6151_v42  ;;  %2363 = vmatpush.bf16.msrb.mxu2 %v6663_v44  ;;  %v6566_v14 = vld [vmem:[#allocation6 + $0x888] sm:$0xf]  ;;  %v6311_v19 = vor.u32 %v8310_v13, %v6310_v11  ;;  %v5480_v42 = vld [vmem:[#allocation6 + $0x28] sm:$0xf0]  ;;  %v6443_v8 = vor.u32 %v8338_v1, %v6440_v2 }
  0xb7   :  { %v8374_v15 = vld [vmem:[#allocation6 + $0x8a4] sm:$0xf0]  ;;  %v5960_v44 = vld [vmem:[#allocation6 + $0x3e8] sm:$0xf0] }
  0xb8   :  { %2377 = vmatpush.bf16.msrb.mxu3 %v5643_v49  ;;  %2350 = vmatpush.bf16.msrb.mxu1 %v6375_v57  ;;  %v6567_v20 = vor.u32 %v8374_v15, %v6566_v14  ;;  %v6022_v21 = vld [vmem:[#allocation6 + $0x448] sm:$0xf]  ;;  %v8346_v49 = vld [vmem:[#allocation6 + $0x7cc] sm:$0xf]  ;;  %v5963_v57 = vor.u32 %v8218_v43, %v5960_v44 }
  0xb9   :  { %v8238_v22 = vld [vmem:[#allocation6 + $0x464] sm:$0xf0]  ;;  %v6475_v59 = vor.u32 %v8346_v49, %v6472_v50  ;;  %v8202_v10 = vld [vmem:[#allocation6 + $0x34c] sm:$0xf] }
  0xba   :  { %2336 = vmatpush.bf16.msrb.mxu0 %v6119_v56  ;;  %2364 = vmatpush.bf16.msrb.mxu2 %v6631_v58  ;;  %v6278_v23 = vld [vmem:[#allocation6 + $0x648] sm:$0xf]  ;;  %v6023_v30 = vor.u32 %v8238_v22, %v6022_v21  ;;  %v5483_v56 = vor.u32 %v8098_v41, %v5480_v42  ;;  %v6219_v58 = vor.u32 %v8282_v45, %v6216_v48  ;;  %v5896_v11 = vld [vmem:[#allocation6 + $0x368] sm:$0xf0] }
  0xbb   :  { %v8302_v25 = vld [vmem:[#allocation6 + $0x664] sm:$0xf0]  ;;  %v6152_v14 = vld [vmem:[#allocation6 + $0x568] sm:$0xf0] }
  0xbc   :  { %2378 = vmatpush.bf16.msrb.mxu3 %v5611_v62  ;;  %2351 = vmatpush.bf16.msrb.mxu1 %v6343_v5  ;;  %v6534_v26 = vld [vmem:[#allocation6 + $0x848] sm:$0xf]  ;;  %v6279_v33 = vor.u32 %v8302_v25, %v6278_v23  ;;  %v8274_v62 = vld [vmem:[#allocation6 + $0x58c] sm:$0xf]  ;;  %v5931_v5 = vor.u32 %v8210_v60, %v5928_v61 }
  0xbd   :  { %v8366_v27 = vld [vmem:[#allocation6 + $0x864] sm:$0xf0]  ;;  %v8330_v15 = vld [vmem:[#allocation6 + $0x74c] sm:$0xf] }
  0xbe   :  { %2337 = vmatpush.bf16.msrb.mxu0 %v6087_v4  ;;  %2365 = vmatpush.bf16.msrb.mxu2 %v6599_v7  ;;  %v5990_v31 = vld [vmem:[#allocation6 + $0x408] sm:$0xf]  ;;  %v6535_v34 = vor.u32 %v8366_v27, %v6534_v26  ;;  %v6696_v4 = vld [vmem:[#allocation6 + $0x9a8] sm:$0xf0]  ;;  %v6187_v7 = vor.u32 %v8274_v62, %v6184_v0 }
  0xbf   :  { %v8230_v32 = vld [vmem:[#allocation6 + $0x424] sm:$0xf0]  ;;  %v6699_v13 = vor.u32 %v8402_v3, %v6696_v4  ;;  %v6408_v16 = vld [vmem:[#allocation6 + $0x768] sm:$0xf0] }
  0xc0   :  { %2379 = vmatpush.bf16.msrb.mxu3 %v5579_v12  ;;  %2352 = vmatpush.bf16.msrb.mxu1 %v6311_v19  ;;  %v6246_v35 = vld [vmem:[#allocation6 + $0x608] sm:$0xf]  ;;  %v5991_v47 = vor.u32 %v8230_v32, %v5990_v31  ;;  %v8266_v12 = vld [vmem:[#allocation6 + $0x54c] sm:$0xf]  ;;  %v5899_v19 = vor.u32 %v8202_v10, %v5896_v11  ;;  %v6411_v21 = vor.u32 %v8330_v15, %v6408_v16 }
  0xc1   :  { %v8294_v36 = vld [vmem:[#allocation6 + $0x624] sm:$0xf0]  ;;  %v8394_v17 = vld [vmem:[#allocation6 + $0x94c] sm:$0xf] }
  0xc2   :  { %2338 = vmatpush.bf16.msrb.mxu0 %v6055_v18  ;;  %2366 = vmatpush.bf16.msrb.mxu2 %v6567_v20  ;;  %v6502_v37 = vld [vmem:[#allocation6 + $0x808] sm:$0xf]  ;;  %v6247_v52 = vor.u32 %v8294_v36, %v6246_v35  ;;  %v6664_v18 = vld [vmem:[#allocation6 + $0x968] sm:$0xf0]  ;;  %v6155_v20 = vor.u32 %v8266_v12, %v6152_v14 }
  0xc3   :  { %v8358_v40 = vld [vmem:[#allocation6 + $0x824] sm:$0xf0]  ;;  %v8194_v22 = vld [vmem:[#allocation6 + $0x30c] sm:$0xf]  ;;  %v6667_v25 = vor.u32 %v8394_v17, %v6664_v18 }
  0xc4   :  { %2380 = vmatpush.bf16.msrb.mxu3 %v5547_v24  ;;  %2353 = vmatpush.bf16.msrb.mxu1 %v6279_v33  ;;  %v6503_v53 = vor.u32 %v8358_v40, %v6502_v37  ;;  %v5864_v23 = vld [vmem:[#allocation6 + $0x328] sm:$0xf0] }
  0xc5   :  { %v8258_v24 = vld [vmem:[#allocation6 + $0x50c] sm:$0xf]  ;;  %v5867_v31 = vor.u32 %v8194_v22, %v5864_v23  ;;  %v5966_v22 = vld [vmem:[#allocation6 + $0x3d0] sm:$0xf] }
  0xc6   :  { %2339 = vmatpush.bf16.msrb.mxu0 %v6023_v30  ;;  %2367 = vmatpush.bf16.msrb.mxu2 %v6535_v34  ;;  %v6120_v26 = vld [vmem:[#allocation6 + $0x528] sm:$0xf0] }
  0xc7   :  { %v8322_v27 = vld [vmem:[#allocation6 + $0x70c] sm:$0xf]  ;;  %v6123_v32 = vor.u32 %v8258_v24, %v6120_v26  ;;  %v8223_v24 = vld [vmem:[#allocation6 + $0x3ec] sm:$0xf0] }
  0xc8   :  { %2381 = vmatpush.bf16.msrb.mxu3 %v5515_v38  ;;  %2354 = vmatpush.bf16.msrb.mxu1 %v6247_v52  ;;  %v6376_v28 = vld [vmem:[#allocation6 + $0x728] sm:$0xf0]  ;;  %v8287_v26 = vld [vmem:[#allocation6 + $0x5ec] sm:$0xf0] }
  0xc9   :  { %v8386_v29 = vld [vmem:[#allocation6 + $0x90c] sm:$0xf]  ;;  %v6379_v33 = vor.u32 %v8322_v27, %v6376_v28 }
  0xca   :  { %2340 = vmatpush.bf16.msrb.mxu0 %v5991_v47  ;;  %2368 = vmatpush.bf16.msrb.mxu2 %v6503_v53  ;;  %v6632_v30 = vld [vmem:[#allocation6 + $0x928] sm:$0xf0] }
  0xcb   :  { %2355 = vmatmul.bf16.vlgmr.msrb.gmra.mxu1 %v9139_v9  ;;  %v8186_v34 = vld [vmem:[#allocation6 + $0x2cc] sm:$0xf]  ;;  %v6635_v37 = vor.u32 %v8386_v29, %v6632_v30  ;;  %v6478_v29 = vld [vmem:[#allocation6 + $0x7d0] sm:$0xf] }
  0xcc   :  { %2382 = vmatpush.bf16.msrb.mxu3 %v5483_v56  ;;  %2403 = vmatpush.bf16.msra.mxu1 %v6219_v58  ;;  %v5832_v35 = vld [vmem:[#allocation6 + $0x2e8] sm:$0xf0]  ;;  %v8351_v30 = vld [vmem:[#allocation6 + $0x7ec] sm:$0xf0] }
  0xcd   :  { %2341 = vmatmul.bf16.vlgmr.msrb.gmra.mxu0 %v9136_v6  ;;  %2369 = vmatmul.bf16.vlgmr.msrb.gmra.mxu2 %v9144_v51  ;;  %v8250_v36 = vld [vmem:[#allocation6 + $0x4cc] sm:$0xf]  ;;  %v5835_v44 = vor.u32 %v8186_v34, %v5832_v35  ;;  %v5678_v35 = vld [vmem:[#allocation6 + $0x190] sm:$0xf] }
  0xce   :  { %2389 = vmatpush.bf16.msra.mxu0 %v5963_v57  ;;  %2417 = vmatpush.bf16.msra.mxu2 %v6475_v59  ;;  %v6088_v38 = vld [vmem:[#allocation6 + $0x4e8] sm:$0xf0] }
  0xcf   :  { %2383 = vmatmul.bf16.vlgmr.msrb.gmra.mxu3 %v9130_v39  ;;  %v8314_v40 = vld [vmem:[#allocation6 + $0x6cc] sm:$0xf]  ;;  %v6091_v45 = vor.u32 %v8250_v36, %v6088_v38  ;;  %v8151_v36 = vld [vmem:[#allocation6 + $0x1ac] sm:$0xf0]  ;;  %v6479_v38 = vor.u32 %v8351_v30, %v6478_v29 }
  0xd0   :  { %2431 = vmatpush.bf16.msra.mxu3 %v6731_v63  ;;  %2404 = vmatpush.bf16.msra.mxu1 %v6187_v7  ;;  %v6344_v41 = vld [vmem:[#allocation6 + $0x6e8] sm:$0xf0]  ;;  %v8183_v29 = vld [vmem:[#allocation6 + $0x2ac] sm:$0xf0] }
  0xd1   :  { %v8378_v42 = vld [vmem:[#allocation6 + $0x8cc] sm:$0xf]  ;;  %v6347_v47 = vor.u32 %v8314_v40, %v6344_v41  ;;  %v8215_v40 = vld [vmem:[#allocation6 + $0x3ac] sm:$0xf0] }
  0xd2   :  { %2390 = vmatpush.bf16.msra.mxu0 %v5931_v5  ;;  %2418 = vmatpush.bf16.msra.mxu2 %v6443_v8  ;;  %v6600_v43 = vld [vmem:[#allocation6 + $0x8e8] sm:$0xf0]  ;;  %v6190_v41 = vld [vmem:[#allocation6 + $0x590] sm:$0xf] }
  0xd3   :  { %v8178_v48 = vld [vmem:[#allocation6 + $0x28c] sm:$0xf]  ;;  %v6603_v52 = vor.u32 %v8378_v42, %v6600_v43  ;;  %v8279_v42 = vld [vmem:[#allocation6 + $0x5ac] sm:$0xf0] }
  0xd4   :  { %2432 = vmatpush.bf16.msra.mxu3 %v6699_v13  ;;  %2405 = vmatpush.bf16.msra.mxu1 %v6155_v20  ;;  %v5800_v49 = vld [vmem:[#allocation6 + $0x2a8] sm:$0xf0]  ;;  %v5710_v20 = vld [vmem:[#allocation6 + $0x1d0] sm:$0xf] }
  0xd5   :  { %v8242_v50 = vld [vmem:[#allocation6 + $0x48c] sm:$0xf]  ;;  %v5803_v58 = vor.u32 %v8178_v48, %v5800_v49  ;;  %v6446_v43 = vld [vmem:[#allocation6 + $0x790] sm:$0xf]  ;;  %v6191_v48 = vor.u32 %v8279_v42, %v6190_v41 }
  0xd6   :  { %2391 = vmatpush.bf16.msra.mxu0 %v5899_v19  ;;  %2419 = vmatpush.bf16.msra.mxu2 %v6411_v21  ;;  %v6056_v53 = vld [vmem:[#allocation6 + $0x4a8] sm:$0xf0]  ;;  %v8159_v21 = vld [vmem:[#allocation6 + $0x1ec] sm:$0xf0] }
  0xd7   :  { %v8306_v54 = vld [vmem:[#allocation6 + $0x68c] sm:$0xf]  ;;  %v6059_v59 = vor.u32 %v8242_v50, %v6056_v53  ;;  %v5646_v49 = vld [vmem:[#allocation6 + $0x150] sm:$0xf] }
  0xd8   :  { %2433 = vmatpush.bf16.msra.mxu3 %v6667_v25  ;;  %2406 = vmatpush.bf16.msra.mxu1 %v6123_v32  ;;  %v6312_v55 = vld [vmem:[#allocation6 + $0x6a8] sm:$0xf0]  ;;  %v6222_v25 = vld [vmem:[#allocation6 + $0x5d0] sm:$0xf]  ;;  %v5711_v32 = vor.u32 %v8159_v21, %v5710_v20 }
  0xd9   :  { %v8370_v56 = vld [vmem:[#allocation6 + $0x88c] sm:$0xf]  ;;  %v6315_v60 = vor.u32 %v8306_v54, %v6312_v55  ;;  %v6223_v34 = vor.u32 %v8287_v26, %v6222_v25  ;;  %v8143_v50 = vld [vmem:[#allocation6 + $0x16c] sm:$0xf0] }
  0xda   :  { %2392 = vmatpush.bf16.msra.mxu0 %v5867_v31  ;;  %2420 = vmatpush.bf16.msra.mxu2 %v6379_v33  ;;  %v6568_v57 = vld [vmem:[#allocation6 + $0x8a8] sm:$0xf0]  ;;  %v5967_v33 = vor.u32 %v8223_v24, %v5966_v22  ;;  %v8207_v54 = vld [vmem:[#allocation6 + $0x36c] sm:$0xf0] }
  0xdb   :  { %v8170_v61 = vld [vmem:[#allocation6 + $0x24c] sm:$0xf]  ;;  %v6571_v0 = vor.u32 %v8370_v56, %v6568_v57  ;;  %v6158_v55 = vld [vmem:[#allocation6 + $0x550] sm:$0xf] }
  0xdc   :  { %2434 = vmatpush.bf16.msra.mxu3 %v6635_v37  ;;  %2407 = vmatpush.bf16.msra.mxu1 %v6091_v45  ;;  %v5768_v62 = vld [vmem:[#allocation6 + $0x268] sm:$0xf0]  ;;  %v5934_v37 = vld [vmem:[#allocation6 + $0x390] sm:$0xf]  ;;  %v5679_v45 = vor.u32 %v8151_v36, %v5678_v35 }
  0xdd   :  { %v8234_v63 = vld [vmem:[#allocation6 + $0x44c] sm:$0xf]  ;;  %v5771_v7 = vor.u32 %v8170_v61, %v5768_v62  ;;  %v8271_v56 = vld [vmem:[#allocation6 + $0x56c] sm:$0xf0] }
  0xde   :  { %2393 = vmatpush.bf16.msra.mxu0 %v5835_v44  ;;  %2421 = vmatpush.bf16.msra.mxu2 %v6347_v47  ;;  %v6024_v1 = vld [vmem:[#allocation6 + $0x468] sm:$0xf0]  ;;  %v8343_v44 = vld [vmem:[#allocation6 + $0x7ac] sm:$0xf0]  ;;  %v5935_v47 = vor.u32 %v8215_v40, %v5934_v37  ;;  %v6159_v61 = vor.u32 %v8271_v56, %v6158_v55 }
  0xdf   :  { %v8298_v2 = vld [vmem:[#allocation6 + $0x64c] sm:$0xf]  ;;  %v6027_v11 = vor.u32 %v8234_v63, %v6024_v1  ;;  %v6447_v53 = vor.u32 %v8343_v44, %v6446_v43  ;;  %v6414_v57 = vld [vmem:[#allocation6 + $0x750] sm:$0xf] }
  0xe0   :  { %2435 = vmatpush.bf16.msra.mxu3 %v6603_v52  ;;  %v6280_v3 = vld [vmem:[#allocation6 + $0x668] sm:$0xf0]  ;;  %2408 = vmatpush.bf16.msra.mxu1 %v6059_v59  ;;  %v5902_v52 = vld [vmem:[#allocation6 + $0x350] sm:$0xf]  ;;  %v5647_v59 = vor.u32 %v8143_v50, %v5646_v49 }
  0xe1   :  { %v8362_v4 = vld [vmem:[#allocation6 + $0x84c] sm:$0xf]  ;;  %v6283_v12 = vor.u32 %v8298_v2, %v6280_v3  ;;  %v5614_v62 = vld [vmem:[#allocation6 + $0x110] sm:$0xf] }
  0xe2   :  { %v6536_v5 = vld [vmem:[#allocation6 + $0x868] sm:$0xf0]  ;;  %2394 = vmatpush.bf16.msra.mxu0 %v5803_v58  ;;  %2422 = vmatpush.bf16.msra.mxu2 %v6315_v60  ;;  %v8335_v58 = vld [vmem:[#allocation6 + $0x76c] sm:$0xf0]  ;;  %v5903_v60 = vor.u32 %v8207_v54, %v5902_v52 }
  0xe3   :  { %v8162_v8 = vld [vmem:[#allocation6 + $0x20c] sm:$0xf]  ;;  %v6539_v16 = vor.u32 %v8362_v4, %v6536_v5  ;;  %v8135_v63 = vld [vmem:[#allocation6 + $0x12c] sm:$0xf0]  ;;  %v6415_v1 = vor.u32 %v8335_v58, %v6414_v57 }
  0xe4   :  { %v5736_v10 = vld [vmem:[#allocation6 + $0x228] sm:$0xf0]  ;;  %2436 = vmatpush.bf16.msra.mxu3 %v6571_v0  ;;  %2409 = vmatpush.bf16.msra.mxu1 %v6027_v11  ;;  %v5870_v0 = vld [vmem:[#allocation6 + $0x310] sm:$0xf] }
  0xe5   :  { %v8226_v13 = vld [vmem:[#allocation6 + $0x40c] sm:$0xf]  ;;  %v5739_v23 = vor.u32 %v8162_v8, %v5736_v10  ;;  %v8199_v2 = vld [vmem:[#allocation6 + $0x32c] sm:$0xf0]  ;;  %v5615_v8 = vor.u32 %v8135_v63, %v5614_v62 }
  0xe6   :  { %v5992_v14 = vld [vmem:[#allocation6 + $0x428] sm:$0xf0]  ;;  %2395 = vmatpush.bf16.msra.mxu0 %v5771_v7  ;;  %2423 = vmatpush.bf16.msra.mxu2 %v6283_v12  ;;  %v6126_v3 = vld [vmem:[#allocation6 + $0x510] sm:$0xf]  ;;  %v5871_v10 = vor.u32 %v8199_v2, %v5870_v0 }
  0xe7   :  { %v8290_v15 = vld [vmem:[#allocation6 + $0x60c] sm:$0xf]  ;;  %v5995_v27 = vor.u32 %v8226_v13, %v5992_v14  ;;  %v8263_v4 = vld [vmem:[#allocation6 + $0x52c] sm:$0xf0] }
  0xe8   :  { %v6248_v17 = vld [vmem:[#allocation6 + $0x628] sm:$0xf0]  ;;  %2437 = vmatpush.bf16.msra.mxu3 %v6539_v16  ;;  %v6382_v5 = vld [vmem:[#allocation6 + $0x710] sm:$0xf]  ;;  %v6127_v11 = vor.u32 %v8263_v4, %v6126_v3  ;;  %v8155_v4 = vld [vmem:[#allocation6 + $0x1d4] sm:$0xf] }
  0xe9   :  { %v8354_v18 = vld [vmem:[#allocation6 + $0x80c] sm:$0xf]  ;;  %v6251_v28 = vor.u32 %v8290_v15, %v6248_v17  ;;  %2410 = vmatpush.bf16.msra.mxu1 %v5995_v27  ;;  %v8327_v7 = vld [vmem:[#allocation6 + $0x72c] sm:$0xf0]  ;;  %v9162_v27 = vld [vmem:[#allocation8] sm:$0xff] }
  0xea   :  { %v6504_v19 = vld [vmem:[#allocation6 + $0x828] sm:$0xf0]  ;;  %2396 = vmatpush.bf16.msra.mxu0 %v5739_v23  ;;  %v5582_v12 = vld [vmem:[#allocation6 + $0xd0] sm:$0xf]  ;;  %v6383_v15 = vor.u32 %v8327_v7, %v6382_v5  ;;  %v523_v35 = vperm.slane %v9162_v27, 0 }
  0xeb   :  { %v6507_v31 = vor.u32 %v8354_v18, %v6504_v19  ;;  %2424 = vmatpush.bf16.msra.mxu2 %v6251_v28  ;;  %v8127_v13 = vld [vmem:[#allocation6 + $0xec] sm:$0xf0]  ;;  %v5712_v7 = vld [vmem:[#allocation6 + $0x1f0] sm:$0xf0] }
  0xec   :  { %2411 = vmatmul.bf16.vlgmr.msra.gmra.mxu1 %v9136_v6  ;;  %v5838_v14 = vld [vmem:[#allocation6 + $0x2d0] sm:$0xf]  ;;  %v5583_v21 = vor.u32 %v8127_v13, %v5582_v12  ;;  %v8283_v13 = vld [vmem:[#allocation6 + $0x5d4] sm:$0xf] }
  0xed   :  { %2438 = vmatpush.bf16.msra.mxu3 %v6507_v31  ;;  %2459 = vmatpush.bf16.msrb.mxu1 %v5967_v33  ;;  %v8191_v16 = vld [vmem:[#allocation6 + $0x2ec] sm:$0xf0] }
  0xee   :  { %2445 = vmatpush.bf16.msrb.mxu0 %v5711_v32  ;;  %2425 = vmatmul.bf16.vlgmr.msra.gmra.mxu2 %v9139_v9  ;;  %v6094_v17 = vld [vmem:[#allocation6 + $0x4d0] sm:$0xf]  ;;  %v5839_v23 = vor.u32 %v8191_v16, %v5838_v14  ;;  %v6224_v14 = vld [vmem:[#allocation6 + $0x5f0] sm:$0xf0] }
  0xef   :  { %2473 = vmatpush.bf16.msrb.mxu2 %v6223_v34  ;;  %2397 = vmatmul.bf16.vlgmr.msra.gmra.mxu0 %v9132_v46  ;;  %v8255_v18 = vld [vmem:[#allocation6 + $0x4ec] sm:$0xf0] }
  0xf0   :  { %2439 = vmatmul.bf16.vlgmr.msra.gmra.mxu3 %v9144_v51  ;;  %v6350_v19 = vld [vmem:[#allocation6 + $0x6d0] sm:$0xf]  ;;  %v6095_v24 = vor.u32 %v8255_v18, %v6094_v17  ;;  %v5715_v17 = vor.u32 %v8155_v4, %v5712_v7  ;;  %v5584_v4 = vld [vmem:[#allocation6 + $0xf0] sm:$0xf0] }
  0xf1   :  { %2487 = vmatpush.bf16.msrb.mxu3 %v6479_v38  ;;  %2460 = vmatpush.bf16.msrb.mxu1 %v5935_v47  ;;  %v8319_v20 = vld [vmem:[#allocation6 + $0x6ec] sm:$0xf0]  ;;  %v5840_v7 = vld [vmem:[#allocation6 + $0x2f0] sm:$0xf0] }
  0xf2   :  { %2446 = vmatpush.bf16.msrb.mxu0 %v5679_v45  ;;  %v5550_v22 = vld [vmem:[#allocation6 + $0x90] sm:$0xf]  ;;  %v6351_v28 = vor.u32 %v8319_v20, %v6350_v19 }
  0xf3   :  { %2474 = vmatpush.bf16.msrb.mxu2 %v6191_v48  ;;  %v8119_v25 = vld [vmem:[#allocation6 + $0xac] sm:$0xf0] }
  0xf4   :  { %v5806_v26 = vld [vmem:[#allocation6 + $0x290] sm:$0xf]  ;;  %v5551_v34 = vor.u32 %v8119_v25, %v5550_v22  ;;  %v6227_v22 = vor.u32 %v8283_v13, %v6224_v14  ;;  %v5936_v25 = vld [vmem:[#allocation6 + $0x3b0] sm:$0xf0] }
  0xf5   :  { %2488 = vmatpush.bf16.msrb.mxu3 %v6447_v53  ;;  %2461 = vmatpush.bf16.msrb.mxu1 %v5903_v60  ;;  %v6062_v30 = vld [vmem:[#allocation6 + $0x490] sm:$0xf]  ;;  %v5807_v36 = vor.u32 %v8183_v29, %v5806_v26  ;;  %v8275_v26 = vld [vmem:[#allocation6 + $0x594] sm:$0xf] }
  0xf6   :  { %2447 = vmatpush.bf16.msrb.mxu0 %v5647_v59  ;;  %v8247_v31 = vld [vmem:[#allocation6 + $0x4ac] sm:$0xf0] }
  0xf7   :  { %2475 = vmatpush.bf16.msrb.mxu2 %v6159_v61  ;;  %v6318_v32 = vld [vmem:[#allocation6 + $0x690] sm:$0xf]  ;;  %v6063_v37 = vor.u32 %v8247_v31, %v6062_v30 }
  0xf8   :  { %v8311_v33 = vld [vmem:[#allocation6 + $0x6ac] sm:$0xf0] }
  0xf9   :  { %2489 = vmatpush.bf16.msrb.mxu3 %v6415_v1  ;;  %2462 = vmatpush.bf16.msrb.mxu1 %v5871_v10  ;;  %v5518_v38 = vld [vmem:[#allocation6 + $0x50] sm:$0xf]  ;;  %v6319_v42 = vor.u32 %v8311_v33, %v6318_v32  ;;  %v5968_v10 = vld [vmem:[#allocation6 + $0x3f0] sm:$0xf0] }
  0xfa   :  { %2448 = vmatpush.bf16.msrb.mxu0 %v5615_v8  ;;  %v8111_v40 = vld [vmem:[#allocation6 + $0x6c] sm:$0xf0]  ;;  %v2174_v47 = vpop.f32.mrf.mxu0  ;;  %v2188_v60 = vpop.f32.mrf.mxu1  ;;  %v8219_v8 = vld [vmem:[#allocation6 + $0x3d4] sm:$0xf] }
  0xfb   :  { %2476 = vmatpush.bf16.msrb.mxu2 %v6127_v11  ;;  %v5774_v41 = vld [vmem:[#allocation6 + $0x250] sm:$0xf]  ;;  %v2175_v50 = vadd.f32 %v2174_v47, %v523_v35  ;;  %v5519_v52 = vor.u32 %v8111_v40, %v5518_v38  ;;  %v5971_v18 = vor.u32 %v8219_v8, %v5968_v10  ;;  %v5648_v40 = vld [vmem:[#allocation6 + $0x170] sm:$0xf0] }
  0xfc   :  { %v8175_v43 = vld [vmem:[#allocation6 + $0x26c] sm:$0xf0]  ;;  %v8251_v8 = vld [vmem:[#allocation6 + $0x4d4] sm:$0xf] }
  0xfd   :  { %2490 = vmatpush.bf16.msrb.mxu3 %v6383_v15  ;;  %2463 = vmatpush.bf16.msrb.mxu1 %v5839_v23  ;;  %v6030_v44 = vld [vmem:[#allocation6 + $0x450] sm:$0xf]  ;;  %v5775_v55 = vor.u32 %v8175_v43, %v5774_v41  ;;  %v2189_v1 = vadd.f32 %v2188_v60, %v2175_v50  ;;  %v5680_v23 = vld [vmem:[#allocation6 + $0x1b0] sm:$0xf0] }
  0xfe   :  { %2449 = vmatpush.bf16.msrb.mxu0 %v5583_v21  ;;  %v8239_v45 = vld [vmem:[#allocation6 + $0x46c] sm:$0xf0]  ;;  %v8147_v21 = vld [vmem:[#allocation6 + $0x194] sm:$0xf] }
  0xff   :  { %2477 = vmatpush.bf16.msrb.mxu2 %v6095_v24  ;;  %v6286_v48 = vld [vmem:[#allocation6 + $0x650] sm:$0xf]  ;;  %v6031_v56 = vor.u32 %v8239_v45, %v6030_v44  ;;  %v8211_v24 = vld [vmem:[#allocation6 + $0x394] sm:$0xf]  ;;  %v5683_v30 = vor.u32 %v8147_v21, %v5680_v23 }
 0x100   :  { %v8303_v49 = vld [vmem:[#allocation6 + $0x66c] sm:$0xf0]  ;;  %v5939_v31 = vor.u32 %v8211_v24, %v5936_v25  ;;  %v8203_v41 = vld [vmem:[#allocation6 + $0x354] sm:$0xf] }
 0x101   :  { %2491 = vmatpush.bf16.msrb.mxu3 %v6351_v28  ;;  %v5486_v53 = vld [vmem:[#allocation6 + $0x10] sm:$0xf]  ;;  %2464 = vmatpush.bf16.msrb.mxu1 %v5807_v36  ;;  %v6287_v61 = vor.u32 %v8303_v49, %v6286_v48  ;;  %v6192_v28 = vld [vmem:[#allocation6 + $0x5b0] sm:$0xf0] }
 0x102   :  { %2450 = vmatpush.bf16.msrb.mxu0 %v5551_v34  ;;  %v8103_v54 = vld [vmem:[#allocation6 + $0x2c] sm:$0xf0]  ;;  %v2202_v32 = vpop.f32.mrf.mxu2  ;;  %v8139_v36 = vld [vmem:[#allocation6 + $0x154] sm:$0xf]  ;;  %v2216_v47 = vpop.f32.mrf.mxu3 }
 0x103   :  { %2478 = vmatpush.bf16.msrb.mxu2 %v6063_v37  ;;  %v5742_v57 = vld [vmem:[#allocation6 + $0x210] sm:$0xf]  ;;  %v5487_v5 = vor.u32 %v8103_v54, %v5486_v53  ;;  %v6195_v37 = vor.u32 %v8275_v26, %v6192_v28  ;;  %v2203_v38 = vadd.f32 %v2202_v32, %v2189_v1  ;;  %v8267_v43 = vld [vmem:[#allocation6 + $0x554] sm:$0xf]  ;;  %v5651_v48 = vor.u32 %v8139_v36, %v5648_v40 }
 0x104   :  { %v8167_v58 = vld [vmem:[#allocation6 + $0x22c] sm:$0xf0]  ;;  %v6160_v44 = vld [vmem:[#allocation6 + $0x570] sm:$0xf0] }
 0x105   :  { %v5998_v59 = vld [vmem:[#allocation6 + $0x410] sm:$0xf]  ;;  %2492 = vmatpush.bf16.msrb.mxu3 %v6319_v42  ;;  %2465 = vmatpush.bf16.msrb.mxu1 %v5775_v55  ;;  %v5743_v11 = vor.u32 %v8167_v58, %v5742_v57  ;;  %v5904_v42 = vld [vmem:[#allocation6 + $0x370] sm:$0xf0]  ;;  %v9171_v50 = vadd.f32 %v2216_v47, %v2203_v38  ;;  %v6163_v55 = vor.u32 %v8267_v43, %v6160_v44 }
 0x106   :  { %v8231_v62 = vld [vmem:[#allocation6 + $0x42c] sm:$0xf0]  ;;  %2451 = vmatpush.bf16.msrb.mxu0 %v5519_v52  ;;  %v5907_v49 = vor.u32 %v8203_v41, %v5904_v42  ;;  %v8131_v54 = vld [vmem:[#allocation6 + $0x114] sm:$0xf] }
 0x107   :  { %v6254_v63 = vld [vmem:[#allocation6 + $0x610] sm:$0xf]  ;;  %2479 = vmatpush.bf16.msrb.mxu2 %v6031_v56  ;;  %v5999_v12 = vor.u32 %v8231_v62, %v5998_v59  ;;  %v5616_v56 = vld [vmem:[#allocation6 + $0x130] sm:$0xf0] }
 0x108   :  { %v8295_v0 = vld [vmem:[#allocation6 + $0x62c] sm:$0xf0]  ;;  %v8195_v57 = vld [vmem:[#allocation6 + $0x314] sm:$0xf]  ;;  %v5619_v62 = vor.u32 %v8131_v54, %v5616_v56 }
 0x109   :  { %v6734_v2 = vld [vmem:[#allocation6 + $0x9d0] sm:$0xf]  ;;  %2493 = vmatpush.bf16.msrb.mxu3 %v6287_v61  ;;  %v6255_v15 = vor.u32 %v8295_v0, %v6254_v63  ;;  %2466 = vmatpush.bf16.msrb.mxu1 %v5743_v11  ;;  %v5872_v58 = vld [vmem:[#allocation6 + $0x330] sm:$0xf0] }
 0x10a   :  { %v8415_v3 = vld [vmem:[#allocation6 + $0x9ec] sm:$0xf0]  ;;  %2452 = vmatpush.bf16.msrb.mxu0 %v5487_v5  ;;  %v8259_v59 = vld [vmem:[#allocation6 + $0x514] sm:$0xf]  ;;  %v5875_v63 = vor.u32 %v8195_v57, %v5872_v58  ;;  %v5718_v58 = vld [vmem:[#allocation6 + $0x1d8] sm:$0xf] }
 0x10b   :  { %v6735_v16 = vor.u32 %v8415_v3, %v6734_v2  ;;  %v6702_v19 = vld [vmem:[#allocation6 + $0x990] sm:$0xf]  ;;  %2480 = vmatpush.bf16.msrb.mxu2 %v5999_v12  ;;  %v6128_v60 = vld [vmem:[#allocation6 + $0x530] sm:$0xf0] }
 0x10c   :  { %v8407_v20 = vld [vmem:[#allocation6 + $0x9ac] sm:$0xf0]  ;;  %2467 = vmatmul.bf16.vlgmr.msrb.gmra.mxu1 %v9132_v46  ;;  %v8123_v2 = vld [vmem:[#allocation6 + $0xd4] sm:$0xf]  ;;  %v6131_v3 = vor.u32 %v8259_v59, %v6128_v60  ;;  %v8160_v59 = vld [vmem:[#allocation6 + $0x1f4] sm:$0xf0] }
 0x10d   :  { %2494 = vmatpush.bf16.msrb.mxu3 %v6255_v15  ;;  %v6703_v29 = vor.u32 %v8407_v20, %v6702_v19  ;;  %2515 = vmatpush.bf16.msra.mxu1 %v5715_v17  ;;  %v6670_v33 = vld [vmem:[#allocation6 + $0x950] sm:$0xf]  ;;  %v8187_v5 = vld [vmem:[#allocation6 + $0x2d4] sm:$0xf]  ;;  %v5587_v12 = vor.u32 %v8123_v2, %v5584_v4 }
 0x10e   :  { %2501 = vmatpush.bf16.msra.mxu0 %v6735_v16  ;;  %v8399_v34 = vld [vmem:[#allocation6 + $0x96c] sm:$0xf0]  ;;  %2481 = vmatmul.bf16.vlgmr.msrb.gmra.mxu2 %v9136_v6  ;;  %v6096_v10 = vld [vmem:[#allocation6 + $0x4f0] sm:$0xf0]  ;;  %v5843_v13 = vor.u32 %v8187_v5, %v5840_v7 }
 0x10f   :  { %2529 = vmatpush.bf16.msra.mxu2 %v5971_v18  ;;  %2453 = vmatmul.bf16.vlgmr.msrb.gmra.mxu0 %v9130_v39  ;;  %v6671_v45 = vor.u32 %v8399_v34, %v6670_v33  ;;  %v6638_v52 = vld [vmem:[#allocation6 + $0x910] sm:$0xf]  ;;  %v8115_v16 = vld [vmem:[#allocation6 + $0x94] sm:$0xf]  ;;  %v6099_v17 = vor.u32 %v8251_v8, %v6096_v10 }
 0x110   :  { %2495 = vmatmul.bf16.vlgmr.msrb.gmra.mxu3 %v9139_v9  ;;  %v8391_v53 = vld [vmem:[#allocation6 + $0x92c] sm:$0xf0]  ;;  %v5552_v18 = vld [vmem:[#allocation6 + $0xb0] sm:$0xf0] }
 0x111   :  { %2543 = vmatpush.bf16.msra.mxu3 %v6227_v22  ;;  %2516 = vmatpush.bf16.msra.mxu1 %v5683_v30  ;;  %v6639_v61 = vor.u32 %v8391_v53, %v6638_v52  ;;  %v6606_v0 = vld [vmem:[#allocation6 + $0x8d0] sm:$0xf]  ;;  %v8179_v19 = vld [vmem:[#allocation6 + $0x294] sm:$0xf]  ;;  %v5555_v24 = vor.u32 %v8115_v16, %v5552_v18 }
 0x112   :  { %2502 = vmatpush.bf16.msra.mxu0 %v6703_v29  ;;  %v8383_v1 = vld [vmem:[#allocation6 + $0x8ec] sm:$0xf0]  ;;  %v5808_v20 = vld [vmem:[#allocation6 + $0x2b0] sm:$0xf0] }
 0x113   :  { %2530 = vmatpush.bf16.msra.mxu2 %v5939_v31  ;;  %v6607_v11 = vor.u32 %v8383_v1, %v6606_v0  ;;  %v6574_v14 = vld [vmem:[#allocation6 + $0x890] sm:$0xf]  ;;  %v8243_v21 = vld [vmem:[#allocation6 + $0x494] sm:$0xf]  ;;  %v5811_v25 = vor.u32 %v8179_v19, %v5808_v20 }
 0x114   :  { %v8375_v15 = vld [vmem:[#allocation6 + $0x8ac] sm:$0xf0]  ;;  %v6064_v22 = vld [vmem:[#allocation6 + $0x4b0] sm:$0xf0] }
 0x115   :  { %2544 = vmatpush.bf16.msra.mxu3 %v6195_v37  ;;  %2517 = vmatpush.bf16.msra.mxu1 %v5651_v48  ;;  %v6575_v23 = vor.u32 %v8375_v15, %v6574_v14  ;;  %v6542_v26 = vld [vmem:[#allocation6 + $0x850] sm:$0xf]  ;;  %v8107_v29 = vld [vmem:[#allocation6 + $0x54] sm:$0xf]  ;;  %v6067_v30 = vor.u32 %v8243_v21, %v6064_v22  ;;  %v8216_v14 = vld [vmem:[#allocation6 + $0x3b4] sm:$0xf0] }
 0x116   :  { %2503 = vmatpush.bf16.msra.mxu0 %v6671_v45  ;;  %v8367_v28 = vld [vmem:[#allocation6 + $0x86c] sm:$0xf0]  ;;  %v5520_v31 = vld [vmem:[#allocation6 + $0x70] sm:$0xf0] }
 0x117   :  { %2531 = vmatpush.bf16.msra.mxu2 %v5907_v49  ;;  %v8171_v32 = vld [vmem:[#allocation6 + $0x254] sm:$0xf]  ;;  %v6543_v37 = vor.u32 %v8367_v28, %v6542_v26  ;;  %v6510_v38 = vld [vmem:[#allocation6 + $0x810] sm:$0xf]  ;;  %v5523_v41 = vor.u32 %v8107_v29, %v5520_v31  ;;  %v8208_v26 = vld [vmem:[#allocation6 + $0x374] sm:$0xf0] }
 0x118   :  { %v5776_v33 = vld [vmem:[#allocation6 + $0x270] sm:$0xf0]  ;;  %v8359_v40 = vld [vmem:[#allocation6 + $0x82c] sm:$0xf0] }
 0x119   :  { %2545 = vmatpush.bf16.msra.mxu3 %v6163_v55  ;;  %2518 = vmatpush.bf16.msra.mxu1 %v5619_v62  ;;  %v8235_v34 = vld [vmem:[#allocation6 + $0x454] sm:$0xf]  ;;  %v5779_v42 = vor.u32 %v8171_v32, %v5776_v33  ;;  %v6511_v56 = vor.u32 %v8359_v40, %v6510_v38  ;;  %v5974_v62 = vld [vmem:[#allocation6 + $0x3d8] sm:$0xf] }
 0x11a   :  { %2504 = vmatpush.bf16.msra.mxu0 %v6639_v61  ;;  %v6032_v36 = vld [vmem:[#allocation6 + $0x470] sm:$0xf0]  ;;  %v8136_v38 = vld [vmem:[#allocation6 + $0x134] sm:$0xf0] }
 0x11b   :  { %2532 = vmatpush.bf16.msra.mxu2 %v5875_v63  ;;  %v8099_v43 = vld [vmem:[#allocation6 + $0x14] sm:$0xf]  ;;  %v6035_v47 = vor.u32 %v8235_v34, %v6032_v36  ;;  %v8224_v63 = vld [vmem:[#allocation6 + $0x3f4] sm:$0xf0] }
 0x11c   :  { %v5488_v44 = vld [vmem:[#allocation6 + $0x30] sm:$0xf0]  ;;  %v5975_v8 = vor.u32 %v8224_v63, %v5974_v62  ;;  %v5878_v40 = vld [vmem:[#allocation6 + $0x318] sm:$0xf] }
 0x11d   :  { %2546 = vmatpush.bf16.msra.mxu3 %v6131_v3  ;;  %2519 = vmatpush.bf16.msra.mxu1 %v5587_v12  ;;  %v8163_v45 = vld [vmem:[#allocation6 + $0x214] sm:$0xf]  ;;  %v5491_v60 = vor.u32 %v8099_v43, %v5488_v44  ;;  %v5719_v3 = vor.u32 %v8160_v59, %v5718_v58  ;;  %v8152_v12 = vld [vmem:[#allocation6 + $0x1b4] sm:$0xf0] }
 0x11e   :  { %2505 = vmatpush.bf16.msra.mxu0 %v6607_v11  ;;  %v5744_v48 = vld [vmem:[#allocation6 + $0x230] sm:$0xf0]  ;;  %v5686_v11 = vld [vmem:[#allocation6 + $0x198] sm:$0xf] }
 0x11f   :  { %2533 = vmatpush.bf16.msra.mxu2 %v5843_v13  ;;  %v8227_v49 = vld [vmem:[#allocation6 + $0x414] sm:$0xf]  ;;  %v5747_v61 = vor.u32 %v8163_v45, %v5744_v48  ;;  %v5942_v13 = vld [vmem:[#allocation6 + $0x398] sm:$0xf] }
 0x120   :  { %v6000_v52 = vld [vmem:[#allocation6 + $0x430] sm:$0xf0]  ;;  %v5943_v21 = vor.u32 %v8216_v14, %v5942_v13 }
 0x121   :  { %2547 = vmatpush.bf16.msra.mxu3 %v6099_v17  ;;  %2520 = vmatpush.bf16.msra.mxu1 %v5555_v24  ;;  %v8347_v53 = vld [vmem:[#allocation6 + $0x7d4] sm:$0xf]  ;;  %v6003_v0 = vor.u32 %v8227_v49, %v6000_v52  ;;  %v5687_v17 = vor.u32 %v8152_v12, %v5686_v11  ;;  %v8144_v24 = vld [vmem:[#allocation6 + $0x174] sm:$0xf0] }
 0x122   :  { %2506 = vmatpush.bf16.msra.mxu0 %v6575_v23  ;;  %v6480_v54 = vld [vmem:[#allocation6 + $0x7f0] sm:$0xf0]  ;;  %v5654_v23 = vld [vmem:[#allocation6 + $0x158] sm:$0xf] }
 0x123   :  { %2534 = vmatpush.bf16.msra.mxu2 %v5811_v25  ;;  %v8411_v55 = vld [vmem:[#allocation6 + $0x9d4] sm:$0xf]  ;;  %v6483_v1 = vor.u32 %v8347_v53, %v6480_v54  ;;  %v5910_v25 = vld [vmem:[#allocation6 + $0x358] sm:$0xf] }
 0x124   :  { %v6736_v57 = vld [vmem:[#allocation6 + $0x9f0] sm:$0xf0]  ;;  %v5911_v34 = vor.u32 %v8208_v26, %v5910_v25  ;;  %v5590_v53 = vld [vmem:[#allocation6 + $0xd8] sm:$0xf] }
 0x125   :  { %2548 = vmatpush.bf16.msra.mxu3 %v6067_v30  ;;  %2521 = vmatpush.bf16.msra.mxu1 %v5523_v41  ;;  %v6739_v2 = vor.u32 %v8411_v55, %v6736_v57  ;;  %v8339_v4 = vld [vmem:[#allocation6 + $0x794] sm:$0xf]  ;;  %v5655_v30 = vor.u32 %v8144_v24, %v5654_v23  ;;  %v8200_v41 = vld [vmem:[#allocation6 + $0x334] sm:$0xf0] }
 0x126   :  { %2507 = vmatpush.bf16.msra.mxu0 %v6543_v37  ;;  %v6448_v5 = vld [vmem:[#allocation6 + $0x7b0] sm:$0xf0]  ;;  %v5622_v37 = vld [vmem:[#allocation6 + $0x118] sm:$0xf]  ;;  %v5879_v49 = vor.u32 %v8200_v41, %v5878_v40  ;;  %v9177_v41 = vpop.f32.mrf.mxu0 }
 0x127   :  { %2535 = vmatpush.bf16.msra.mxu2 %v5779_v42  ;;  %v8403_v7 = vld [vmem:[#allocation6 + $0x994] sm:$0xf]  ;;  %v6451_v15 = vor.u32 %v8339_v4, %v6448_v5  ;;  %v5623_v44 = vor.u32 %v8136_v38, %v5622_v37  ;;  %v8128_v54 = vld [vmem:[#allocation6 + $0xf4] sm:$0xf0] }
 0x128   :  { %v6704_v10 = vld [vmem:[#allocation6 + $0x9b0] sm:$0xf0]  ;;  %v5846_v55 = vld [vmem:[#allocation6 + $0x2d8] sm:$0xf]  ;;  %v5591_v59 = vor.u32 %v8128_v54, %v5590_v53 }
 0x129   :  { %2549 = vmatpush.bf16.msra.mxu3 %v6035_v47  ;;  %2522 = vmatpush.bf16.msra.mxu1 %v5491_v60  ;;  %v6707_v16 = vor.u32 %v8403_v7, %v6704_v10  ;;  %v8331_v18 = vld [vmem:[#allocation6 + $0x754] sm:$0xf]  ;;  %v8184_v4 = vld [vmem:[#allocation6 + $0x2b4] sm:$0xf0] }
 0x12a   :  { %2508 = vmatpush.bf16.msra.mxu0 %v6511_v56  ;;  %v6416_v19 = vld [vmem:[#allocation6 + $0x770] sm:$0xf0]  ;;  %v8192_v56 = vld [vmem:[#allocation6 + $0x2f4] sm:$0xf0] }
 0x12b   :  { %2536 = vmatpush.bf16.msra.mxu2 %v5747_v61  ;;  %v8395_v20 = vld [vmem:[#allocation6 + $0x954] sm:$0xf]  ;;  %v6419_v28 = vor.u32 %v8331_v18, %v6416_v19  ;;  %v5847_v63 = vor.u32 %v8192_v56, %v5846_v55  ;;  %v8176_v18 = vld [vmem:[#allocation6 + $0x274] sm:$0xf0] }
 0x12c   :  { %v6672_v22 = vld [vmem:[#allocation6 + $0x970] sm:$0xf0]  ;;  %2523 = vmatmul.bf16.vlgmr.msra.gmra.mxu1 %v9130_v39  ;;  %v5494_v26 = vld [vmem:[#allocation6 + $0x18] sm:$0xf] }
 0x12d   :  { %2550 = vmatpush.bf16.msra.mxu3 %v6003_v0  ;;  %2571 = vmatpush.bf16.msrb.mxu1 %v6739_v2  ;;  %v6675_v29 = vor.u32 %v8395_v20, %v6672_v22  ;;  %v8323_v31 = vld [vmem:[#allocation6 + $0x714] sm:$0xf]  ;;  %v8120_v2 = vld [vmem:[#allocation6 + $0xb4] sm:$0xf0] }
 0x12e   :  { %2557 = vmatpush.bf16.msrb.mxu0 %v6483_v1  ;;  %2537 = vmatmul.bf16.vlgmr.msra.gmra.mxu2 %v9132_v46  ;;  %v6384_v32 = vld [vmem:[#allocation6 + $0x730] sm:$0xf0]  ;;  %v5558_v1 = vld [vmem:[#allocation6 + $0x98] sm:$0xf] }
 0x12f   :  { %2585 = vmatpush.bf16.msrb.mxu2 %v5719_v3  ;;  %2509 = vmatmul.bf16.vlgmr.msra.gmra.mxu0 %v9144_v51  ;;  %v8387_v33 = vld [vmem:[#allocation6 + $0x914] sm:$0xf]  ;;  %v6387_v42 = vor.u32 %v8323_v31, %v6384_v32  ;;  %v5814_v3 = vld [vmem:[#allocation6 + $0x298] sm:$0xf] }
 0x130   :  { %2551 = vmatmul.bf16.vlgmr.msra.gmra.mxu3 %v9136_v6  ;;  %v6640_v36 = vld [vmem:[#allocation6 + $0x930] sm:$0xf0]  ;;  %v5815_v13 = vor.u32 %v8184_v4, %v5814_v3  ;;  %v8168_v31 = vld [vmem:[#allocation6 + $0x234] sm:$0xf0] }
 0x131   :  { %2599 = vmatpush.bf16.msrb.mxu3 %v5975_v8  ;;  %2572 = vmatpush.bf16.msrb.mxu1 %v6707_v16  ;;  %v6643_v43 = vor.u32 %v8387_v33, %v6640_v36  ;;  %v8315_v45 = vld [vmem:[#allocation6 + $0x6d4] sm:$0xf]  ;;  %v5559_v8 = vor.u32 %v8120_v2, %v5558_v1  ;;  %v8112_v16 = vld [vmem:[#allocation6 + $0x74] sm:$0xf0] }
 0x132   :  { %2558 = vmatpush.bf16.msrb.mxu0 %v6451_v15  ;;  %v6352_v47 = vld [vmem:[#allocation6 + $0x6f0] sm:$0xf0]  ;;  %v5526_v15 = vld [vmem:[#allocation6 + $0x58] sm:$0xf] }
 0x133   :  { %2586 = vmatpush.bf16.msrb.mxu2 %v5687_v17  ;;  %v8379_v48 = vld [vmem:[#allocation6 + $0x8d4] sm:$0xf]  ;;  %v6355_v57 = vor.u32 %v8315_v45, %v6352_v47  ;;  %v5782_v17 = vld [vmem:[#allocation6 + $0x258] sm:$0xf]  ;;  %v5527_v23 = vor.u32 %v8112_v16, %v5526_v15  ;;  %v5720_v45 = vld [vmem:[#allocation6 + $0x1f8] sm:$0xf0]  ;;  %v9187_v15 = vpop.f32.mrf.mxu0  ;;  %v9189_v16 = vpop.f32.mrf.mxu3 }
 0x134   :  { %v6608_v52 = vld [vmem:[#allocation6 + $0x8f0] sm:$0xf0]  ;;  %v6230_v32 = vld [vmem:[#allocation6 + $0x5d8] sm:$0xf] }
 0x135   :  { %2600 = vmatpush.bf16.msrb.mxu3 %v5943_v21  ;;  %2573 = vmatpush.bf16.msrb.mxu1 %v6675_v29  ;;  %v6611_v58 = vor.u32 %v8379_v48, %v6608_v52  ;;  %v8307_v60 = vld [vmem:[#allocation6 + $0x694] sm:$0xf]  ;;  %v8104_v29 = vld [vmem:[#allocation6 + $0x34] sm:$0xf0] }
 0x136   :  { %2559 = vmatpush.bf16.msrb.mxu0 %v6419_v28  ;;  %v6320_v61 = vld [vmem:[#allocation6 + $0x6b0] sm:$0xf0]  ;;  %v5783_v28 = vor.u32 %v8176_v18, %v5782_v17  ;;  %v8288_v33 = vld [vmem:[#allocation6 + $0x5f4] sm:$0xf0] }
 0x137   :  { %2587 = vmatpush.bf16.msrb.mxu2 %v5655_v30  ;;  %v8371_v62 = vld [vmem:[#allocation6 + $0x894] sm:$0xf]  ;;  %v6323_v5 = vor.u32 %v8307_v60, %v6320_v61  ;;  %v5750_v30 = vld [vmem:[#allocation6 + $0x218] sm:$0xf]  ;;  %v6231_v48 = vor.u32 %v8288_v33, %v6230_v32  ;;  %v9179_v60 = vpop.f32.mrf.mxu1  ;;  %v8148_v61 = vld [vmem:[#allocation6 + $0x19c] sm:$0xf] }
 0x138   :  { %v6576_v0 = vld [vmem:[#allocation6 + $0x8b0] sm:$0xf0]  ;;  %v8352_v37 = vld [vmem:[#allocation6 + $0x7f4] sm:$0xf0]  ;;  %v5751_v47 = vor.u32 %v8168_v31, %v5750_v30 }
 0x139   :  { %2601 = vmatpush.bf16.msrb.mxu3 %v5911_v34  ;;  %2574 = vmatpush.bf16.msrb.mxu1 %v6643_v43  ;;  %v6579_v7 = vor.u32 %v8371_v62, %v6576_v0  ;;  %v8299_v10 = vld [vmem:[#allocation6 + $0x654] sm:$0xf]  ;;  %v6486_v34 = vld [vmem:[#allocation6 + $0x7d8] sm:$0xf]  ;;  %v5495_v43 = vor.u32 %v8104_v29, %v5494_v26  ;;  %v5688_v62 = vld [vmem:[#allocation6 + $0x1b8] sm:$0xf0]  ;;  %v9181_v0 = vpop.f32.mrf.mxu2 }
 0x13a   :  { %2560 = vmatpush.bf16.msrb.mxu0 %v6387_v42  ;;  %v6288_v11 = vld [vmem:[#allocation6 + $0x670] sm:$0xf0]  ;;  %v6742_v38 = vld [vmem:[#allocation6 + $0x9d8] sm:$0xf]  ;;  %v5624_v29 = vld [vmem:[#allocation6 + $0x138] sm:$0xf0] }
 0x13b   :  { %2588 = vmatpush.bf16.msrb.mxu2 %v5623_v44  ;;  %v8363_v12 = vld [vmem:[#allocation6 + $0x854] sm:$0xf]  ;;  %v6291_v19 = vor.u32 %v8299_v10, %v6288_v11  ;;  %v8416_v40 = vld [vmem:[#allocation6 + $0x9f4] sm:$0xf0]  ;;  %v8156_v44 = vld [vmem:[#allocation6 + $0x1dc] sm:$0xf] }
 0x13c   :  { %v6544_v14 = vld [vmem:[#allocation6 + $0x870] sm:$0xf0]  ;;  %v6743_v52 = vor.u32 %v8416_v40, %v6742_v38  ;;  %v6198_v53 = vld [vmem:[#allocation6 + $0x598] sm:$0xf]  ;;  %v5723_v56 = vor.u32 %v8156_v44, %v5720_v45  ;;  %v8124_v44 = vld [vmem:[#allocation6 + $0xdc] sm:$0xf] }
 0x13d   :  { %2602 = vmatpush.bf16.msrb.mxu3 %v5879_v49  ;;  %2575 = vmatpush.bf16.msrb.mxu1 %v6611_v58  ;;  %v8291_v20 = vld [vmem:[#allocation6 + $0x614] sm:$0xf]  ;;  %v6547_v22 = vor.u32 %v8363_v12, %v6544_v14  ;;  %v6487_v49 = vor.u32 %v8352_v37, %v6486_v34  ;;  %v8280_v54 = vld [vmem:[#allocation6 + $0x5b4] sm:$0xf0]  ;;  %v8140_v12 = vld [vmem:[#allocation6 + $0x15c] sm:$0xf] }
 0x13e   :  { %2561 = vmatpush.bf16.msrb.mxu0 %v6355_v57  ;;  %v6256_v21 = vld [vmem:[#allocation6 + $0x630] sm:$0xf0]  ;;  %v6454_v55 = vld [vmem:[#allocation6 + $0x798] sm:$0xf]  ;;  %v5592_v45 = vld [vmem:[#allocation6 + $0xf8] sm:$0xf0] }
 0x13f   :  { %2589 = vmatpush.bf16.msrb.mxu2 %v5591_v59  ;;  %v8355_v24 = vld [vmem:[#allocation6 + $0x814] sm:$0xf]  ;;  %v6259_v36 = vor.u32 %v8291_v20, %v6256_v21  ;;  %v8344_v57 = vld [vmem:[#allocation6 + $0x7b4] sm:$0xf0]  ;;  %v9191_v26 = vpop.f32.mrf.mxu1 }
 0x140   :  { %v6512_v25 = vld [vmem:[#allocation6 + $0x830] sm:$0xf0]  ;;  %v6710_v58 = vld [vmem:[#allocation6 + $0x998] sm:$0xf]  ;;  %v6455_v1 = vor.u32 %v8344_v57, %v6454_v55 }
 0x141   :  { %2603 = vmatpush.bf16.msrb.mxu3 %v5847_v63  ;;  %2576 = vmatpush.bf16.msrb.mxu1 %v6579_v7  ;;  %v6515_v42 = vor.u32 %v8355_v24, %v6512_v25  ;;  %v8408_v59 = vld [vmem:[#allocation6 + $0x9b4] sm:$0xf0]  ;;  %v6199_v63 = vor.u32 %v8280_v54, %v6198_v53  ;;  %v5691_v7 = vor.u32 %v8148_v61, %v5688_v62  ;;  %v9193_v31 = vpop.f32.mrf.mxu2  ;;  %v9197_v61 = vpop.f32.mrf.mxu0  ;;  %v8116_v62 = vld [vmem:[#allocation6 + $0x9c] sm:$0xf] }
 0x142   :  { %2562 = vmatpush.bf16.msrb.mxu0 %v6323_v5  ;;  %v6711_v2 = vor.u32 %v8408_v59, %v6710_v58  ;;  %v6166_v3 = vld [vmem:[#allocation6 + $0x558] sm:$0xf] }
 0x143   :  { %2590 = vmatpush.bf16.msrb.mxu2 %v5559_v8  ;;  %v8272_v4 = vld [vmem:[#allocation6 + $0x574] sm:$0xf0] }
 0x144   :  { %v6422_v5 = vld [vmem:[#allocation6 + $0x758] sm:$0xf]  ;;  %v6167_v14 = vor.u32 %v8272_v4, %v6166_v3 }
 0x145   :  { %2604 = vmatpush.bf16.msrb.mxu3 %v5815_v13  ;;  %2577 = vmatpush.bf16.msrb.mxu1 %v6547_v22  ;;  %v8336_v8 = vld [vmem:[#allocation6 + $0x774] sm:$0xf0]  ;;  %v5656_v13 = vld [vmem:[#allocation6 + $0x178] sm:$0xf0] }
 0x146   :  { %2563 = vmatpush.bf16.msrb.mxu0 %v6291_v19  ;;  %v6678_v10 = vld [vmem:[#allocation6 + $0x958] sm:$0xf]  ;;  %v6423_v17 = vor.u32 %v8336_v8, %v6422_v5  ;;  %v5659_v22 = vor.u32 %v8140_v12, %v5656_v13 }
 0x147   :  { %2591 = vmatpush.bf16.msrb.mxu2 %v5527_v23  ;;  %v8400_v11 = vld [vmem:[#allocation6 + $0x974] sm:$0xf0] }
 0x148   :  { %v6679_v18 = vor.u32 %v8400_v11, %v6678_v10  ;;  %v6134_v19 = vld [vmem:[#allocation6 + $0x518] sm:$0xf] }
 0x149   :  { %2605 = vmatpush.bf16.msrb.mxu3 %v5783_v28  ;;  %2578 = vmatpush.bf16.msrb.mxu1 %v6515_v42  ;;  %v8264_v20 = vld [vmem:[#allocation6 + $0x534] sm:$0xf0]  ;;  %v8132_v28 = vld [vmem:[#allocation6 + $0x11c] sm:$0xf] }
 0x14a   :  { %2564 = vmatpush.bf16.msrb.mxu0 %v6259_v36  ;;  %v6390_v21 = vld [vmem:[#allocation6 + $0x718] sm:$0xf]  ;;  %v6135_v30 = vor.u32 %v8264_v20, %v6134_v19  ;;  %v5627_v38 = vor.u32 %v8132_v28, %v5624_v29 }
 0x14b   :  { %2592 = vmatpush.bf16.msrb.mxu2 %v5495_v43  ;;  %v8328_v23 = vld [vmem:[#allocation6 + $0x734] sm:$0xf0] }
 0x14c   :  { %2579 = vmatmul.bf16.vlgmr.msrb.gmra.mxu1 %v9144_v51  ;;  %v6646_v24 = vld [vmem:[#allocation6 + $0x918] sm:$0xf]  ;;  %v6391_v32 = vor.u32 %v8328_v23, %v6390_v21 }
 0x14d   :  { %2606 = vmatpush.bf16.msrb.mxu3 %v5751_v47  ;;  %2627 = vmatpush.bf16.msra.mxu1 %v6487_v49  ;;  %v8392_v25 = vld [vmem:[#allocation6 + $0x934] sm:$0xf0] }
 0x14e   :  { %2613 = vmatpush.bf16.msra.mxu0 %v6231_v48  ;;  %2593 = vmatmul.bf16.vlgmr.msrb.gmra.mxu2 %v9130_v39  ;;  %v6647_v33 = vor.u32 %v8392_v25, %v6646_v24  ;;  %v6102_v34 = vld [vmem:[#allocation6 + $0x4d8] sm:$0xf]  ;;  %v9195_v48 = vpop.f32.mrf.mxu3 }
 0x14f   :  { %2641 = vmatpush.bf16.msra.mxu2 %v6743_v52  ;;  %2565 = vmatmul.bf16.vlgmr.msrb.gmra.mxu0 %v9139_v9  ;;  %v8256_v36 = vld [vmem:[#allocation6 + $0x4f4] sm:$0xf0] }
 0x150   :  { %2607 = vmatmul.bf16.vlgmr.msrb.gmra.mxu3 %v9132_v46  ;;  %v6358_v37 = vld [vmem:[#allocation6 + $0x6d8] sm:$0xf]  ;;  %v6103_v47 = vor.u32 %v8256_v36, %v6102_v34  ;;  %v9203_v34 = vpop.f32.mrf.mxu0 }
 0x151   :  { %2655 = vmatpush.bf16.msra.mxu3 %v5723_v56  ;;  %2628 = vmatpush.bf16.msra.mxu1 %v6455_v1  ;;  %v8320_v40 = vld [vmem:[#allocation6 + $0x6f4] sm:$0xf0]  ;;  %v5595_v56 = vor.u32 %v8124_v44, %v5592_v45  ;;  %v8348_v44 = vld [vmem:[#allocation6 + $0x7dc] sm:$0xf] }
 0x152   :  { %2614 = vmatpush.bf16.msra.mxu0 %v6199_v63  ;;  %v6614_v42 = vld [vmem:[#allocation6 + $0x8d8] sm:$0xf]  ;;  %v6359_v49 = vor.u32 %v8320_v40, %v6358_v37  ;;  %v5560_v63 = vld [vmem:[#allocation6 + $0xb8] sm:$0xf0] }
 0x153   :  { %2642 = vmatpush.bf16.msra.mxu2 %v6711_v2  ;;  %v8384_v43 = vld [vmem:[#allocation6 + $0x8f4] sm:$0xf0]  ;;  %v9199_v2 = vpop.f32.mrf.mxu1  ;;  %v5563_v10 = vor.u32 %v8116_v62, %v5560_v63  ;;  %v8220_v37 = vld [vmem:[#allocation6 + $0x3dc] sm:$0xf] }
 0x154   :  { %v6615_v52 = vor.u32 %v8384_v43, %v6614_v42  ;;  %v6070_v53 = vld [vmem:[#allocation6 + $0x498] sm:$0xf]  ;;  %v8284_v40 = vld [vmem:[#allocation6 + $0x5dc] sm:$0xf] }
 0x155   :  { %2656 = vmatpush.bf16.msra.mxu3 %v5691_v7  ;;  %2629 = vmatpush.bf16.msra.mxu1 %v6423_v17  ;;  %v8248_v54 = vld [vmem:[#allocation6 + $0x4b4] sm:$0xf0]  ;;  %v8108_v17 = vld [vmem:[#allocation6 + $0x5c] sm:$0xf] }
 0x156   :  { %2615 = vmatpush.bf16.msra.mxu0 %v6167_v14  ;;  %v6326_v55 = vld [vmem:[#allocation6 + $0x698] sm:$0xf]  ;;  %v6071_v1 = vor.u32 %v8248_v54, %v6070_v53  ;;  %v9201_v14 = vpop.f32.mrf.mxu2  ;;  %v9205_v36 = vpop.f32.mrf.mxu3  ;;  %v6232_v43 = vld [vmem:[#allocation6 + $0x5f8] sm:$0xf0] }
 0x157   :  { %2643 = vmatpush.bf16.msra.mxu2 %v6679_v18  ;;  %v8312_v57 = vld [vmem:[#allocation6 + $0x6b4] sm:$0xf0]  ;;  %v5528_v18 = vld [vmem:[#allocation6 + $0x78] sm:$0xf0] }
 0x158   :  { %v6582_v58 = vld [vmem:[#allocation6 + $0x898] sm:$0xf]  ;;  %v6327_v3 = vor.u32 %v8312_v57, %v6326_v55  ;;  %v5531_v29 = vor.u32 %v8108_v17, %v5528_v18  ;;  %v6488_v45 = vld [vmem:[#allocation6 + $0x7f8] sm:$0xf0] }
 0x159   :  { %2657 = vmatpush.bf16.msra.mxu3 %v5659_v22  ;;  %2630 = vmatpush.bf16.msra.mxu1 %v6391_v32  ;;  %v8376_v59 = vld [vmem:[#allocation6 + $0x8b4] sm:$0xf0]  ;;  %v8100_v32 = vld [vmem:[#allocation6 + $0x1c] sm:$0xf] }
 0x15a   :  { %2616 = vmatpush.bf16.msra.mxu0 %v6135_v30  ;;  %v6583_v4 = vor.u32 %v8376_v59, %v6582_v58  ;;  %v6038_v5 = vld [vmem:[#allocation6 + $0x458] sm:$0xf]  ;;  %v6744_v53 = vld [vmem:[#allocation6 + $0x9f8] sm:$0xf0]  ;;  %v6235_v58 = vor.u32 %v8284_v40, %v6232_v43  ;;  %v6491_v59 = vor.u32 %v8348_v44, %v6488_v45 }
 0x15b   :  { %2644 = vmatpush.bf16.msra.mxu2 %v6647_v33  ;;  %v8240_v7 = vld [vmem:[#allocation6 + $0x474] sm:$0xf0]  ;;  %v5496_v33 = vld [vmem:[#allocation6 + $0x38] sm:$0xf0] }
 0x15c   :  { %v6294_v8 = vld [vmem:[#allocation6 + $0x658] sm:$0xf]  ;;  %v6039_v19 = vor.u32 %v8240_v7, %v6038_v5  ;;  %v5499_v54 = vor.u32 %v8100_v32, %v5496_v33  ;;  %v8212_v62 = vld [vmem:[#allocation6 + $0x39c] sm:$0xf] }
 0x15d   :  { %2658 = vmatpush.bf16.msra.mxu3 %v5627_v38  ;;  %2631 = vmatpush.bf16.msra.mxu1 %v6359_v49  ;;  %v8304_v11 = vld [vmem:[#allocation6 + $0x674] sm:$0xf0]  ;;  %v5976_v38 = vld [vmem:[#allocation6 + $0x3f8] sm:$0xf0] }
 0x15e   :  { %2617 = vmatpush.bf16.msra.mxu0 %v6103_v47  ;;  %v6550_v12 = vld [vmem:[#allocation6 + $0x858] sm:$0xf]  ;;  %v6295_v22 = vor.u32 %v8304_v11, %v6294_v8  ;;  %v5979_v55 = vor.u32 %v8220_v37, %v5976_v38  ;;  %v9209_v57 = vpop.f32.mrf.mxu2  ;;  %v5944_v63 = vld [vmem:[#allocation6 + $0x3b8] sm:$0xf0] }
 0x15f   :  { %2645 = vmatpush.bf16.msra.mxu2 %v6615_v52  ;;  %v8368_v13 = vld [vmem:[#allocation6 + $0x874] sm:$0xf0]  ;;  %v8412_v52 = vld [vmem:[#allocation6 + $0x9dc] sm:$0xf]  ;;  %v5947_v11 = vor.u32 %v8212_v62, %v5944_v63 }
 0x160   :  { %v6006_v20 = vld [vmem:[#allocation6 + $0x418] sm:$0xf]  ;;  %v6551_v23 = vor.u32 %v8368_v13, %v6550_v12  ;;  %v8340_v5 = vld [vmem:[#allocation6 + $0x79c] sm:$0xf]  ;;  %v9211_v12 = vpop.f32.mrf.mxu3 }
 0x161   :  { %2659 = vmatpush.bf16.msra.mxu3 %v5595_v56  ;;  %v8232_v21 = vld [vmem:[#allocation6 + $0x434] sm:$0xf0]  ;;  %2632 = vmatpush.bf16.msra.mxu1 %v6327_v3  ;;  %v9207_v56 = vpop.f32.mrf.mxu1  ;;  %v6747_v3 = vor.u32 %v8412_v52, %v6744_v53  ;;  %v6456_v7 = vld [vmem:[#allocation6 + $0x7b8] sm:$0xf0] }
 0x162   :  { %2618 = vmatpush.bf16.msra.mxu0 %v6071_v1  ;;  %v6262_v24 = vld [vmem:[#allocation6 + $0x618] sm:$0xf]  ;;  %v6007_v42 = vor.u32 %v8232_v21, %v6006_v20  ;;  %v8276_v1 = vld [vmem:[#allocation6 + $0x59c] sm:$0xf]  ;;  %v6459_v17 = vor.u32 %v8340_v5, %v6456_v7 }
 0x163   :  { %2646 = vmatpush.bf16.msra.mxu2 %v6583_v4  ;;  %v8296_v25 = vld [vmem:[#allocation6 + $0x634] sm:$0xf0]  ;;  %v6200_v4 = vld [vmem:[#allocation6 + $0x5b8] sm:$0xf0] }
 0x164   :  { %v6518_v28 = vld [vmem:[#allocation6 + $0x818] sm:$0xf]  ;;  %v6263_v47 = vor.u32 %v8296_v25, %v6262_v24  ;;  %v8404_v8 = vld [vmem:[#allocation6 + $0x99c] sm:$0xf]  ;;  %v6203_v13 = vor.u32 %v8276_v1, %v6200_v4  ;;  %v9214_v25 = vpop.f32.mrf.mxu0 }
 0x165   :  { %2660 = vmatpush.bf16.msra.mxu3 %v5563_v10  ;;  %v8360_v30 = vld [vmem:[#allocation6 + $0x834] sm:$0xf0]  ;;  %2633 = vmatpush.bf16.msra.mxu1 %v6295_v22  ;;  %v6712_v10 = vld [vmem:[#allocation6 + $0x9b8] sm:$0xf0] }
 0x166   :  { %2619 = vmatpush.bf16.msra.mxu0 %v6039_v19  ;;  %v6519_v49 = vor.u32 %v8360_v30, %v6518_v28  ;;  %v8204_v18 = vld [vmem:[#allocation6 + $0x35c] sm:$0xf]  ;;  %v6715_v21 = vor.u32 %v8404_v8, %v6712_v10 }
 0x167   :  { %2647 = vmatpush.bf16.msra.mxu2 %v6551_v23  ;;  %v5912_v19 = vld [vmem:[#allocation6 + $0x378] sm:$0xf0] }
 0x168   :  { %v8268_v20 = vld [vmem:[#allocation6 + $0x55c] sm:$0xf]  ;;  %v5915_v30 = vor.u32 %v8204_v18, %v5912_v19  ;;  %v9225_v7 = vpop.f32.mrf.mxu3 }
 0x169   :  { %2661 = vmatpush.bf16.msra.mxu3 %v5531_v29  ;;  %2634 = vmatpush.bf16.msra.mxu1 %v6263_v47  ;;  %v6168_v22 = vld [vmem:[#allocation6 + $0x578] sm:$0xf0]  ;;  %v9219_v47 = vpop.f32.mrf.mxu1 }
 0x16a   :  { %2620 = vmatpush.bf16.msra.mxu0 %v6007_v42  ;;  %v8332_v23 = vld [vmem:[#allocation6 + $0x75c] sm:$0xf]  ;;  %v6171_v32 = vor.u32 %v8268_v20, %v6168_v22 }
 0x16b   :  { %2648 = vmatpush.bf16.msra.mxu2 %v6519_v49  ;;  %v6424_v24 = vld [vmem:[#allocation6 + $0x778] sm:$0xf0]  ;;  %v9221_v49 = vpop.f32.mrf.mxu2 }
 0x16c   :  { %2635 = vmatmul.bf16.vlgmr.msra.gmra.mxu1 %v9139_v9  ;;  %v8396_v28 = vld [vmem:[#allocation6 + $0x95c] sm:$0xf]  ;;  %v6427_v33 = vor.u32 %v8332_v23, %v6424_v24  ;;  %v9223_v5 = vpop.f32.mrf.mxu0 }
 0x16d   :  { %2662 = vmatpush.bf16.msra.mxu3 %v5499_v54  ;;  %2683 = vmatpush.bf16.msrb.mxu1 %v6235_v58  ;;  %v6680_v29 = vld [vmem:[#allocation6 + $0x978] sm:$0xf0] }
 0x16e   :  { %2669 = vmatpush.bf16.msrb.mxu0 %v5979_v55  ;;  %2649 = vmatmul.bf16.vlgmr.msra.gmra.mxu2 %v9144_v51  ;;  %v8196_v37 = vld [vmem:[#allocation6 + $0x31c] sm:$0xf]  ;;  %v6683_v42 = vor.u32 %v8396_v28, %v6680_v29 }
 0x16f   :  { %2697 = vmatpush.bf16.msrb.mxu2 %v6491_v59  ;;  %2621 = vmatmul.bf16.vlgmr.msra.gmra.mxu0 %v9136_v6  ;;  %v5880_v38 = vld [vmem:[#allocation6 + $0x338] sm:$0xf0] }
 0x170   :  { %2663 = vmatmul.bf16.vlgmr.msra.gmra.mxu3 %v9130_v39  ;;  %v8260_v40 = vld [vmem:[#allocation6 + $0x51c] sm:$0xf]  ;;  %v5883_v39 = vor.u32 %v8196_v37, %v5880_v38 }
 0x171   :  { %2711 = vmatpush.bf16.msrb.mxu3 %v6747_v3  ;;  %2684 = vmatpush.bf16.msrb.mxu1 %v6203_v13  ;;  %v6136_v43 = vld [vmem:[#allocation6 + $0x538] sm:$0xf0]  ;;  %v9227_v28 = vpop.f32.mrf.mxu1 }
 0x172   :  { %2670 = vmatpush.bf16.msrb.mxu0 %v5947_v11  ;;  %v8324_v44 = vld [vmem:[#allocation6 + $0x71c] sm:$0xf]  ;;  %v6139_v54 = vor.u32 %v8260_v40, %v6136_v43 }
 0x173   :  { %2698 = vmatpush.bf16.msrb.mxu2 %v6459_v17  ;;  %v6392_v45 = vld [vmem:[#allocation6 + $0x738] sm:$0xf0] }
 0x174   :  { %v8388_v52 = vld [vmem:[#allocation6 + $0x91c] sm:$0xf]  ;;  %v6395_v55 = vor.u32 %v8324_v44, %v6392_v45 }
 0x175   :  { %2712 = vmatpush.bf16.msrb.mxu3 %v6715_v21  ;;  %v6648_v53 = vld [vmem:[#allocation6 + $0x938] sm:$0xf0]  ;;  %2685 = vmatpush.bf16.msrb.mxu1 %v6171_v32 }
 0x176   :  { %2671 = vmatpush.bf16.msrb.mxu0 %v5915_v30  ;;  %v8188_v58 = vld [vmem:[#allocation6 + $0x2dc] sm:$0xf]  ;;  %v6651_v63 = vor.u32 %v8388_v52, %v6648_v53 }
 0x177   :  { %2699 = vmatpush.bf16.msrb.mxu2 %v6427_v33  ;;  %v5848_v59 = vld [vmem:[#allocation6 + $0x2f8] sm:$0xf0]  ;;  %v9229_v33 = vpop.f32.mrf.mxu2 }
 0x178   :  { %v8252_v62 = vld [vmem:[#allocation6 + $0x4dc] sm:$0xf]  ;;  %v5851_v11 = vor.u32 %v8188_v58, %v5848_v59 }
 0x179   :  { %2713 = vmatpush.bf16.msrb.mxu3 %v6683_v42  ;;  %v6104_v1 = vld [vmem:[#allocation6 + $0x4f8] sm:$0xf0]  ;;  %2686 = vmatpush.bf16.msrb.mxu1 %v6139_v54 }
 0x17a   :  { %v8316_v3 = vld [vmem:[#allocation6 + $0x6dc] sm:$0xf]  ;;  %2672 = vmatpush.bf16.msrb.mxu0 %v5883_v39  ;;  %v6107_v13 = vor.u32 %v8252_v62, %v6104_v1  ;;  %v9231_v39 = vpop.f32.mrf.mxu3 }
 0x17b   :  { %v6360_v4 = vld [vmem:[#allocation6 + $0x6f8] sm:$0xf0]  ;;  %2700 = vmatpush.bf16.msrb.mxu2 %v6395_v55 }
 0x17c   :  { %v8380_v8 = vld [vmem:[#allocation6 + $0x8dc] sm:$0xf]  ;;  %v6363_v17 = vor.u32 %v8316_v3, %v6360_v4 }
 0x17d   :  { %v6616_v10 = vld [vmem:[#allocation6 + $0x8f8] sm:$0xf0]  ;;  %2714 = vmatpush.bf16.msrb.mxu3 %v6651_v63  ;;  %2687 = vmatpush.bf16.msrb.mxu1 %v6107_v13  ;;  %v9233_v63 = vpop.f32.mrf.mxu0 }
 0x17e   :  { %v8180_v18 = vld [vmem:[#allocation6 + $0x29c] sm:$0xf]  ;;  %v6619_v21 = vor.u32 %v8380_v8, %v6616_v10  ;;  %2673 = vmatpush.bf16.msrb.mxu0 %v5851_v11 }
 0x17f   :  { %v5816_v19 = vld [vmem:[#allocation6 + $0x2b8] sm:$0xf0]  ;;  %2701 = vmatpush.bf16.msrb.mxu2 %v6363_v17 }
 0x180   :  { %v8244_v20 = vld [vmem:[#allocation6 + $0x49c] sm:$0xf]  ;;  %v5819_v32 = vor.u32 %v8180_v18, %v5816_v19  ;;  %v6862_v19 = vld [vmem:[#allocation9 + $0xe0] sm:$0xf] }
 0x181   :  { %v6072_v22 = vld [vmem:[#allocation6 + $0x4b8] sm:$0xf0]  ;;  %2715 = vmatpush.bf16.msrb.mxu3 %v6619_v21  ;;  %v6990_v21 = vld [vmem:[#allocation9 + $0x1e0] sm:$0xf] }
 0x182   :  { %v8308_v23 = vld [vmem:[#allocation6 + $0x69c] sm:$0xf]  ;;  %v6075_v37 = vor.u32 %v8244_v20, %v6072_v22  ;;  %2674 = vmatpush.bf16.msrb.mxu0 %v5819_v32  ;;  %v8447_v20 = vld [vmem:[#allocation9 + $0xec] sm:$0xf0] }
 0x183   :  { %v6328_v24 = vld [vmem:[#allocation6 + $0x6b8] sm:$0xf0] }
 0x184   :  { %v8372_v29 = vld [vmem:[#allocation6 + $0x89c] sm:$0xf]  ;;  %v6331_v38 = vor.u32 %v8308_v23, %v6328_v24  ;;  %2688 = vmatpush.bf16.msrb.mxu1 %v6075_v37  ;;  %v8479_v23 = vld [vmem:[#allocation9 + $0x1ec] sm:$0xf0]  ;;  %v7118_v24 = vld [vmem:[#allocation9 + $0x2e0] sm:$0xf] }
 0x185   :  { %v6584_v30 = vld [vmem:[#allocation6 + $0x8b8] sm:$0xf0] }
 0x186   :  { %v8172_v40 = vld [vmem:[#allocation6 + $0x25c] sm:$0xf]  ;;  %v6587_v44 = vor.u32 %v8372_v29, %v6584_v30  ;;  %2702 = vmatpush.bf16.msrb.mxu2 %v6331_v38  ;;  %v8511_v29 = vld [vmem:[#allocation9 + $0x2ec] sm:$0xf0]  ;;  %v9235_v30 = vpop.f32.mrf.mxu1  ;;  %v7246_v38 = vld [vmem:[#allocation9 + $0x3e0] sm:$0xf] }
 0x187   :  { %v5784_v42 = vld [vmem:[#allocation6 + $0x278] sm:$0xf0] }
 0x188   :  { %v8236_v43 = vld [vmem:[#allocation6 + $0x45c] sm:$0xf]  ;;  %v5787_v58 = vor.u32 %v8172_v40, %v5784_v42  ;;  %2716 = vmatpush.bf16.msrb.mxu3 %v6587_v44  ;;  %v8543_v40 = vld [vmem:[#allocation9 + $0x3ec] sm:$0xf0]  ;;  %v9237_v44 = vpop.f32.mrf.mxu2 }
 0x189   :  { %v6040_v45 = vld [vmem:[#allocation6 + $0x478] sm:$0xf0] }
 0x18a   :  { %v8300_v52 = vld [vmem:[#allocation6 + $0x65c] sm:$0xf]  ;;  %v6043_v1 = vor.u32 %v8236_v43, %v6040_v45  ;;  %2675 = vmatpush.bf16.msrb.mxu0 %v5787_v58  ;;  %v6863_v43 = vor.u32 %v8447_v20, %v6862_v19  ;;  %v6991_v45 = vor.u32 %v8479_v23, %v6990_v21  ;;  %v7247_v58 = vor.u32 %v8543_v40, %v7246_v38  ;;  %v8439_v20 = vld [vmem:[#allocation9 + $0xac] sm:$0xf0]  ;;  %v6958_v21 = vld [vmem:[#allocation9 + $0x1a0] sm:$0xf] }
 0x18b   :  { %v6296_v53 = vld [vmem:[#allocation6 + $0x678] sm:$0xf0]  ;;  %v8471_v23 = vld [vmem:[#allocation9 + $0x1ac] sm:$0xf0] }
 0x18c   :  { %v8364_v54 = vld [vmem:[#allocation6 + $0x85c] sm:$0xf]  ;;  %v6299_v3 = vor.u32 %v8300_v52, %v6296_v53  ;;  %2689 = vmatpush.bf16.msrb.mxu1 %v6043_v1  ;;  %v7119_v52 = vor.u32 %v8511_v29, %v7118_v24  ;;  %v6846_v53 = vld [vmem:[#allocation9 + $0xc0] sm:$0xf]  ;;  %v8507_v1 = vld [vmem:[#allocation9 + $0x2cc] sm:$0xf0] }
 0x18d   :  { %v6552_v55 = vld [vmem:[#allocation6 + $0x878] sm:$0xf0]  ;;  %v7086_v24 = vld [vmem:[#allocation9 + $0x2a0] sm:$0xf]  ;;  %v8503_v29 = vld [vmem:[#allocation9 + $0x2ac] sm:$0xf0] }
 0x18e   :  { %v8164_v59 = vld [vmem:[#allocation6 + $0x21c] sm:$0xf]  ;;  %v6555_v11 = vor.u32 %v8364_v54, %v6552_v55  ;;  %2703 = vmatpush.bf16.msrb.mxu2 %v6299_v3  ;;  %v8443_v54 = vld [vmem:[#allocation9 + $0xcc] sm:$0xf0]  ;;  %v6974_v55 = vld [vmem:[#allocation9 + $0x1c0] sm:$0xf]  ;;  %v2177_v3 = vadd.f32 %v9177_v41, %v523_v35  ;;  %v9252_v40 = vpop.f32.mrf.mxu1 }
 0x18f   :  { %v5752_v62 = vld [vmem:[#allocation6 + $0x238] sm:$0xf0]  ;;  %v6847_v19 = vor.u32 %v8443_v54, %v6846_v53  ;;  %v6830_v41 = vld [vmem:[#allocation9 + $0xa0] sm:$0xf] }
 0x190   :  { %v8228_v4 = vld [vmem:[#allocation6 + $0x41c] sm:$0xf]  ;;  %v5755_v22 = vor.u32 %v8164_v59, %v5752_v62  ;;  %2717 = vmatpush.bf16.msrb.mxu3 %v6555_v11  ;;  %v8475_v59 = vld [vmem:[#allocation9 + $0x1cc] sm:$0xf0]  ;;  %v7102_v62 = vld [vmem:[#allocation9 + $0x2c0] sm:$0xf]  ;;  %v9245_v11 = vpop.f32.mrf.mxu0 }
 0x191   :  { %v6008_v8 = vld [vmem:[#allocation6 + $0x438] sm:$0xf0]  ;;  %v6975_v27 = vor.u32 %v8475_v59, %v6974_v55  ;;  %v7103_v35 = vor.u32 %v8507_v1, %v7102_v62  ;;  %v6814_v53 = vld [vmem:[#allocation9 + $0x80] sm:$0xf]  ;;  %v8467_v55 = vld [vmem:[#allocation9 + $0x18c] sm:$0xf0] }
 0x192   :  { %v8292_v10 = vld [vmem:[#allocation6 + $0x61c] sm:$0xf]  ;;  %v6011_v32 = vor.u32 %v8228_v4, %v6008_v8  ;;  %2676 = vmatpush.bf16.msrb.mxu0 %v5755_v22  ;;  %v9242_v4 = vld [vmem:[#allocation8] sm:$0xff]  ;;  %v6942_v54 = vld [vmem:[#allocation9 + $0x180] sm:$0xf] }
 0x193   :  { %v6264_v13 = vld [vmem:[#allocation6 + $0x638] sm:$0xf0]  ;;  %v524_v8 = vperm.slane %v9242_v4, 1  ;;  %v7198_v1 = vld [vmem:[#allocation9 + $0x380] sm:$0xf] }
 0x194   :  { %v8356_v17 = vld [vmem:[#allocation6 + $0x81c] sm:$0xf]  ;;  %v6267_v37 = vor.u32 %v8292_v10, %v6264_v13  ;;  %v2386_v10 = vpop.f32.mrf.mxu3  ;;  %2690 = vmatpush.bf16.msrb.mxu1 %v6011_v32  ;;  %v7230_v13 = vld [vmem:[#allocation9 + $0x3c0] sm:$0xf]  ;;  %v2191_v32 = vadd.f32 %v9179_v60, %v2177_v3  ;;  %v6831_v60 = vor.u32 %v8439_v20, %v6830_v41  ;;  %v8531_v3 = vld [vmem:[#allocation9 + $0x38c] sm:$0xf0] }
 0x195   :  { %v6520_v18 = vld [vmem:[#allocation6 + $0x838] sm:$0xf0]  ;;  %2677 = vmatmul.bf16.vlgmr.msrb.gmra.mxu0 %v9132_v46  ;;  %v2247_v38 = vadd.f32 %v9199_v2, %v524_v8  ;;  %v7087_v2 = vor.u32 %v8503_v29, %v7086_v24  ;;  %v6798_v20 = vld [vmem:[#allocation9 + $0x60] sm:$0xf]  ;;  %v8527_v29 = vld [vmem:[#allocation9 + $0x36c] sm:$0xf0] }
 0x196   :  { %v6523_v42 = vor.u32 %v8356_v17, %v6520_v18  ;;  %2704 = vmatpush.bf16.msrb.mxu2 %v6267_v37  ;;  %v8539_v17 = vld [vmem:[#allocation9 + $0x3cc] sm:$0xf0]  ;;  %v525_v18 = vperm.slane %v9242_v4, 2  ;;  %4295 = vmatpush.bf16.msra.mxu0 %v6863_v43  ;;  %v2245_v37 = vadd.f32 %v9191_v26, %v524_v8  ;;  %v6959_v26 = vor.u32 %v8471_v23, %v6958_v21  ;;  %v6926_v21 = vld [vmem:[#allocation9 + $0x160] sm:$0xf] }
 0x197   :  { %v7231_v22 = vor.u32 %v8539_v17, %v7230_v13  ;;  %2691 = vmatmul.bf16.vlgmr.msrb.gmra.mxu1 %v9136_v6  ;;  %v8535_v43 = vld [vmem:[#allocation9 + $0x3ac] sm:$0xf0]  ;;  %v2205_v59 = vadd.f32 %v9181_v0, %v2191_v32  ;;  %v2261_v62 = vadd.f32 %v9201_v14, %v2247_v38  ;;  %v6943_v0 = vor.u32 %v8467_v55, %v6942_v54  ;;  %v7182_v24 = vld [vmem:[#allocation9 + $0x360] sm:$0xf] }
 0x198   :  { %2718 = vmatpush.bf16.msrb.mxu3 %v6523_v42  ;;  %4309 = vmatpush.bf16.msra.mxu1 %v6991_v45  ;;  %v7214_v42 = vld [vmem:[#allocation9 + $0x3a0] sm:$0xf]  ;;  %v2315_v46 = vadd.f32 %v9209_v57, %v525_v18  ;;  %v526_v45 = vperm.slane %v9242_v4, 3  ;;  %v8435_v6 = vld [vmem:[#allocation9 + $0x8c] sm:$0xf0]  ;;  %v2317_v8 = vadd.f32 %v9221_v49, %v525_v18 }
 0x199   :  { %2705 = vmatmul.bf16.vlgmr.msrb.gmra.mxu2 %v9139_v9  ;;  %v7215_v9 = vor.u32 %v8535_v43, %v7214_v42  ;;  %v8499_v57 = vld [vmem:[#allocation9 + $0x28c] sm:$0xf0]  ;;  %v7054_v18 = vld [vmem:[#allocation9 + $0x260] sm:$0xf] }
 0x19a   :  { %4323 = vmatpush.bf16.msra.mxu2 %v7119_v52  ;;  %4296 = vmatpush.bf16.msra.mxu0 %v6847_v19  ;;  %v9259_v52 = vpop.f32.mrf.mxu2  ;;  %v2329_v13 = vadd.f32 %v9211_v12, %v2315_v46  ;;  %v2387_v17 = vadd.f32 %v2386_v10, %v526_v45  ;;  %v6815_v19 = vor.u32 %v8435_v6, %v6814_v53  ;;  %v8431_v14 = vld [vmem:[#allocation9 + $0x6c] sm:$0xf0]  ;;  %v2414_v46 = vpop.f32.mrf.mxu1  ;;  %v7038_v53 = vld [vmem:[#allocation9 + $0x240] sm:$0xf] }
 0x19b   :  { %2719 = vmatmul.bf16.vlgmr.msrb.gmra.mxu3 %v9144_v51  ;;  %v2259_v51 = vadd.f32 %v9193_v31, %v2245_v37  ;;  %v8463_v49 = vld [vmem:[#allocation9 + $0x16c] sm:$0xf0]  ;;  %v2219_v10 = vadd.f32 %v9189_v16, %v2205_v59  ;;  %v2331_v37 = vadd.f32 %v9225_v7, %v2317_v8  ;;  %v6799_v42 = vor.u32 %v8431_v14, %v6798_v20  ;;  %v7166_v55 = vld [vmem:[#allocation9 + $0x340] sm:$0xf] }
 0x19c   :  { %4337 = vmatpush.bf16.msra.mxu3 %v7247_v58  ;;  %4310 = vmatpush.bf16.msra.mxu1 %v6975_v27  ;;  %v7070_v58 = vld [vmem:[#allocation9 + $0x280] sm:$0xf]  ;;  %v2385_v27 = vadd.f32 %v9231_v39, %v526_v45  ;;  %v9267_v41 = vpop.f32.mrf.mxu3  ;;  %v8495_v12 = vld [vmem:[#allocation9 + $0x26c] sm:$0xf0]  ;;  %v2275_v39 = vadd.f32 %v9205_v36, %v2261_v62  ;;  %v2343_v32 = vadd.f32 %v9223_v5, %v2329_v13 }
 0x19d   :  { %v7071_v31 = vor.u32 %v8499_v57, %v7070_v58  ;;  %v2273_v23 = vadd.f32 %v9195_v48, %v2259_v51  ;;  %v6927_v45 = vor.u32 %v8463_v49, %v6926_v21  ;;  %v7055_v16 = vor.u32 %v8495_v12, %v7054_v18  ;;  %v8427_v48 = vld [vmem:[#allocation9 + $0x4c] sm:$0xf0]  ;;  %v6750_v49 = vld [vmem:[#allocation9] sm:$0xf] }
 0x19e   :  { %4324 = vmatpush.bf16.msra.mxu2 %v7103_v35  ;;  %4297 = vmatpush.bf16.msra.mxu0 %v6831_v60  ;;  %v2400_v35 = vpop.f32.mrf.mxu0  ;;  %v2399_v43 = vadd.f32 %v9245_v11, %v2385_v27  ;;  %v6782_v60 = vld [vmem:[#allocation9 + $0x40] sm:$0xf]  ;;  %v7183_v36 = vor.u32 %v8527_v29, %v7182_v24  ;;  %v8491_v5 = vld [vmem:[#allocation9 + $0x24c] sm:$0xf0]  ;;  %v9277_v7 = vadd.f32 %v9187_v15, %v9171_v50 }
 0x19f   :  { %v2401_v38 = vadd.f32 %v2400_v35, %v2387_v17  ;;  %v9280_v6 = vadd.f32 %v9197_v61, %v2219_v10  ;;  %v2287_v11 = vadd.f32 %v9203_v34, %v2273_v23  ;;  %v2289_v54 = vadd.f32 %v9214_v25, %v2275_v39  ;;  %v8523_v58 = vld [vmem:[#allocation9 + $0x34c] sm:$0xf0]  ;;  %v7022_v17 = vld [vmem:[#allocation9 + $0x220] sm:$0xf] }
 0x1a0   :  { %4338 = vmatpush.bf16.msra.mxu3 %v7231_v22  ;;  %4311 = vmatpush.bf16.msra.mxu1 %v6959_v26  ;;  %v7199_v22 = vor.u32 %v8531_v3, %v7198_v1  ;;  %v6910_v26 = vld [vmem:[#allocation9 + $0x140] sm:$0xf]  ;;  %v2357_v57 = vadd.f32 %v9227_v28, %v2343_v32  ;;  %v2345_v59 = vadd.f32 %v9233_v63, %v2331_v37  ;;  %v8423_v34 = vld [vmem:[#allocation9 + $0x2c] sm:$0xf0] }
 0x1a1   :  { %v2415_v51 = vadd.f32 %v2414_v46, %v2401_v38  ;;  %v6783_v62 = vor.u32 %v8427_v48, %v6782_v60  ;;  %v2413_v50 = vadd.f32 %v9252_v40, %v2399_v43  ;;  %v7039_v61 = vor.u32 %v8491_v5, %v7038_v53  ;;  %v6766_v1 = vld [vmem:[#allocation9 + $0x20] sm:$0xf]  ;;  %v8455_v28 = vld [vmem:[#allocation9 + $0x12c] sm:$0xf0] }
 0x1a2   :  { %4325 = vmatpush.bf16.msra.mxu2 %v7087_v2  ;;  %4298 = vmatpush.bf16.msra.mxu0 %v6815_v19  ;;  %v8459_v2 = vld [vmem:[#allocation9 + $0x14c] sm:$0xf0]  ;;  %v6894_v3 = vld [vmem:[#allocation9 + $0x120] sm:$0xf]  ;;  %v7167_v8 = vor.u32 %v8523_v58, %v7166_v55  ;;  %v2725_v19 = vmax.f32 %v9277_v7, 0.0  ;;  %v2733_v27 = vmax.f32 %v9280_v6, 0.0  ;;  %v2301_v40 = vadd.f32 %v9207_v56, %v2287_v11  ;;  %v2468_v7 = vpop.f32.mrf.mxu1 }
 0x1a3   :  { %v6911_v15 = vor.u32 %v8459_v2, %v6910_v26  ;;  %v8487_v63 = vld [vmem:[#allocation9 + $0x22c] sm:$0xf0]  ;;  %v2303_v20 = vadd.f32 %v9219_v47, %v2289_v54  ;;  %v2371_v14 = vadd.f32 %v9229_v33, %v2357_v57  ;;  %v2359_v21 = vadd.f32 %v9235_v30, %v2345_v59  ;;  %v6878_v56 = vld [vmem:[#allocation9 + $0x100] sm:$0xf] }
 0x1a4   :  { %4339 = vmatpush.bf16.msra.mxu3 %v7215_v9  ;;  %4312 = vmatpush.bf16.msra.mxu1 %v6943_v0  ;;  %v2428_v9 = vpop.f32.mrf.mxu2  ;;  %v2442_v35 = vpop.f32.mrf.mxu3  ;;  %v7150_v0 = vld [vmem:[#allocation9 + $0x320] sm:$0xf]  ;;  %v2427_v18 = vadd.f32 %v9259_v52, %v2413_v50  ;;  %v6895_v12 = vor.u32 %v8455_v28, %v6894_v3  ;;  %v7023_v10 = vor.u32 %v8487_v63, %v7022_v17  ;;  %v8419_v23 = vld [vmem:[#allocation9 + $0xc] sm:$0xf0]  ;;  %v2726_v43 = vmax.f32 %v2301_v40, 0.0 }
 0x1a5   :  { %v2429_v25 = vadd.f32 %v2428_v9, %v2415_v51  ;;  %v8451_v39 = vld [vmem:[#allocation9 + $0x10c] sm:$0xf0]  ;;  %v2373_v24 = vadd.f32 %v9237_v44, %v2359_v21  ;;  %v7006_v33 = vld [vmem:[#allocation9 + $0x200] sm:$0xf]  ;;  %v2734_v52 = vmax.f32 %v2303_v20, 0.0  ;;  %v6751_v46 = vor.u32 %v8419_v23, %v6750_v49 }
 0x1a6   :  { %4326 = vmatpush.bf16.msra.mxu2 %v7071_v31  ;;  %4299 = vmatpush.bf16.msra.mxu0 %v6799_v42  ;;  %v9287_v13 = vpop.f32.mrf.mxu0  ;;  %v8519_v31 = vld [vmem:[#allocation9 + $0x32c] sm:$0xf0]  ;;  %v7134_v30 = vld [vmem:[#allocation9 + $0x300] sm:$0xf]  ;;  %v2727_v60 = vmax.f32 %v2371_v14, 0.0  ;;  %v2441_v48 = vadd.f32 %v9267_v41, %v2427_v18  ;;  %v6879_v44 = vor.u32 %v8451_v39, %v6878_v56  ;;  %v9298_v41 = vpack.c.bf16 %v2733_v27, %v2725_v19 }
 0x1a7   :  { %v2443_v29 = vadd.f32 %v2442_v35, %v2429_v25  ;;  %v7151_v47 = vor.u32 %v8519_v31, %v7150_v0  ;;  %v8483_v32 = vld [vmem:[#allocation9 + $0x20c] sm:$0xf0]  ;;  %v7374_v38 = vld [vmem:[#allocation9 + $0x4e0] sm:$0xf]  ;;  %v9300_v50 = vpack.c.bf16 %v2734_v52, %v2726_v43 }
 0x1a8   :  { %4340 = vmatpush.bf16.msra.mxu3 %v7199_v22  ;;  %4313 = vmatpush.bf16.msra.mxu1 %v6927_v45  ;;  %v6767_v22 = vor.u32 %v8423_v34, %v6766_v1  ;;  %v8515_v37 = vld [vmem:[#allocation9 + $0x30c] sm:$0xf0]  ;;  %v7502_v45 = vld [vmem:[#allocation9 + $0x5e0] sm:$0xf]  ;;  %v7007_v26 = vor.u32 %v8483_v32, %v7006_v33  ;;  %v2728_v51 = vmax.f32 %v2441_v48, 0.0 }
 0x1a9   :  { %v8575_v42 = vld [vmem:[#allocation9 + $0x4ec] sm:$0xf0]  ;;  %v2736_v2 = vmax.f32 %v2443_v29, 0.0  ;;  %v7135_v53 = vor.u32 %v8515_v37, %v7134_v30  ;;  %v7358_v11 = vld [vmem:[#allocation9 + $0x4c0] sm:$0xf] }
 0x1aa   :  { %4327 = vmatpush.bf16.msra.mxu2 %v7055_v16  ;;  %4300 = vmatpush.bf16.msra.mxu0 %v6783_v62  ;;  %v8607_v16 = vld [vmem:[#allocation9 + $0x5ec] sm:$0xf0]  ;;  %v7375_v5 = vor.u32 %v8575_v42, %v7374_v38  ;;  %v7486_v9 = vld [vmem:[#allocation9 + $0x5c0] sm:$0xf] }
 0x1ab   :  { %v7503_v6 = vor.u32 %v8607_v16, %v7502_v45  ;;  %v8571_v54 = vld [vmem:[#allocation9 + $0x4cc] sm:$0xf0]  ;;  %v7630_v57 = vld [vmem:[#allocation9 + $0x6e0] sm:$0xf]  ;;  %v9305_v3 = vpack.c.bf16 %v2736_v2, %v2728_v51 }
 0x1ac   :  { %4341 = vmatpush.bf16.msra.mxu3 %v7183_v36  ;;  %4314 = vmatpush.bf16.msra.mxu1 %v6911_v15  ;;  %v2735_v36 = vmax.f32 %v2373_v24, 0.0  ;;  %v8603_v58 = vld [vmem:[#allocation9 + $0x5cc] sm:$0xf0]  ;;  %v7359_v1 = vor.u32 %v8571_v54, %v7358_v11  ;;  %v2482_v34 = vpop.f32.mrf.mxu2  ;;  %v7470_v17 = vld [vmem:[#allocation9 + $0x5a0] sm:$0xf]  ;;  %v2496_v0 = vpop.f32.mrf.mxu3 }
 0x1ad   :  { %v8639_v59 = vld [vmem:[#allocation9 + $0x6ec] sm:$0xf0]  ;;  %v7487_v25 = vor.u32 %v8603_v58, %v7486_v9  ;;  %v7614_v19 = vld [vmem:[#allocation9 + $0x6c0] sm:$0xf] }
 0x1ae   :  { %4328 = vmatpush.bf16.msra.mxu2 %v7039_v61  ;;  %4301 = vmatpush.bf16.msra.mxu0 %v6767_v22  ;;  %v2456_v55 = vpop.f32.mrf.mxu0  ;;  %v7631_v62 = vor.u32 %v8639_v59, %v7630_v57  ;;  %v9302_v15 = vpack.c.bf16 %v2735_v36, %v2727_v60  ;;  %v527_v61 = vperm.slane %v9242_v4, 4  ;;  %v8567_v28 = vld [vmem:[#allocation9 + $0x4ac] sm:$0xf0]  ;;  %v7326_v21 = vld [vmem:[#allocation9 + $0x480] sm:$0xf] }
 0x1af   :  { %v8599_v63 = vld [vmem:[#allocation9 + $0x5ac] sm:$0xf0]  ;;  %v7454_v49 = vld [vmem:[#allocation9 + $0x580] sm:$0xf] }
 0x1b0   :  { %4342 = vmatpush.bf16.msra.mxu3 %v7167_v8  ;;  %4315 = vmatpush.bf16.msra.mxu1 %v6895_v12  ;;  %v7342_v8 = vld [vmem:[#allocation9 + $0x4a0] sm:$0xf]  ;;  %v8635_v27 = vld [vmem:[#allocation9 + $0x6cc] sm:$0xf0]  ;;  %v2455_v31 = vadd.f32 %v9287_v13, %v527_v61  ;;  %v2457_v20 = vadd.f32 %v2456_v55, %v527_v61  ;;  %v7471_v14 = vor.u32 %v8599_v63, %v7470_v17  ;;  %v2470_v12 = vpop.f32.mrf.mxu1 }
 0x1b1   :  { %v7615_v40 = vor.u32 %v8635_v27, %v7614_v19  ;;  %v7343_v35 = vor.u32 %v8567_v28, %v7342_v8  ;;  %v8563_v22 = vld [vmem:[#allocation9 + $0x48c] sm:$0xf0]  ;;  %v7310_v13 = vld [vmem:[#allocation9 + $0x460] sm:$0xf] }
 0x1b2   :  { %4329 = vmatpush.bf16.msra.mxu2 %v7023_v10  ;;  %4302 = vmatpush.bf16.msra.mxu0 %v6751_v46  ;;  %v8595_v18 = vld [vmem:[#allocation9 + $0x58c] sm:$0xf0]  ;;  %v7598_v10 = vld [vmem:[#allocation9 + $0x6a0] sm:$0xf]  ;;  %v7327_v24 = vor.u32 %v8563_v22, %v7326_v21  ;;  %v2469_v29 = vadd.f32 %v2468_v7, %v2455_v31  ;;  %v2471_v33 = vadd.f32 %v2470_v12, %v2457_v20  ;;  %v6992_v21 = vld [vmem:[#allocation9 + $0x1f0] sm:$0xf0] }
 0x1b3   :  { %v8631_v23 = vld [vmem:[#allocation9 + $0x6ac] sm:$0xf0]  ;;  %v7438_v30 = vld [vmem:[#allocation9 + $0x560] sm:$0xf] }
 0x1b4   :  { %4343 = vmatpush.bf16.msra.mxu3 %v7151_v47  ;;  %4316 = vmatpush.bf16.msra.mxu1 %v6879_v44  ;;  %v7599_v56 = vor.u32 %v8631_v23, %v7598_v10  ;;  %v7455_v47 = vor.u32 %v8595_v18, %v7454_v49  ;;  %v8559_v32 = vld [vmem:[#allocation9 + $0x46c] sm:$0xf0]  ;;  %v2484_v37 = vpop.f32.mrf.mxu2  ;;  %v7582_v42 = vld [vmem:[#allocation9 + $0x680] sm:$0xf]  ;;  %v2483_v45 = vadd.f32 %v2482_v34, %v2469_v29  ;;  %v2498_v36 = vpop.f32.mrf.mxu3  ;;  %v528_v49 = vperm.slane %v9242_v4, 5 }
 0x1b5   :  { %4303 = vmatmul.bf16.vlgmr.msra.gmra.mxu0 %v9298_v41  ;;  %v8591_v38 = vld [vmem:[#allocation9 + $0x56c] sm:$0xf0]  ;;  %v7311_v46 = vor.u32 %v8559_v32, %v7310_v13  ;;  %v2485_v16 = vadd.f32 %v2484_v37, %v2471_v33  ;;  %v7294_v48 = vld [vmem:[#allocation9 + $0x440] sm:$0xf]  ;;  %v8473_v33 = vld [vmem:[#allocation9 + $0x1c4] sm:$0xf] }
 0x1b6   :  { %4330 = vmatpush.bf16.msra.mxu2 %v7007_v26  ;;  %4351 = vmatpush.bf16.msrb.mxu0 %v7375_v5  ;;  %v2510_v39 = vpop.f32.mrf.mxu0  ;;  %v8627_v43 = vld [vmem:[#allocation9 + $0x68c] sm:$0xf0]  ;;  %v7439_v60 = vor.u32 %v8591_v38, %v7438_v30  ;;  %v7422_v26 = vld [vmem:[#allocation9 + $0x540] sm:$0xf]  ;;  %v2497_v11 = vadd.f32 %v2496_v0, %v2483_v45  ;;  %v6864_v0 = vld [vmem:[#allocation9 + $0xf0] sm:$0xf0] }
 0x1b7   :  { %4317 = vmatmul.bf16.vlgmr.msra.gmra.mxu1 %v9300_v50  ;;  %v7583_v52 = vor.u32 %v8627_v43, %v7582_v42  ;;  %v8555_v44 = vld [vmem:[#allocation9 + $0x44c] sm:$0xf0]  ;;  %v2499_v54 = vadd.f32 %v2498_v36, %v2485_v16  ;;  %v7278_v55 = vld [vmem:[#allocation9 + $0x420] sm:$0xf]  ;;  %v6976_v30 = vld [vmem:[#allocation9 + $0x1d0] sm:$0xf0] }
 0x1b8   :  { %4344 = vmatpush.bf16.msra.mxu3 %v7135_v53  ;;  %4365 = vmatpush.bf16.msrb.mxu1 %v7503_v6  ;;  %v8587_v2 = vld [vmem:[#allocation9 + $0x54c] sm:$0xf0]  ;;  %v7566_v53 = vld [vmem:[#allocation9 + $0x660] sm:$0xf]  ;;  %v7295_v6 = vor.u32 %v8555_v44, %v7294_v48  ;;  %v2511_v17 = vadd.f32 %v2510_v39, %v2497_v11  ;;  %v8441_v39 = vld [vmem:[#allocation9 + $0xc4] sm:$0xf] }
 0x1b9   :  { %4331 = vmatmul.bf16.vlgmr.msra.gmra.mxu2 %v9302_v15  ;;  %v8623_v5 = vld [vmem:[#allocation9 + $0x66c] sm:$0xf0]  ;;  %v7423_v9 = vor.u32 %v8587_v2, %v7422_v26  ;;  %v7406_v57 = vld [vmem:[#allocation9 + $0x520] sm:$0xf]  ;;  %v8509_v38 = vld [vmem:[#allocation9 + $0x2e4] sm:$0xf]  ;;  %v6979_v26 = vor.u32 %v8473_v33, %v6976_v30 }
 0x1ba   :  { %4379 = vmatpush.bf16.msrb.mxu2 %v7631_v62  ;;  %4352 = vmatpush.bf16.msrb.mxu0 %v7359_v1  ;;  %v7567_v7 = vor.u32 %v8623_v5, %v7566_v53  ;;  %v8551_v58 = vld [vmem:[#allocation9 + $0x42c] sm:$0xf0]  ;;  %v2524_v62 = vpop.f32.mrf.mxu1  ;;  %v7550_v61 = vld [vmem:[#allocation9 + $0x640] sm:$0xf]  ;;  %v2729_v12 = vmax.f32 %v2511_v17, 0.0 }
 0x1bb   :  { %4345 = vmatmul.bf16.vlgmr.msra.gmra.mxu3 %v9305_v3  ;;  %v8583_v51 = vld [vmem:[#allocation9 + $0x52c] sm:$0xf0]  ;;  %v7262_v8 = vld [vmem:[#allocation9 + $0x400] sm:$0xf]  ;;  %v7120_v42 = vld [vmem:[#allocation9 + $0x2f0] sm:$0xf0]  ;;  %v2525_v43 = vadd.f32 %v2524_v62, %v528_v49 }
 0x1bc   :  { %4366 = vmatpush.bf16.msrb.mxu1 %v7487_v25  ;;  %v8619_v1 = vld [vmem:[#allocation9 + $0x64c] sm:$0xf0]  ;;  %v7279_v25 = vor.u32 %v8551_v58, %v7278_v55  ;;  %v7407_v19 = vor.u32 %v8583_v51, %v7406_v57  ;;  %v7390_v27 = vld [vmem:[#allocation9 + $0x500] sm:$0xf]  ;;  %v2538_v29 = vpop.f32.mrf.mxu2  ;;  %v8437_v36 = vld [vmem:[#allocation9 + $0xa4] sm:$0xf] }
 0x1bd   :  { %v7551_v34 = vor.u32 %v8619_v1, %v7550_v61  ;;  %v8547_v28 = vld [vmem:[#allocation9 + $0x40c] sm:$0xf0]  ;;  %v7534_v31 = vld [vmem:[#allocation9 + $0x620] sm:$0xf]  ;;  %v6832_v2 = vld [vmem:[#allocation9 + $0xb0] sm:$0xf0] }
 0x1be   :  { %4380 = vmatpush.bf16.msrb.mxu2 %v7615_v40  ;;  %4353 = vmatpush.bf16.msrb.mxu0 %v7343_v35  ;;  %v2512_v59 = vpop.f32.mrf.mxu0  ;;  %v8579_v40 = vld [vmem:[#allocation9 + $0x50c] sm:$0xf0]  ;;  %v8445_v35 = vld [vmem:[#allocation9 + $0xe4] sm:$0xf]  ;;  %v7263_v18 = vor.u32 %v8547_v28, %v7262_v8  ;;  %v7518_v13 = vld [vmem:[#allocation9 + $0x600] sm:$0xf]  ;;  %v6835_v55 = vor.u32 %v8437_v36, %v6832_v2 }
 0x1bf   :  { %v2513_v63 = vadd.f32 %v2512_v59, %v2499_v54  ;;  %v8615_v20 = vld [vmem:[#allocation9 + $0x62c] sm:$0xf0]  ;;  %v7391_v23 = vor.u32 %v8579_v40, %v7390_v27  ;;  %v7758_v48 = vld [vmem:[#allocation9 + $0x7e0] sm:$0xf]  ;;  %v8469_v53 = vld [vmem:[#allocation9 + $0x1a4] sm:$0xf]  ;;  %v2539_v54 = vadd.f32 %v2538_v29, %v2525_v43 }
 0x1c0   :  { %4367 = vmatpush.bf16.msrb.mxu1 %v7471_v14  ;;  %v8477_v14 = vld [vmem:[#allocation9 + $0x1e4] sm:$0xf]  ;;  %v7535_v22 = vor.u32 %v8615_v20, %v7534_v31  ;;  %v8611_v32 = vld [vmem:[#allocation9 + $0x60c] sm:$0xf0]  ;;  %v7104_v11 = vld [vmem:[#allocation9 + $0x2d0] sm:$0xf0] }
 0x1c1   :  { %v2737_v10 = vmax.f32 %v2513_v63, 0.0  ;;  %v7519_v37 = vor.u32 %v8611_v32, %v7518_v13  ;;  %v8671_v44 = vld [vmem:[#allocation9 + $0x7ec] sm:$0xf0]  ;;  %v7742_v58 = vld [vmem:[#allocation9 + $0x7c0] sm:$0xf] }
 0x1c2   :  { %4381 = vmatpush.bf16.msrb.mxu2 %v7599_v56  ;;  %4354 = vmatpush.bf16.msrb.mxu0 %v7327_v24  ;;  %v6867_v56 = vor.u32 %v8445_v35, %v6864_v0  ;;  %v6848_v24 = vld [vmem:[#allocation9 + $0xd0] sm:$0xf0]  ;;  %v7759_v5 = vor.u32 %v8671_v44, %v7758_v48  ;;  %v8667_v57 = vld [vmem:[#allocation9 + $0x7cc] sm:$0xf0]  ;;  %v8433_v62 = vld [vmem:[#allocation9 + $0x84] sm:$0xf] }
 0x1c3   :  { %v9313_v45 = vpack.c.bf16 %v2737_v10, %v2729_v12  ;;  %v6851_v16 = vor.u32 %v8441_v39, %v6848_v24  ;;  %v6816_v61 = vld [vmem:[#allocation9 + $0x90] sm:$0xf0]  ;;  %v8465_v1 = vld [vmem:[#allocation9 + $0x184] sm:$0xf]  ;;  %v7726_v35 = vld [vmem:[#allocation9 + $0x7a0] sm:$0xf] }
 0x1c4   :  { %4368 = vmatpush.bf16.msrb.mxu1 %v7455_v47  ;;  %v6995_v47 = vor.u32 %v8477_v14, %v6992_v21  ;;  %4393 = vmatpush.bf16.msrb.mxu3 %v7759_v5  ;;  %v2540_v8 = vpop.f32.mrf.mxu2  ;;  %v8501_v28 = vld [vmem:[#allocation9 + $0x2a4] sm:$0xf]  ;;  %v7088_v17 = vld [vmem:[#allocation9 + $0x2b0] sm:$0xf0]  ;;  %v6819_v40 = vor.u32 %v8433_v62, %v6816_v61  ;;  %v8663_v0 = vld [vmem:[#allocation9 + $0x7ac] sm:$0xf0] }
 0x1c5   :  { %v8429_v21 = vld [vmem:[#allocation9 + $0x64] sm:$0xf]  ;;  %v6928_v12 = vld [vmem:[#allocation9 + $0x170] sm:$0xf0]  ;;  %v8659_v33 = vld [vmem:[#allocation9 + $0x78c] sm:$0xf0] }
 0x1c6   :  { %4382 = vmatpush.bf16.msrb.mxu2 %v7583_v52  ;;  %4355 = vmatpush.bf16.msrb.mxu0 %v7311_v46  ;;  %v2526_v52 = vpop.f32.mrf.mxu1  ;;  %v7123_v46 = vor.u32 %v8509_v38, %v7120_v42  ;;  %v8425_v30 = vld [vmem:[#allocation9 + $0x44] sm:$0xf]  ;;  %v6912_v43 = vld [vmem:[#allocation9 + $0x150] sm:$0xf0]  ;;  %v8655_v36 = vld [vmem:[#allocation9 + $0x76c] sm:$0xf0] }
 0x1c7   :  { %v2527_v59 = vadd.f32 %v2526_v52, %v528_v49  ;;  %v8461_v49 = vld [vmem:[#allocation9 + $0x164] sm:$0xf]  ;;  %v6752_v62 = vld [vmem:[#allocation9 + $0x10] sm:$0xf0] }
 0x1c8   :  { %4369 = vmatpush.bf16.msrb.mxu1 %v7439_v60  ;;  %v2552_v60 = vpop.f32.mrf.mxu3  ;;  %v6931_v13 = vor.u32 %v8461_v49, %v6928_v12  ;;  %v8457_v38 = vld [vmem:[#allocation9 + $0x144] sm:$0xf]  ;;  %v7662_v49 = vld [vmem:[#allocation9 + $0x720] sm:$0xf] }
 0x1c9   :  { %v2553_v63 = vadd.f32 %v2552_v60, %v2539_v54  ;;  %v2541_v14 = vadd.f32 %v2540_v8, %v2527_v59  ;;  %v8493_v52 = vld [vmem:[#allocation9 + $0x264] sm:$0xf]  ;;  %v8651_v8 = vld [vmem:[#allocation9 + $0x74c] sm:$0xf0] }
 0x1ca   :  { %4383 = vmatpush.bf16.msrb.mxu2 %v7567_v7  ;;  %4356 = vmatpush.bf16.msrb.mxu0 %v7295_v6  ;;  %v6960_v7 = vld [vmem:[#allocation9 + $0x1b0] sm:$0xf0]  ;;  %v8505_v6 = vld [vmem:[#allocation9 + $0x2c4] sm:$0xf] }
 0x1cb   :  { %v6963_v51 = vor.u32 %v8469_v53, %v6960_v7  ;;  %v6915_v53 = vor.u32 %v8457_v38, %v6912_v43  ;;  %v8421_v7 = vld [vmem:[#allocation9 + $0x24] sm:$0xf]  ;;  %v8643_v38 = vld [vmem:[#allocation9 + $0x70c] sm:$0xf0] }
 0x1cc   :  { %4370 = vmatpush.bf16.msrb.mxu1 %v7423_v9  ;;  %v7107_v9 = vor.u32 %v8505_v6, %v7104_v11  ;;  %v2566_v27 = vpop.f32.mrf.mxu0  ;;  %v6768_v6 = vld [vmem:[#allocation9 + $0x30] sm:$0xf0]  ;;  %v8453_v11 = vld [vmem:[#allocation9 + $0x124] sm:$0xf] }
 0x1cd   :  { %v2567_v39 = vadd.f32 %v2566_v27, %v2553_v63  ;;  %v6880_v63 = vld [vmem:[#allocation9 + $0x110] sm:$0xf0]  ;;  %v8565_v43 = vld [vmem:[#allocation9 + $0x4a4] sm:$0xf] }
 0x1ce   :  { %4384 = vmatpush.bf16.msrb.mxu2 %v7551_v34  ;;  %4357 = vmatpush.bf16.msrb.mxu0 %v7279_v25  ;;  %v7743_v34 = vor.u32 %v8667_v57, %v7742_v58  ;;  %v6944_v25 = vld [vmem:[#allocation9 + $0x190] sm:$0xf0]  ;;  %v2580_v20 = vpop.f32.mrf.mxu1 }
 0x1cf   :  { %v6947_v31 = vor.u32 %v8465_v1, %v6944_v25  ;;  %v7040_v58 = vld [vmem:[#allocation9 + $0x250] sm:$0xf0]  ;;  %v6771_v1 = vor.u32 %v8421_v7, %v6768_v6  ;;  %v7678_v25 = vld [vmem:[#allocation9 + $0x740] sm:$0xf]  ;;  %v8537_v7 = vld [vmem:[#allocation9 + $0x3c4] sm:$0xf] }
 0x1d0   :  { %4371 = vmatpush.bf16.msrb.mxu1 %v7407_v19  ;;  %4394 = vmatpush.bf16.msrb.mxu3 %v7743_v34  ;;  %v7091_v19 = vor.u32 %v8501_v28, %v7088_v17  ;;  %v2554_v10 = vpop.f32.mrf.mxu3  ;;  %v8449_v34 = vld [vmem:[#allocation9 + $0x104] sm:$0xf]  ;;  %v7679_v27 = vor.u32 %v8651_v8, %v7678_v25  ;;  %v7232_v6 = vld [vmem:[#allocation9 + $0x3d0] sm:$0xf0] }
 0x1d1   :  { %v2555_v32 = vadd.f32 %v2554_v10, %v2541_v14  ;;  %v7504_v14 = vld [vmem:[#allocation9 + $0x5f0] sm:$0xf0]  ;;  %v6883_v12 = vor.u32 %v8449_v34, %v6880_v63  ;;  %v8557_v25 = vld [vmem:[#allocation9 + $0x464] sm:$0xf] }
 0x1d2   :  { %4385 = vmatpush.bf16.msrb.mxu2 %v7535_v22  ;;  %4358 = vmatpush.bf16.msrb.mxu0 %v7263_v18  ;;  %v6800_v22 = vld [vmem:[#allocation9 + $0x70] sm:$0xf0]  ;;  %v7727_v18 = vor.u32 %v8663_v0, %v7726_v35  ;;  %v8485_v35 = vld [vmem:[#allocation9 + $0x224] sm:$0xf] }
 0x1d3   :  { %v6803_v29 = vor.u32 %v8429_v21, %v6800_v22  ;;  %v7024_v0 = vld [vmem:[#allocation9 + $0x230] sm:$0xf0]  ;;  %v8589_v63 = vld [vmem:[#allocation9 + $0x564] sm:$0xf] }
 0x1d4   :  { %4372 = vmatpush.bf16.msrb.mxu1 %v7391_v23  ;;  %v8497_v23 = vld [vmem:[#allocation9 + $0x284] sm:$0xf]  ;;  %4395 = vmatpush.bf16.msrb.mxu3 %v7727_v18  ;;  %v2568_v48 = vpop.f32.mrf.mxu0  ;;  %v7027_v21 = vor.u32 %v8485_v35, %v7024_v0  ;;  %v8647_v18 = vld [vmem:[#allocation9 + $0x72c] sm:$0xf0]  ;;  %v7312_v8 = vld [vmem:[#allocation9 + $0x470] sm:$0xf0] }
 0x1d5   :  { %4359 = vmatmul.bf16.vlgmr.msrb.gmra.mxu0 %v9313_v45  ;;  %v2569_v2 = vadd.f32 %v2568_v48, %v2555_v32  ;;  %v7488_v32 = vld [vmem:[#allocation9 + $0x5d0] sm:$0xf0]  ;;  %v7315_v0 = vor.u32 %v8557_v25, %v7312_v8 }
 0x1d6   :  { %4407 = vmatpush.bf16.msra.mxu0 %v6867_v56  ;;  %4386 = vmatpush.bf16.msrb.mxu2 %v7519_v37  ;;  %v7072_v56 = vld [vmem:[#allocation9 + $0x290] sm:$0xf0]  ;;  %v2582_v5 = vpop.f32.mrf.mxu1 }
 0x1d7   :  { %v7075_v24 = vor.u32 %v8497_v23, %v7072_v56  ;;  %v6784_v37 = vld [vmem:[#allocation9 + $0x50] sm:$0xf0]  ;;  %v2583_v59 = vadd.f32 %v2582_v5, %v2569_v2  ;;  %v2594_v23 = vpop.f32.mrf.mxu2  ;;  %v8569_v56 = vld [vmem:[#allocation9 + $0x4c4] sm:$0xf] }
 0x1d8   :  { %4421 = vmatpush.bf16.msra.mxu1 %v6995_v47  ;;  %v7710_v47 = vld [vmem:[#allocation9 + $0x780] sm:$0xf]  ;;  %v6787_v44 = vor.u32 %v8425_v30, %v6784_v37  ;;  %v7248_v48 = vld [vmem:[#allocation9 + $0x3f0] sm:$0xf0] }
 0x1d9   :  { %v7711_v42 = vor.u32 %v8659_v33, %v7710_v47  ;;  %v2738_v28 = vmax.f32 %v2583_v59, 0.0  ;;  %v8481_v47 = vld [vmem:[#allocation9 + $0x204] sm:$0xf]  ;;  %v7008_v33 = vld [vmem:[#allocation9 + $0x210] sm:$0xf0] }
 0x1da   :  { %4435 = vmatpush.bf16.msra.mxu2 %v7123_v46  ;;  %4408 = vmatpush.bf16.msra.mxu0 %v6851_v16  ;;  %v7056_v46 = vld [vmem:[#allocation9 + $0x270] sm:$0xf0]  ;;  %v2581_v16 = vadd.f32 %v2580_v20, %v2567_v39  ;;  %v8605_v20 = vld [vmem:[#allocation9 + $0x5e4] sm:$0xf]  ;;  %v7663_v39 = vor.u32 %v8647_v18, %v7662_v49  ;;  %v7011_v30 = vor.u32 %v8481_v47, %v7008_v33  ;;  %v7646_v37 = vld [vmem:[#allocation9 + $0x700] sm:$0xf] }
 0x1db   :  { %4396 = vmatpush.bf16.msrb.mxu3 %v7711_v42  ;;  %v7059_v60 = vor.u32 %v8493_v52, %v7056_v46  ;;  %v7647_v52 = vor.u32 %v8643_v38, %v7646_v37  ;;  %v7456_v59 = vld [vmem:[#allocation9 + $0x590] sm:$0xf0]  ;;  %v8581_v38 = vld [vmem:[#allocation9 + $0x524] sm:$0xf] }
 0x1dc   :  { %4422 = vmatpush.bf16.msra.mxu1 %v6979_v26  ;;  %v7694_v26 = vld [vmem:[#allocation9 + $0x760] sm:$0xf]  ;;  %v2730_v57 = vmax.f32 %v2581_v16, 0.0  ;;  %v7344_v16 = vld [vmem:[#allocation9 + $0x4b0] sm:$0xf0] }
 0x1dd   :  { %v7695_v54 = vor.u32 %v8655_v36, %v7694_v26  ;;  %v8597_v26 = vld [vmem:[#allocation9 + $0x5a4] sm:$0xf]  ;;  %v7472_v36 = vld [vmem:[#allocation9 + $0x5b0] sm:$0xf0]  ;;  %v7347_v5 = vor.u32 %v8565_v43, %v7344_v16 }
 0x1de   :  { %4436 = vmatpush.bf16.msra.mxu2 %v7107_v9  ;;  %4409 = vmatpush.bf16.msra.mxu0 %v6835_v55  ;;  %v6896_v9 = vld [vmem:[#allocation9 + $0x130] sm:$0xf0]  ;;  %v8489_v55 = vld [vmem:[#allocation9 + $0x244] sm:$0xf] }
 0x1df   :  { %4397 = vmatpush.bf16.msrb.mxu3 %v7695_v54  ;;  %v7043_v61 = vor.u32 %v8489_v55, %v7040_v58  ;;  %v6899_v17 = vor.u32 %v8453_v11, %v6896_v9  ;;  %v7475_v11 = vor.u32 %v8597_v26, %v7472_v36  ;;  %v8561_v54 = vld [vmem:[#allocation9 + $0x484] sm:$0xf]  ;;  %v7328_v9 = vld [vmem:[#allocation9 + $0x490] sm:$0xf0]  ;;  %v7235_v55 = vor.u32 %v8537_v7, %v7232_v6  ;;  %v2596_v58 = vpop.f32.mrf.mxu2  ;;  %v8448_v7 = vld [vmem:[#allocation9 + $0xf4] sm:$0xf0] }
 0x1e0   :  { %4423 = vmatpush.bf16.msra.mxu1 %v6963_v51  ;;  %v8417_v51 = vld [vmem:[#allocation9 + $0x4] sm:$0xf]  ;;  %v7296_v49 = vld [vmem:[#allocation9 + $0x450] sm:$0xf0] }
 0x1e1   :  { %v6755_v22 = vor.u32 %v8417_v51, %v6752_v62  ;;  %v7331_v62 = vor.u32 %v8561_v54, %v7328_v9  ;;  %v7184_v47 = vld [vmem:[#allocation9 + $0x370] sm:$0xf0]  ;;  %v8577_v36 = vld [vmem:[#allocation9 + $0x504] sm:$0xf]  ;;  %v6998_v9 = vld [vmem:[#allocation9 + $0x1e8] sm:$0xf] }
 0x1e2   :  { %4437 = vmatpush.bf16.msra.mxu2 %v7091_v19  ;;  %4410 = vmatpush.bf16.msra.mxu0 %v6819_v40  ;;  %v8573_v19 = vld [vmem:[#allocation9 + $0x4e4] sm:$0xf]  ;;  %v7376_v40 = vld [vmem:[#allocation9 + $0x4f0] sm:$0xf0] }
 0x1e3   :  { %4398 = vmatpush.bf16.msrb.mxu3 %v7679_v27  ;;  %v7379_v10 = vor.u32 %v8573_v19, %v7376_v40  ;;  %v7440_v19 = vld [vmem:[#allocation9 + $0x570] sm:$0xf0] }
 0x1e4   :  { %4424 = vmatpush.bf16.msra.mxu1 %v6947_v31  ;;  %v9316_v31 = vpack.c.bf16 %v2738_v28, %v2730_v57  ;;  %v8593_v57 = vld [vmem:[#allocation9 + $0x584] sm:$0xf]  ;;  %v7264_v26 = vld [vmem:[#allocation9 + $0x410] sm:$0xf0] }
 0x1e5   :  { %v7459_v34 = vor.u32 %v8593_v57, %v7456_v59  ;;  %v8517_v59 = vld [vmem:[#allocation9 + $0x324] sm:$0xf] }
 0x1e6   :  { %4438 = vmatpush.bf16.msra.mxu2 %v7075_v24  ;;  %4411 = vmatpush.bf16.msra.mxu0 %v6803_v29  ;;  %v7507_v24 = vor.u32 %v8605_v20, %v7504_v14  ;;  %v7360_v29 = vld [vmem:[#allocation9 + $0x4d0] sm:$0xf0]  ;;  %v8529_v20 = vld [vmem:[#allocation9 + $0x384] sm:$0xf] }
 0x1e7   :  { %4373 = vmatmul.bf16.vlgmr.msrb.gmra.mxu1 %v9316_v31  ;;  %4399 = vmatpush.bf16.msrb.mxu3 %v7663_v39  ;;  %v7363_v42 = vor.u32 %v8569_v56, %v7360_v29  ;;  %v7200_v14 = vld [vmem:[#allocation9 + $0x390] sm:$0xf0]  ;;  %v8525_v29 = vld [vmem:[#allocation9 + $0x364] sm:$0xf] }
 0x1e8   :  { %4425 = vmatpush.bf16.msra.mxu1 %v6931_v13  ;;  %v8601_v13 = vld [vmem:[#allocation9 + $0x5c4] sm:$0xf]  ;;  %v7203_v18 = vor.u32 %v8529_v20, %v7200_v14  ;;  %v7187_v37 = vor.u32 %v8525_v29, %v7184_v47  ;;  %v7136_v20 = vld [vmem:[#allocation9 + $0x310] sm:$0xf0] }
 0x1e9   :  { %v7491_v46 = vor.u32 %v8601_v13, %v7488_v32  ;;  %v8549_v32 = vld [vmem:[#allocation9 + $0x424] sm:$0xf] }
 0x1ea   :  { %4439 = vmatpush.bf16.msra.mxu2 %v7059_v60  ;;  %4412 = vmatpush.bf16.msra.mxu0 %v6787_v44  ;;  %v8541_v60 = vld [vmem:[#allocation9 + $0x3e4] sm:$0xf]  ;;  %v2608_v44 = vpop.f32.mrf.mxu3 }
 0x1eb   :  { %v7251_v2 = vor.u32 %v8541_v60, %v7248_v48  ;;  %4400 = vmatpush.bf16.msrb.mxu3 %v7647_v52  ;;  %v8545_v60 = vld [vmem:[#allocation9 + $0x404] sm:$0xf] }
 0x1ec   :  { %4426 = vmatpush.bf16.msra.mxu1 %v6915_v53  ;;  %v529_v53 = vperm.slane %v9242_v4, 6  ;;  %v7216_v4 = vld [vmem:[#allocation9 + $0x3b0] sm:$0xf0]  ;;  %v8521_v48 = vld [vmem:[#allocation9 + $0x344] sm:$0xf]  ;;  %v7267_v57 = vor.u32 %v8545_v60, %v7264_v26  ;;  %v8776_v26 = vld [vmem:[#allocation8] sm:$0xff] }
 0x1ee   :  { %4440 = vmatpush.bf16.msra.mxu2 %v7043_v61  ;;  %4413 = vmatpush.bf16.msra.mxu0 %v6771_v1  ;;  %v2595_v51 = vadd.f32 %v2594_v23, %v529_v53  ;;  %v8533_v61 = vld [vmem:[#allocation9 + $0x3a4] sm:$0xf]  ;;  %v2622_v1 = vpop.f32.mrf.mxu0  ;;  %v2597_v40 = vadd.f32 %v2596_v58, %v529_v53  ;;  %v7392_v53 = vld [vmem:[#allocation9 + $0x510] sm:$0xf0] }
 0x1ef   :  { %4449 = vmatpush.bf16.msra.mxu3 %v7251_v2  ;;  %v7219_v28 = vor.u32 %v8533_v61, %v7216_v4  ;;  %v7168_v2 = vld [vmem:[#allocation9 + $0x350] sm:$0xf0]  ;;  %v7395_v61 = vor.u32 %v8577_v36, %v7392_v53  ;;  %v530_v36 = vperm.slane %v8776_v26, 7  ;;  %v8512_v26 = vld [vmem:[#allocation9 + $0x2f4] sm:$0xf0] }
 0x1f0   :  { %4427 = vmatpush.bf16.msra.mxu1 %v6899_v17  ;;  %v2636_v17 = vpop.f32.mrf.mxu1  ;;  %v2609_v27 = vadd.f32 %v2608_v44, %v2595_v51  ;;  %v7171_v6 = vor.u32 %v8521_v48, %v7168_v2  ;;  %v7152_v51 = vld [vmem:[#allocation9 + $0x330] sm:$0xf0]  ;;  %v6806_v48 = vld [vmem:[#allocation9 + $0x68] sm:$0xf] }
 0x1f1   :  { %v2650_v39 = vpop.f32.mrf.mxu2  ;;  %v7155_v25 = vor.u32 %v8517_v59, %v7152_v51  ;;  %v8428_v59 = vld [vmem:[#allocation9 + $0x54] sm:$0xf0] }
 0x1f2   :  { %4441 = vmatpush.bf16.msra.mxu2 %v7027_v21  ;;  %4414 = vmatpush.bf16.msra.mxu0 %v6755_v22  ;;  %v2610_v35 = vpop.f32.mrf.mxu3  ;;  %v7443_v21 = vor.u32 %v8589_v63, %v7440_v19  ;;  %v8553_v22 = vld [vmem:[#allocation9 + $0x444] sm:$0xf]  ;;  %v2623_v23 = vadd.f32 %v2622_v1, %v2609_v27  ;;  %v6982_v27 = vld [vmem:[#allocation9 + $0x1c8] sm:$0xf] }
 0x1f3   :  { %4450 = vmatpush.bf16.msra.mxu3 %v7235_v55  ;;  %v2611_v56 = vadd.f32 %v2610_v35, %v2597_v40  ;;  %v8480_v55 = vld [vmem:[#allocation9 + $0x1f4] sm:$0xf0]  ;;  %v8637_v1 = vld [vmem:[#allocation9 + $0x6e4] sm:$0xf] }
 0x1f4   :  { %4428 = vmatpush.bf16.msra.mxu1 %v6883_v12  ;;  %v8585_v12 = vld [vmem:[#allocation9 + $0x544] sm:$0xf]  ;;  %v2637_v43 = vadd.f32 %v2636_v17, %v2623_v23  ;;  %v6999_v8 = vor.u32 %v8480_v55, %v6998_v9  ;;  %v8444_v17 = vld [vmem:[#allocation9 + $0xd4] sm:$0xf0]  ;;  %v6838_v23 = vld [vmem:[#allocation9 + $0xa8] sm:$0xf] }
 0x1f5   :  { %4415 = vmatmul.bf16.vlgmr.msra.gmra.mxu0 %v9298_v41  ;;  %v8476_v40 = vld [vmem:[#allocation9 + $0x1d4] sm:$0xf0]  ;;  %v7568_v9 = vld [vmem:[#allocation9 + $0x670] sm:$0xf0] }
 0x1f6   :  { %4463 = vmatpush.bf16.msrb.mxu0 %v7379_v10  ;;  %4442 = vmatpush.bf16.msra.mxu2 %v7011_v30  ;;  %v7424_v10 = vld [vmem:[#allocation9 + $0x550] sm:$0xf0]  ;;  %v2624_v33 = vpop.f32.mrf.mxu0 }
 0x1f7   :  { %4451 = vmatpush.bf16.msra.mxu3 %v7219_v28  ;;  %4429 = vmatmul.bf16.vlgmr.msra.gmra.mxu1 %v9300_v50  ;;  %v7427_v13 = vor.u32 %v8585_v12, %v7424_v10  ;;  %v7280_v30 = vld [vmem:[#allocation9 + $0x430] sm:$0xf0]  ;;  %v2625_v52 = vadd.f32 %v2624_v33, %v2611_v56  ;;  %v6854_v28 = vld [vmem:[#allocation9 + $0xc8] sm:$0xf]  ;;  %v6983_v10 = vor.u32 %v8476_v40, %v6982_v27  ;;  %v8440_v56 = vld [vmem:[#allocation9 + $0xb4] sm:$0xf0] }
 0x1f8   :  { %4477 = vmatpush.bf16.msrb.mxu1 %v7507_v24  ;;  %v7299_v24 = vor.u32 %v8553_v22, %v7296_v49  ;;  %v7283_v16 = vor.u32 %v8549_v32, %v7280_v30  ;;  %v6855_v22 = vor.u32 %v8444_v17, %v6854_v28  ;;  %v8633_v49 = vld [vmem:[#allocation9 + $0x6c4] sm:$0xf]  ;;  %v6839_v47 = vor.u32 %v8440_v56, %v6838_v23  ;;  %v6822_v30 = vld [vmem:[#allocation9 + $0x88] sm:$0xf] }
 0x1f9   :  { %v2652_v58 = vpop.f32.mrf.mxu2  ;;  %v8629_v33 = vld [vmem:[#allocation9 + $0x6a4] sm:$0xf]  ;;  %v6758_v56 = vld [vmem:[#allocation9 + $0x8] sm:$0xf] }
 0x1fa   :  { %4464 = vmatpush.bf16.msrb.mxu0 %v7363_v42  ;;  %v7408_v42 = vld [vmem:[#allocation9 + $0x530] sm:$0xf0]  ;;  %v2664_v14 = vpop.f32.mrf.mxu3 }
 0x1fb   :  { %4452 = vmatpush.bf16.msra.mxu3 %v7203_v18  ;;  %v7411_v44 = vor.u32 %v8581_v38, %v7408_v42  ;;  %v7616_v18 = vld [vmem:[#allocation9 + $0x6d0] sm:$0xf0]  ;;  %v6950_v38 = vld [vmem:[#allocation9 + $0x188] sm:$0xf]  ;;  %v8468_v42 = vld [vmem:[#allocation9 + $0x194] sm:$0xf0]  ;;  %v2665_v51 = vadd.f32 %v2664_v14, %v530_v36 }
 0x1fc   :  { %4478 = vmatpush.bf16.msrb.mxu1 %v7491_v46  ;;  %v2638_v46 = vpop.f32.mrf.mxu1  ;;  %v7619_v29 = vor.u32 %v8633_v49, %v7616_v18  ;;  %v6951_v60 = vor.u32 %v8468_v42, %v6950_v38  ;;  %v8608_v38 = vld [vmem:[#allocation9 + $0x5f4] sm:$0xf0] }
 0x1fd   :  { %v2639_v54 = vadd.f32 %v2638_v46, %v2625_v52  ;;  %v8625_v46 = vld [vmem:[#allocation9 + $0x684] sm:$0xf] }
 0x1fe   :  { %4465 = vmatpush.bf16.msrb.mxu0 %v7347_v5  ;;  %v6870_v5 = vld [vmem:[#allocation9 + $0xe8] sm:$0xf] }
 0x1ff   :  { %4453 = vmatpush.bf16.msra.mxu3 %v7187_v37  ;;  %v6871_v4 = vor.u32 %v8448_v7, %v6870_v5  ;;  %v8436_v37 = vld [vmem:[#allocation9 + $0x94] sm:$0xf0]  ;;  %v6934_v5 = vld [vmem:[#allocation9 + $0x168] sm:$0xf] }
 0x200   :  { %4479 = vmatpush.bf16.msrb.mxu1 %v7475_v11  ;;  %v2651_v11 = vadd.f32 %v2650_v39, %v2637_v43  ;;  %v6966_v39 = vld [vmem:[#allocation9 + $0x1a8] sm:$0xf]  ;;  %v6823_v52 = vor.u32 %v8436_v37, %v6822_v30  ;;  %v8464_v7 = vld [vmem:[#allocation9 + $0x174] sm:$0xf0] }
 0x201   :  { %v7510_v37 = vld [vmem:[#allocation9 + $0x5e8] sm:$0xf] }
 0x202   :  { %4466 = vmatpush.bf16.msrb.mxu0 %v7331_v62  ;;  %v2653_v62 = vadd.f32 %v2652_v58, %v2639_v54  ;;  %v2731_v63 = vmax.f32 %v2651_v11, 0.0  ;;  %v2666_v2 = vpop.f32.mrf.mxu3  ;;  %v8621_v54 = vld [vmem:[#allocation9 + $0x664] sm:$0xf]  ;;  %v6935_v58 = vor.u32 %v8464_v7, %v6934_v5  ;;  %v7366_v5 = vld [vmem:[#allocation9 + $0x4c8] sm:$0xf] }
 0x203   :  { %4454 = vmatpush.bf16.msra.mxu3 %v7171_v6  ;;  %v2667_v27 = vadd.f32 %v2666_v2, %v530_v36  ;;  %v8572_v7 = vld [vmem:[#allocation9 + $0x4d4] sm:$0xf0] }
 0x204   :  { %4480 = vmatpush.bf16.msrb.mxu1 %v7459_v34  ;;  %v7632_v34 = vld [vmem:[#allocation9 + $0x6f0] sm:$0xf0]  ;;  %v2739_v19 = vmax.f32 %v2653_v62, 0.0  ;;  %v6918_v62 = vld [vmem:[#allocation9 + $0x148] sm:$0xf] }
 0x205   :  { %v7635_v35 = vor.u32 %v8637_v1, %v7632_v34 }
 0x206   :  { %4467 = vmatpush.bf16.msrb.mxu0 %v7315_v0  ;;  %v8513_v0 = vld [vmem:[#allocation9 + $0x304] sm:$0xf] }
 0x207   :  { %4455 = vmatpush.bf16.msra.mxu3 %v7155_v25  ;;  %v7139_v12 = vor.u32 %v8513_v0, %v7136_v20  ;;  %v8617_v25 = vld [vmem:[#allocation9 + $0x644] sm:$0xf]  ;;  %v6902_v0 = vld [vmem:[#allocation9 + $0x128] sm:$0xf]  ;;  %v8456_v20 = vld [vmem:[#allocation9 + $0x134] sm:$0xf0] }
 0x208   :  { %4481 = vmatpush.bf16.msrb.mxu1 %v7443_v21  ;;  %v9322_v21 = vpack.c.bf16 %v2739_v19, %v2731_v63  ;;  %v6774_v63 = vld [vmem:[#allocation9 + $0x28] sm:$0xf]  ;;  %v8424_v19 = vld [vmem:[#allocation9 + $0x34] sm:$0xf0]  ;;  %v6903_v23 = vor.u32 %v8456_v20, %v6902_v0 }
 0x209   :  { %v6775_v18 = vor.u32 %v8424_v19, %v6774_v63  ;;  %v8600_v63 = vld [vmem:[#allocation9 + $0x5b4] sm:$0xf0]  ;;  %v7094_v20 = vld [vmem:[#allocation9 + $0x2a8] sm:$0xf] }
 0x20a   :  { %4468 = vmatpush.bf16.msrb.mxu0 %v7299_v24  ;;  %4387 = vmatmul.bf16.vlgmr.msrb.gmra.mxu2 %v9322_v21  ;;  %v8472_v24 = vld [vmem:[#allocation9 + $0x1b4] sm:$0xf0] }
 0x20b   :  { %4491 = vmatpush.bf16.msrb.mxu2 %v7635_v35  ;;  %4456 = vmatpush.bf16.msra.mxu3 %v7139_v12  ;;  %v6967_v32 = vor.u32 %v8472_v24, %v6966_v39  ;;  %v8613_v12 = vld [vmem:[#allocation9 + $0x624] sm:$0xf]  ;;  %v8420_v39 = vld [vmem:[#allocation9 + $0x14] sm:$0xf0]  ;;  %v6886_v24 = vld [vmem:[#allocation9 + $0x108] sm:$0xf] }
 0x20c   :  { %4482 = vmatpush.bf16.msrb.mxu1 %v7427_v13  ;;  %v7600_v13 = vld [vmem:[#allocation9 + $0x6b0] sm:$0xf0] }
 0x20d   :  { %v7603_v43 = vor.u32 %v8629_v33, %v7600_v13  ;;  %v7382_v33 = vld [vmem:[#allocation9 + $0x4e8] sm:$0xf]  ;;  %v8576_v13 = vld [vmem:[#allocation9 + $0x4f4] sm:$0xf0] }
 0x20e   :  { %4469 = vmatpush.bf16.msrb.mxu0 %v7283_v16  ;;  %v7584_v16 = vld [vmem:[#allocation9 + $0x690] sm:$0xf0] }
 0x20f   :  { %4492 = vmatpush.bf16.msrb.mxu2 %v7619_v29  ;;  %v7587_v6 = vor.u32 %v8625_v46, %v7584_v16  ;;  %v7520_v46 = vld [vmem:[#allocation9 + $0x610] sm:$0xf0] }
 0x210   :  { %4483 = vmatpush.bf16.msrb.mxu1 %v7411_v44  ;;  %v8432_v44 = vld [vmem:[#allocation9 + $0x74] sm:$0xf0] }
 0x211   :  { %v6807_v11 = vor.u32 %v8432_v44, %v6806_v48  ;;  %v7383_v48 = vor.u32 %v8576_v13, %v7382_v33  ;;  %v7126_v44 = vld [vmem:[#allocation9 + $0x2e8] sm:$0xf]  ;;  %v8500_v33 = vld [vmem:[#allocation9 + $0x294] sm:$0xf0] }
 0x212   :  { %4470 = vmatpush.bf16.msrb.mxu0 %v7267_v57  ;;  %v2678_v53 = vpop.f32.mrf.mxu0  ;;  %v6790_v57 = vld [vmem:[#allocation9 + $0x48] sm:$0xf] }
 0x213   :  { %4493 = vmatpush.bf16.msrb.mxu2 %v7603_v43  ;;  %v2679_v1 = vadd.f32 %v2678_v53, %v2665_v51  ;;  %v6791_v34 = vor.u32 %v8428_v59, %v6790_v57  ;;  %v6759_v43 = vor.u32 %v8420_v39, %v6758_v56  ;;  %v7511_v53 = vor.u32 %v8608_v38, %v7510_v37  ;;  %v8669_v57 = vld [vmem:[#allocation9 + $0x7e4] sm:$0xf]  ;;  %v7760_v59 = vld [vmem:[#allocation9 + $0x7f0] sm:$0xf0]  ;;  %v7446_v38 = vld [vmem:[#allocation9 + $0x568] sm:$0xf] }
 0x214   :  { %4484 = vmatpush.bf16.msrb.mxu1 %v7395_v61  ;;  %v2692_v55 = vpop.f32.mrf.mxu1  ;;  %v8460_v61 = vld [vmem:[#allocation9 + $0x154] sm:$0xf0]  ;;  %v7367_v51 = vor.u32 %v8572_v7, %v7366_v5  ;;  %v8661_v39 = vld [vmem:[#allocation9 + $0x7a4] sm:$0xf] }
 0x215   :  { %4471 = vmatmul.bf16.vlgmr.msrb.gmra.mxu0 %v9313_v45  ;;  %v6919_v17 = vor.u32 %v8460_v61, %v6918_v62  ;;  %v7110_v62 = vld [vmem:[#allocation9 + $0x2c8] sm:$0xf]  ;;  %v8508_v61 = vld [vmem:[#allocation9 + $0x2d4] sm:$0xf0] }
 0x216   :  { %4519 = vmatpush.bf16.msra.mxu0 %v6871_v4  ;;  %v7571_v4 = vor.u32 %v8621_v54, %v7568_v9  ;;  %v7494_v54 = vld [vmem:[#allocation9 + $0x5c8] sm:$0xf]  ;;  %v8604_v9 = vld [vmem:[#allocation9 + $0x5d4] sm:$0xf0] }
 0x217   :  { %4485 = vmatmul.bf16.vlgmr.msrb.gmra.mxu1 %v9316_v31  ;;  %4494 = vmatpush.bf16.msrb.mxu2 %v7587_v6  ;;  %v8588_v5 = vld [vmem:[#allocation9 + $0x554] sm:$0xf0] }
 0x218   :  { %4533 = vmatpush.bf16.msra.mxu1 %v6999_v8  ;;  %v7552_v8 = vld [vmem:[#allocation9 + $0x650] sm:$0xf0] }
 0x219   :  { %v7555_v14 = vor.u32 %v8617_v25, %v7552_v8  ;;  %v7350_v25 = vld [vmem:[#allocation9 + $0x4a8] sm:$0xf]  ;;  %v8568_v8 = vld [vmem:[#allocation9 + $0x4b4] sm:$0xf0] }
 0x21a   :  { %4520 = vmatpush.bf16.msra.mxu0 %v6855_v22  ;;  %v2680_v35 = vpop.f32.mrf.mxu0  ;;  %4443 = vmatmul.bf16.vlgmr.msra.gmra.mxu2 %v9302_v15  ;;  %v2693_v22 = vadd.f32 %v2692_v55, %v2679_v1  ;;  %v7351_v0 = vor.u32 %v8568_v8, %v7350_v25  ;;  %v7030_v8 = vld [vmem:[#allocation9 + $0x228] sm:$0xf] }
 0x21b   :  { %4495 = vmatpush.bf16.msrb.mxu2 %v7571_v4  ;;  %v2681_v49 = vadd.f32 %v2680_v35, %v2667_v27  ;;  %v7111_v27 = vor.u32 %v8508_v61, %v7110_v62  ;;  %v7744_v35 = vld [vmem:[#allocation9 + $0x7d0] sm:$0xf0]  ;;  %v7414_v62 = vld [vmem:[#allocation9 + $0x528] sm:$0xf]  ;;  %v8584_v61 = vld [vmem:[#allocation9 + $0x534] sm:$0xf0] }
 0x21c   :  { %4534 = vmatpush.bf16.msra.mxu1 %v6983_v10  ;;  %v2706_v28 = vpop.f32.mrf.mxu2  ;;  %v7536_v10 = vld [vmem:[#allocation9 + $0x630] sm:$0xf0] }
 0x21d   :  { %v2707_v29 = vadd.f32 %v2706_v28, %v2693_v22  ;;  %v7539_v30 = vor.u32 %v8613_v12, %v7536_v10  ;;  %v7763_v28 = vor.u32 %v8669_v57, %v7760_v59  ;;  %v7462_v10 = vld [vmem:[#allocation9 + $0x588] sm:$0xf]  ;;  %v8552_v59 = vld [vmem:[#allocation9 + $0x434] sm:$0xf0] }
 0x21e   :  { %4521 = vmatpush.bf16.msra.mxu0 %v6839_v47  ;;  %v2720_v40 = vpop.f32.mrf.mxu3  ;;  %v8452_v47 = vld [vmem:[#allocation9 + $0x114] sm:$0xf0]  ;;  %v7286_v57 = vld [vmem:[#allocation9 + $0x428] sm:$0xf] }
 0x21f   :  { %4496 = vmatpush.bf16.msrb.mxu2 %v7555_v14  ;;  %v2721_v36 = vadd.f32 %v2720_v40, %v2707_v29  ;;  %v8665_v40 = vld [vmem:[#allocation9 + $0x7c4] sm:$0xf]  ;;  %v8504_v14 = vld [vmem:[#allocation9 + $0x2b4] sm:$0xf0]  ;;  %v7287_v25 = vor.u32 %v8552_v59, %v7286_v57  ;;  %v7606_v59 = vld [vmem:[#allocation9 + $0x6a8] sm:$0xf] }
 0x220   :  { %4535 = vmatpush.bf16.msra.mxu1 %v6967_v32  ;;  %v2694_v32 = vpop.f32.mrf.mxu1  ;;  %v7747_v12 = vor.u32 %v8665_v40, %v7744_v35  ;;  %v7095_v56 = vor.u32 %v8504_v14, %v7094_v20  ;;  %v7398_v40 = vld [vmem:[#allocation9 + $0x508] sm:$0xf]  ;;  %v8580_v35 = vld [vmem:[#allocation9 + $0x514] sm:$0xf0]  ;;  %v8645_v20 = vld [vmem:[#allocation9 + $0x724] sm:$0xf] }
 0x221   :  { %v2695_v42 = vadd.f32 %v2694_v32, %v2681_v49  ;;  %v2732_v4 = vmax.f32 %v2721_v36, 0.0  ;;  %v7334_v49 = vld [vmem:[#allocation9 + $0x488] sm:$0xf]  ;;  %v8556_v36 = vld [vmem:[#allocation9 + $0x454] sm:$0xf0] }
 0x222   :  { %4522 = vmatpush.bf16.msra.mxu0 %v6823_v52  ;;  %v8609_v52 = vld [vmem:[#allocation9 + $0x604] sm:$0xf]  ;;  %v7318_v32 = vld [vmem:[#allocation9 + $0x468] sm:$0xf]  ;;  %v8446_v14 = vld [vmem:[#allocation9 + $0xec] sm:$0xf] }
 0x223   :  { %4497 = vmatpush.bf16.msrb.mxu2 %v7539_v30  ;;  %v8560_v30 = vld [vmem:[#allocation9 + $0x474] sm:$0xf0] }
 0x224   :  { %4536 = vmatpush.bf16.msra.mxu1 %v6951_v60  ;;  %v2708_v16 = vpop.f32.mrf.mxu2  ;;  %v6887_v60 = vor.u32 %v8452_v47, %v6886_v24  ;;  %v7728_v24 = vld [vmem:[#allocation9 + $0x7b0] sm:$0xf0]  ;;  %v7078_v47 = vld [vmem:[#allocation9 + $0x288] sm:$0xf] }
 0x225   :  { %v2709_v2 = vadd.f32 %v2708_v16, %v2695_v42  ;;  %v7731_v37 = vor.u32 %v8661_v39, %v7728_v24  ;;  %v8592_v42 = vld [vmem:[#allocation9 + $0x574] sm:$0xf0]  ;;  %v7319_v16 = vor.u32 %v8560_v30, %v7318_v32  ;;  %v7399_v24 = vor.u32 %v8580_v35, %v7398_v40  ;;  %v8641_v30 = vld [vmem:[#allocation9 + $0x704] sm:$0xf] }
 0x226   :  { %4523 = vmatpush.bf16.msra.mxu0 %v6807_v11  ;;  %v2722_v6 = vpop.f32.mrf.mxu3  ;;  %v7523_v11 = vor.u32 %v8609_v52, %v7520_v46  ;;  %v8657_v52 = vld [vmem:[#allocation9 + $0x784] sm:$0xf]  ;;  %v7712_v46 = vld [vmem:[#allocation9 + $0x790] sm:$0xf0]  ;;  %v8484_v39 = vld [vmem:[#allocation9 + $0x214] sm:$0xf0] }
 0x227   :  { %v2723_v55 = vadd.f32 %v2722_v6, %v2709_v2  ;;  %v7715_v2 = vor.u32 %v8657_v52, %v7712_v46  ;;  %v8653_v6 = vld [vmem:[#allocation9 + $0x764] sm:$0xf]  ;;  %v8474_v52 = vld [vmem:[#allocation9 + $0x1cc] sm:$0xf]  ;;  %v6984_v46 = vld [vmem:[#allocation9 + $0x1d8] sm:$0xf0] }
 0x228   :  { %4537 = vmatpush.bf16.msra.mxu1 %v6935_v58  ;;  %v7127_v58 = vor.u32 %v8512_v26, %v7126_v44  ;;  %4498 = vmatpush.bf16.msrb.mxu2 %v7523_v11  ;;  %v7447_v44 = vor.u32 %v8592_v42, %v7446_v38  ;;  %v7302_v26 = vld [vmem:[#allocation9 + $0x448] sm:$0xf]  ;;  %v7696_v11 = vld [vmem:[#allocation9 + $0x770] sm:$0xf0]  ;;  %v6856_v38 = vld [vmem:[#allocation9 + $0xd8] sm:$0xf0] }
 0x229   :  { %v2740_v1 = vmax.f32 %v2723_v55, 0.0  ;;  %v8492_v55 = vld [vmem:[#allocation9 + $0x254] sm:$0xf0] }
 0x22a   :  { %4524 = vmatpush.bf16.msra.mxu0 %v6791_v34  ;;  %v7495_v34 = vor.u32 %v8604_v9, %v7494_v54  ;;  %v7303_v54 = vor.u32 %v8556_v36, %v7302_v26  ;;  %v7046_v9 = vld [vmem:[#allocation9 + $0x248] sm:$0xf]  ;;  %v8636_v36 = vld [vmem:[#allocation9 + $0x6d4] sm:$0xf0] }
 0x22b   :  { %v9329_v19 = vpack.c.bf16 %v2740_v1, %v2732_v4  ;;  %4499 = vmatmul.bf16.vlgmr.msrb.gmra.mxu2 %v9322_v21  ;;  %v7047_v4 = vor.u32 %v8492_v55, %v7046_v9  ;;  %v8649_v1 = vld [vmem:[#allocation9 + $0x744] sm:$0xf]  ;;  %v7622_v26 = vld [vmem:[#allocation9 + $0x6c8] sm:$0xf]  ;;  %v8628_v40 = vld [vmem:[#allocation9 + $0x694] sm:$0xf0] }
 0x22c   :  { %4538 = vmatpush.bf16.msra.mxu1 %v6919_v17  ;;  %v7478_v17 = vld [vmem:[#allocation9 + $0x5a8] sm:$0xf]  ;;  %4547 = vmatpush.bf16.msra.mxu2 %v7127_v58  ;;  %v7623_v9 = vor.u32 %v8636_v36, %v7622_v26  ;;  %v6904_v26 = vld [vmem:[#allocation9 + $0x138] sm:$0xf0] }
 0x22d   :  { %4401 = vmatmul.bf16.vlgmr.msrb.gmra.mxu3 %v9329_v19  ;;  %v7479_v22 = vor.u32 %v8600_v63, %v7478_v17  ;;  %v7270_v17 = vld [vmem:[#allocation9 + $0x408] sm:$0xf]  ;;  %v7415_v63 = vor.u32 %v8584_v61, %v7414_v62  ;;  %v8434_v61 = vld [vmem:[#allocation9 + $0x8c] sm:$0xf] }
 0x22e   :  { %4525 = vmatpush.bf16.msra.mxu0 %v6775_v18  ;;  %v8564_v18 = vld [vmem:[#allocation9 + $0x494] sm:$0xf0]  ;;  %4505 = vmatpush.bf16.msrb.mxu3 %v7763_v28  ;;  %v7238_v55 = vld [vmem:[#allocation9 + $0x3c8] sm:$0xf] }
 0x22f   :  { %v7335_v29 = vor.u32 %v8564_v18, %v7334_v49  ;;  %v8488_v28 = vld [vmem:[#allocation9 + $0x234] sm:$0xf0]  ;;  %v7664_v18 = vld [vmem:[#allocation9 + $0x730] sm:$0xf0] }
 0x230   :  { %4539 = vmatpush.bf16.msra.mxu1 %v6903_v23  ;;  %v8596_v23 = vld [vmem:[#allocation9 + $0x594] sm:$0xf0]  ;;  %4548 = vmatpush.bf16.msra.mxu2 %v7111_v27  ;;  %v7031_v49 = vor.u32 %v8488_v28, %v7030_v8  ;;  %v7222_v28 = vld [vmem:[#allocation9 + $0x3a8] sm:$0xf] }
 0x231   :  { %v7463_v13 = vor.u32 %v8596_v23, %v7462_v10  ;;  %v8548_v27 = vld [vmem:[#allocation9 + $0x414] sm:$0xf0]  ;;  %v7000_v10 = vld [vmem:[#allocation9 + $0x1f8] sm:$0xf0] }
 0x232   :  { %4526 = vmatpush.bf16.msra.mxu0 %v6759_v43  ;;  %4506 = vmatpush.bf16.msrb.mxu3 %v7747_v12  ;;  %v7079_v43 = vor.u32 %v8500_v33, %v7078_v47  ;;  %v8478_v12 = vld [vmem:[#allocation9 + $0x1ec] sm:$0xf]  ;;  %v7271_v23 = vor.u32 %v8548_v27, %v7270_v17  ;;  %v7638_v47 = vld [vmem:[#allocation9 + $0x6e8] sm:$0xf]  ;;  %v8640_v33 = vld [vmem:[#allocation9 + $0x6f4] sm:$0xf0] }
 0x233   :  { %v7003_v32 = vor.u32 %v8478_v12, %v7000_v10  ;;  %v8536_v17 = vld [vmem:[#allocation9 + $0x3b4] sm:$0xf0]  ;;  %v7590_v27 = vld [vmem:[#allocation9 + $0x688] sm:$0xf] }
 0x234   :  { %4540 = vmatpush.bf16.msra.mxu1 %v6887_v60  ;;  %4549 = vmatpush.bf16.msra.mxu2 %v7095_v56  ;;  %v7062_v60 = vld [vmem:[#allocation9 + $0x268] sm:$0xf]  ;;  %v8532_v10 = vld [vmem:[#allocation9 + $0x394] sm:$0xf0] }
 0x235   :  { %4527 = vmatmul.bf16.vlgmr.msra.gmra.mxu0 %v9298_v41  ;;  %v7014_v56 = vld [vmem:[#allocation9 + $0x208] sm:$0xf] }
 0x236   :  { %4575 = vmatpush.bf16.msrb.mxu0 %v7383_v48  ;;  %v8496_v48 = vld [vmem:[#allocation9 + $0x274] sm:$0xf0]  ;;  %4507 = vmatpush.bf16.msrb.mxu3 %v7731_v37  ;;  %v8442_v37 = vld [vmem:[#allocation9 + $0xcc] sm:$0xf]  ;;  %v7015_v42 = vor.u32 %v8484_v39, %v7014_v56  ;;  %v7206_v12 = vld [vmem:[#allocation9 + $0x388] sm:$0xf] }
 0x237   :  { %4541 = vmatmul.bf16.vlgmr.msra.gmra.mxu1 %v9300_v50  ;;  %v7063_v7 = vor.u32 %v8496_v48, %v7062_v60  ;;  %v7254_v60 = vld [vmem:[#allocation9 + $0x3e8] sm:$0xf]  ;;  %v8544_v48 = vld [vmem:[#allocation9 + $0x3f4] sm:$0xf0] }
 0x238   :  { %4589 = vmatpush.bf16.msrb.mxu1 %v7511_v53  ;;  %v7430_v53 = vld [vmem:[#allocation9 + $0x548] sm:$0xf]  ;;  %4550 = vmatpush.bf16.msra.mxu2 %v7079_v43  ;;  %v7648_v43 = vld [vmem:[#allocation9 + $0x710] sm:$0xf0]  ;;  %v8624_v39 = vld [vmem:[#allocation9 + $0x674] sm:$0xf0] }
 0x239   :  { %v7431_v58 = vor.u32 %v8588_v5, %v7430_v53  ;;  %v6987_v53 = vor.u32 %v8474_v52, %v6984_v46  ;;  %v8438_v5 = vld [vmem:[#allocation9 + $0xac] sm:$0xf]  ;;  %v7574_v56 = vld [vmem:[#allocation9 + $0x668] sm:$0xf]  ;;  %v8620_v52 = vld [vmem:[#allocation9 + $0x654] sm:$0xf0] }
 0x23a   :  { %4576 = vmatpush.bf16.msrb.mxu0 %v7367_v51  ;;  %4508 = vmatpush.bf16.msrb.mxu3 %v7715_v2  ;;  %v7699_v51 = vor.u32 %v8653_v6, %v7696_v11  ;;  %v7651_v2 = vor.u32 %v8641_v30, %v7648_v43  ;;  %v7255_v6 = vor.u32 %v8544_v48, %v7254_v60  ;;  %v8470_v11 = vld [vmem:[#allocation9 + $0x1ac] sm:$0xf]  ;;  %v7558_v43 = vld [vmem:[#allocation9 + $0x648] sm:$0xf]  ;;  %v6776_v60 = vld [vmem:[#allocation9 + $0x38] sm:$0xf0] }
 0x23b   :  { %v7575_v30 = vor.u32 %v8624_v39, %v7574_v56  ;;  %v7559_v36 = vor.u32 %v8620_v52, %v7558_v43  ;;  %v7766_v56 = vld [vmem:[#allocation9 + $0x7e8] sm:$0xf]  ;;  %v8672_v39 = vld [vmem:[#allocation9 + $0x7f4] sm:$0xf0] }
 0x23c   :  { %4590 = vmatpush.bf16.msrb.mxu1 %v7495_v34  ;;  %4551 = vmatpush.bf16.msra.mxu2 %v7063_v7  ;;  %v7680_v34 = vld [vmem:[#allocation9 + $0x750] sm:$0xf0]  ;;  %v6840_v7 = vld [vmem:[#allocation9 + $0xb8] sm:$0xf0]  ;;  %v7750_v52 = vld [vmem:[#allocation9 + $0x7c8] sm:$0xf] }
 0x23d   :  { %4457 = vmatmul.bf16.vlgmr.msra.gmra.mxu3 %v9305_v3  ;;  %v6843_v57 = vor.u32 %v8438_v5, %v6840_v7  ;;  %v7542_v7 = vld [vmem:[#allocation9 + $0x628] sm:$0xf] }
 0x23e   :  { %4577 = vmatpush.bf16.msrb.mxu0 %v7351_v0  ;;  %4509 = vmatpush.bf16.msrb.mxu3 %v7699_v51  ;;  %v7683_v0 = vor.u32 %v8649_v1, %v7680_v34  ;;  %v8632_v51 = vld [vmem:[#allocation9 + $0x6b4] sm:$0xf0]  ;;  %v8466_v34 = vld [vmem:[#allocation9 + $0x18c] sm:$0xf] }
 0x23f   :  { %v7607_v8 = vor.u32 %v8632_v51, %v7606_v59  ;;  %v7158_v59 = vld [vmem:[#allocation9 + $0x328] sm:$0xf]  ;;  %v8574_v51 = vld [vmem:[#allocation9 + $0x4ec] sm:$0xf] }
 0x240   :  { %4591 = vmatpush.bf16.msrb.mxu1 %v7479_v22  ;;  %v6872_v22 = vld [vmem:[#allocation9 + $0xf8] sm:$0xf0]  ;;  %4552 = vmatpush.bf16.msra.mxu2 %v7047_v4 }
 0x241   :  { %v6824_v4 = vld [vmem:[#allocation9 + $0x98] sm:$0xf0] }
 0x242   :  { %4578 = vmatpush.bf16.msrb.mxu0 %v7335_v29  ;;  %v6875_v29 = vor.u32 %v8446_v14, %v6872_v22  ;;  %4510 = vmatpush.bf16.msrb.mxu3 %v7683_v0  ;;  %v8430_v0 = vld [vmem:[#allocation9 + $0x6c] sm:$0xf]  ;;  %v7223_v14 = vor.u32 %v8536_v17, %v7222_v28  ;;  %v8612_v28 = vld [vmem:[#allocation9 + $0x614] sm:$0xf0] }
 0x243   :  { %v8462_v22 = vld [vmem:[#allocation9 + $0x16c] sm:$0xf] }
 0x244   :  { %4592 = vmatpush.bf16.msrb.mxu1 %v7463_v13  ;;  %v7667_v13 = vor.u32 %v8645_v20, %v7664_v18  ;;  %4553 = vmatpush.bf16.msra.mxu2 %v7031_v49  ;;  %v6808_v20 = vld [vmem:[#allocation9 + $0x78] sm:$0xf0]  ;;  %v7591_v18 = vor.u32 %v8628_v40, %v7590_v27  ;;  %v8510_v27 = vld [vmem:[#allocation9 + $0x2ec] sm:$0xf] }
 0x245   :  { %v6936_v49 = vld [vmem:[#allocation9 + $0x178] sm:$0xf0] }
 0x246   :  { %4579 = vmatpush.bf16.msrb.mxu0 %v7319_v16  ;;  %v7639_v16 = vor.u32 %v8640_v33, %v7638_v47  ;;  %4511 = vmatpush.bf16.msrb.mxu3 %v7667_v13  ;;  %v6792_v47 = vld [vmem:[#allocation9 + $0x58] sm:$0xf0]  ;;  %v7207_v33 = vor.u32 %v8532_v10, %v7206_v12  ;;  %v8458_v13 = vld [vmem:[#allocation9 + $0x14c] sm:$0xf] }
 0x247   :  { %v7128_v40 = vld [vmem:[#allocation9 + $0x2f8] sm:$0xf0]  ;;  %v8602_v12 = vld [vmem:[#allocation9 + $0x5cc] sm:$0xf] }
 0x248   :  { %4593 = vmatpush.bf16.msrb.mxu1 %v7447_v44  ;;  %v6859_v44 = vor.u32 %v8442_v37, %v6856_v38  ;;  %4554 = vmatpush.bf16.msra.mxu2 %v7015_v42  ;;  %v7190_v37 = vld [vmem:[#allocation9 + $0x368] sm:$0xf]  ;;  %v8528_v38 = vld [vmem:[#allocation9 + $0x374] sm:$0xf0]  ;;  %v7496_v10 = vld [vmem:[#allocation9 + $0x5d8] sm:$0xf0] }
 0x249   :  { %v7191_v48 = vor.u32 %v8528_v38, %v7190_v37  ;;  %v7767_v37 = vor.u32 %v8672_v39, %v7766_v56  ;;  %v8598_v38 = vld [vmem:[#allocation9 + $0x5ac] sm:$0xf]  ;;  %v7416_v39 = vld [vmem:[#allocation9 + $0x538] sm:$0xf0] }
 0x24a   :  { %4580 = vmatpush.bf16.msrb.mxu0 %v7303_v54  ;;  %v6968_v54 = vld [vmem:[#allocation9 + $0x1b8] sm:$0xf0]  ;;  %4512 = vmatpush.bf16.msrb.mxu3 %v7651_v2  ;;  %v7174_v2 = vld [vmem:[#allocation9 + $0x348] sm:$0xf]  ;;  %v8582_v56 = vld [vmem:[#allocation9 + $0x52c] sm:$0xf] }
 0x24b   :  { %v6971_v62 = vor.u32 %v8470_v11, %v6968_v54  ;;  %4555 = vmatmul.bf16.vlgmr.msra.gmra.mxu2 %v9302_v15  ;;  %v8418_v11 = vld [vmem:[#allocation9 + $0xc] sm:$0xf] }
 0x24c   :  { %4594 = vmatpush.bf16.msrb.mxu1 %v7431_v58  ;;  %4603 = vmatpush.bf16.msrb.mxu2 %v7639_v16  ;;  %v8540_v58 = vld [vmem:[#allocation9 + $0x3d4] sm:$0xf0]  ;;  %v8422_v16 = vld [vmem:[#allocation9 + $0x2c] sm:$0xf] }
 0x24d   :  { %v7239_v1 = vor.u32 %v8540_v58, %v7238_v55  ;;  %4513 = vmatmul.bf16.vlgmr.msrb.gmra.mxu3 %v9329_v19  ;;  %v6779_v5 = vor.u32 %v8422_v16, %v6776_v60  ;;  %v8450_v55 = vld [vmem:[#allocation9 + $0x10c] sm:$0xf]  ;;  %v6888_v58 = vld [vmem:[#allocation9 + $0x118] sm:$0xf0] }
 0x24e   :  { %4581 = vmatpush.bf16.msrb.mxu0 %v7287_v25  ;;  %4561 = vmatpush.bf16.msra.mxu3 %v7255_v6  ;;  %v6952_v25 = vld [vmem:[#allocation9 + $0x198] sm:$0xf0]  ;;  %v8616_v6 = vld [vmem:[#allocation9 + $0x634] sm:$0xf0]  ;;  %v6891_v17 = vor.u32 %v8450_v55, %v6888_v58  ;;  %v8502_v60 = vld [vmem:[#allocation9 + $0x2ac] sm:$0xf] }
 0x24f   :  { %v6955_v35 = vor.u32 %v8466_v34, %v6952_v25  ;;  %v7512_v34 = vld [vmem:[#allocation9 + $0x5f8] sm:$0xf0]  ;;  %v8558_v55 = vld [vmem:[#allocation9 + $0x46c] sm:$0xf] }
 0x250   :  { %4595 = vmatpush.bf16.msrb.mxu1 %v7415_v63  ;;  %4604 = vmatpush.bf16.msrb.mxu2 %v7623_v9  ;;  %v6827_v63 = vor.u32 %v8434_v61, %v6824_v4  ;;  %v6760_v9 = vld [vmem:[#allocation9 + $0x18] sm:$0xf0]  ;;  %v7543_v61 = vor.u32 %v8616_v6, %v7542_v7  ;;  %v8520_v4 = vld [vmem:[#allocation9 + $0x334] sm:$0xf0] }
 0x251   :  { %v6763_v25 = vor.u32 %v8418_v11, %v6760_v9  ;;  %v8664_v7 = vld [vmem:[#allocation9 + $0x7b4] sm:$0xf0]  ;;  %v8498_v11 = vld [vmem:[#allocation9 + $0x28c] sm:$0xf]  ;;  %v7320_v58 = vld [vmem:[#allocation9 + $0x478] sm:$0xf0] }
 0x252   :  { %4582 = vmatpush.bf16.msrb.mxu0 %v7271_v23  ;;  %4562 = vmatpush.bf16.msra.mxu3 %v7239_v1  ;;  %v6811_v23 = vor.u32 %v8430_v0, %v6808_v20  ;;  %v8606_v1 = vld [vmem:[#allocation9 + $0x5ec] sm:$0xf]  ;;  %v7142_v20 = vld [vmem:[#allocation9 + $0x308] sm:$0xf] }
 0x253   :  { %v7515_v0 = vor.u32 %v8606_v1, %v7512_v34  ;;  %v7323_v1 = vor.u32 %v8558_v55, %v7320_v58  ;;  %v8494_v34 = vld [vmem:[#allocation9 + $0x26c] sm:$0xf]  ;;  %v8644_v55 = vld [vmem:[#allocation9 + $0x714] sm:$0xf0] }
 0x254   :  { %4596 = vmatpush.bf16.msrb.mxu1 %v7399_v24  ;;  %4605 = vmatpush.bf16.msrb.mxu2 %v7607_v8  ;;  %v6939_v24 = vor.u32 %v8462_v22, %v6936_v49  ;;  %v7526_v8 = vld [vmem:[#allocation9 + $0x608] sm:$0xf]  ;;  %v7368_v22 = vld [vmem:[#allocation9 + $0x4d8] sm:$0xf0] }
 0x255   :  { %4583 = vmatmul.bf16.vlgmr.msrb.gmra.mxu0 %v9313_v45  ;;  %v7527_v49 = vor.u32 %v8612_v28, %v7526_v8  ;;  %v8554_v28 = vld [vmem:[#allocation9 + $0x44c] sm:$0xf] }
 0x256   :  { %4631 = vmatpush.bf16.msra.mxu0 %v6875_v29  ;;  %v8426_v29 = vld [vmem:[#allocation9 + $0x4c] sm:$0xf]  ;;  %4563 = vmatpush.bf16.msra.mxu3 %v7223_v14 }
 0x257   :  { %4597 = vmatmul.bf16.vlgmr.msrb.gmra.mxu1 %v9316_v31  ;;  %v6795_v42 = vor.u32 %v8426_v29, %v6792_v47  ;;  %v8570_v14 = vld [vmem:[#allocation9 + $0x4cc] sm:$0xf]  ;;  %v7112_v47 = vld [vmem:[#allocation9 + $0x2d8] sm:$0xf0] }
 0x258   :  { %4645 = vmatpush.bf16.msra.mxu1 %v7003_v32  ;;  %v6920_v32 = vld [vmem:[#allocation9 + $0x158] sm:$0xf0]  ;;  %4606 = vmatpush.bf16.msrb.mxu2 %v7591_v18  ;;  %v8516_v18 = vld [vmem:[#allocation9 + $0x314] sm:$0xf0]  ;;  %v8506_v29 = vld [vmem:[#allocation9 + $0x2cc] sm:$0xf] }
 0x259   :  { %v6923_v46 = vor.u32 %v8458_v13, %v6920_v32  ;;  %v7499_v13 = vor.u32 %v8602_v12, %v7496_v10  ;;  %v8566_v32 = vld [vmem:[#allocation9 + $0x4ac] sm:$0xf]  ;;  %v7115_v43 = vor.u32 %v8506_v29, %v7112_v47  ;;  %v7288_v10 = vld [vmem:[#allocation9 + $0x438] sm:$0xf0]  ;;  %v7686_v29 = vld [vmem:[#allocation9 + $0x748] sm:$0xf] }
 0x25a   :  { %4632 = vmatpush.bf16.msra.mxu0 %v6859_v44  ;;  %4564 = vmatpush.bf16.msra.mxu3 %v7207_v33  ;;  %v8454_v44 = vld [vmem:[#allocation9 + $0x12c] sm:$0xf]  ;;  %v7143_v33 = vor.u32 %v8516_v18, %v7142_v20  ;;  %v8656_v20 = vld [vmem:[#allocation9 + $0x774] sm:$0xf0] }
 0x25b   :  { %v6907_v54 = vor.u32 %v8454_v44, %v6904_v26  ;;  %v8562_v26 = vld [vmem:[#allocation9 + $0x48c] sm:$0xf]  ;;  %v8652_v47 = vld [vmem:[#allocation9 + $0x754] sm:$0xf0] }
 0x25c   :  { %4646 = vmatpush.bf16.msra.mxu1 %v6987_v53  ;;  %4607 = vmatpush.bf16.msrb.mxu2 %v7575_v30  ;;  %v8524_v53 = vld [vmem:[#allocation9 + $0x354] sm:$0xf0]  ;;  %v7352_v30 = vld [vmem:[#allocation9 + $0x4b8] sm:$0xf0]  ;;  %v8550_v12 = vld [vmem:[#allocation9 + $0x42c] sm:$0xf] }
 0x25d   :  { %v7355_v16 = vor.u32 %v8566_v32, %v7352_v30  ;;  %v7032_v32 = vld [vmem:[#allocation9 + $0x238] sm:$0xf0]  ;;  %v7419_v30 = vor.u32 %v8582_v56, %v7416_v39  ;;  %v8530_v56 = vld [vmem:[#allocation9 + $0x38c] sm:$0xf] }
 0x25e   :  { %4633 = vmatpush.bf16.msra.mxu0 %v6843_v57  ;;  %4565 = vmatpush.bf16.msra.mxu3 %v7191_v48  ;;  %v7175_v57 = vor.u32 %v8524_v53, %v7174_v2  ;;  %v7096_v48 = vld [vmem:[#allocation9 + $0x2b8] sm:$0xf0]  ;;  %v8594_v2 = vld [vmem:[#allocation9 + $0x58c] sm:$0xf] }
 0x25f   :  { %v7464_v53 = vld [vmem:[#allocation9 + $0x598] sm:$0xf0] }
 0x260   :  { %4647 = vmatpush.bf16.msra.mxu1 %v6971_v62  ;;  %v7384_v62 = vld [vmem:[#allocation9 + $0x4f8] sm:$0xf0]  ;;  %4608 = vmatpush.bf16.msrb.mxu2 %v7559_v36  ;;  %v7467_v9 = vor.u32 %v8594_v2, %v7464_v53  ;;  %v8638_v53 = vld [vmem:[#allocation9 + $0x6ec] sm:$0xf] }
 0x261   :  { %v7336_v36 = vld [vmem:[#allocation9 + $0x498] sm:$0xf0] }
 0x262   :  { %4634 = vmatpush.bf16.msra.mxu0 %v6827_v63  ;;  %v7387_v63 = vor.u32 %v8574_v51, %v7384_v62  ;;  %4566 = vmatpush.bf16.msra.mxu3 %v7175_v57  ;;  %v7339_v6 = vor.u32 %v8562_v26, %v7336_v36  ;;  %v7448_v51 = vld [vmem:[#allocation9 + $0x578] sm:$0xf0]  ;;  %v8482_v36 = vld [vmem:[#allocation9 + $0x20c] sm:$0xf] }
 0x263   :  { %v7208_v39 = vld [vmem:[#allocation9 + $0x398] sm:$0xf0] }
 0x264   :  { %4648 = vmatpush.bf16.msra.mxu1 %v6955_v35  ;;  %v7159_v35 = vor.u32 %v8520_v4, %v7158_v59  ;;  %4609 = vmatpush.bf16.msrb.mxu2 %v7543_v61  ;;  %v8590_v59 = vld [vmem:[#allocation9 + $0x56c] sm:$0xf]  ;;  %v7718_v61 = vld [vmem:[#allocation9 + $0x788] sm:$0xf]  ;;  %v8660_v4 = vld [vmem:[#allocation9 + $0x794] sm:$0xf0] }
 0x265   :  { %v7451_v8 = vor.u32 %v8590_v59, %v7448_v51  ;;  %v7256_v59 = vld [vmem:[#allocation9 + $0x3f8] sm:$0xf0]  ;;  %v8634_v51 = vld [vmem:[#allocation9 + $0x6cc] sm:$0xf] }
 0x266   :  { %4635 = vmatpush.bf16.msra.mxu0 %v6811_v23  ;;  %v7131_v23 = vor.u32 %v8510_v27, %v7128_v40  ;;  %4567 = vmatpush.bf16.msra.mxu3 %v7159_v35  ;;  %v8586_v27 = vld [vmem:[#allocation9 + $0x54c] sm:$0xf]  ;;  %v7432_v40 = vld [vmem:[#allocation9 + $0x558] sm:$0xf0] }
 0x267   :  { %v7435_v18 = vor.u32 %v8586_v27, %v7432_v40  ;;  %v7608_v27 = vld [vmem:[#allocation9 + $0x6b8] sm:$0xf0] }
 0x268   :  { %4649 = vmatpush.bf16.msra.mxu1 %v6939_v24  ;;  %v7371_v24 = vor.u32 %v8570_v14, %v7368_v22  ;;  %4610 = vmatpush.bf16.msrb.mxu2 %v7527_v49  ;;  %v8490_v22 = vld [vmem:[#allocation9 + $0x24c] sm:$0xf]  ;;  %v7048_v49 = vld [vmem:[#allocation9 + $0x258] sm:$0xf0] }
 0x26a   :  { %4636 = vmatpush.bf16.msra.mxu0 %v6795_v42  ;;  %v7480_v42 = vld [vmem:[#allocation9 + $0x5b8] sm:$0xf0]  ;;  %4568 = vmatpush.bf16.msra.mxu3 %v7143_v33  ;;  %v7291_v33 = vor.u32 %v8550_v12, %v7288_v10  ;;  %v7798_v12 = vld [vmem:[#allocation12 + $0x30] sm:$0xf] }
 0x26b   :  { %v7483_v44 = vor.u32 %v8598_v38, %v7480_v42  ;;  %4611 = vmatmul.bf16.vlgmr.msrb.gmra.mxu2 %v9322_v21  ;;  %v7272_v38 = vld [vmem:[#allocation9 + $0x418] sm:$0xf0]  ;;  %v8578_v42 = vld [vmem:[#allocation9 + $0x50c] sm:$0xf] }
 0x26c   :  { %4650 = vmatpush.bf16.msra.mxu1 %v6923_v46  ;;  %4659 = vmatpush.bf16.msra.mxu2 %v7131_v23  ;;  %v8668_v46 = vld [vmem:[#allocation9 + $0x7d4] sm:$0xf0]  ;;  %v8680_v10 = vld [vmem:[#allocation12 + $0x34] sm:$0xf0] }
 0x26d   :  { %4569 = vmatmul.bf16.vlgmr.msra.gmra.mxu3 %v9305_v3 }
 0x26e   :  { %4637 = vmatpush.bf16.msra.mxu0 %v6779_v5  ;;  %4617 = vmatpush.bf16.msrb.mxu3 %v7767_v37  ;;  %v7734_v5 = vld [vmem:[#allocation9 + $0x7a8] sm:$0xf]  ;;  %v8546_v37 = vld [vmem:[#allocation9 + $0x40c] sm:$0xf] }
 0x26f   :  { %v7735_v57 = vor.u32 %v8664_v7, %v7734_v5  ;;  %v7275_v26 = vor.u32 %v8546_v37, %v7272_v38  ;;  %v9349_v37 = vpop.f32.mrf.mxu1 }
 0x270   :  { %4651 = vmatpush.bf16.msra.mxu1 %v6907_v54  ;;  %4660 = vmatpush.bf16.msra.mxu2 %v7115_v43  ;;  %v7080_v54 = vld [vmem:[#allocation9 + $0x298] sm:$0xf0]  ;;  %v7687_v43 = vor.u32 %v8652_v47, %v7686_v29  ;;  %v7799_v47 = vor.u32 %v8680_v10, %v7798_v12  ;;  %v9357_v12 = vld [vmem:[#allocation11] sm:$0xf] }
 0x271   :  { %v7083_v62 = vor.u32 %v8498_v11, %v7080_v54  ;;  %v8686_v11 = vld [vmem:[#allocation12 + $0x64] sm:$0xf0]  ;;  %v7576_v29 = vld [vmem:[#allocation9 + $0x678] sm:$0xf0] }
 0x272   :  { %4638 = vmatpush.bf16.msra.mxu0 %v6763_v25  ;;  %v7064_v25 = vld [vmem:[#allocation9 + $0x278] sm:$0xf0] }
 0x273   :  { %v7067_v35 = vor.u32 %v8494_v34, %v7064_v25  ;;  %v8684_v34 = vld [vmem:[#allocation12 + $0x54] sm:$0xf0] }
 0x274   :  { %4652 = vmatpush.bf16.msra.mxu1 %v6891_v17  ;;  %v7304_v17 = vld [vmem:[#allocation9 + $0x458] sm:$0xf0] }
 0x275   :  { %4639 = vmatmul.bf16.vlgmr.msra.gmra.mxu0 %v9298_v41  ;;  %v7751_v41 = vor.u32 %v8668_v46, %v7750_v52  ;;  %v7307_v14 = vor.u32 %v8554_v28, %v7304_v17  ;;  %v7400_v52 = vld [vmem:[#allocation9 + $0x518] sm:$0xf0]  ;;  %v7830_v46 = vld [vmem:[#allocation12 + $0x70] sm:$0xf]  ;;  %v8538_v28 = vld [vmem:[#allocation9 + $0x3cc] sm:$0xf] }
 0x276   :  { %4687 = vmatpush.bf16.msrb.mxu0 %v7387_v63  ;;  %v7719_v63 = vor.u32 %v8660_v4, %v7718_v61  ;;  %v7403_v2 = vor.u32 %v8578_v42, %v7400_v52  ;;  %v7240_v17 = vld [vmem:[#allocation9 + $0x3d8] sm:$0xf0]  ;;  %v8526_v42 = vld [vmem:[#allocation9 + $0x36c] sm:$0xf] }
 0x277   :  { %4653 = vmatmul.bf16.vlgmr.msra.gmra.mxu1 %v9300_v50  ;;  %v7099_v50 = vor.u32 %v8502_v60, %v7096_v48  ;;  %4618 = vmatpush.bf16.msrb.mxu3 %v7751_v41  ;;  %v7670_v48 = vld [vmem:[#allocation9 + $0x728] sm:$0xf]  ;;  %v7016_v41 = vld [vmem:[#allocation9 + $0x218] sm:$0xf0]  ;;  %v8618_v52 = vld [vmem:[#allocation9 + $0x64c] sm:$0xf] }
 0x278   :  { %4701 = vmatpush.bf16.msrb.mxu1 %v7515_v0  ;;  %v7702_v0 = vld [vmem:[#allocation9 + $0x768] sm:$0xf]  ;;  %v7019_v54 = vor.u32 %v8482_v36, %v7016_v41  ;;  %v8704_v36 = vld [vmem:[#allocation12 + $0xf4] sm:$0xf0]  ;;  %v9351_v41 = vpop.f32.mrf.mxu2 }
 0x279   :  { %4661 = vmatpush.bf16.msra.mxu2 %v7099_v50  ;;  %v7703_v23 = vor.u32 %v8656_v20, %v7702_v0  ;;  %v7640_v50 = vld [vmem:[#allocation9 + $0x6f8] sm:$0xf0]  ;;  %v8682_v0 = vld [vmem:[#allocation12 + $0x44] sm:$0xf0]  ;;  %v7243_v20 = vor.u32 %v8538_v28, %v7240_v17  ;;  %v9355_v17 = vpop.f32.mrf.mxu1 }
 0x27a   :  { %4688 = vmatpush.bf16.msrb.mxu0 %v7371_v24  ;;  %v7051_v24 = vor.u32 %v8490_v22, %v7048_v49  ;;  %v7643_v58 = vor.u32 %v8638_v53, %v7640_v50  ;;  %v7224_v22 = vld [vmem:[#allocation9 + $0x3b8] sm:$0xf0]  ;;  %v8522_v53 = vld [vmem:[#allocation9 + $0x34c] sm:$0xf] }
 0x27b   :  { %4619 = vmatpush.bf16.msrb.mxu3 %v7735_v57  ;;  %v8542_v57 = vld [vmem:[#allocation9 + $0x3ec] sm:$0xf]  ;;  %v7592_v49 = vld [vmem:[#allocation9 + $0x698] sm:$0xf0] }
 0x27c   :  { %4702 = vmatpush.bf16.msrb.mxu1 %v7499_v13  ;;  %v8486_v13 = vld [vmem:[#allocation9 + $0x22c] sm:$0xf]  ;;  %v7259_v25 = vor.u32 %v8542_v57, %v7256_v59  ;;  %v7176_v50 = vld [vmem:[#allocation9 + $0x358] sm:$0xf0]  ;;  %v7832_v57 = vld [vmem:[#allocation12 + $0x78] sm:$0xf0] }
 0x27d   :  { %4662 = vmatpush.bf16.msra.mxu2 %v7083_v62  ;;  %v7035_v60 = vor.u32 %v8486_v13, %v7032_v32  ;;  %v7624_v62 = vld [vmem:[#allocation9 + $0x6d8] sm:$0xf0]  ;;  %v8678_v13 = vld [vmem:[#allocation12 + $0x24] sm:$0xf0]  ;;  %v7211_v32 = vor.u32 %v8530_v56, %v7208_v39  ;;  %v7886_v59 = vld [vmem:[#allocation12 + $0xe0] sm:$0xf] }
 0x27e   :  { %4689 = vmatpush.bf16.msrb.mxu0 %v7355_v16  ;;  %v8688_v16 = vld [vmem:[#allocation12 + $0x74] sm:$0xf0]  ;;  %v7816_v39 = vld [vmem:[#allocation12 + $0x58] sm:$0xf0] }
 0x27f   :  { %4620 = vmatpush.bf16.msrb.mxu3 %v7719_v63  ;;  %v7831_v5 = vor.u32 %v8688_v16, %v7830_v46  ;;  %v8630_v63 = vld [vmem:[#allocation9 + $0x6ac] sm:$0xf]  ;;  %v7560_v46 = vld [vmem:[#allocation9 + $0x658] sm:$0xf0] }
 0x280   :  { %4703 = vmatpush.bf16.msrb.mxu1 %v7483_v44  ;;  %v8648_v44 = vld [vmem:[#allocation9 + $0x734] sm:$0xf0]  ;;  %v9359_v10 = vpop.f32.mrf.mxu2 }
 0x281   :  { %4663 = vmatpush.bf16.msra.mxu2 %v7067_v35  ;;  %v7671_v7 = vor.u32 %v8648_v44, %v7670_v48  ;;  %v7806_v35 = vld [vmem:[#allocation12 + $0x40] sm:$0xf]  ;;  %v8676_v48 = vld [vmem:[#allocation12 + $0x14] sm:$0xf0] }
 0x282   :  { %4690 = vmatpush.bf16.msrb.mxu0 %v7339_v6  ;;  %v7822_v6 = vld [vmem:[#allocation12 + $0x60] sm:$0xf] }
 0x283   :  { %4621 = vmatpush.bf16.msrb.mxu3 %v7703_v23  ;;  %v7823_v61 = vor.u32 %v8686_v11, %v7822_v6  ;;  %v7544_v6 = vld [vmem:[#allocation9 + $0x638] sm:$0xf0] }
 0x284   :  { %4704 = vmatpush.bf16.msrb.mxu1 %v7467_v9  ;;  %v7654_v9 = vld [vmem:[#allocation9 + $0x708] sm:$0xf] }
 0x285   :  { %4664 = vmatpush.bf16.msra.mxu2 %v7051_v24  ;;  %v7655_v4 = vor.u32 %v8644_v55, %v7654_v9  ;;  %v8622_v24 = vld [vmem:[#allocation9 + $0x66c] sm:$0xf]  ;;  %v8687_v55 = vld [vmem:[#allocation12 + $0x74] sm:$0xf] }
 0x286   :  { %4691 = vmatpush.bf16.msrb.mxu0 %v7323_v1  ;;  %v7814_v1 = vld [vmem:[#allocation12 + $0x50] sm:$0xf]  ;;  %v7579_v38 = vor.u32 %v8622_v24, %v7576_v29  ;;  %v8674_v9 = vld [vmem:[#allocation12 + $0x4] sm:$0xf0]  ;;  %v7870_v24 = vld [vmem:[#allocation12 + $0xc0] sm:$0xf] }
 0x287   :  { %4622 = vmatpush.bf16.msrb.mxu3 %v7687_v43  ;;  %v7815_v40 = vor.u32 %v8684_v34, %v7814_v1  ;;  %v7192_v43 = vld [vmem:[#allocation9 + $0x378] sm:$0xf0]  ;;  %v8610_v34 = vld [vmem:[#allocation9 + $0x60c] sm:$0xf] }
 0x288   :  { %4705 = vmatpush.bf16.msrb.mxu1 %v7451_v8  ;;  %v7627_v8 = vor.u32 %v8634_v51, %v7624_v62  ;;  %v7195_v44 = vor.u32 %v8526_v42, %v7192_v43  ;;  %v8702_v51 = vld [vmem:[#allocation12 + $0xe4] sm:$0xf0]  ;;  %v3007_v42 = vperm.slane %v9357_v12, 0 }
 0x289   :  { %4665 = vmatpush.bf16.msra.mxu2 %v7035_v60  ;;  %v7782_v60 = vld [vmem:[#allocation12 + $0x10] sm:$0xf]  ;;  %v7887_v1 = vor.u32 %v8702_v51, %v7886_v59  ;;  %v8698_v29 = vld [vmem:[#allocation12 + $0xc4] sm:$0xf0]  ;;  %v7720_v59 = vld [vmem:[#allocation9 + $0x798] sm:$0xf0] }
 0x28a   :  { %4692 = vmatpush.bf16.msrb.mxu0 %v7307_v14  ;;  %v8534_v14 = vld [vmem:[#allocation9 + $0x3ac] sm:$0xf]  ;;  %v7783_v11 = vor.u32 %v8676_v48, %v7782_v60  ;;  %v7808_v60 = vld [vmem:[#allocation12 + $0x48] sm:$0xf0]  ;;  %v7862_v48 = vld [vmem:[#allocation12 + $0xb0] sm:$0xf] }
 0x28b   :  { %4623 = vmatpush.bf16.msrb.mxu3 %v7671_v7  ;;  %v7227_v23 = vor.u32 %v8534_v14, %v7224_v22  ;;  %v8614_v7 = vld [vmem:[#allocation9 + $0x62c] sm:$0xf]  ;;  %v7144_v22 = vld [vmem:[#allocation9 + $0x318] sm:$0xf0] }
 0x28c   :  { %4706 = vmatpush.bf16.msrb.mxu1 %v7435_v18  ;;  %v7807_v18 = vor.u32 %v8682_v0, %v7806_v35  ;;  %v7547_v62 = vor.u32 %v8614_v7, %v7544_v6  ;;  %v7824_v35 = vld [vmem:[#allocation12 + $0x68] sm:$0xf0]  ;;  %v7878_v0 = vld [vmem:[#allocation12 + $0xd0] sm:$0xf]  ;;  %v8514_v14 = vld [vmem:[#allocation9 + $0x30c] sm:$0xf] }
 0x28d   :  { %4666 = vmatpush.bf16.msra.mxu2 %v7019_v54  ;;  %v7774_v54 = vld [vmem:[#allocation12] sm:$0xf]  ;;  %v7147_v56 = vor.u32 %v8514_v14, %v7144_v22  ;;  %v8679_v7 = vld [vmem:[#allocation12 + $0x34] sm:$0xf]  ;;  %v8690_v22 = vld [vmem:[#allocation12 + $0x84] sm:$0xf0] }
 0x28e   :  { %4693 = vmatpush.bf16.msrb.mxu0 %v7291_v33  ;;  %v7790_v33 = vld [vmem:[#allocation12 + $0x20] sm:$0xf] }
 0x28f   :  { %4624 = vmatpush.bf16.msrb.mxu3 %v7655_v4  ;;  %v7791_v16 = vor.u32 %v8678_v13, %v7790_v33  ;;  %v7160_v4 = vld [vmem:[#allocation9 + $0x338] sm:$0xf0]  ;;  %v7871_v13 = vor.u32 %v8698_v29, %v7870_v24  ;;  %v7838_v14 = vld [vmem:[#allocation12 + $0x80] sm:$0xf] }
 0x290   :  { %4707 = vmatpush.bf16.msrb.mxu1 %v7419_v30  ;;  %4667 = vmatmul.bf16.vlgmr.msra.gmra.mxu2 %v9302_v15  ;;  %v9347_v30 = vpop.f32.mrf.mxu0 }
 0x291   :  { %4715 = vmatpush.bf16.msrb.mxu2 %v7643_v58  ;;  %v7179_v58 = vor.u32 %v8522_v53, %v7176_v50  ;;  %v7736_v53 = vld [vmem:[#allocation9 + $0x7b8] sm:$0xf0]  ;;  %v9369_v50 = vpop.f32.mrf.mxu2  ;;  %v4305_v6 = vadd.f32 %v9347_v30, %v3007_v42  ;;  %v7846_v30 = vld [vmem:[#allocation12 + $0x90] sm:$0xf] }
 0x292   :  { %4694 = vmatpush.bf16.msrb.mxu0 %v7275_v26  ;;  %4625 = vmatmul.bf16.vlgmr.msrb.gmra.mxu3 %v9329_v19  ;;  %v7894_v26 = vld [vmem:[#allocation12 + $0xf0] sm:$0xf] }
 0x293   :  { %4673 = vmatpush.bf16.msra.mxu3 %v7259_v25  ;;  %v7528_v25 = vld [vmem:[#allocation9 + $0x618] sm:$0xf0] }
 0x294   :  { %4708 = vmatpush.bf16.msrb.mxu1 %v7403_v2  ;;  %v7563_v2 = vor.u32 %v8618_v52, %v7560_v46  ;;  %v9366_v52 = vpop.f32.mrf.mxu1 }
 0x295   :  { %4695 = vmatmul.bf16.vlgmr.msrb.gmra.mxu0 %v9313_v45  ;;  %4716 = vmatpush.bf16.msrb.mxu2 %v7627_v8  ;;  %v7611_v45 = vor.u32 %v8630_v63, %v7608_v27  ;;  %v7775_v8 = vor.u32 %v8674_v9, %v7774_v54  ;;  %v7835_v63 = vor.u32 %v8687_v55, %v7832_v57  ;;  %v8685_v27 = vld [vmem:[#allocation12 + $0x64] sm:$0xf]  ;;  %v8694_v54 = vld [vmem:[#allocation12 + $0xa4] sm:$0xf0] }
 0x296   :  { %5145 = vmatpush.bf16.msra.mxu0 %v7831_v5  ;;  %v7895_v5 = vor.u32 %v8704_v36, %v7894_v26  ;;  %v8658_v57 = vld [vmem:[#allocation9 + $0x78c] sm:$0xf] }
 0x297   :  { %4709 = vmatmul.bf16.vlgmr.msrb.gmra.mxu1 %v9316_v31  ;;  %v8626_v31 = vld [vmem:[#allocation9 + $0x68c] sm:$0xf]  ;;  %4674 = vmatpush.bf16.msra.mxu3 %v7243_v20  ;;  %v8700_v20 = vld [vmem:[#allocation12 + $0xd4] sm:$0xf0] }
 0x298   :  { %v7595_v15 = vor.u32 %v8626_v31, %v7592_v49  ;;  %5159 = vmatpush.bf16.msra.mxu1 %v7895_v5  ;;  %v9353_v28 = vpop.f32.mrf.mxu0  ;;  %v7879_v31 = vor.u32 %v8700_v20, %v7878_v0  ;;  %v8670_v49 = vld [vmem:[#allocation9 + $0x7ec] sm:$0xf]  ;;  %v8675_v20 = vld [vmem:[#allocation12 + $0x14] sm:$0xf] }
 0x299   :  { %4717 = vmatpush.bf16.msrb.mxu2 %v7611_v45  ;;  %v7531_v45 = vor.u32 %v8610_v34, %v7528_v25 }
 0x29a   :  { %5146 = vmatpush.bf16.msra.mxu0 %v7823_v61  ;;  %v8518_v61 = vld [vmem:[#allocation9 + $0x32c] sm:$0xf] }
 0x29b   :  { %4675 = vmatpush.bf16.msra.mxu3 %v7227_v23  ;;  %v7827_v23 = vor.u32 %v8685_v27, %v7824_v35  ;;  %v7704_v35 = vld [vmem:[#allocation9 + $0x778] sm:$0xf0] }
 0x29c   :  { %5160 = vmatpush.bf16.msra.mxu1 %v7887_v1  ;;  %v8692_v1 = vld [vmem:[#allocation12 + $0x94] sm:$0xf0]  ;;  %v4376_v25 = vpop.f32.mrf.mxu1 }
 0x29d   :  { %4718 = vmatpush.bf16.msrb.mxu2 %v7595_v15  ;;  %v8683_v15 = vld [vmem:[#allocation12 + $0x54] sm:$0xf] }
 0x29e   :  { %5147 = vmatpush.bf16.msra.mxu0 %v7815_v40  ;;  %v7163_v40 = vor.u32 %v8518_v61, %v7160_v4  ;;  %v7819_v46 = vor.u32 %v8683_v15, %v7816_v39  ;;  %v4319_v61 = vadd.f32 %v9349_v37, %v4305_v6  ;;  %v7792_v4 = vld [vmem:[#allocation12 + $0x28] sm:$0xf0]  ;;  %v7896_v15 = vld [vmem:[#allocation12 + $0xf8] sm:$0xf0] }
 0x29f   :  { %4676 = vmatpush.bf16.msra.mxu3 %v7211_v32  ;;  %v8666_v32 = vld [vmem:[#allocation9 + $0x7cc] sm:$0xf]  ;;  %v7880_v6 = vld [vmem:[#allocation12 + $0xd8] sm:$0xf0] }
 0x2a0   :  { %5161 = vmatpush.bf16.msra.mxu1 %v7879_v31  ;;  %v9364_v43 = vpop.f32.mrf.mxu0  ;;  %v4333_v27 = vadd.f32 %v9351_v41, %v4319_v61  ;;  %v4390_v31 = vpop.f32.mrf.mxu2 }
 0x2a1   :  { %4719 = vmatpush.bf16.msrb.mxu2 %v7579_v38  ;;  %v7752_v38 = vld [vmem:[#allocation9 + $0x7d8] sm:$0xf0] }
 0x2a2   :  { %5148 = vmatpush.bf16.msra.mxu0 %v7807_v18  ;;  %v7768_v18 = vld [vmem:[#allocation9 + $0x7f8] sm:$0xf0]  ;;  %v7755_v26 = vor.u32 %v8666_v32, %v7752_v38  ;;  %v7776_v32 = vld [vmem:[#allocation12 + $0x8] sm:$0xf0] }
 0x2a3   :  { %4677 = vmatpush.bf16.msra.mxu3 %v7195_v44  ;;  %v7771_v33 = vor.u32 %v8670_v49, %v7768_v18  ;;  %v8696_v44 = vld [vmem:[#allocation12 + $0xb4] sm:$0xf0]  ;;  %v7839_v18 = vor.u32 %v8690_v22, %v7838_v14  ;;  %v7848_v14 = vld [vmem:[#allocation12 + $0x98] sm:$0xf0] }
 0x2a4   :  { %5162 = vmatpush.bf16.msra.mxu1 %v7871_v13  ;;  %v7863_v36 = vor.u32 %v8696_v44, %v7862_v48  ;;  %v8673_v13 = vld [vmem:[#allocation12 + $0x4] sm:$0xf]  ;;  %v8646_v48 = vld [vmem:[#allocation9 + $0x72c] sm:$0xf]  ;;  %v7672_v44 = vld [vmem:[#allocation9 + $0x738] sm:$0xf0] }
 0x2a5   :  { %4720 = vmatpush.bf16.msrb.mxu2 %v7563_v2  ;;  %v8662_v2 = vld [vmem:[#allocation9 + $0x7ac] sm:$0xf] }
 0x2a6   :  { %5149 = vmatpush.bf16.msra.mxu0 %v7799_v47  ;;  %v9361_v47 = vpop.f32.mrf.mxu3  ;;  %v7739_v9 = vor.u32 %v8662_v2, %v7736_v53  ;;  %v7779_v2 = vor.u32 %v8673_v13, %v7776_v32 }
 0x2a7   :  { %4678 = vmatpush.bf16.msra.mxu3 %v7179_v58  ;;  %v4307_v58 = vadd.f32 %v9353_v28, %v3007_v42  ;;  %v4347_v41 = vadd.f32 %v9361_v47, %v4333_v27 }
 0x2a8   :  { %5163 = vmatpush.bf16.msra.mxu1 %v7863_v36  ;;  %v4362_v34 = vpop.f32.mrf.mxu0  ;;  %v4430_v36 = vpop.f32.mrf.mxu1 }
 0x2a9   :  { %4721 = vmatpush.bf16.msrb.mxu2 %v7547_v62  ;;  %v4321_v28 = vadd.f32 %v9355_v17, %v4307_v58  ;;  %v8650_v17 = vld [vmem:[#allocation9 + $0x74c] sm:$0xf] }
 0x2aa   :  { %5150 = vmatpush.bf16.msra.mxu0 %v7791_v16  ;;  %v8681_v16 = vld [vmem:[#allocation12 + $0x44] sm:$0xf] }
 0x2ab   :  { %4679 = vmatpush.bf16.msra.mxu3 %v7163_v40  ;;  %v7811_v5 = vor.u32 %v8681_v16, %v7808_v60  ;;  %v8654_v40 = vld [vmem:[#allocation9 + $0x76c] sm:$0xf]  ;;  %v4335_v37 = vadd.f32 %v9359_v10, %v4321_v28  ;;  %v4361_v10 = vadd.f32 %v9364_v43, %v4347_v41  ;;  %v7888_v16 = vld [vmem:[#allocation12 + $0xe8] sm:$0xf0] }
 0x2ac   :  { %v7707_v49 = vor.u32 %v8654_v40, %v7704_v35  ;;  %v8693_v40 = vld [vmem:[#allocation12 + $0xa4] sm:$0xf]  ;;  %v7856_v35 = vld [vmem:[#allocation12 + $0xa8] sm:$0xf0] }
 0x2ad   :  { %4722 = vmatpush.bf16.msrb.mxu2 %v7531_v45  ;;  %v7784_v45 = vld [vmem:[#allocation12 + $0x18] sm:$0xf0]  ;;  %v4375_v47 = vadd.f32 %v9366_v52, %v4361_v10  ;;  %v4444_v52 = vpop.f32.mrf.mxu2  ;;  %v7840_v10 = vld [vmem:[#allocation12 + $0x88] sm:$0xf0] }
 0x2ae   :  { %5151 = vmatpush.bf16.msra.mxu0 %v7783_v11  ;;  %v7800_v11 = vld [vmem:[#allocation12 + $0x38] sm:$0xf0]  ;;  %v4348_v51 = vpop.f32.mrf.mxu3  ;;  %v7787_v29 = vor.u32 %v8675_v20, %v7784_v45  ;;  %v7859_v20 = vor.u32 %v8693_v40, %v7856_v35  ;;  %v8691_v45 = vld [vmem:[#allocation12 + $0x94] sm:$0xf]  ;;  %v8717_v35 = vld [vmem:[#allocation12 + $0x164] sm:$0xf] }
 0x2af   :  { %4680 = vmatpush.bf16.msra.mxu3 %v7147_v56  ;;  %v7803_v62 = vor.u32 %v8679_v7, %v7800_v11  ;;  %v7688_v56 = vld [vmem:[#allocation9 + $0x758] sm:$0xf0]  ;;  %v4389_v43 = vadd.f32 %v9369_v50, %v4375_v47  ;;  %v8699_v7 = vld [vmem:[#allocation12 + $0xd4] sm:$0xf] }
 0x2b0   :  { %4723 = vmatmul.bf16.vlgmr.msrb.gmra.mxu2 %v9322_v21  ;;  %v7854_v21 = vld [vmem:[#allocation12 + $0xa0] sm:$0xf]  ;;  %v4416_v38 = vpop.f32.mrf.mxu0  ;;  %v7691_v42 = vor.u32 %v8650_v17, %v7688_v56 }
 0x2b1   :  { %v7855_v55 = vor.u32 %v8694_v54, %v7854_v21  ;;  %v8642_v54 = vld [vmem:[#allocation9 + $0x70c] sm:$0xf] }
 0x2b2   :  { %5152 = vmatpush.bf16.msra.mxu0 %v7775_v8  ;;  %4681 = vmatmul.bf16.vlgmr.msra.gmra.mxu3 %v9305_v3  ;;  %v8677_v3 = vld [vmem:[#allocation12 + $0x24] sm:$0xf]  ;;  %v7723_v8 = vor.u32 %v8658_v57, %v7720_v59 }
 0x2b3   :  { %4729 = vmatpush.bf16.msrb.mxu3 %v7771_v33  ;;  %5164 = vmatpush.bf16.msra.mxu1 %v7855_v55  ;;  %v7795_v0 = vor.u32 %v8677_v3, %v7792_v4  ;;  %v4349_v33 = vadd.f32 %v4348_v51, %v4335_v37  ;;  %v7883_v55 = vor.u32 %v8699_v7, %v7880_v6  ;;  %v8697_v51 = vld [vmem:[#allocation12 + $0xc4] sm:$0xf]  ;;  %v7934_v6 = vld [vmem:[#allocation12 + $0x140] sm:$0xf] }
 0x2b5   :  { %v4363_v60 = vadd.f32 %v4362_v34, %v4349_v33  ;;  %v8695_v34 = vld [vmem:[#allocation12 + $0xb4] sm:$0xf]  ;;  %v4446_v28 = vpop.f32.mrf.mxu2 }
 0x2b6   :  { %5201 = vmatpush.bf16.msrb.mxu0 %v7835_v63  ;;  %v7847_v63 = vor.u32 %v8692_v1, %v7846_v30  ;;  %v4402_v24 = vpop.f32.mrf.mxu3  ;;  %v4432_v1 = vpop.f32.mrf.mxu1 }
 0x2b7   :  { %4730 = vmatpush.bf16.msrb.mxu3 %v7755_v26  ;;  %v4377_v53 = vadd.f32 %v4376_v25, %v4363_v60  ;;  %v4403_v21 = vadd.f32 %v4402_v24, %v4389_v43  ;;  %v7864_v25 = vld [vmem:[#allocation12 + $0xb8] sm:$0xf0]  ;;  %v8689_v24 = vld [vmem:[#allocation12 + $0x84] sm:$0xf] }
 0x2b8   :  { %5165 = vmatpush.bf16.msra.mxu1 %v7847_v63  ;;  %v4418_v4 = vpop.f32.mrf.mxu0  ;;  %v7867_v63 = vor.u32 %v8695_v34, %v7864_v25  ;;  %v7843_v32 = vor.u32 %v8689_v24, %v7840_v10  ;;  %v7902_v25 = vld [vmem:[#allocation12 + $0x100] sm:$0xf] }
 0x2b9   :  { %v4391_v11 = vadd.f32 %v4390_v31, %v4377_v53  ;;  %v4743_v50 = vmax.f32 %v4403_v21, 0.0 }
 0x2ba   :  { %5202 = vmatpush.bf16.msrb.mxu0 %v7827_v23  ;;  %v8703_v23 = vld [vmem:[#allocation12 + $0xf4] sm:$0xf] }
 0x2bb   :  { %4731 = vmatpush.bf16.msrb.mxu3 %v7739_v9  ;;  %v7899_v39 = vor.u32 %v8703_v23, %v7896_v15  ;;  %v7656_v9 = vld [vmem:[#allocation9 + $0x718] sm:$0xf0] }
 0x2bc   :  { %5166 = vmatpush.bf16.msra.mxu1 %v7839_v18  ;;  %v7659_v59 = vor.u32 %v8642_v54, %v7656_v9 }
 0x2bd   :  { %v4500_v13 = vpop.f32.mrf.mxu2 }
 0x2be   :  { %5203 = vmatpush.bf16.msrb.mxu0 %v7819_v46  ;;  %v8701_v46 = vld [vmem:[#allocation12 + $0xe4] sm:$0xf]  ;;  %v4404_v58 = vpop.f32.mrf.mxu3  ;;  %v4486_v15 = vpop.f32.mrf.mxu1 }
 0x2bf   :  { %4732 = vmatpush.bf16.msrb.mxu3 %v7723_v8  ;;  %v7891_v26 = vor.u32 %v8701_v46, %v7888_v16  ;;  %v4405_v57 = vadd.f32 %v4404_v58, %v4391_v11  ;;  %v3008_v8 = vperm.slane %v9357_v12, 1  ;;  %v7950_v46 = vld [vmem:[#allocation12 + $0x160] sm:$0xf]  ;;  %v8718_v16 = vld [vmem:[#allocation12 + $0x164] sm:$0xf0] }
 0x2c0   :  { %5215 = vmatpush.bf16.msrb.mxu1 %v7899_v39  ;;  %v4472_v37 = vpop.f32.mrf.mxu0  ;;  %v8720_v39 = vld [vmem:[#allocation12 + $0x174] sm:$0xf0]  ;;  %v7951_v47 = vor.u32 %v8718_v16, %v7950_v46  ;;  %v8714_v11 = vld [vmem:[#allocation12 + $0x144] sm:$0xf0] }
 0x2c1   :  { %v4747_v3 = vmax.f32 %v4405_v57, 0.0  ;;  %v4419_v22 = vadd.f32 %v4418_v4, %v3008_v8  ;;  %v7935_v9 = vor.u32 %v8714_v11, %v7934_v6  ;;  %v8712_v58 = vld [vmem:[#allocation12 + $0x134] sm:$0xf0]  ;;  %v8022_v11 = vld [vmem:[#allocation12 + $0x1f0] sm:$0xf] }
 0x2c2   :  { %5204 = vmatpush.bf16.msrb.mxu0 %v7811_v5  ;;  %v7675_v5 = vor.u32 %v8646_v48, %v7672_v44 }
 0x2c3   :  { %4733 = vmatpush.bf16.msrb.mxu3 %v7707_v49  ;;  %v4751_v30 = vpack.c.bf16 %v4747_v3, %v4743_v50  ;;  %v7851_v49 = vor.u32 %v8691_v45, %v7848_v14  ;;  %v4433_v18 = vadd.f32 %v4432_v1, %v4419_v22  ;;  %v7918_v3 = vld [vmem:[#allocation12 + $0x120] sm:$0xf]  ;;  %v8708_v1 = vld [vmem:[#allocation12 + $0x114] sm:$0xf0]  ;;  %v8715_v45 = vld [vmem:[#allocation12 + $0x154] sm:$0xf] }
 0x2c4   :  { %5216 = vmatpush.bf16.msrb.mxu1 %v7891_v26  ;;  %v7944_v14 = vld [vmem:[#allocation12 + $0x158] sm:$0xf0] }
 0x2c5   :  { %5153 = vmatmul.bf16.vlgmr.msra.gmra.mxu0 %v4751_v30  ;;  %v4447_v17 = vadd.f32 %v4446_v28, %v4433_v18  ;;  %v4502_v7 = vpop.f32.mrf.mxu2  ;;  %v7960_v28 = vld [vmem:[#allocation12 + $0x178] sm:$0xf0]  ;;  %v7936_v18 = vld [vmem:[#allocation12 + $0x148] sm:$0xf0] }
 0x2c6   :  { %5205 = vmatpush.bf16.msrb.mxu0 %v7803_v62  ;;  %v7872_v62 = vld [vmem:[#allocation12 + $0xc8] sm:$0xf0]  ;;  %v4458_v27 = vpop.f32.mrf.mxu3  ;;  %v4488_v26 = vpop.f32.mrf.mxu1 }
 0x2c7   :  { %4734 = vmatpush.bf16.msrb.mxu3 %v7691_v42  ;;  %v7875_v61 = vor.u32 %v8697_v51, %v7872_v62 }
 0x2c8   :  { %5217 = vmatpush.bf16.msrb.mxu1 %v7883_v55  ;;  %v4474_v42 = vpop.f32.mrf.mxu0 }
 0x2ca   :  { %5206 = vmatpush.bf16.msrb.mxu0 %v7795_v0  ;;  %v4417_v0 = vadd.f32 %v4416_v38, %v3008_v8  ;;  %v8706_v8 = vld [vmem:[#allocation12 + $0x104] sm:$0xf0] }
 0x2cb   :  { %4735 = vmatpush.bf16.msrb.mxu3 %v7675_v5 }
 0x2cc   :  { %5218 = vmatpush.bf16.msrb.mxu1 %v7875_v61  ;;  %v4431_v31 = vadd.f32 %v4430_v36, %v4417_v0  ;;  %v7942_v36 = vld [vmem:[#allocation12 + $0x150] sm:$0xf]  ;;  %v8710_v61 = vld [vmem:[#allocation12 + $0x124] sm:$0xf0]  ;;  %v7952_v0 = vld [vmem:[#allocation12 + $0x168] sm:$0xf0] }
 0x2cd   :  { %v7919_v4 = vor.u32 %v8710_v61, %v7918_v3 }
 0x2ce   :  { %5207 = vmatpush.bf16.msrb.mxu0 %v7787_v29  ;;  %v4445_v23 = vadd.f32 %v4444_v52, %v4431_v31  ;;  %v4460_v41 = vpop.f32.mrf.mxu3  ;;  %v7926_v52 = vld [vmem:[#allocation12 + $0x130] sm:$0xf]  ;;  %v4542_v22 = vpop.f32.mrf.mxu1  ;;  %v7947_v31 = vor.u32 %v8715_v45, %v7944_v14 }
 0x2cf   :  { %4736 = vmatpush.bf16.msrb.mxu3 %v7659_v59  ;;  %v4461_v29 = vadd.f32 %v4460_v41, %v4447_v17  ;;  %v7927_v59 = vor.u32 %v8712_v58, %v7926_v52  ;;  %v3009_v17 = vperm.slane %v9357_v12, 2 }
 0x2d0   :  { %5219 = vmatpush.bf16.msrb.mxu1 %v7867_v63  ;;  %v4459_v56 = vadd.f32 %v4458_v27, %v4445_v23  ;;  %v7903_v63 = vor.u32 %v8706_v8, %v7902_v25  ;;  %v8719_v27 = vld [vmem:[#allocation12 + $0x174] sm:$0xf]  ;;  %v4556_v23 = vpop.f32.mrf.mxu2 }
 0x2d1   :  { %v4475_v60 = vadd.f32 %v4474_v42, %v4461_v29  ;;  %v7963_v40 = vor.u32 %v8719_v27, %v7960_v28  ;;  %v8709_v29 = vld [vmem:[#allocation12 + $0x124] sm:$0xf]  ;;  %v7912_v42 = vld [vmem:[#allocation12 + $0x118] sm:$0xf0]  ;;  %v8730_v27 = vld [vmem:[#allocation12 + $0x1c4] sm:$0xf0] }
 0x2d2   :  { %5208 = vmatpush.bf16.msrb.mxu0 %v7779_v2  ;;  %4737 = vmatmul.bf16.vlgmr.msrb.gmra.mxu3 %v9329_v19  ;;  %v7958_v19 = vld [vmem:[#allocation12 + $0x170] sm:$0xf]  ;;  %v4473_v38 = vadd.f32 %v4472_v37, %v4459_v56  ;;  %v8716_v2 = vld [vmem:[#allocation12 + $0x154] sm:$0xf0]  ;;  %v7955_v37 = vor.u32 %v8717_v35, %v7952_v0  ;;  %v8711_v56 = vld [vmem:[#allocation12 + $0x134] sm:$0xf] }
 0x2d3   :  { %v7959_v33 = vor.u32 %v8720_v39, %v7958_v19  ;;  %v4489_v53 = vadd.f32 %v4488_v26, %v4475_v60  ;;  %v7943_v43 = vor.u32 %v8716_v2, %v7942_v36  ;;  %v7928_v19 = vld [vmem:[#allocation12 + $0x138] sm:$0xf0] }
 0x2d4   :  { %5220 = vmatpush.bf16.msrb.mxu1 %v7859_v20  ;;  %v4487_v44 = vadd.f32 %v4486_v15, %v4473_v38  ;;  %v4528_v20 = vpop.f32.mrf.mxu0  ;;  %v7931_v24 = vor.u32 %v8711_v56, %v7928_v19  ;;  %v8707_v38 = vld [vmem:[#allocation12 + $0x114] sm:$0xf]  ;;  %v7966_v19 = vld [vmem:[#allocation12 + $0x180] sm:$0xf] }
 0x2d5   :  { %5173 = vmatpush.bf16.msra.mxu2 %v7959_v33  ;;  %5209 = vmatmul.bf16.vlgmr.msrb.gmra.mxu0 %v4751_v30  ;;  %v4503_v54 = vadd.f32 %v4502_v7, %v4489_v53  ;;  %v7910_v30 = vld [vmem:[#allocation12 + $0x110] sm:$0xf]  ;;  %v7920_v33 = vld [vmem:[#allocation12 + $0x128] sm:$0xf0] }
 0x2d6   :  { %v4514_v48 = vpop.f32.mrf.mxu3  ;;  %v4501_v5 = vadd.f32 %v4500_v13, %v4487_v44  ;;  %v7911_v34 = vor.u32 %v8708_v1, %v7910_v30  ;;  %v4544_v10 = vpop.f32.mrf.mxu1  ;;  %v7923_v13 = vor.u32 %v8709_v29, %v7920_v33  ;;  %v7904_v7 = vld [vmem:[#allocation12 + $0x108] sm:$0xf0]  ;;  %v8732_v30 = vld [vmem:[#allocation12 + $0x1d4] sm:$0xf0]  ;;  %v8735_v29 = vld [vmem:[#allocation12 + $0x1f4] sm:$0xf] }
 0x2d7   :  { %v8024_v33 = vld [vmem:[#allocation12 + $0x1f8] sm:$0xf0] }
 0x2d8   :  { %5221 = vmatpush.bf16.msrb.mxu1 %v7851_v49  ;;  %v4515_v21 = vadd.f32 %v4514_v48, %v4501_v5  ;;  %v8713_v49 = vld [vmem:[#allocation12 + $0x144] sm:$0xf]  ;;  %v4558_v60 = vpop.f32.mrf.mxu2 }
 0x2d9   :  { %5174 = vmatpush.bf16.msra.mxu2 %v7951_v47  ;;  %v7939_v15 = vor.u32 %v8713_v49, %v7936_v18  ;;  %v7915_v47 = vor.u32 %v8707_v38, %v7912_v42  ;;  %v8705_v5 = vld [vmem:[#allocation12 + $0x104] sm:$0xf] }
 0x2da   :  { %v4744_v51 = vmax.f32 %v4515_v21, 0.0  ;;  %v7907_v6 = vor.u32 %v8705_v5, %v7904_v7  ;;  %v8736_v21 = vld [vmem:[#allocation12 + $0x1f4] sm:$0xf0]  ;;  %v7992_v5 = vld [vmem:[#allocation12 + $0x1b8] sm:$0xf0] }
 0x2dc   :  { %5222 = vmatpush.bf16.msrb.mxu1 %v7843_v32  ;;  %v4530_v41 = vpop.f32.mrf.mxu0  ;;  %v4529_v32 = vadd.f32 %v4528_v20, %v3009_v17  ;;  %v7990_v20 = vld [vmem:[#allocation12 + $0x1b0] sm:$0xf] }
 0x2dd   :  { %5175 = vmatpush.bf16.msra.mxu2 %v7943_v43  ;;  %v4531_v46 = vadd.f32 %v4530_v41, %v3009_v17  ;;  %v7974_v41 = vld [vmem:[#allocation12 + $0x190] sm:$0xf]  ;;  %v8724_v17 = vld [vmem:[#allocation12 + $0x194] sm:$0xf0] }
 0x2de   :  { %v4516_v55 = vpop.f32.mrf.mxu3  ;;  %v4543_v48 = vadd.f32 %v4542_v22, %v4529_v32  ;;  %v4598_v36 = vpop.f32.mrf.mxu1  ;;  %v7982_v22 = vld [vmem:[#allocation12 + $0x1a0] sm:$0xf]  ;;  %v7975_v56 = vor.u32 %v8724_v17, %v7974_v41  ;;  %v8016_v32 = vld [vmem:[#allocation12 + $0x1e8] sm:$0xf0] }
 0x2df   :  { %v4517_v57 = vadd.f32 %v4516_v55, %v4503_v54  ;;  %v4545_v44 = vadd.f32 %v4544_v10, %v4531_v46  ;;  %v8027_v10 = vor.u32 %v8735_v29, %v8024_v33  ;;  %v8731_v46 = vld [vmem:[#allocation12 + $0x1d4] sm:$0xf]  ;;  %v8740_v29 = vld [vmem:[#allocation15 + $0x18] sm:$0xff] }
 0x2e0   :  { %v4557_v26 = vadd.f32 %v4556_v23, %v4543_v48  ;;  %v8729_v48 = vld [vmem:[#allocation12 + $0x1c4] sm:$0xf]  ;;  %v8752_v33 = vld [vmem:[#allocation15 + $0x78] sm:$0xff] }
 0x2e1   :  { %5176 = vmatpush.bf16.msra.mxu2 %v7935_v9  ;;  %v4748_v62 = vmax.f32 %v4517_v57, 0.0  ;;  %v4559_v53 = vadd.f32 %v4558_v60, %v4545_v44  ;;  %v8023_v9 = vor.u32 %v8736_v21, %v8022_v11  ;;  %v8014_v57 = vld [vmem:[#allocation12 + $0x1e0] sm:$0xf]  ;;  %v8000_v44 = vld [vmem:[#allocation12 + $0x1c8] sm:$0xf0] }
 0x2e3   :  { %v4752_v50 = vpack.c.bf16 %v4748_v62, %v4744_v51  ;;  %5187 = vmatpush.bf16.msra.mxu3 %v8023_v9  ;;  %v7984_v9 = vld [vmem:[#allocation12 + $0x1a8] sm:$0xf0] }
 0x2e4   :  { %v4584_v16 = vpop.f32.mrf.mxu0 }
 0x2e5   :  { %5177 = vmatpush.bf16.msra.mxu2 %v7927_v59  ;;  %5167 = vmatmul.bf16.vlgmr.msra.gmra.mxu1 %v4752_v50  ;;  %v8734_v59 = vld [vmem:[#allocation12 + $0x1e4] sm:$0xf0] }
 0x2e6   :  { %v8015_v62 = vor.u32 %v8734_v59, %v8014_v57  ;;  %v4600_v61 = vpop.f32.mrf.mxu1  ;;  %5409 = vmatpush.bf16.msra.mxu1 %v8752_v33 }
 0x2e8   :  { %5188 = vmatpush.bf16.msra.mxu3 %v8015_v62 }
 0x2e9   :  { %5178 = vmatpush.bf16.msra.mxu2 %v7919_v4  ;;  %v8006_v4 = vld [vmem:[#allocation12 + $0x1d0] sm:$0xf] }
 0x2ec   :  { %v4586_v58 = vpop.f32.mrf.mxu0 }
 0x2ed   :  { %5179 = vmatpush.bf16.msra.mxu2 %v7911_v34  ;;  %v8007_v34 = vor.u32 %v8732_v30, %v8006_v4 }
 0x2ee   :  { %v4612_v55 = vpop.f32.mrf.mxu2 }
 0x2ef   :  { %5189 = vmatpush.bf16.msra.mxu3 %v8007_v34  ;;  %v8721_v34 = vld [vmem:[#allocation12 + $0x184] sm:$0xf] }
 0x2f0   :  { %v4570_v39 = vpop.f32.mrf.mxu3 }
 0x2f1   :  { %5180 = vmatpush.bf16.msra.mxu2 %v7903_v63  ;;  %v4571_v43 = vadd.f32 %v4570_v39, %v4557_v26  ;;  %v7998_v63 = vld [vmem:[#allocation12 + $0x1c0] sm:$0xf]  ;;  %v8722_v39 = vld [vmem:[#allocation12 + $0x184] sm:$0xf0] }
 0x2f2   :  { %v7999_v35 = vor.u32 %v8730_v27, %v7998_v63 }
 0x2f3   :  { %v4585_v52 = vadd.f32 %v4584_v16, %v4571_v43  ;;  %v8008_v16 = vld [vmem:[#allocation12 + $0x1d8] sm:$0xf0]  ;;  %v8727_v43 = vld [vmem:[#allocation12 + $0x1b4] sm:$0xf] }
 0x2f4   :  { %5190 = vmatpush.bf16.msra.mxu3 %v7999_v35  ;;  %v4640_v38 = vpop.f32.mrf.mxu0  ;;  %v4654_v60 = vpop.f32.mrf.mxu1 }
 0x2f5   :  { %5229 = vmatpush.bf16.msrb.mxu2 %v7963_v40  ;;  %5223 = vmatmul.bf16.vlgmr.msrb.gmra.mxu1 %v4752_v50  ;;  %v4599_v3 = vadd.f32 %v4598_v36, %v4585_v52  ;;  %v8003_v36 = vor.u32 %v8729_v48, %v8000_v44 }
 0x2f6   :  { %v4614_v8 = vpop.f32.mrf.mxu2 }
 0x2f7   :  { %v4613_v25 = vadd.f32 %v4612_v55, %v4599_v3  ;;  %v8723_v55 = vld [vmem:[#allocation12 + $0x194] sm:$0xf] }
 0x2f8   :  { %v4572_v2 = vpop.f32.mrf.mxu3 }
 0x2f9   :  { %5230 = vmatpush.bf16.msrb.mxu2 %v7955_v37  ;;  %v4573_v54 = vadd.f32 %v4572_v2, %v4559_v53  ;;  %v8728_v37 = vld [vmem:[#allocation12 + $0x1b4] sm:$0xf0]  ;;  %v3010_v53 = vperm.slane %v9357_v12, 3 }
 0x2fa   :  { %v7991_v14 = vor.u32 %v8728_v37, %v7990_v20 }
 0x2fb   :  { %v4587_v51 = vadd.f32 %v4586_v58, %v4573_v54  ;;  %v4641_v21 = vadd.f32 %v4640_v38, %v3010_v53  ;;  %v8725_v54 = vld [vmem:[#allocation12 + $0x1a4] sm:$0xf]  ;;  %v7976_v58 = vld [vmem:[#allocation12 + $0x198] sm:$0xf0]  ;;  %v8750_v38 = vld [vmem:[#allocation15 + $0x68] sm:$0xff] }
 0x2fc   :  { %5191 = vmatpush.bf16.msra.mxu3 %v7991_v14  ;;  %v4642_v2 = vpop.f32.mrf.mxu0  ;;  %v4656_v11 = vpop.f32.mrf.mxu1  ;;  %v7987_v52 = vor.u32 %v8725_v54, %v7984_v9  ;;  %v7979_v62 = vor.u32 %v8723_v55, %v7976_v58 }
 0x2fd   :  { %5231 = vmatpush.bf16.msrb.mxu2 %v7947_v31  ;;  %v4601_v1 = vadd.f32 %v4600_v61, %v4587_v51  ;;  %v8726_v31 = vld [vmem:[#allocation12 + $0x1a4] sm:$0xf0]  ;;  %v4643_v57 = vadd.f32 %v4642_v2, %v3010_v53 }
 0x2fe   :  { %v8745_v2 = vld [vmem:[#allocation15 + $0x40] sm:$0xff] }
 0x2ff   :  { %v4615_v40 = vadd.f32 %v4614_v8, %v4601_v1  ;;  %v4657_v3 = vadd.f32 %v4656_v11, %v4643_v57 }
 0x301   :  { %5232 = vmatpush.bf16.msrb.mxu2 %v7939_v15  ;;  %v7983_v15 = vor.u32 %v8726_v31, %v7982_v22 }
 0x303   :  { %5192 = vmatpush.bf16.msra.mxu3 %v7983_v15 }
 0x305   :  { %5233 = vmatpush.bf16.msrb.mxu2 %v7931_v24  ;;  %v7967_v24 = vor.u32 %v8722_v39, %v7966_v19  ;;  %v8743_v19 = vld [vmem:[#allocation15 + $0x30] sm:$0xff]  ;;  %v8742_v39 = vld [vmem:[#allocation15 + $0x28] sm:$0xff] }
 0x307   :  { %5193 = vmatpush.bf16.msra.mxu3 %v7975_v56  ;;  %v8744_v56 = vld [vmem:[#allocation15 + $0x38] sm:$0xff] }
 0x308   :  { %5395 = vmatpush.bf16.msra.mxu0 %v8744_v56 }
 0x309   :  { %5234 = vmatpush.bf16.msrb.mxu2 %v7923_v13  ;;  %v8733_v13 = vld [vmem:[#allocation12 + $0x1e4] sm:$0xf] }
 0x30a   :  { %v8019_v42 = vor.u32 %v8733_v13, %v8016_v32  ;;  %v8751_v13 = vld [vmem:[#allocation15 + $0x70] sm:$0xff]  ;;  %v8738_v32 = vld [vmem:[#allocation15 + $0x8] sm:$0xff] }
 0x30b   :  { %5194 = vmatpush.bf16.msra.mxu3 %v7967_v24  ;;  %v8741_v24 = vld [vmem:[#allocation15 + $0x20] sm:$0xff]  ;;  %5410 = vmatpush.bf16.msra.mxu1 %v8751_v13 }
 0x30c   :  { %5396 = vmatpush.bf16.msra.mxu0 %v8743_v19 }
 0x30d   :  { %5235 = vmatpush.bf16.msrb.mxu2 %v7915_v47  ;;  %v8011_v47 = vor.u32 %v8731_v46, %v8008_v16  ;;  %v8749_v46 = vld [vmem:[#allocation15 + $0x60] sm:$0xff]  ;;  %v8748_v16 = vld [vmem:[#allocation15 + $0x58] sm:$0xff] }
 0x30f   :  { %5243 = vmatpush.bf16.msrb.mxu3 %v8027_v10  ;;  %v8739_v10 = vld [vmem:[#allocation15 + $0x10] sm:$0xff]  ;;  %5411 = vmatpush.bf16.msra.mxu1 %v8750_v38 }
 0x310   :  { %5397 = vmatpush.bf16.msra.mxu0 %v8742_v39 }
 0x311   :  { %5236 = vmatpush.bf16.msrb.mxu2 %v7907_v6  ;;  %v7995_v6 = vor.u32 %v8727_v43, %v7992_v5 }
 0x312   :  { %v4696_v59 = vpop.f32.mrf.mxu0 }
 0x313   :  { %5244 = vmatpush.bf16.msrb.mxu3 %v8019_v42  ;;  %v4668_v26 = vpop.f32.mrf.mxu2  ;;  %v8737_v42 = vld [vmem:[#allocation15] sm:$0xff]  ;;  %5412 = vmatpush.bf16.msra.mxu1 %v8749_v46 }
 0x314   :  { %v4710_v61 = vpop.f32.mrf.mxu1  ;;  %5398 = vmatpush.bf16.msra.mxu0 %v8741_v24 }
 0x315   :  { %v4626_v50 = vpop.f32.mrf.mxu3 }
 0x316   :  { %v4627_v28 = vadd.f32 %v4626_v50, %v4613_v25  ;;  %v4655_v50 = vadd.f32 %v4654_v60, %v4641_v21  ;;  %v7968_v25 = vld [vmem:[#allocation12 + $0x188] sm:$0xf0] }
 0x317   :  { %5245 = vmatpush.bf16.msrb.mxu3 %v8011_v47  ;;  %v7971_v8 = vor.u32 %v8721_v34, %v7968_v25  ;;  %5413 = vmatpush.bf16.msra.mxu1 %v8748_v16  ;;  %v8747_v47 = vld [vmem:[#allocation15 + $0x50] sm:$0xff] }
 0x318   :  { %v4745_v49 = vmax.f32 %v4627_v28, 0.0  ;;  %v4669_v12 = vadd.f32 %v4668_v26, %v4655_v50  ;;  %5399 = vmatpush.bf16.msra.mxu0 %v8740_v29  ;;  %v8746_v26 = vld [vmem:[#allocation15 + $0x48] sm:$0xff] }
 0x31b   :  { %5246 = vmatpush.bf16.msrb.mxu3 %v8003_v36  ;;  %v4670_v51 = vpop.f32.mrf.mxu2  ;;  %5414 = vmatpush.bf16.msra.mxu1 %v8747_v47  ;;  %v4819_v36 = vld [vmem:[#allocation14] sm:$0x3] }
 0x31c   :  { %v4671_v30 = vadd.f32 %v4670_v51, %v4657_v3  ;;  %v4712_v37 = vpop.f32.mrf.mxu1  ;;  %5400 = vmatpush.bf16.msra.mxu0 %v8739_v10  ;;  %v4821_v43 = vperm.slane %v4819_v36, 0 }
 0x31d   :  { %v4628_v0 = vpop.f32.mrf.mxu3 }
 0x31e   :  { %v4629_v45 = vadd.f32 %v4628_v0, %v4615_v40  ;;  %v4698_v40 = vpop.f32.mrf.mxu0 }
 0x31f   :  { %5247 = vmatpush.bf16.msrb.mxu3 %v7995_v6  ;;  %5415 = vmatpush.bf16.msra.mxu1 %v8746_v26 }
 0x320   :  { %v4749_v18 = vmax.f32 %v4629_v45, 0.0  ;;  %5401 = vmatpush.bf16.msra.mxu0 %v8738_v32 }
 0x322   :  { %v4753_v23 = vpack.c.bf16 %v4749_v18, %v4745_v49 }
 0x323   :  { %5248 = vmatpush.bf16.msrb.mxu3 %v7987_v52  ;;  %5416 = vmatpush.bf16.msra.mxu1 %v8745_v2 }
 0x324   :  { %5181 = vmatmul.bf16.vlgmr.msra.gmra.mxu2 %v4753_v23  ;;  %5402 = vmatpush.bf16.msra.mxu0 %v8737_v42 }
 0x327   :  { %5249 = vmatpush.bf16.msrb.mxu3 %v7979_v62 }
 0x32b   :  { %5250 = vmatpush.bf16.msrb.mxu3 %v7971_v8 }
 0x333   :  { %v4724_v27 = vpop.f32.mrf.mxu2 }
 0x334   :  { %5237 = vmatmul.bf16.vlgmr.msrb.gmra.mxu2 %v4753_v23 }
 0x335   :  { %v4682_v7 = vpop.f32.mrf.mxu3 }
 0x336   :  { %v4683_v1 = vadd.f32 %v4682_v7, %v4669_v12 }
 0x338   :  { %v4697_v28 = vadd.f32 %v4696_v59, %v4683_v1 }
 0x33a   :  { %v4711_v20 = vadd.f32 %v4710_v61, %v4697_v28  ;;  %v4822_v61 = vperm.slane %v4819_v36, 1 }
 0x33b   :  { %v4726_v22 = vpop.f32.mrf.mxu2 }
 0x33c   :  { %v4725_v14 = vadd.f32 %v4724_v27, %v4711_v20 }
 0x33d   :  { %v4684_v4 = vpop.f32.mrf.mxu3 }
 0x33e   :  { %v4685_v63 = vadd.f32 %v4684_v4, %v4671_v30 }
 0x340   :  { %v4699_v35 = vadd.f32 %v4698_v40, %v4685_v63 }
 0x342   :  { %v4713_v45 = vadd.f32 %v4712_v37, %v4699_v35  ;;  %v5154_v60 = vpop.f32.mrf.mxu0 }
 0x343   :  { %v5155_v11 = vadd.f32 %v5154_v60, %v4821_v43 }
 0x344   :  { %v4727_v49 = vadd.f32 %v4726_v22, %v4713_v45 }
 0x34a   :  { %v5156_v53 = vpop.f32.mrf.mxu0 }
 0x34b   :  { %v5157_v21 = vadd.f32 %v5156_v53, %v4821_v43 }
 0x352   :  { %v5210_v52 = vpop.f32.mrf.mxu0 }
 0x353   :  { %v5211_v34 = vadd.f32 %v5210_v52, %v4822_v61 }
 0x355   :  { %v4738_v0 = vpop.f32.mrf.mxu3 }
 0x356   :  { %v4739_v31 = vadd.f32 %v4738_v0, %v4725_v14 }
 0x358   :  { %v4746_v15 = vmax.f32 %v4739_v31, 0.0 }
 0x35a   :  { %v5212_v30 = vpop.f32.mrf.mxu0 }
 0x35b   :  { %v5213_v8 = vadd.f32 %v5212_v30, %v4822_v61 }
 0x35d   :  { %v4740_v18 = vpop.f32.mrf.mxu3 }
 0x35e   :  { %v4741_v23 = vadd.f32 %v4740_v18, %v4727_v49  ;;  %v8774_v49 = vld [vmem:[#allocation17] ss:$0 sm:$0xff] }
 0x360   :  { %v4750_v41 = vmax.f32 %v4741_v23, 0.0 }
 0x362   :  { %v4754_v17 = vpack.c.bf16 %v4750_v41, %v4746_v15  ;;  %v5168_v48 = vpop.f32.mrf.mxu1 }
 0x363   :  { %v5169_v54 = vadd.f32 %v5168_v48, %v5155_v11 }
 0x364   :  { %5195 = vmatmul.bf16.vlgmr.msra.gmra.mxu3 %v4754_v17 }
 0x36a   :  { %v5170_v5 = vpop.f32.mrf.mxu1 }
 0x36b   :  { %v5171_v9 = vadd.f32 %v5170_v5, %v5157_v21 }
 0x372   :  { %v5224_v59 = vpop.f32.mrf.mxu1 }
 0x373   :  { %v5225_v63 = vadd.f32 %v5224_v59, %v5211_v34 }
 0x374   :  { %5251 = vmatmul.bf16.vlgmr.msrb.gmra.mxu3 %v4754_v17 }
 0x37a   :  { %v5226_v25 = vpop.f32.mrf.mxu1 }
 0x37b   :  { %v5227_v28 = vadd.f32 %v5226_v25, %v5213_v8 }
 0x3a7   :  { %v5182_v44 = vpop.f32.mrf.mxu2 }
 0x3a8   :  { %v5183_v55 = vadd.f32 %v5182_v44, %v5169_v54 }
 0x3af   :  { %v5184_v7 = vpop.f32.mrf.mxu2 }
 0x3b0   :  { %v5185_v58 = vadd.f32 %v5184_v7, %v5171_v9 }
 0x3b7   :  { %v5238_v50 = vpop.f32.mrf.mxu2 }
 0x3b8   :  { %v5239_v40 = vadd.f32 %v5238_v50, %v5225_v63 }
 0x3bf   :  { %v5240_v27 = vpop.f32.mrf.mxu2 }
 0x3c0   :  { %v5241_v35 = vadd.f32 %v5240_v27, %v5227_v28 }
 0x3e7   :  { %v5196_v6 = vpop.f32.mrf.mxu3 }
 0x3e8   :  { %v5197_v57 = vadd.f32 %v5196_v6, %v5183_v55 }
 0x3ea   :  { %v5257_v3 = vmax.f32 %v5197_v57, 0.0 }
 0x3ef   :  { %v5198_v51 = vpop.f32.mrf.mxu3 }
 0x3f0   :  { %v5199_v62 = vadd.f32 %v5198_v51, %v5185_v58 }
 0x3f2   :  { %v5259_v12 = vmax.f32 %v5199_v62, 0.0 }
 0x3f4   :  { %v5261_v4 = vpack.c.bf16 %v5259_v12, %v5257_v3 }
 0x3f6   :  { %5403 = vmatmul.bf16.vlgmr.msra.gmra.mxu0 %v5261_v4 }
 0x3f7   :  { %v5252_v1 = vpop.f32.mrf.mxu3 }
 0x3f8   :  { %v5253_v0 = vadd.f32 %v5252_v1, %v5239_v40 }
 0x3fa   :  { %v5258_v45 = vmax.f32 %v5253_v0, 0.0 }
 0x3ff   :  { %v5254_v20 = vpop.f32.mrf.mxu3 }
 0x400   :  { %v5255_v37 = vadd.f32 %v5254_v20, %v5241_v35 }
 0x402   :  { %v5260_v14 = vmax.f32 %v5255_v37, 0.0 }
 0x404   :  { %v5262_v22 = vpack.c.bf16 %v5260_v14, %v5258_v45 }
 0x406   :  { %5417 = vmatmul.bf16.vlgmr.msra.gmra.mxu1 %v5262_v22 }
 0x473   :  { %v5404_v31 = vpop.f32.mrf.mxu0 }
 0x474   :  { %v5405_v18 = vadd.f32 %v8774_v49, %v5404_v31 }
 0x47b   :  { %v5406_v41 = vpop.f32.mrf.mxu0 }
 0x47c   :  { %v5407_v17 = vadd.f32 %v8774_v49, %v5406_v41 }
 0x483   :  { %v5418_v23 = vpop.f32.mrf.mxu1 }
 0x484   :  { %v5419_v15 = vadd.f32 %v5418_v23, %v5405_v18 }
 0x486   :  { %5423 = vst [vmem:[#allocation18] sm:$0xff] %v5419_v15 }
 0x48b   :  { %v5420_v56 = vpop.f32.mrf.mxu1 }
 0x48c   :  { %v5421_v19 = vadd.f32 %v5420_v56, %v5407_v17 }
 0x48e   :  { %5424 = vst [vmem:[#allocation18 + $0x8] sm:$0xff] %v5421_v19 }
 0x48f   :  { %5437 = dma.vmem_to_hbm [thread:$0]  %s5430_s8, 256, %s5432_s16, [#allocation5], %s9036_s29, %s9036_s29, %s9037_s30  }
 0x490   :  { %9027 = dma.done.wait [#allocation5], 256  }
 0x491   :  { %9028 = vsyncadd [#allocation5], 4294967040 }
 0x492   :  { %5442 = vsyncpa [#allocation4], 1 }
 0x493   :  { %5443 = vsyncpa [#allocation7], 1 }
 0x494   :  { %5444 = vsyncpa [#allocation10], 1 }
 0x495   :  { %5445 = vsyncpa [#allocation13], 1 }
 0x496   :  { %5446 = vsyncpa [#allocation16], 1 }
 0x497   :  { %5447 = vsyncpa [#allocation5], 1 }

</bundles_post_ra>
